<compile_context>
chip_gen: v7x
topology: tpu7x:2x2x1
jax: 0.10.0
libtpu: 0.0.40
codegen_flags: <defaults>
</compile_context>

<pallas_src>
import functools

import jax
import jax.numpy as jnp
from jax.experimental import pallas as pl
from jax.experimental.pallas import tpu as pltpu


def _linear_kernel(x_ref, w_ref, b_ref, o_ref):
    """One grid step per N block: out = bias + x @ W_block (f32 MXU accumulate)."""
    o_ref[...] = jnp.broadcast_to(b_ref[...], o_ref.shape) + jnp.dot(
        x_ref[...], w_ref[...], preferred_element_type=jnp.float32
    )


def prepare_params(w_t, b, *, n_block=512):
    """One-time padding (outside the hot path) to a lane-dense, block-aligned N.

    w_t: (K, N) f32 (transposed PyTorch weight), b: (N,) f32.
    Returns (w_t_padded (K, n_pad), b_padded (1, n_pad)). Padded columns are zero.
    """
    K, N = w_t.shape
    n_pad = pl.cdiv(N, n_block) * n_block
    if n_pad != N:
        w_t = jnp.pad(w_t, ((0, 0), (0, n_pad - N)))
        b = jnp.pad(b, (0, n_pad - N))
    return w_t, b.reshape(1, n_pad)


@functools.partial(jax.jit, static_argnames=("n_out", "n_block"))
def linear_pallas(x, w_t_pad, b_pad2d, *, n_out, n_block=512):
    """x: (M, K) f32, w_t_pad: (K, n_pad) f32, b_pad2d: (1, n_pad) f32."""
    M, K = x.shape
    K2, n_pad = w_t_pad.shape
    assert K == K2
    assert n_pad % n_block == 0
    assert b_pad2d.shape == (1, n_pad)

    grid = (n_pad // n_block,)  # N split only; each block does the full K

    out = pl.pallas_call(
        _linear_kernel,
        out_shape=jax.ShapeDtypeStruct((M, n_pad), jnp.float32),
        grid_spec=pltpu.PrefetchScalarGridSpec(
            num_scalar_prefetch=0,
            grid=grid,
            in_specs=[
                # x: tiny (16 KB), fully resident across the grid.
                pl.BlockSpec((M, K), lambda j: (0, 0)),
                # Weight: the only real HBM stream; one (K, 512) = 8 MiB tile
                # per grid step.
                pl.BlockSpec((K, n_block), lambda j: (0, j)),
                # Bias: one lane-dense row per N block.
                pl.BlockSpec((1, n_block), lambda j: (0, j)),
            ],
            # Lane-dense (multiple of 128) output block, written once per step.
            out_specs=pl.BlockSpec((M, n_block), lambda j: (0, j)),
        ),
        compiler_params=pltpu.CompilerParams(
            # Parallel N axis -> shards across the 2 TensorCores on v7x
            # (megacore); harmless serial loop on single-core v5e/v6e.
            dimension_semantics=(pltpu.PARALLEL,),
            # 8 MiB weight tile x 2 pipeline buffers = 16 MiB; raise the scoped
            # limit so this also compiles under v5e's 16 MiB default.
            vmem_limit_bytes=32 << 20,
        ),
    )(x, w_t_pad, b_pad2d)

    # Drop the padded lanes (1024 -> 1000). Cheap: operates on a (1, 1024) array.
    return out[:, :n_out]


if __name__ == "__main__":
    IN_FEATURES = 4096
    OUT_FEATURES = 1000
    BATCH = 1

    key = jax.random.PRNGKey(0)
    kx, kw, kb = jax.random.split(key, 3)

    # Deterministic parameter init (matches PyTorch Linear's U(-1/sqrt(fan_in), .) scale).
    bound = 1.0 / (IN_FEATURES ** 0.5)
    # Stored directly as (in_features, out_features) == weight.T
    w_t = jax.random.uniform(
        kw, (IN_FEATURES, OUT_FEATURES), jnp.float32, minval=-bound, maxval=bound
    )
    b = jax.random.uniform(
        kb, (OUT_FEATURES,), jnp.float32, minval=-bound, maxval=bound
    )

    # Input x45: torch.randn([1, 4096])
    x = jax.random.normal(kx, (BATCH, IN_FEATURES), jnp.float32)

    # One-time param preparation (padding) outside the jitted hot path.
    w_t_pad, b_pad2d = prepare_params(w_t, b)
    w_t_pad = jax.block_until_ready(w_t_pad)
    b_pad2d = jax.block_until_ready(b_pad2d)

    out = linear_pallas(x, w_t_pad, b_pad2d, n_out=OUT_FEATURES)
    out = jax.block_until_ready(out)

    # Correctness check against plain JAX reference (unpadded params).
    ref = x @ w_t + b
    assert out.shape == (BATCH, OUT_FEATURES)
    assert jnp.allclose(out, ref, atol=1e-4, rtol=1e-4)

    print("KERNEL_OK")
</pallas_src>

<mosaic_0001>
module attributes {stable_mosaic.version = 11 : i64} {
  func.func @_linear_kernel(%arg0: i32, %arg1: memref<1x4096xf32, #tpu.memory_space<vmem>>, %arg2: memref<4096x512xf32, #tpu.memory_space<vmem>>, %arg3: memref<1x512xf32, #tpu.memory_space<vmem>>, %arg4: memref<1x512xf32, #tpu.memory_space<vmem>>) attributes {dimension_semantics = [#tpu.dimension_semantics<parallel>], iteration_bounds = array<i64: 2>, scalar_prefetch = 0 : i64, scratch_operands = 0 : i64, tpu.core_type = #tpu.core_type<tc>, window_params = [{pipeline_mode = #tpu.pipeline_mode<synchronous>, transform_indices = @transform_0, window_bounds = array<i64: 1, 4096>}, {transform_indices = @transform_1, window_bounds = array<i64: 4096, 512>}, {transform_indices = @transform_2, window_bounds = array<i64: 1, 512>}, {transform_indices = @transform_3, window_bounds = array<i64: 1, 512>}]} {
    %c0 = arith.constant 0 : index
    %c0_0 = arith.constant 0 : index
    %0 = vector.load %arg3[%c0, %c0_0] : memref<1x512xf32, #tpu.memory_space<vmem>>, vector<1x512xf32>
    %c0_1 = arith.constant 0 : index
    %c0_2 = arith.constant 0 : index
    %1 = vector.load %arg1[%c0_1, %c0_2] : memref<1x4096xf32, #tpu.memory_space<vmem>>, vector<1x4096xf32>
    %c0_3 = arith.constant 0 : index
    %c0_4 = arith.constant 0 : index
    %2 = vector.load %arg2[%c0_3, %c0_4] : memref<4096x512xf32, #tpu.memory_space<vmem>>, vector<4096x512xf32>
    %cst = arith.constant dense<0.000000e+00> : vector<1x512xf32>
    %3 = tpu.matmul %1, %2, %cst {dimension_numbers = #tpu.dot_dimension_numbers<[1], [0], [0], [1], [0, 0, 1, 1], [], []>} : vector<1x4096xf32>, vector<4096x512xf32>, vector<1x512xf32> -> vector<1x512xf32>
    %4 = arith.addf %0, %3 : vector<1x512xf32>
    %c0_5 = arith.constant 0 : index
    %c0_6 = arith.constant 0 : index
    %5 = vector.load %arg4[%c0_5, %c0_6] : memref<1x512xf32, #tpu.memory_space<vmem>>, vector<1x512xf32>
    tpu.vector_store %arg4[%c0_5, %c0_6], %4 {strides = array<i32>} : memref<1x512xf32, #tpu.memory_space<vmem>>, vector<1x512xf32>,
    return
  }
  func.func @transform_0(%arg0: i32) -> (i32, i32) {
    %c0_i32 = arith.constant 0 : i32
    %c0_i32_0 = arith.constant 0 : i32
    %c0_i32_1 = arith.constant 0 : i32
    return %c0_i32, %c0_i32_0 : i32, i32
  }
  func.func @transform_1(%arg0: i32) -> (i32, i32) {
    %c0_i32 = arith.constant 0 : i32
    %c0_i32_0 = arith.constant 0 : i32
    return %c0_i32, %arg0 : i32, i32
  }
  func.func @transform_2(%arg0: i32) -> (i32, i32) {
    %c0_i32 = arith.constant 0 : i32
    %c0_i32_0 = arith.constant 0 : i32
    return %c0_i32, %arg0 : i32, i32
  }
  func.func @transform_3(%arg0: i32) -> (i32, i32) {
    %c0_i32 = arith.constant 0 : i32
    %c0_i32_0 = arith.constant 0 : i32
    return %c0_i32, %arg0 : i32, i32
  }
}

</mosaic_0001>

<bundles_post_ra>
// kernel: linear_pallas.1
= control target key start
LH: loop header
LB: loop body
LE: loop exit
PB: predicated region body
PF: predicated region fallthrough
CT: control target
= control target key end

     0   :  { %8 = vsyncpa [#allocation3], 0  ;;  %s9663_s0 = inlined_call_operand.hbm [shape: f32[1,4096], index: 0, kind: input, shape index: {}]   ;;  %s9664_s1 = inlined_call_operand.hbm [shape: f32[4096,1024], index: 1, kind: input, shape index: {}]   ;;  %s9665_s2 = inlined_call_operand.hbm [shape: f32[1,1024], index: 2, kind: input, shape index: {}]   ;;  %s9666_s3 = inlined_call_operand.hbm [shape: f32[1,1024], index: 3, kind: output, shape index: {}]  }
   0x1   :  { %9 = vsyncpa [#allocation6], 0 }
   0x2   :  { %11 = vsyncpa [#allocation6 + $0x1], 0 }
   0x3   :  { %12 = vsyncpa [#allocation4], 0 }
   0x4   :  { %14 = vsyncpa [#allocation4 + $0x1], 0  ;;  %s7273_s12 = smov 0   ;;  %s7275_s13 = smov 0  }
   0x5   :  { %s7277_s14 = smov 0   ;;  %s7279_s15 = smov 0  }
   0x6 LB: > { %s7294_s16 = sadd.s32 1, %s7243_s15   ;;  %s48_s17 = sadd.s32 1, %s7239_s14  ;;  %s7243_s15 = sphi %s7279_s15, %s9693_s15   ;;  %s7239_s14 = sphi %s7277_s14, %s9692_s14   ;;  %s7235_s13 = sphi %s7275_s13, %s9691_s13   ;;  %s7231_s12 = sphi %s7273_s12, %s9690_s12  }
   0x7   : > { %s45_s18 = ssub.s32 %s7243_s15, %s7294_s16  ;;  %p55_p0 = scmp.ne.s32.totalorder %s7239_s14, %s7235_s13 }
   0x8   : > { %p46_p1 = scmp.eq.s32.totalorder %s45_s18, 0  ;;  %p56_p2 = scmp.eq.s32.totalorder %s7243_s15, 0 }
   0x9   : > { %p7038_p4 = scmp.lt.s32.totalorder %s7243_s15, 2  ;;  %s148_s20 = sand.u32 1, %s7243_s15  }
   0xa   : > { %s7305_s19 = scalar_select %p46_p1, %s7239_s14, %s48_s17  }
   0xb   : > { %p57_p5 = por %p56_p2, %p55_p0  ;;  %s150_s21 = sand.u32 1, %s7239_s14  }
   0xc   : > { %s4885_s22 = sshll.u32 %s150_s21, 14  ;;  %s4901_s23 = sshll.u32 %s7243_s15, 9 }
   0xd   : > { %s7318_s26 = scalar_lea.hbm %s9664_s1, %s4901_s23  ;;  %s152_s27 = scalar_lea.vmem [#allocation5], %s4885_s22 }
   0xe   : > { %s159_s28 = sshll.u32 %s152_s27, 4  ;;  %p7320_p6 = pnand %p7038_p4, %p57_p5  ;;  %s7324_s28 = int_to_ptr.vmem [resolvable:$true] %s159_s28 }
   0xf   : > { %s7326_s30 = scalar_lea.sflag [#allocation6], %s148_s20  ;;  %s7085_s4 = scalar_lea.hbm %s7318_s26, 262144 }
  0x10   : > { %s9674_s29 = scalar_select %p7320_p6, 1, 0 }
  0x11   : > { %p7086_p7 = scmp.ne.s32.totalorder %s7318_s26, %s7085_s4  ;;  %p9668_p8 = pneg %p7320_p6 }
  0x12   : > { %s7090_s7 = scalar_lea.hbm %s9664_s1, 524288  ;;  %p7091_p11 = scmp.lt.u32.totalorder %s7318_s26, %s9664_s1 }
  0x13   : > { %p7088_p9 = pnand %p9668_p8, %p7086_p7  ;;  %p7092_p12 = scmp.lt.u32.totalorder %s7090_s7, %s7085_s4 }
  0x14   : > { %p7094_p1 = scmp.lt.u32.totalorder %s7085_s4, %s7318_s26 }
  0x15   : > { %p7089_p10 = pneg %p7088_p9  ;;  %p7093_p13 = por %p7092_p12, %p7091_p11 }
  0x17   : > { %p7095_p2 = por %p7094_p1, %p7093_p13 }
  0x19   : > { %p7096_p4 = pnand %p7095_p2, %p7089_p10 }
  0x1b   : > { %7099 = shalt.err (!%p7096_p4)
}
  0x1c   : > { %s7100_s10 = scalar_lea.vmem %s7324_s28, 262144  ;;  %s7245_s11 = smov [#allocation5]  }
  0x1d   : > { %p7101_p5 = scmp.ne.s32.totalorder %s7324_s28, %s7100_s10  ;;  %s7105_s17 = sshll.u32 %s7245_s11, 4  ;;  %s7106_s17 = int_to_ptr.vmem [resolvable:$false] %s7105_s17 }
  0x1e   : > { %s7107_s18 = scalar_lea.vmem %s7106_s17, 524288  ;;  %p7108_p3 = scmp.lt.s32.totalorder %s7324_s28, %s7106_s17 }
  0x1f   : > { %p7103_p7 = pnand %p7101_p5, %p9668_p8  ;;  %p7109_p11 = scmp.lt.s32.totalorder %s7107_s18, %s7100_s10 }
  0x21   : > { %p7104_p9 = pneg %p7103_p7  ;;  %p7110_p12 = por %p7109_p11, %p7108_p3 }
  0x23   : > { %p7111_p13 = pnand %p7110_p12, %p7104_p9 }
  0x25   : > { %7114 = shalt.err (!%p7111_p13)
}
  0x26   : > { %s7246_s20 = smov 1024   ;;  %s7247_s22 = smov 512  }
  0x27   : > { %s7248_s23 = smov 32   ;;  %s7355_s24 = sadd.s32 4294967295, %s7243_s15  }
  0x28   : > { %7029 = dma.hbm_to_vmem [thread:$0]  (!%p7320_p6), %s7318_s26, 262144, %s7324_s28, %s7326_s30, %s7246_s20, %s7247_s22, %s7248_s23  }
  0x29   : > { %s4881_s25 = sadd.s32 4294967294, %s7243_s15   ;;  %p61_p3 = scmp.ne.s32.totalorder %s7235_s13, %s7231_s12 }
  0x2a   : > { %p9667_p10 = scmp.eq.s32.totalorder %s7355_s24, 0  ;;  %p111_p1 = scmp.eq.s32.totalorder %s7355_s24, 1 }
  0x2b   : > { %p117_p2 = scmp.eq.s32.totalorder %s4881_s25, 1  ;;  %p4882_p4 = scmp.ge.s32.totalorder %s7243_s15, 1 }
  0x2c   : > { %p7365_p5 = por %p9667_p10, %p61_p3  ;;  %p7372_p7 = por %p111_p1, %p55_p0 }
  0x2d   : > { %p7376_p9 = por %p117_p2, %p61_p3  ;;  %p124_p11 = scmp.lt.s32.totalorder %s7243_s15, 3 }
  0x2e   : > { %s9675_s27 = scalar_select %p7365_p5, 1, 0 }
  0x2f   : > { %s9676_s26 = scalar_select %p7372_p7, 1, 0 }
  0x30   : > { %s9677_s28 = scalar_select %p7376_p9, 1, 0 }
  0x31   : > { %p7381_p12 = pnand %p4882_p4, %p124_p11  ;;  %s7249_s5 = smov [#allocation2]  }
  0x32   : > { %s137_s6 = sshll.u32 %s7249_s5, 4  ;;  %s4888_s7 = sshll.u32 %s150_s21, 2  ;;  %s138_s6 = int_to_ptr.vmem [resolvable:$true] %s137_s6 }
  0x33   : > { %s9678_s4 = scalar_select %p7381_p12, 1, 0 }
  0x34   : > { %p7022_p13 = pneg %p7381_p12  ;;  %s4902_s8 = sshll.u32 %s7243_s15, 6 }
  0x35   : > { %s173_s9 = scalar_lea.vmem [#allocation7], %s4888_s7  ;;  %s7399_s20 = scalar_lea.hbm %s9665_s2, %s4902_s8 }
  0x36   : > { %s181_s10 = sshll.u32 %s173_s9, 4  ;;  %p7392_p0 = pnand %p7022_p13, %p9667_p10  ;;  %s7401_s10 = int_to_ptr.vmem [resolvable:$true] %s181_s10 }
  0x37   : > { %s7115_s23 = scalar_lea.hbm %s9663_s0, 512 }
  0x38   : > { %p7116_p3 = scmp.ne.s32.totalorder %s9663_s0, %s7115_s23  ;;  %p7117_p1 = pneg %p7392_p0 }
  0x39   : > { %p7122_p11 = scmp.lt.u32.totalorder %s7115_s23, %s9663_s0 }
  0x3a   : > { %p7118_p2 = pnand %p7117_p1, %p7116_p3 }
  0x3c   : > { %p7119_p4 = pneg %p7118_p2 }
  0x3e   : > { %p7124_p13 = pnand %p7122_p11, %p7119_p4 }
  0x40   : > { %7127 = shalt.err (!%p7124_p13)
}
  0x41   : > { %s7128_s8 = scalar_lea.vmem %s138_s6, 512  ;;  %p7136_p7 = scmp.lt.s32.totalorder %s138_s6, %s138_s6 }
  0x42   : > { %p7129_p10 = scmp.ne.s32.totalorder %s138_s6, %s7128_s8  ;;  %p7137_p5 = scmp.lt.s32.totalorder %s7128_s8, %s7128_s8 }
  0x44   : > { %p7131_p8 = pnand %p7129_p10, %p7117_p1  ;;  %p7138_p12 = por %p7137_p5, %p7136_p7 }
  0x46   : > { %p7132_p9 = pneg %p7131_p8 }
  0x48   : > { %p7139_p6 = pnand %p7138_p12, %p7132_p9 }
  0x4a   : > { %7142 = shalt.err (!%p7139_p6)
}
  0x4b   : > { %7025 = dma.hbm_to_vmem [thread:$0]  (!%p7392_p0), %s9663_s0, 512, %s138_s6, [#allocation3]  }
  0x4c   : > { %s7143_s21 = scalar_lea.hbm %s7399_s20, 64  ;;  %p9680_p10 = scmp.ne.s32.totalorder %s9674_s29, 0 }
  0x4d   : > { %p7144_p3 = scmp.ne.s32.totalorder %s7399_s20, %s7143_s21  ;;  %s7148_s25 = scalar_lea.hbm %s9665_s2, 128 }
  0x4e   : > { %p9681_p8 = pneg %p9680_p10  ;;  %p7149_p6 = scmp.lt.u32.totalorder %s7399_s20, %s9665_s2 }
  0x4f   : > { %p7150_p5 = scmp.lt.u32.totalorder %s7148_s25, %s7143_s21  ;;  %p7152_p9 = scmp.lt.u32.totalorder %s7143_s21, %s7399_s20 }
  0x50   : > { %p7146_p1 = pnand %p7144_p3, %p9681_p8 }
  0x51   : > { %p7151_p7 = por %p7150_p5, %p7149_p6 }
  0x52   : > { %p7147_p2 = pneg %p7146_p1 }
  0x53   : > { %p7153_p12 = por %p7152_p9, %p7151_p7 }
  0x55   : > { %p7154_p4 = pnand %p7153_p12, %p7147_p2 }
  0x57   : > { %7157 = shalt.err (!%p7154_p4)
}
  0x58   : > { %s7158_s6 = scalar_lea.vmem %s7401_s10, 64  ;;  %p9682_p11 = pmov %p9681_p8 }
  0x59   : > { %p7159_p0 = scmp.ne.s32.totalorder %s7401_s10, %s7158_s6  ;;  %s7250_s7 = smov [#allocation7]  }
  0x5a   : > { %s7163_s9 = sshll.u32 %s7250_s7, 4  ;;  %s7164_s9 = int_to_ptr.vmem [resolvable:$false] %s7163_s9 }
  0x5b   : > { %p7161_p13 = pnand %p7159_p0, %p9682_p11  ;;  %s7165_s8 = scalar_lea.vmem %s7164_s9, 128 }
  0x5c   : > { %p7166_p8 = scmp.lt.s32.totalorder %s7401_s10, %s7164_s9  ;;  %p7167_p1 = scmp.lt.s32.totalorder %s7165_s8, %s7158_s6 }
  0x5d   : > { %p7162_p3 = pneg %p7161_p13 }
  0x5e   : > { %p7168_p6 = por %p7167_p1, %p7166_p8 }
  0x60   : > { %p7169_p5 = pnand %p7168_p6, %p7162_p3 }
  0x62   : > { %7172 = shalt.err (!%p7169_p5)
}
  0x63   : > { %7032 = dma.hbm_to_vmem [thread:$0]  (!%p9680_p10), %s7399_s20, 64, %s7401_s10, %s7326_s30  }
  0x64   : > { %p9683_p2 = scmp.ne.s32.totalorder %s9678_s4, 0 }
  0x65   : > { %p9684_p7 = scmp.eq.s32.totalorder (!%p9683_p2), %s7355_s24, 0 }
  0x66   : > { %190 = sbr.rel (%p9683_p2) target bundleno = 1381 (0x565), region = 32 }
  0x6d   : > { %7218 = dma.done.wait (%p9684_p7), [#allocation3], 512   ;;  %p9685_p9 = pmov %p9684_p7 }
  0x6e   : > { %s196_s17 = sand.u32 1, %s7355_s24   ;;  %s7451_s18 = sand.u32 1, %s7235_s13  }
  0x6f   : > { %7220 = vsyncadd (%p9685_p9), [#allocation3], 4294966784  ;;  %s4893_s29 = sshll.u32 %s7451_s18, 14  ;;  %s197_s21 = scalar_lea.sflag [#allocation6], %s196_s17 }
  0x70   : > { %s7454_s22 = scalar_lea.vmem [#allocation5], %s4893_s29  ;;  %p9686_p10 = scmp.ne.s32.totalorder %s9675_s27, 0 }
  0x72   : > { %7222 = dma.done.wait (%p9686_p10), %s197_s21, 262208  }
  0x73   : > { %7224 = vsyncadd (%p9686_p10), %s197_s21, 4294705088  ;;  %v246_v0 = vld [vmem:[%s7454_s22 + $0x8] sm:$0xff]  ;;  %v248_v2 = vld [vmem:[%s7454_s22 + $0x18] sm:$0xff]  ;;  %s4894_s30 = sshll.u32 %s7451_s18, 2  ;;  %s4903_s4 = sshll.u32 %s7355_s24, 6 }
  0x74   : > { %v250_v1 = vld [vmem:[%s7454_s22 + $0x28] sm:$0xff]  ;;  %v252_v4 = vld [vmem:[%s7454_s22 + $0x38] sm:$0xff]  ;;  %v245_v5 = vld [vmem:[%s7454_s22] sm:$0xff]  ;;  %s209_s27 = scalar_lea.vmem [#allocation7], %s4894_s30  ;;  %s236_s10 = scalar_lea.vmem [#allocation8], %s4894_s30 }
  0x75   : > { %v4904_v3 = vpack.c.bf16 %v250_v1, %v246_v0  ;;  %v249_v6 = vld [vmem:[%s7454_s22 + $0x20] sm:$0xff]  ;;  %v5928_v7 = vpack.c.bf16 %v252_v4, %v248_v2  ;;  %v247_v9 = vld [vmem:[%s7454_s22 + $0x10] sm:$0xff]  ;;  %v254_v11 = vld [vmem:[%s7454_s22 + $0x48] sm:$0xff]  ;;  %s4779_s20 = sshll.u32 %s236_s10, 4  ;;  %s9619_s11 = scalar_lea.hbm %s9666_s3, %s4903_s4  ;;  %s9621_s20 = int_to_ptr.vmem [resolvable:$true] %s4779_s20 }
  0x76   : > { %v4906_v8 = vpack.c.bf16 %v249_v6, %v245_v5  ;;  %v251_v10 = vld [vmem:[%s7454_s22 + $0x30] sm:$0xff]  ;;  %v258_v13 = vld [vmem:[%s7454_s22 + $0x68] sm:$0xff]  ;;  %v256_v14 = vld [vmem:[%s7454_s22 + $0x58] sm:$0xff]  ;;  %s4765_s5 = scalar_lea.sflag [#allocation4], %s7451_s18  ;;  %s7173_s6 = scalar_lea.vmem %s9621_s20, 64 }
  0x77   : > { %4905 = vmatprep.subr.bf16.mxu0 %v4904_v3  ;;  %v5930_v12 = vpack.c.bf16 %v251_v10, %v247_v9  ;;  %v260_v15 = vld [vmem:[%s7454_s22 + $0x78] sm:$0xff]  ;;  %5929 = vmatprep.subr.bf16.mxu1 %v5928_v7  ;;  %v4908_v16 = vpack.c.bf16 %v258_v13, %v254_v11  ;;  %v253_v18 = vld [vmem:[%s7454_s22 + $0x40] sm:$0xff]  ;;  %v255_v20 = vld [vmem:[%s7454_s22 + $0x50] sm:$0xff]  ;;  %p7174_p12 = scmp.ne.s32.totalorder %s9621_s20, %s7173_s6  ;;  %p9687_p4 = scmp.ne.s32.totalorder %s9676_s26, 0 }
  0x78   : > { %4907 = vmatpush1.bf16.msra.mxu0 %v4906_v8  ;;  %v5932_v17 = vpack.c.bf16 %v260_v15, %v256_v14  ;;  %v257_v19 = vld [vmem:[%s7454_s22 + $0x60] sm:$0xff]  ;;  %v259_v22 = vld [vmem:[%s7454_s22 + $0x70] sm:$0xff]  ;;  %v262_v23 = vld [vmem:[%s7454_s22 + $0x88] sm:$0xff]  ;;  %s7252_s24 = smov [#allocation8]  }
  0x79   : > { %5931 = vmatpush1.bf16.msra.mxu1 %v5930_v12  ;;  %v4910_v21 = vpack.c.bf16 %v257_v19, %v253_v18  ;;  %v266_v24 = vld [vmem:[%s7454_s22 + $0xa8] sm:$0xff]  ;;  %4909 = vmatprep.subr.bf16.mxu0 %v4908_v16  ;;  %v5934_v25 = vpack.c.bf16 %v259_v22, %v255_v20  ;;  %v264_v27 = vld [vmem:[%s7454_s22 + $0x98] sm:$0xff]  ;;  %v261_v29 = vld [vmem:[%s7454_s22 + $0x80] sm:$0xff]  ;;  %p7175_p0 = pnand %p7174_p12, %p9687_p4  ;;  %s7177_s7 = sshll.u32 %s7252_s24, 4  ;;  %s7178_s7 = int_to_ptr.vmem [resolvable:$false] %s7177_s7 }
  0x7a   : > { %5933 = vmatprep.subr.bf16.mxu1 %v5932_v17  ;;  %v4912_v26 = vpack.c.bf16 %v266_v24, %v262_v23  ;;  %v268_v28 = vld [vmem:[%s7454_s22 + $0xb8] sm:$0xff]  ;;  %v265_v31 = vld [vmem:[%s7454_s22 + $0xa0] sm:$0xff]  ;;  %v263_v32 = vld [vmem:[%s7454_s22 + $0x90] sm:$0xff]  ;;  %s7179_s9 = scalar_lea.vmem %s7178_s7, 128  ;;  %p7180_p13 = scmp.lt.s32.totalorder %s9621_s20, %s7178_s7 }
  0x7b   : > { %v5936_v30 = vpack.c.bf16 %v268_v28, %v264_v27  ;;  %v267_v33 = vld [vmem:[%s7454_s22 + $0xb0] sm:$0xff]  ;;  %v4914_v34 = vpack.c.bf16 %v265_v31, %v261_v29  ;;  %v270_v35 = vld [vmem:[%s7454_s22 + $0xc8] sm:$0xff]  ;;  %v272_v37 = vld [vmem:[%s7454_s22 + $0xd8] sm:$0xff]  ;;  %p7176_p11 = pneg %p7175_p0  ;;  %p7181_p3 = scmp.lt.s32.totalorder %s7179_s9, %s7173_s6 }
  0x7c   : > { %4911 = vmatpush1.bf16.msra.mxu0 %v4910_v21  ;;  %v274_v36 = vld [vmem:[%s7454_s22 + $0xe8] sm:$0xff]  ;;  %v5938_v38 = vpack.c.bf16 %v267_v33, %v263_v32  ;;  %v276_v40 = vld [vmem:[%s7454_s22 + $0xf8] sm:$0xff]  ;;  %v269_v41 = vld [vmem:[%s7454_s22 + $0xc0] sm:$0xff] }
  0x7d   : > { %5935 = vmatpush1.bf16.msra.mxu1 %v5934_v25  ;;  %4913 = vmatprep.subr.bf16.mxu0 %v4912_v26  ;;  %v4916_v39 = vpack.c.bf16 %v274_v36, %v270_v35  ;;  %v273_v42 = vld [vmem:[%s7454_s22 + $0xe0] sm:$0xff]  ;;  %v5940_v43 = vpack.c.bf16 %v276_v40, %v272_v37  ;;  %v271_v44 = vld [vmem:[%s7454_s22 + $0xd0] sm:$0xff]  ;;  %v278_v46 = vld [vmem:[%s7454_s22 + $0x108] sm:$0xff]  ;;  %p7182_p8 = por %p7181_p3, %p7180_p13 }
  0x7e   : > { %5937 = vmatprep.subr.bf16.mxu1 %v5936_v30  ;;  %v275_v45 = vld [vmem:[%s7454_s22 + $0xf0] sm:$0xff]  ;;  %v282_v47 = vld [vmem:[%s7454_s22 + $0x128] sm:$0xff]  ;;  %v280_v48 = vld [vmem:[%s7454_s22 + $0x118] sm:$0xff]  ;;  %v4918_v50 = vpack.c.bf16 %v273_v42, %v269_v41 }
  0x7f   : > { %v284_v49 = vld [vmem:[%s7454_s22 + $0x138] sm:$0xff]  ;;  %v5942_v51 = vpack.c.bf16 %v275_v45, %v271_v44  ;;  %v4920_v52 = vpack.c.bf16 %v282_v47, %v278_v46  ;;  %v277_v53 = vld [vmem:[%s7454_s22 + $0x100] sm:$0xff]  ;;  %v279_v55 = vld [vmem:[%s7454_s22 + $0x110] sm:$0xff]  ;;  %v2297_v46 = vlaneseq  ;;  %p7183_p1 = pnand %p7182_p8, %p7176_p11 }
  0x80   : > { %4915 = vmatpush1.bf16.msra.mxu0 %v4914_v34  ;;  %v281_v54 = vld [vmem:[%s7454_s22 + $0x120] sm:$0xff]  ;;  %v5944_v56 = vpack.c.bf16 %v284_v49, %v280_v48  ;;  %v283_v57 = vld [vmem:[%s7454_s22 + $0x130] sm:$0xff]  ;;  %v286_v58 = vld [vmem:[%s7454_s22 + $0x148] sm:$0xff] }
  0x81   : > { %5939 = vmatpush1.bf16.msra.mxu1 %v5938_v38  ;;  %4917 = vmatprep.subr.bf16.mxu0 %v4916_v39  ;;  %v290_v59 = vld [vmem:[%s7454_s22 + $0x168] sm:$0xff]  ;;  %v288_v60 = vld [vmem:[%s7454_s22 + $0x158] sm:$0xff]  ;;  %v4922_v62 = vpack.c.bf16 %v281_v54, %v277_v53  ;;  %v5946_v63 = vpack.c.bf16 %v283_v57, %v279_v55  ;;  %v285_v1 = vld [vmem:[%s7454_s22 + $0x140] sm:$0xff]  ;;  %vm4761_vm0 = vcmp.lt.s32.totalorder %v2297_v46, 512 }
  0x82   : > { %5941 = vmatprep.subr.bf16.mxu1 %v5940_v43  ;;  %v292_v61 = vld [vmem:[%s7454_s22 + $0x178] sm:$0xff]  ;;  %v4924_v0 = vpack.c.bf16 %v290_v59, %v286_v58  ;;  %v289_v2 = vld [vmem:[%s7454_s22 + $0x160] sm:$0xff]  ;;  %v287_v3 = vld [vmem:[%s7454_s22 + $0x150] sm:$0xff]  ;;  %v7545_v59 = vshrl.u32 %v2297_v46, 7 }
  0x83   : > { %v5948_v4 = vpack.c.bf16 %v292_v61, %v288_v60  ;;  %v291_v5 = vld [vmem:[%s7454_s22 + $0x170] sm:$0xff]  ;;  %v294_v6 = vld [vmem:[%s7454_s22 + $0x188] sm:$0xff]  ;;  %v296_v8 = vld [vmem:[%s7454_s22 + $0x198] sm:$0xff]  ;;  %v4926_v10 = vpack.c.bf16 %v289_v2, %v285_v1 }
  0x84   : > { %4919 = vmatpush1.bf16.msra.mxu0 %v4918_v50  ;;  %v298_v7 = vld [vmem:[%s7454_s22 + $0x1a8] sm:$0xff]  ;;  %v300_v9 = vld [vmem:[%s7454_s22 + $0x1b8] sm:$0xff]  ;;  %v5950_v11 = vpack.c.bf16 %v291_v5, %v287_v3  ;;  %v293_v13 = vld [vmem:[%s7454_s22 + $0x180] sm:$0xff] }
  0x85   : > { %5943 = vmatpush1.bf16.msra.mxu1 %v5942_v51  ;;  %4921 = vmatprep.subr.bf16.mxu0 %v4920_v52  ;;  %v4928_v12 = vpack.c.bf16 %v298_v7, %v294_v6  ;;  %v297_v14 = vld [vmem:[%s7454_s22 + $0x1a0] sm:$0xff]  ;;  %v295_v15 = vld [vmem:[%s7454_s22 + $0x190] sm:$0xff]  ;;  %v5952_v16 = vpack.c.bf16 %v300_v9, %v296_v8  ;;  %v302_v18 = vld [vmem:[%s7454_s22 + $0x1c8] sm:$0xff]  ;;  %v7556_v8 = vsub.s32 1, %v7545_v59 }
  0x86   : > { %5945 = vmatprep.subr.bf16.mxu1 %v5944_v56  ;;  %v299_v17 = vld [vmem:[%s7454_s22 + $0x1b0] sm:$0xff]  ;;  %v306_v19 = vld [vmem:[%s7454_s22 + $0x1e8] sm:$0xff]  ;;  %v304_v20 = vld [vmem:[%s7454_s22 + $0x1d8] sm:$0xff]  ;;  %v4930_v22 = vpack.c.bf16 %v297_v14, %v293_v13 }
  0x87   : > { %v308_v21 = vld [vmem:[%s7454_s22 + $0x1f8] sm:$0xff]  ;;  %v5954_v23 = vpack.c.bf16 %v299_v17, %v295_v15  ;;  %v4932_v24 = vpack.c.bf16 %v306_v19, %v302_v18  ;;  %v301_v25 = vld [vmem:[%s7454_s22 + $0x1c0] sm:$0xff]  ;;  %v303_v27 = vld [vmem:[%s7454_s22 + $0x1d0] sm:$0xff] }
  0x88   : > { %4923 = vmatpush1.bf16.msra.mxu0 %v4922_v62  ;;  %v305_v26 = vld [vmem:[%s7454_s22 + $0x1e0] sm:$0xff]  ;;  %v5956_v28 = vpack.c.bf16 %v308_v21, %v304_v20  ;;  %v307_v29 = vld [vmem:[%s7454_s22 + $0x1f0] sm:$0xff]  ;;  %v310_v30 = vld [vmem:[%s7454_s22 + $0x208] sm:$0xff] }
  0x89   : > { %5947 = vmatpush1.bf16.msra.mxu1 %v5946_v63  ;;  %4925 = vmatprep.subr.bf16.mxu0 %v4924_v0  ;;  %v314_v31 = vld [vmem:[%s7454_s22 + $0x228] sm:$0xff]  ;;  %v312_v32 = vld [vmem:[%s7454_s22 + $0x218] sm:$0xff]  ;;  %v4934_v34 = vpack.c.bf16 %v305_v26, %v301_v25  ;;  %v5958_v35 = vpack.c.bf16 %v307_v29, %v303_v27  ;;  %v309_v37 = vld [vmem:[%s7454_s22 + $0x200] sm:$0xff] }
  0x8a   : > { %5949 = vmatprep.subr.bf16.mxu1 %v5948_v4  ;;  %v316_v33 = vld [vmem:[%s7454_s22 + $0x238] sm:$0xff]  ;;  %v4936_v36 = vpack.c.bf16 %v314_v31, %v310_v30  ;;  %v313_v38 = vld [vmem:[%s7454_s22 + $0x220] sm:$0xff]  ;;  %v311_v39 = vld [vmem:[%s7454_s22 + $0x210] sm:$0xff] }
  0x8b   : > { %v5960_v40 = vpack.c.bf16 %v316_v33, %v312_v32  ;;  %v315_v41 = vld [vmem:[%s7454_s22 + $0x230] sm:$0xff]  ;;  %v318_v42 = vld [vmem:[%s7454_s22 + $0x248] sm:$0xff]  ;;  %v320_v44 = vld [vmem:[%s7454_s22 + $0x258] sm:$0xff]  ;;  %v4938_v47 = vpack.c.bf16 %v313_v38, %v309_v37 }
  0x8c   : > { %4927 = vmatpush1.bf16.msra.mxu0 %v4926_v10  ;;  %v322_v43 = vld [vmem:[%s7454_s22 + $0x268] sm:$0xff]  ;;  %v324_v45 = vld [vmem:[%s7454_s22 + $0x278] sm:$0xff]  ;;  %v5962_v48 = vpack.c.bf16 %v315_v41, %v311_v39  ;;  %v317_v50 = vld [vmem:[%s7454_s22 + $0x240] sm:$0xff] }
  0x8d   : > { %5951 = vmatpush1.bf16.msra.mxu1 %v5950_v11  ;;  %4929 = vmatprep.subr.bf16.mxu0 %v4928_v12  ;;  %v4940_v49 = vpack.c.bf16 %v322_v43, %v318_v42  ;;  %v321_v51 = vld [vmem:[%s7454_s22 + $0x260] sm:$0xff]  ;;  %v319_v52 = vld [vmem:[%s7454_s22 + $0x250] sm:$0xff]  ;;  %v5964_v53 = vpack.c.bf16 %v324_v45, %v320_v44  ;;  %v326_v55 = vld [vmem:[%s7454_s22 + $0x288] sm:$0xff] }
  0x8e   : > { %5953 = vmatprep.subr.bf16.mxu1 %v5952_v16  ;;  %v323_v54 = vld [vmem:[%s7454_s22 + $0x270] sm:$0xff]  ;;  %v330_v56 = vld [vmem:[%s7454_s22 + $0x2a8] sm:$0xff]  ;;  %v328_v57 = vld [vmem:[%s7454_s22 + $0x298] sm:$0xff]  ;;  %v4942_v60 = vpack.c.bf16 %v321_v51, %v317_v50 }
  0x8f   : > { %v332_v58 = vld [vmem:[%s7454_s22 + $0x2b8] sm:$0xff]  ;;  %v5966_v61 = vpack.c.bf16 %v323_v54, %v319_v52  ;;  %v4944_v62 = vpack.c.bf16 %v330_v56, %v326_v55  ;;  %v325_v63 = vld [vmem:[%s7454_s22 + $0x280] sm:$0xff]  ;;  %v327_v1 = vld [vmem:[%s7454_s22 + $0x290] sm:$0xff] }
  0x90   : > { %4931 = vmatpush1.bf16.msra.mxu0 %v4930_v22  ;;  %v329_v0 = vld [vmem:[%s7454_s22 + $0x2a0] sm:$0xff]  ;;  %v5968_v2 = vpack.c.bf16 %v332_v58, %v328_v57  ;;  %v331_v3 = vld [vmem:[%s7454_s22 + $0x2b0] sm:$0xff]  ;;  %v334_v4 = vld [vmem:[%s7454_s22 + $0x2c8] sm:$0xff] }
  0x91   : > { %5955 = vmatpush1.bf16.msra.mxu1 %v5954_v23  ;;  %4933 = vmatprep.subr.bf16.mxu0 %v4932_v24  ;;  %v338_v5 = vld [vmem:[%s7454_s22 + $0x2e8] sm:$0xff]  ;;  %v336_v6 = vld [vmem:[%s7454_s22 + $0x2d8] sm:$0xff]  ;;  %v4946_v9 = vpack.c.bf16 %v329_v0, %v325_v63  ;;  %v333_v10 = vld [vmem:[%s7454_s22 + $0x2c0] sm:$0xff]  ;;  %v5970_v11 = vpack.c.bf16 %v331_v3, %v327_v1 }
  0x92   : > { %5957 = vmatprep.subr.bf16.mxu1 %v5956_v28  ;;  %v340_v7 = vld [vmem:[%s7454_s22 + $0x2f8] sm:$0xff]  ;;  %v4948_v12 = vpack.c.bf16 %v338_v5, %v334_v4  ;;  %v337_v13 = vld [vmem:[%s7454_s22 + $0x2e0] sm:$0xff]  ;;  %v335_v14 = vld [vmem:[%s7454_s22 + $0x2d0] sm:$0xff] }
  0x93   : > { %v339_v15 = vld [vmem:[%s7454_s22 + $0x2f0] sm:$0xff]  ;;  %v5972_v16 = vpack.c.bf16 %v340_v7, %v336_v6  ;;  %v342_v17 = vld [vmem:[%s7454_s22 + $0x308] sm:$0xff]  ;;  %v7564_v19 = vld [vmem:[#allocation2] sm:$0xff]  ;;  %v4950_v23 = vpack.c.bf16 %v337_v13, %v333_v10  ;;  %v7603_v10 = vsub.s32 0, %v7545_v59 }
  0x94   : > { %4935 = vmatpush1.bf16.msra.mxu0 %v4934_v34  ;;  %v346_v18 = vld [vmem:[%s7454_s22 + $0x328] sm:$0xff]  ;;  %v344_v20 = vld [vmem:[%s7454_s22 + $0x318] sm:$0xff]  ;;  %v2304_v22 = vrot.slane %v7564_v19, %v7556_v8  ;;  %v5974_v24 = vpack.c.bf16 %v339_v15, %v335_v14  ;;  %v341_v26 = vld [vmem:[%s7454_s22 + $0x300] sm:$0xff] }
  0x95   : > { %5959 = vmatpush1.bf16.msra.mxu1 %v5958_v35  ;;  %4937 = vmatprep.subr.bf16.mxu0 %v4936_v36  ;;  %v348_v21 = vld [vmem:[%s7454_s22 + $0x338] sm:$0xff]  ;;  %v4952_v25 = vpack.c.bf16 %v346_v18, %v342_v17  ;;  %v345_v27 = vld [vmem:[%s7454_s22 + $0x320] sm:$0xff]  ;;  %v343_v28 = vld [vmem:[%s7454_s22 + $0x310] sm:$0xff] }
  0x96   : > { %5961 = vmatprep.subr.bf16.mxu1 %v5960_v40  ;;  %v5976_v29 = vpack.c.bf16 %v348_v21, %v344_v20  ;;  %v347_v30 = vld [vmem:[%s7454_s22 + $0x330] sm:$0xff]  ;;  %v350_v31 = vld [vmem:[%s7454_s22 + $0x348] sm:$0xff]  ;;  %2521 = vmatprep.mubr.f32.mxu0 %v2304_v22  ;;  %v352_v33 = vld [vmem:[%s7454_s22 + $0x358] sm:$0xff]  ;;  %v4954_v35 = vpack.c.bf16 %v345_v27, %v341_v26 }
  0x97   : > { %v354_v32 = vld [vmem:[%s7454_s22 + $0x368] sm:$0xff]  ;;  %v356_v34 = vld [vmem:[%s7454_s22 + $0x378] sm:$0xff]  ;;  %3657 = vmatprep.mubr.f32.mxu1 %v2304_v22  ;;  %v5978_v36 = vpack.c.bf16 %v347_v30, %v343_v28  ;;  %v349_v38 = vld [vmem:[%s7454_s22 + $0x340] sm:$0xff]  ;;  %v7612_v22 = vsub.s32 3, %v7545_v59 }
  0x98   : > { %4939 = vmatpush1.bf16.msra.mxu0 %v4938_v47  ;;  %v4956_v37 = vpack.c.bf16 %v354_v32, %v350_v31  ;;  %v353_v39 = vld [vmem:[%s7454_s22 + $0x360] sm:$0xff]  ;;  %v351_v40 = vld [vmem:[%s7454_s22 + $0x350] sm:$0xff]  ;;  %v5980_v41 = vpack.c.bf16 %v356_v34, %v352_v33  ;;  %v358_v43 = vld [vmem:[%s7454_s22 + $0x388] sm:$0xff] }
  0x99   : > { %5963 = vmatpush1.bf16.msra.mxu1 %v5962_v48  ;;  %4941 = vmatprep.subr.bf16.mxu0 %v4940_v49  ;;  %v355_v42 = vld [vmem:[%s7454_s22 + $0x370] sm:$0xff]  ;;  %v362_v44 = vld [vmem:[%s7454_s22 + $0x3a8] sm:$0xff]  ;;  %v360_v45 = vld [vmem:[%s7454_s22 + $0x398] sm:$0xff]  ;;  %v4958_v48 = vpack.c.bf16 %v353_v39, %v349_v38 }
  0x9a   : > { %5965 = vmatprep.subr.bf16.mxu1 %v5964_v53  ;;  %v364_v47 = vld [vmem:[%s7454_s22 + $0x3b8] sm:$0xff]  ;;  %v5982_v49 = vpack.c.bf16 %v355_v42, %v351_v40  ;;  %v4960_v50 = vpack.c.bf16 %v362_v44, %v358_v43  ;;  %v357_v51 = vld [vmem:[%s7454_s22 + $0x380] sm:$0xff]  ;;  %v359_v53 = vld [vmem:[%s7454_s22 + $0x390] sm:$0xff] }
  0x9b   : > { %v361_v52 = vld [vmem:[%s7454_s22 + $0x3a0] sm:$0xff]  ;;  %v5984_v54 = vpack.c.bf16 %v364_v47, %v360_v45  ;;  %v363_v55 = vld [vmem:[%s7454_s22 + $0x3b0] sm:$0xff]  ;;  %v366_v56 = vld [vmem:[%s7454_s22 + $0x3c8] sm:$0xff] }
  0x9c   : > { %4943 = vmatpush1.bf16.msra.mxu0 %v4942_v60  ;;  %v370_v57 = vld [vmem:[%s7454_s22 + $0x3e8] sm:$0xff]  ;;  %v368_v58 = vld [vmem:[%s7454_s22 + $0x3d8] sm:$0xff]  ;;  %v365_v0 = vld [vmem:[%s7454_s22 + $0x3c0] sm:$0xff] }
  0x9d   : > { %5967 = vmatpush1.bf16.msra.mxu1 %v5966_v61  ;;  %4945 = vmatprep.subr.bf16.mxu0 %v4944_v62  ;;  %v372_v60 = vld [vmem:[%s7454_s22 + $0x3f8] sm:$0xff]  ;;  %v4962_v61 = vpack.c.bf16 %v361_v52, %v357_v51  ;;  %v5986_v62 = vpack.c.bf16 %v363_v55, %v359_v53  ;;  %v4964_v63 = vpack.c.bf16 %v370_v57, %v366_v56  ;;  %v369_v1 = vld [vmem:[%s7454_s22 + $0x3e0] sm:$0xff]  ;;  %v371_v4 = vld [vmem:[%s7454_s22 + $0x3f0] sm:$0xff] }
  0x9e   : > { %5969 = vmatprep.subr.bf16.mxu1 %v5968_v2  ;;  %v367_v2 = vld [vmem:[%s7454_s22 + $0x3d0] sm:$0xff]  ;;  %v5988_v3 = vpack.c.bf16 %v372_v60, %v368_v58  ;;  %v374_v5 = vld [vmem:[%s7454_s22 + $0x408] sm:$0xff]  ;;  %v376_v7 = vld [vmem:[%s7454_s22 + $0x418] sm:$0xff] }
  0x9f   : > { %v378_v6 = vld [vmem:[%s7454_s22 + $0x428] sm:$0xff]  ;;  %v373_v14 = vld [vmem:[%s7454_s22 + $0x400] sm:$0xff]  ;;  %v379_v18 = vld [vmem:[%s7454_s22 + $0x430] sm:$0xff] }
  0xa0   : > { %4947 = vmatpush1.bf16.msra.mxu0 %v4946_v9  ;;  %v380_v9 = vld [vmem:[%s7454_s22 + $0x438] sm:$0xff]  ;;  %v4968_v13 = vpack.c.bf16 %v378_v6, %v374_v5  ;;  %v377_v15 = vld [vmem:[%s7454_s22 + $0x420] sm:$0xff]  ;;  %v382_v20 = vld [vmem:[%s7454_s22 + $0x448] sm:$0xff] }
  0xa1   : > { %5971 = vmatpush1.bf16.msra.mxu1 %v5970_v11  ;;  %4949 = vmatprep.subr.bf16.mxu0 %v4948_v12  ;;  %v4966_v11 = vpack.c.bf16 %v369_v1, %v365_v0  ;;  %v5990_v12 = vpack.c.bf16 %v371_v4, %v367_v2  ;;  %v5992_v17 = vpack.c.bf16 %v380_v9, %v376_v7  ;;  %v386_v21 = vld [vmem:[%s7454_s22 + $0x468] sm:$0xff]  ;;  %v385_v30 = vld [vmem:[%s7454_s22 + $0x460] sm:$0xff]  ;;  %v383_v31 = vld [vmem:[%s7454_s22 + $0x450] sm:$0xff] }
  0xa2   : > { %5973 = vmatprep.subr.bf16.mxu1 %v5972_v16  ;;  %v375_v16 = vld [vmem:[%s7454_s22 + $0x410] sm:$0xff]  ;;  %v4970_v26 = vpack.c.bf16 %v377_v15, %v373_v14  ;;  %v4972_v28 = vpack.c.bf16 %v386_v21, %v382_v20  ;;  %v390_v34 = vld [vmem:[%s7454_s22 + $0x488] sm:$0xff]  ;;  %v396_v38 = vld [vmem:[%s7454_s22 + $0x4b8] sm:$0xff] }
  0xa3   : > { %v5994_v27 = vpack.c.bf16 %v379_v18, %v375_v16  ;;  %v387_v33 = vld [vmem:[%s7454_s22 + $0x470] sm:$0xff]  ;;  %v389_v42 = vld [vmem:[%s7454_s22 + $0x480] sm:$0xff]  ;;  %v404_v51 = vld [vmem:[%s7454_s22 + $0x4f8] sm:$0xff] }
  0xa4   : > { %4951 = vmatpush1.bf16.msra.mxu0 %v4950_v23  ;;  %v2300_v23 = vrot.slane %v7564_v19, %v7603_v10  ;;  %v5998_v40 = vpack.c.bf16 %v387_v33, %v383_v31  ;;  %v393_v43 = vld [vmem:[%s7454_s22 + $0x4a0] sm:$0xff]  ;;  %v391_v44 = vld [vmem:[%s7454_s22 + $0x490] sm:$0xff]  ;;  %v412_v0 = vld [vmem:[%s7454_s22 + $0x538] sm:$0xff] }
  0xa5   : > { %5975 = vmatpush1.bf16.msra.mxu1 %v5974_v24  ;;  %4953 = vmatprep.subr.bf16.mxu0 %v4952_v25  ;;  %v384_v24 = vld [vmem:[%s7454_s22 + $0x458] sm:$0xff]  ;;  %v395_v47 = vld [vmem:[%s7454_s22 + $0x4b0] sm:$0xff]  ;;  %v4978_v52 = vpack.c.bf16 %v393_v43, %v389_v42  ;;  %v397_v55 = vld [vmem:[%s7454_s22 + $0x4c0] sm:$0xff] }
  0xa6   : > { %5977 = vmatprep.subr.bf16.mxu1 %v5976_v29  ;;  %v388_v25 = vld [vmem:[%s7454_s22 + $0x478] sm:$0xff]  ;;  %v381_v29 = vld [vmem:[%s7454_s22 + $0x440] sm:$0xff]  ;;  %v6002_v53 = vpack.c.bf16 %v395_v47, %v391_v44  ;;  %v399_v57 = vld [vmem:[%s7454_s22 + $0x4d0] sm:$0xff] }
  0xa7   : > { %v5996_v32 = vpack.c.bf16 %v388_v25, %v384_v24  ;;  %v4974_v39 = vpack.c.bf16 %v385_v30, %v381_v29  ;;  %v401_v56 = vld [vmem:[%s7454_s22 + $0x4e0] sm:$0xff]  ;;  %v403_v60 = vld [vmem:[%s7454_s22 + $0x4f0] sm:$0xff]  ;;  %v420_v14 = vld [vmem:[%s7454_s22 + $0x578] sm:$0xff] }
  0xa8   : > { %4955 = vmatpush1.bf16.msra.mxu0 %v4954_v35  ;;  %v394_v35 = vld [vmem:[%s7454_s22 + $0x4a8] sm:$0xff]  ;;  %v4982_v1 = vpack.c.bf16 %v401_v56, %v397_v55  ;;  %v6006_v2 = vpack.c.bf16 %v403_v60, %v399_v57  ;;  %v405_v4 = vld [vmem:[%s7454_s22 + $0x500] sm:$0xff]  ;;  %v407_v6 = vld [vmem:[%s7454_s22 + $0x510] sm:$0xff] }
  0xa9   : > { %5979 = vmatpush1.bf16.msra.mxu1 %v5978_v36  ;;  %4957 = vmatprep.subr.bf16.mxu0 %v4956_v37  ;;  %v2312_v36 = vrot.slane %v7564_v19, %v7612_v22  ;;  %v392_v37 = vld [vmem:[%s7454_s22 + $0x498] sm:$0xff]  ;;  %v409_v5 = vld [vmem:[%s7454_s22 + $0x520] sm:$0xff]  ;;  %v411_v9 = vld [vmem:[%s7454_s22 + $0x530] sm:$0xff] }
  0xaa   : > { %5981 = vmatprep.subr.bf16.mxu1 %v5980_v41  ;;  %v4976_v41 = vpack.c.bf16 %v394_v35, %v390_v34  ;;  %v6000_v45 = vpack.c.bf16 %v396_v38, %v392_v37  ;;  %v4986_v15 = vpack.c.bf16 %v409_v5, %v405_v4  ;;  %v6010_v16 = vpack.c.bf16 %v411_v9, %v407_v6  ;;  %v413_v18 = vld [vmem:[%s7454_s22 + $0x540] sm:$0xff]  ;;  %v415_v21 = vld [vmem:[%s7454_s22 + $0x550] sm:$0xff]  ;;  %v422_v25 = vld [vmem:[%s7454_s22 + $0x588] sm:$0xff] }
  0xab   : > { %v417_v20 = vld [vmem:[%s7454_s22 + $0x560] sm:$0xff]  ;;  %v419_v24 = vld [vmem:[%s7454_s22 + $0x570] sm:$0xff]  ;;  %v430_v37 = vld [vmem:[%s7454_s22 + $0x5c8] sm:$0xff] }
  0xac   : > { %4959 = vmatpush1.bf16.msra.mxu0 %v4958_v48  ;;  %v398_v48 = vld [vmem:[%s7454_s22 + $0x4c8] sm:$0xff]  ;;  %v4990_v29 = vpack.c.bf16 %v417_v20, %v413_v18  ;;  %v6014_v30 = vpack.c.bf16 %v419_v24, %v415_v21  ;;  %v425_v33 = vld [vmem:[%s7454_s22 + $0x5a0] sm:$0xff]  ;;  %v423_v34 = vld [vmem:[%s7454_s22 + $0x590] sm:$0xff] }
  0xad   : > { %5983 = vmatpush1.bf16.msra.mxu1 %v5982_v49  ;;  %4961 = vmatprep.subr.bf16.mxu0 %v4960_v50  ;;  %v402_v49 = vld [vmem:[%s7454_s22 + $0x4e8] sm:$0xff]  ;;  %v400_v50 = vld [vmem:[%s7454_s22 + $0x4d8] sm:$0xff]  ;;  %v429_v44 = vld [vmem:[%s7454_s22 + $0x5c0] sm:$0xff] }
  0xae   : > { %5985 = vmatprep.subr.bf16.mxu1 %v5984_v54  ;;  %v4980_v54 = vpack.c.bf16 %v402_v49, %v398_v48  ;;  %v6004_v58 = vpack.c.bf16 %v404_v51, %v400_v50  ;;  %v434_v38 = vld [vmem:[%s7454_s22 + $0x5e8] sm:$0xff]  ;;  %v431_v47 = vld [vmem:[%s7454_s22 + $0x5d0] sm:$0xff]  ;;  %v437_v57 = vld [vmem:[%s7454_s22 + $0x600] sm:$0xff] }
  0xaf   : > { %v4996_v43 = vpack.c.bf16 %v434_v38, %v430_v37  ;;  %v435_v49 = vld [vmem:[%s7454_s22 + $0x5f0] sm:$0xff]  ;;  %v438_v50 = vld [vmem:[%s7454_s22 + $0x608] sm:$0xff]  ;;  %v445_v6 = vld [vmem:[%s7454_s22 + $0x640] sm:$0xff] }
  0xb0   : > { %4963 = vmatpush1.bf16.msra.mxu0 %v4962_v61  ;;  %v406_v61 = vld [vmem:[%s7454_s22 + $0x508] sm:$0xff]  ;;  %v6022_v55 = vpack.c.bf16 %v435_v49, %v431_v47  ;;  %v439_v60 = vld [vmem:[%s7454_s22 + $0x610] sm:$0xff]  ;;  %v453_v21 = vld [vmem:[%s7454_s22 + $0x680] sm:$0xff] }
  0xb1   : > { %5987 = vmatpush1.bf16.msra.mxu1 %v5986_v62  ;;  %4965 = vmatprep.subr.bf16.mxu0 %v4964_v63  ;;  %v410_v62 = vld [vmem:[%s7454_s22 + $0x528] sm:$0xff]  ;;  %v408_v63 = vld [vmem:[%s7454_s22 + $0x518] sm:$0xff]  ;;  %v447_v9 = vld [vmem:[%s7454_s22 + $0x650] sm:$0xff] }
  0xb2   : > { %5989 = vmatprep.subr.bf16.mxu1 %v5988_v3  ;;  %v4984_v3 = vpack.c.bf16 %v410_v62, %v406_v61  ;;  %v6008_v7 = vpack.c.bf16 %v412_v0, %v408_v63  ;;  %v442_v51 = vld [vmem:[%s7454_s22 + $0x628] sm:$0xff]  ;;  %v443_v62 = vld [vmem:[%s7454_s22 + $0x630] sm:$0xff]  ;;  %v469_v47 = vld [vmem:[%s7454_s22 + $0x700] sm:$0xff] }
  0xb3   : > { %v5000_v56 = vpack.c.bf16 %v442_v51, %v438_v50  ;;  %v446_v63 = vld [vmem:[%s7454_s22 + $0x648] sm:$0xff]  ;;  %v6026_v4 = vpack.c.bf16 %v443_v62, %v439_v60  ;;  %v455_v24 = vld [vmem:[%s7454_s22 + $0x690] sm:$0xff]  ;;  %v477_v60 = vld [vmem:[%s7454_s22 + $0x740] sm:$0xff] }
  0xb4   : > { %4967 = vmatpush1.bf16.msra.mxu0 %v4966_v11  ;;  %v414_v11 = vld [vmem:[%s7454_s22 + $0x548] sm:$0xff]  ;;  %v467_v38 = vld [vmem:[%s7454_s22 + $0x6f0] sm:$0xff] }
  0xb5   : > { %5991 = vmatpush1.bf16.msra.mxu1 %v5990_v12  ;;  %4969 = vmatprep.subr.bf16.mxu0 %v4968_v13  ;;  %v418_v12 = vld [vmem:[%s7454_s22 + $0x568] sm:$0xff]  ;;  %v416_v13 = vld [vmem:[%s7454_s22 + $0x558] sm:$0xff]  ;;  %v471_v49 = vld [vmem:[%s7454_s22 + $0x710] sm:$0xff] }
  0xb6   : > { %5993 = vmatprep.subr.bf16.mxu1 %v5992_v17  ;;  %v4988_v17 = vpack.c.bf16 %v418_v12, %v414_v11  ;;  %v450_v0 = vld [vmem:[%s7454_s22 + $0x668] sm:$0xff]  ;;  %v451_v12 = vld [vmem:[%s7454_s22 + $0x670] sm:$0xff] }
  0xb7   : > { %2522 = vmatmul.mubr.f32.vlgmr.msra.gmra.mrb[0].mxu0 %v2300_v23  ;;  %v5004_v5 = vpack.c.bf16 %v450_v0, %v446_v63  ;;  %v6030_v18 = vpack.c.bf16 %v451_v12, %v447_v9  ;;  %v475_v51 = vld [vmem:[%s7454_s22 + $0x730] sm:$0xff]  ;;  %v485_v9 = vld [vmem:[%s7454_s22 + $0x780] sm:$0xff] }
  0xb8   : > { %4971 = vmatpush1.bf16.msra.mxu0 %v4970_v26  ;;  %3658 = vmatmul.mubr.f32.vlgmr.msra.gmra.mrb[0].mxu1 %v2300_v23  ;;  %v6012_v23 = vpack.c.bf16 %v420_v14, %v416_v13  ;;  %v426_v26 = vld [vmem:[%s7454_s22 + $0x5a8] sm:$0xff]  ;;  %v479_v62 = vld [vmem:[%s7454_s22 + $0x750] sm:$0xff] }
  0xb9   : > { %5995 = vmatpush1.bf16.msra.mxu1 %v5994_v27  ;;  %4973 = vmatprep.subr.bf16.mxu0 %v4972_v28  ;;  %v424_v27 = vld [vmem:[%s7454_s22 + $0x598] sm:$0xff]  ;;  %v4992_v31 = vpack.c.bf16 %v426_v26, %v422_v25  ;;  %v454_v13 = vld [vmem:[%s7454_s22 + $0x688] sm:$0xff]  ;;  %v459_v26 = vld [vmem:[%s7454_s22 + $0x6b0] sm:$0xff] }
  0xba   : > { %5997 = vmatprep.subr.bf16.mxu1 %v5996_v32  ;;  %2592 = vmatprep.mubr.f32.mxu0 %v2312_v36  ;;  %v428_v28 = vld [vmem:[%s7454_s22 + $0x5b8] sm:$0xff]  ;;  %v421_v32 = vld [vmem:[%s7454_s22 + $0x580] sm:$0xff]  ;;  %v458_v14 = vld [vmem:[%s7454_s22 + $0x6a8] sm:$0xff] }
  0xbb   : > { %3728 = vmatprep.mubr.f32.mxu1 %v2312_v36  ;;  %v6016_v35 = vpack.c.bf16 %v428_v28, %v424_v27  ;;  %v427_v36 = vld [vmem:[%s7454_s22 + $0x5b0] sm:$0xff]  ;;  %v5008_v20 = vpack.c.bf16 %v458_v14, %v454_v13  ;;  %v462_v27 = vld [vmem:[%s7454_s22 + $0x6c8] sm:$0xff] }
  0xbc   : > { %4975 = vmatpush1.bf16.msra.mxu0 %v4974_v39  ;;  %v432_v39 = vld [vmem:[%s7454_s22 + $0x5d8] sm:$0xff]  ;;  %v6018_v42 = vpack.c.bf16 %v427_v36, %v423_v34  ;;  %v466_v28 = vld [vmem:[%s7454_s22 + $0x6e8] sm:$0xff]  ;;  %v461_v34 = vld [vmem:[%s7454_s22 + $0x6c0] sm:$0xff] }
  0xbd   : > { %5999 = vmatpush1.bf16.msra.mxu1 %v5998_v40  ;;  %4977 = vmatprep.subr.bf16.mxu0 %v4976_v41  ;;  %v436_v40 = vld [vmem:[%s7454_s22 + $0x5f8] sm:$0xff]  ;;  %v4994_v41 = vpack.c.bf16 %v425_v33, %v421_v32  ;;  %v6034_v32 = vpack.c.bf16 %v459_v26, %v455_v24  ;;  %v5012_v33 = vpack.c.bf16 %v466_v28, %v462_v27  ;;  %v463_v36 = vld [vmem:[%s7454_s22 + $0x6d0] sm:$0xff]  ;;  %v493_v24 = vld [vmem:[%s7454_s22 + $0x7c0] sm:$0xff] }
  0xbe   : > { %6001 = vmatprep.subr.bf16.mxu1 %v6000_v45  ;;  %v433_v45 = vld [vmem:[%s7454_s22 + $0x5e0] sm:$0xff]  ;;  %v6020_v48 = vpack.c.bf16 %v436_v40, %v432_v39  ;;  %v470_v39 = vld [vmem:[%s7454_s22 + $0x708] sm:$0xff]  ;;  %v483_v0 = vld [vmem:[%s7454_s22 + $0x770] sm:$0xff] }
  0xbf   : > { %v474_v40 = vld [vmem:[%s7454_s22 + $0x728] sm:$0xff]  ;;  %v487_v12 = vld [vmem:[%s7454_s22 + $0x790] sm:$0xff] }
  0xc0   : > { %4979 = vmatpush1.bf16.msra.mxu0 %v4978_v52  ;;  %v440_v52 = vld [vmem:[%s7454_s22 + $0x618] sm:$0xff]  ;;  %v491_v14 = vld [vmem:[%s7454_s22 + $0x7b0] sm:$0xff] }
  0xc1   : > { %6003 = vmatpush1.bf16.msra.mxu1 %v6002_v53  ;;  %4981 = vmatprep.subr.bf16.mxu0 %v4980_v54  ;;  %v444_v53 = vld [vmem:[%s7454_s22 + $0x638] sm:$0xff]  ;;  %v4998_v54 = vpack.c.bf16 %v433_v45, %v429_v44  ;;  %v6038_v44 = vpack.c.bf16 %v467_v38, %v463_v36  ;;  %v5016_v45 = vpack.c.bf16 %v474_v40, %v470_v39  ;;  %v495_v26 = vld [vmem:[%s7454_s22 + $0x7d0] sm:$0xff]  ;;  %v505_v38 = vld [vmem:[%s7454_s22 + $0x820] sm:$0xff] }
  0xc2   : > { %6005 = vmatprep.subr.bf16.mxu1 %v6004_v58  ;;  %v441_v58 = vld [vmem:[%s7454_s22 + $0x620] sm:$0xff]  ;;  %v6024_v61 = vpack.c.bf16 %v444_v53, %v440_v52  ;;  %v478_v52 = vld [vmem:[%s7454_s22 + $0x748] sm:$0xff]  ;;  %v499_v28 = vld [vmem:[%s7454_s22 + $0x7f0] sm:$0xff] }
  0xc3   : > { %v482_v53 = vld [vmem:[%s7454_s22 + $0x768] sm:$0xff]  ;;  %v503_v39 = vld [vmem:[%s7454_s22 + $0x810] sm:$0xff] }
  0xc4   : > { %4983 = vmatpush1.bf16.msra.mxu0 %v4982_v1  ;;  %v448_v1 = vld [vmem:[%s7454_s22 + $0x658] sm:$0xff] }
  0xc5   : > { %6007 = vmatpush1.bf16.msra.mxu1 %v6006_v2  ;;  %4985 = vmatprep.subr.bf16.mxu0 %v4984_v3  ;;  %v452_v2 = vld [vmem:[%s7454_s22 + $0x678] sm:$0xff]  ;;  %v5002_v3 = vpack.c.bf16 %v441_v58, %v437_v57  ;;  %v6042_v57 = vpack.c.bf16 %v475_v51, %v471_v49  ;;  %v5020_v58 = vpack.c.bf16 %v482_v53, %v478_v52  ;;  %v509_v52 = vld [vmem:[%s7454_s22 + $0x840] sm:$0xff] }
  0xc6   : > { %6009 = vmatprep.subr.bf16.mxu1 %v6008_v7  ;;  %v449_v7 = vld [vmem:[%s7454_s22 + $0x660] sm:$0xff]  ;;  %v6028_v11 = vpack.c.bf16 %v452_v2, %v448_v1  ;;  %v486_v1 = vld [vmem:[%s7454_s22 + $0x788] sm:$0xff] }
  0xc7   : > { %v490_v2 = vld [vmem:[%s7454_s22 + $0x7a8] sm:$0xff]  ;;  %v513_v53 = vld [vmem:[%s7454_s22 + $0x860] sm:$0xff] }
  0xc8   : > { %4987 = vmatpush1.bf16.msra.mxu0 %v4986_v15  ;;  %v456_v15 = vld [vmem:[%s7454_s22 + $0x698] sm:$0xff] }
  0xc9   : > { %6011 = vmatpush1.bf16.msra.mxu1 %v6010_v16  ;;  %4989 = vmatprep.subr.bf16.mxu0 %v4988_v17  ;;  %v460_v16 = vld [vmem:[%s7454_s22 + $0x6b8] sm:$0xff]  ;;  %v5006_v17 = vpack.c.bf16 %v449_v7, %v445_v6  ;;  %v6046_v6 = vpack.c.bf16 %v483_v0, %v479_v62  ;;  %v5024_v7 = vpack.c.bf16 %v490_v2, %v486_v1  ;;  %v517_v2 = vld [vmem:[%s7454_s22 + $0x880] sm:$0xff] }
  0xca   : > { %6013 = vmatprep.subr.bf16.mxu1 %v6012_v23  ;;  %v457_v23 = vld [vmem:[%s7454_s22 + $0x6a0] sm:$0xff]  ;;  %v6032_v25 = vpack.c.bf16 %v460_v16, %v456_v15  ;;  %v494_v15 = vld [vmem:[%s7454_s22 + $0x7c8] sm:$0xff]  ;;  %v524_v62 = vld [vmem:[%s7454_s22 + $0x8b8] sm:$0xff] }
  0xcb   : > { %v498_v16 = vld [vmem:[%s7454_s22 + $0x7e8] sm:$0xff] }
  0xcc   : > { %4991 = vmatpush1.bf16.msra.mxu0 %v4990_v29  ;;  %v464_v29 = vld [vmem:[%s7454_s22 + $0x6d8] sm:$0xff] }
  0xcd   : > { %6015 = vmatpush1.bf16.msra.mxu1 %v6014_v30  ;;  %4993 = vmatprep.subr.bf16.mxu0 %v4992_v31  ;;  %v468_v30 = vld [vmem:[%s7454_s22 + $0x6f8] sm:$0xff]  ;;  %v5010_v31 = vpack.c.bf16 %v457_v23, %v453_v21  ;;  %v6050_v21 = vpack.c.bf16 %v491_v14, %v487_v12  ;;  %v5028_v23 = vpack.c.bf16 %v498_v16, %v494_v15  ;;  %v525_v15 = vld [vmem:[%s7454_s22 + $0x8c0] sm:$0xff] }
  0xce   : > { %6017 = vmatprep.subr.bf16.mxu1 %v6016_v35  ;;  %v465_v35 = vld [vmem:[%s7454_s22 + $0x6e0] sm:$0xff]  ;;  %v6036_v37 = vpack.c.bf16 %v468_v30, %v464_v29  ;;  %v502_v29 = vld [vmem:[%s7454_s22 + $0x808] sm:$0xff] }
  0xcf   : > { %v506_v30 = vld [vmem:[%s7454_s22 + $0x828] sm:$0xff]  ;;  %v529_v16 = vld [vmem:[%s7454_s22 + $0x8e0] sm:$0xff] }
  0xd0   : > { %4995 = vmatpush1.bf16.msra.mxu0 %v4994_v41  ;;  %v472_v41 = vld [vmem:[%s7454_s22 + $0x718] sm:$0xff]  ;;  %v5032_v36 = vpack.c.bf16 %v506_v30, %v502_v29  ;;  %v533_v29 = vld [vmem:[%s7454_s22 + $0x900] sm:$0xff] }
  0xd1   : > { %6019 = vmatpush1.bf16.msra.mxu1 %v6018_v42  ;;  %4997 = vmatprep.subr.bf16.mxu0 %v4996_v43  ;;  %v476_v42 = vld [vmem:[%s7454_s22 + $0x738] sm:$0xff]  ;;  %v5014_v43 = vpack.c.bf16 %v465_v35, %v461_v34  ;;  %v6054_v35 = vpack.c.bf16 %v499_v28, %v495_v26  ;;  %v5046_v26 = vpack.c.bf16 %v529_v16, %v525_v15  ;;  %v537_v30 = vld [vmem:[%s7454_s22 + $0x920] sm:$0xff] }
  0xd2   : > { %6021 = vmatprep.subr.bf16.mxu1 %v6020_v48  ;;  %v473_v48 = vld [vmem:[%s7454_s22 + $0x720] sm:$0xff]  ;;  %v6040_v50 = vpack.c.bf16 %v476_v42, %v472_v41  ;;  %v507_v41 = vld [vmem:[%s7454_s22 + $0x830] sm:$0xff]  ;;  %v510_v42 = vld [vmem:[%s7454_s22 + $0x848] sm:$0xff] }
  0xd4   : > { %4999 = vmatpush1.bf16.msra.mxu0 %v4998_v54  ;;  %v480_v54 = vld [vmem:[%s7454_s22 + $0x758] sm:$0xff] }
  0xd5   : > { %6023 = vmatpush1.bf16.msra.mxu1 %v6022_v55  ;;  %5001 = vmatprep.subr.bf16.mxu0 %v5000_v56  ;;  %v484_v55 = vld [vmem:[%s7454_s22 + $0x778] sm:$0xff]  ;;  %v5018_v56 = vpack.c.bf16 %v473_v48, %v469_v47 }
  0xd6   : > { %6025 = vmatprep.subr.bf16.mxu1 %v6024_v61  ;;  %v481_v61 = vld [vmem:[%s7454_s22 + $0x760] sm:$0xff]  ;;  %v6044_v63 = vpack.c.bf16 %v484_v55, %v480_v54  ;;  %v512_v47 = vld [vmem:[%s7454_s22 + $0x858] sm:$0xff]  ;;  %v511_v54 = vld [vmem:[%s7454_s22 + $0x850] sm:$0xff] }
  0xd7   : > { %v516_v48 = vld [vmem:[%s7454_s22 + $0x878] sm:$0xff] }
  0xd8   : > { %5003 = vmatpush1.bf16.msra.mxu0 %v5002_v3  ;;  %v488_v3 = vld [vmem:[%s7454_s22 + $0x798] sm:$0xff]  ;;  %v6060_v55 = vpack.c.bf16 %v516_v48, %v512_v47  ;;  %v547_v48 = vld [vmem:[%s7454_s22 + $0x970] sm:$0xff] }
  0xd9   : > { %6027 = vmatpush1.bf16.msra.mxu1 %v6026_v4  ;;  %5005 = vmatprep.subr.bf16.mxu0 %v5004_v5  ;;  %v492_v4 = vld [vmem:[%s7454_s22 + $0x7b8] sm:$0xff]  ;;  %v5022_v5 = vpack.c.bf16 %v481_v61, %v477_v60 }
  0xda   : > { %6029 = vmatprep.subr.bf16.mxu1 %v6028_v11  ;;  %v489_v11 = vld [vmem:[%s7454_s22 + $0x7a0] sm:$0xff]  ;;  %v6048_v13 = vpack.c.bf16 %v492_v4, %v488_v3  ;;  %v520_v61 = vld [vmem:[%s7454_s22 + $0x898] sm:$0xff]  ;;  %v519_v4 = vld [vmem:[%s7454_s22 + $0x890] sm:$0xff] }
  0xdb   : > { %v521_v3 = vld [vmem:[%s7454_s22 + $0x8a0] sm:$0xff] }
  0xdc   : > { %5007 = vmatpush1.bf16.msra.mxu0 %v5006_v17  ;;  %v496_v17 = vld [vmem:[%s7454_s22 + $0x7d8] sm:$0xff]  ;;  %v5042_v12 = vpack.c.bf16 %v521_v3, %v517_v2 }
  0xdd   : > { %6031 = vmatpush1.bf16.msra.mxu1 %v6030_v18  ;;  %5009 = vmatprep.subr.bf16.mxu0 %v5008_v20  ;;  %v500_v18 = vld [vmem:[%s7454_s22 + $0x7f8] sm:$0xff]  ;;  %v5026_v20 = vpack.c.bf16 %v489_v11, %v485_v9 }
  0xde   : > { %6033 = vmatprep.subr.bf16.mxu1 %v6032_v25  ;;  %v497_v25 = vld [vmem:[%s7454_s22 + $0x7e0] sm:$0xff]  ;;  %v6052_v27 = vpack.c.bf16 %v500_v18, %v496_v17  ;;  %v528_v9 = vld [vmem:[%s7454_s22 + $0x8d8] sm:$0xff]  ;;  %v527_v17 = vld [vmem:[%s7454_s22 + $0x8d0] sm:$0xff] }
  0xdf   : > { %v5030_v34 = vpack.c.bf16 %v497_v25, %v493_v24  ;;  %v532_v11 = vld [vmem:[%s7454_s22 + $0x8f8] sm:$0xff] }
  0xe0   : > { %5011 = vmatpush1.bf16.msra.mxu0 %v5010_v31  ;;  %v504_v31 = vld [vmem:[%s7454_s22 + $0x818] sm:$0xff]  ;;  %v6068_v18 = vpack.c.bf16 %v532_v11, %v528_v9  ;;  %v563_v9 = vld [vmem:[%s7454_s22 + $0x9f0] sm:$0xff]  ;;  %v566_v11 = vld [vmem:[%s7454_s22 + $0xa08] sm:$0xff] }
  0xe1   : > { %6035 = vmatpush1.bf16.msra.mxu1 %v6034_v32  ;;  %5013 = vmatprep.subr.bf16.mxu0 %v5012_v33  ;;  %v508_v32 = vld [vmem:[%s7454_s22 + $0x838] sm:$0xff]  ;;  %v7741_v33 = vsub.s32 2, %v7545_v59 }
  0xe2   : > { %6037 = vmatprep.subr.bf16.mxu1 %v6036_v37  ;;  %v501_v37 = vld [vmem:[%s7454_s22 + $0x800] sm:$0xff]  ;;  %v6056_v40 = vpack.c.bf16 %v508_v32, %v504_v31  ;;  %v536_v24 = vld [vmem:[%s7454_s22 + $0x918] sm:$0xff]  ;;  %v535_v31 = vld [vmem:[%s7454_s22 + $0x910] sm:$0xff] }
  0xe3   : > { %v5034_v49 = vpack.c.bf16 %v505_v38, %v501_v37  ;;  %v540_v25 = vld [vmem:[%s7454_s22 + $0x938] sm:$0xff] }
  0xe4   : > { %5015 = vmatpush1.bf16.msra.mxu0 %v5014_v43  ;;  %v514_v43 = vld [vmem:[%s7454_s22 + $0x868] sm:$0xff]  ;;  %v6072_v32 = vpack.c.bf16 %v540_v25, %v536_v24  ;;  %v544_v37 = vld [vmem:[%s7454_s22 + $0x958] sm:$0xff]  ;;  %v571_v24 = vld [vmem:[%s7454_s22 + $0xa30] sm:$0xff] }
  0xe5   : > { %6039 = vmatpush1.bf16.msra.mxu1 %v6038_v44  ;;  %5017 = vmatprep.subr.bf16.mxu0 %v5016_v45  ;;  %v7750_v44 = vsub.s32 5, %v7545_v59  ;;  %v2308_v45 = vrot.slane %v7564_v19, %v7741_v33  ;;  %v5036_v51 = vpack.c.bf16 %v514_v43, %v510_v42  ;;  %v548_v38 = vld [vmem:[%s7454_s22 + $0x978] sm:$0xff]  ;;  %v541_v42 = vld [vmem:[%s7454_s22 + $0x940] sm:$0xff]  ;;  %v574_v25 = vld [vmem:[%s7454_s22 + $0xa48] sm:$0xff] }
  0xe6   : > { %6041 = vmatprep.subr.bf16.mxu1 %v6040_v50  ;;  %v6058_v50 = vpack.c.bf16 %v507_v41, %v503_v39  ;;  %v5050_v39 = vpack.c.bf16 %v537_v30, %v533_v29  ;;  %v545_v43 = vld [vmem:[%s7454_s22 + $0x960] sm:$0xff]  ;;  %v6076_v47 = vpack.c.bf16 %v548_v38, %v544_v37  ;;  %v579_v37 = vld [vmem:[%s7454_s22 + $0xa70] sm:$0xff]  ;;  %v582_v38 = vld [vmem:[%s7454_s22 + $0xa88] sm:$0xff] }
  0xe7   : > { %v2320_v60 = vrot.slane %v7564_v19, %v7750_v44  ;;  %v6064_v19 = vpack.c.bf16 %v524_v62, %v520_v61  ;;  %v555_v61 = vld [vmem:[%s7454_s22 + $0x9b0] sm:$0xff]  ;;  %v558_v62 = vld [vmem:[%s7454_s22 + $0x9c8] sm:$0xff] }
  0xe8   : > { %5019 = vmatpush1.bf16.msra.mxu0 %v5018_v56  ;;  %v515_v56 = vld [vmem:[%s7454_s22 + $0x870] sm:$0xff] }
  0xe9   : > { %6043 = vmatpush1.bf16.msra.mxu1 %v6042_v57  ;;  %5021 = vmatprep.subr.bf16.mxu0 %v5020_v58  ;;  %v518_v57 = vld [vmem:[%s7454_s22 + $0x888] sm:$0xff]  ;;  %v6062_v0 = vpack.c.bf16 %v515_v56, %v511_v54  ;;  %v549_v56 = vld [vmem:[%s7454_s22 + $0x980] sm:$0xff] }
  0xea   : > { %6045 = vmatprep.subr.bf16.mxu1 %v6044_v63  ;;  %v522_v58 = vld [vmem:[%s7454_s22 + $0x8a8] sm:$0xff]  ;;  %v5038_v63 = vpack.c.bf16 %v513_v53, %v509_v52  ;;  %v556_v52 = vld [vmem:[%s7454_s22 + $0x9b8] sm:$0xff]  ;;  %v5054_v53 = vpack.c.bf16 %v545_v43, %v541_v42 }
  0xeb   : > { %v5040_v1 = vpack.c.bf16 %v522_v58, %v518_v57  ;;  %v553_v57 = vld [vmem:[%s7454_s22 + $0x9a0] sm:$0xff]  ;;  %v551_v58 = vld [vmem:[%s7454_s22 + $0x990] sm:$0xff] }
  0xec   : > { %5023 = vmatpush1.bf16.msra.mxu0 %v5022_v5  ;;  %v523_v5 = vld [vmem:[%s7454_s22 + $0x8b0] sm:$0xff]  ;;  %v5058_v2 = vpack.c.bf16 %v553_v57, %v549_v56  ;;  %v6082_v3 = vpack.c.bf16 %v555_v61, %v551_v58  ;;  %v593_v61 = vld [vmem:[%s7454_s22 + $0xae0] sm:$0xff] }
  0xed   : > { %6047 = vmatpush1.bf16.msra.mxu1 %v6046_v6  ;;  %5025 = vmatprep.subr.bf16.mxu0 %v5024_v7  ;;  %v526_v6 = vld [vmem:[%s7454_s22 + $0x8c8] sm:$0xff] }
  0xee   : > { %6049 = vmatprep.subr.bf16.mxu1 %v6048_v13  ;;  %v530_v7 = vld [vmem:[%s7454_s22 + $0x8e8] sm:$0xff]  ;;  %v6066_v13 = vpack.c.bf16 %v523_v5, %v519_v4  ;;  %v561_v5 = vld [vmem:[%s7454_s22 + $0x9e0] sm:$0xff] }
  0xef   : > { %v5044_v14 = vpack.c.bf16 %v530_v7, %v526_v6  ;;  %v559_v6 = vld [vmem:[%s7454_s22 + $0x9d0] sm:$0xff] }
  0xf0   : > { %5027 = vmatpush1.bf16.msra.mxu0 %v5026_v20  ;;  %v531_v20 = vld [vmem:[%s7454_s22 + $0x8f0] sm:$0xff]  ;;  %v6086_v16 = vpack.c.bf16 %v563_v9, %v559_v6  ;;  %v601_v9 = vld [vmem:[%s7454_s22 + $0xb20] sm:$0xff] }
  0xf1   : > { %6051 = vmatpush1.bf16.msra.mxu1 %v6050_v21  ;;  %5029 = vmatprep.subr.bf16.mxu0 %v5028_v23  ;;  %v534_v21 = vld [vmem:[%s7454_s22 + $0x908] sm:$0xff] }
  0xf2   : > { %6053 = vmatprep.subr.bf16.mxu1 %v6052_v27  ;;  %v538_v23 = vld [vmem:[%s7454_s22 + $0x928] sm:$0xff]  ;;  %v6070_v27 = vpack.c.bf16 %v531_v20, %v527_v17  ;;  %v569_v20 = vld [vmem:[%s7454_s22 + $0xa20] sm:$0xff] }
  0xf3   : > { %v5048_v28 = vpack.c.bf16 %v538_v23, %v534_v21  ;;  %v567_v21 = vld [vmem:[%s7454_s22 + $0xa10] sm:$0xff] }
  0xf4   : > { %5031 = vmatpush1.bf16.msra.mxu0 %v5030_v34  ;;  %v539_v34 = vld [vmem:[%s7454_s22 + $0x930] sm:$0xff]  ;;  %v6090_v30 = vpack.c.bf16 %v571_v24, %v567_v21  ;;  %v609_v24 = vld [vmem:[%s7454_s22 + $0xb60] sm:$0xff] }
  0xf5   : > { %6055 = vmatpush1.bf16.msra.mxu1 %v6054_v35  ;;  %5033 = vmatprep.subr.bf16.mxu0 %v5032_v36  ;;  %v542_v35 = vld [vmem:[%s7454_s22 + $0x948] sm:$0xff] }
  0xf6   : > { %6057 = vmatprep.subr.bf16.mxu1 %v6056_v40  ;;  %v546_v36 = vld [vmem:[%s7454_s22 + $0x968] sm:$0xff]  ;;  %v6074_v40 = vpack.c.bf16 %v539_v34, %v535_v31  ;;  %v577_v34 = vld [vmem:[%s7454_s22 + $0xa60] sm:$0xff] }
  0xf7   : > { %2593 = vmatmul.mubr.f32.vlgmr.msra.gmra.mrb[0].mxu0 %v2308_v45  ;;  %v5052_v41 = vpack.c.bf16 %v546_v36, %v542_v35  ;;  %v575_v35 = vld [vmem:[%s7454_s22 + $0xa50] sm:$0xff] }
  0xf8   : > { %5035 = vmatpush1.bf16.msra.mxu0 %v5034_v49  ;;  %3729 = vmatmul.mubr.f32.vlgmr.msra.gmra.mrb[0].mxu1 %v2308_v45  ;;  %v543_v45 = vld [vmem:[%s7454_s22 + $0x950] sm:$0xff]  ;;  %v550_v49 = vld [vmem:[%s7454_s22 + $0x988] sm:$0xff]  ;;  %v6094_v43 = vpack.c.bf16 %v579_v37, %v575_v35  ;;  %v617_v37 = vld [vmem:[%s7454_s22 + $0xba0] sm:$0xff] }
  0xf9   : > { %6059 = vmatpush1.bf16.msra.mxu1 %v6058_v50  ;;  %5037 = vmatprep.subr.bf16.mxu0 %v5036_v51  ;;  %v554_v50 = vld [vmem:[%s7454_s22 + $0x9a8] sm:$0xff]  ;;  %v552_v51 = vld [vmem:[%s7454_s22 + $0x998] sm:$0xff]  ;;  %v6078_v54 = vpack.c.bf16 %v547_v48, %v543_v45  ;;  %v585_v48 = vld [vmem:[%s7454_s22 + $0xaa0] sm:$0xff] }
  0xfa   : > { %6061 = vmatprep.subr.bf16.mxu1 %v6060_v55  ;;  %2663 = vmatprep.mubr.f32.mxu0 %v2320_v60  ;;  %v5056_v55 = vpack.c.bf16 %v554_v50, %v550_v49  ;;  %v583_v49 = vld [vmem:[%s7454_s22 + $0xa90] sm:$0xff] }
  0xfb   : > { %3799 = vmatprep.mubr.f32.mxu1 %v2320_v60  ;;  %v6080_v60 = vpack.c.bf16 %v556_v52, %v552_v51  ;;  %v587_v51 = vld [vmem:[%s7454_s22 + $0xab0] sm:$0xff]  ;;  %v590_v52 = vld [vmem:[%s7454_s22 + $0xac8] sm:$0xff] }
  0xfc   : > { %5039 = vmatpush1.bf16.msra.mxu0 %v5038_v63  ;;  %v562_v63 = vld [vmem:[%s7454_s22 + $0x9e8] sm:$0xff]  ;;  %v6098_v57 = vpack.c.bf16 %v587_v51, %v583_v49  ;;  %v625_v51 = vld [vmem:[%s7454_s22 + $0xbe0] sm:$0xff] }
  0xfd   : > { %6063 = vmatpush1.bf16.msra.mxu1 %v6062_v0  ;;  %5041 = vmatprep.subr.bf16.mxu0 %v5040_v1  ;;  %v560_v0 = vld [vmem:[%s7454_s22 + $0x9d8] sm:$0xff]  ;;  %v5060_v4 = vpack.c.bf16 %v562_v63, %v558_v62  ;;  %v591_v62 = vld [vmem:[%s7454_s22 + $0xad0] sm:$0xff] }
  0xfe   : > { %6065 = vmatprep.subr.bf16.mxu1 %v6064_v19  ;;  %v564_v1 = vld [vmem:[%s7454_s22 + $0x9f8] sm:$0xff]  ;;  %v557_v19 = vld [vmem:[%s7454_s22 + $0x9c0] sm:$0xff] }
  0xff   : > { %v6084_v7 = vpack.c.bf16 %v564_v1, %v560_v0  ;;  %v5062_v15 = vpack.c.bf16 %v561_v5, %v557_v19  ;;  %v595_v0 = vld [vmem:[%s7454_s22 + $0xaf0] sm:$0xff]  ;;  %v598_v1 = vld [vmem:[%s7454_s22 + $0xb08] sm:$0xff] }
 0x100   : > { %5043 = vmatpush1.bf16.msra.mxu0 %v5042_v12  ;;  %v570_v12 = vld [vmem:[%s7454_s22 + $0xa28] sm:$0xff]  ;;  %v6102_v5 = vpack.c.bf16 %v595_v0, %v591_v62  ;;  %v629_v0 = vld [vmem:[%s7454_s22 + $0xc00] sm:$0xff] }
 0x101   : > { %6067 = vmatpush1.bf16.msra.mxu1 %v6066_v13  ;;  %5045 = vmatprep.subr.bf16.mxu0 %v5044_v14  ;;  %v568_v13 = vld [vmem:[%s7454_s22 + $0xa18] sm:$0xff]  ;;  %v5064_v17 = vpack.c.bf16 %v570_v12, %v566_v11  ;;  %v599_v11 = vld [vmem:[%s7454_s22 + $0xb10] sm:$0xff] }
 0x102   : > { %6069 = vmatprep.subr.bf16.mxu1 %v6068_v18  ;;  %v572_v14 = vld [vmem:[%s7454_s22 + $0xa38] sm:$0xff]  ;;  %v565_v18 = vld [vmem:[%s7454_s22 + $0xa00] sm:$0xff] }
 0x103   : > { %v6088_v23 = vpack.c.bf16 %v572_v14, %v568_v13  ;;  %v5066_v29 = vpack.c.bf16 %v569_v20, %v565_v18  ;;  %v603_v13 = vld [vmem:[%s7454_s22 + $0xb30] sm:$0xff]  ;;  %v606_v14 = vld [vmem:[%s7454_s22 + $0xb48] sm:$0xff] }
 0x104   : > { %5047 = vmatpush1.bf16.msra.mxu0 %v5046_v26  ;;  %v578_v26 = vld [vmem:[%s7454_s22 + $0xa68] sm:$0xff]  ;;  %v6106_v20 = vpack.c.bf16 %v603_v13, %v599_v11  ;;  %v640_v11 = vld [vmem:[%s7454_s22 + $0xc58] sm:$0xff] }
 0x105   : > { %6071 = vmatpush1.bf16.msra.mxu1 %v6070_v27  ;;  %5049 = vmatprep.subr.bf16.mxu0 %v5048_v28  ;;  %v576_v27 = vld [vmem:[%s7454_s22 + $0xa58] sm:$0xff]  ;;  %v5068_v31 = vpack.c.bf16 %v578_v26, %v574_v25  ;;  %v607_v25 = vld [vmem:[%s7454_s22 + $0xb50] sm:$0xff] }
 0x106   : > { %6073 = vmatprep.subr.bf16.mxu1 %v6072_v32  ;;  %v580_v28 = vld [vmem:[%s7454_s22 + $0xa78] sm:$0xff]  ;;  %v573_v32 = vld [vmem:[%s7454_s22 + $0xa40] sm:$0xff] }
 0x107   : > { %v6092_v36 = vpack.c.bf16 %v580_v28, %v576_v27  ;;  %v5070_v42 = vpack.c.bf16 %v577_v34, %v573_v32  ;;  %v611_v27 = vld [vmem:[%s7454_s22 + $0xb70] sm:$0xff]  ;;  %v614_v28 = vld [vmem:[%s7454_s22 + $0xb88] sm:$0xff] }
 0x108   : > { %5051 = vmatpush1.bf16.msra.mxu0 %v5050_v39  ;;  %v586_v39 = vld [vmem:[%s7454_s22 + $0xaa8] sm:$0xff]  ;;  %v6110_v34 = vpack.c.bf16 %v611_v27, %v607_v25  ;;  %v652_v27 = vld [vmem:[%s7454_s22 + $0xcb8] sm:$0xff] }
 0x109   : > { %6075 = vmatpush1.bf16.msra.mxu1 %v6074_v40  ;;  %5053 = vmatprep.subr.bf16.mxu0 %v5052_v41  ;;  %v584_v40 = vld [vmem:[%s7454_s22 + $0xa98] sm:$0xff]  ;;  %v5072_v45 = vpack.c.bf16 %v586_v39, %v582_v38  ;;  %v615_v38 = vld [vmem:[%s7454_s22 + $0xb90] sm:$0xff] }
 0x10a   : > { %6077 = vmatprep.subr.bf16.mxu1 %v6076_v47  ;;  %v588_v41 = vld [vmem:[%s7454_s22 + $0xab8] sm:$0xff]  ;;  %v581_v47 = vld [vmem:[%s7454_s22 + $0xa80] sm:$0xff] }
 0x10b   : > { %v6096_v50 = vpack.c.bf16 %v588_v41, %v584_v40  ;;  %v5074_v56 = vpack.c.bf16 %v585_v48, %v581_v47  ;;  %v619_v40 = vld [vmem:[%s7454_s22 + $0xbb0] sm:$0xff]  ;;  %v622_v41 = vld [vmem:[%s7454_s22 + $0xbc8] sm:$0xff] }
 0x10c   : > { %5055 = vmatpush1.bf16.msra.mxu0 %v5054_v53  ;;  %v594_v53 = vld [vmem:[%s7454_s22 + $0xae8] sm:$0xff]  ;;  %v6114_v48 = vpack.c.bf16 %v619_v40, %v615_v38  ;;  %v660_v40 = vld [vmem:[%s7454_s22 + $0xcf8] sm:$0xff] }
 0x10d   : > { %6079 = vmatpush1.bf16.msra.mxu1 %v6078_v54  ;;  %5057 = vmatprep.subr.bf16.mxu0 %v5056_v55  ;;  %v592_v54 = vld [vmem:[%s7454_s22 + $0xad8] sm:$0xff]  ;;  %v5076_v58 = vpack.c.bf16 %v594_v53, %v590_v52  ;;  %v623_v52 = vld [vmem:[%s7454_s22 + $0xbd0] sm:$0xff]  ;;  %v658_v38 = vld [vmem:[%s7454_s22 + $0xce8] sm:$0xff] }
 0x10e   : > { %6081 = vmatprep.subr.bf16.mxu1 %v6080_v60  ;;  %v596_v55 = vld [vmem:[%s7454_s22 + $0xaf8] sm:$0xff]  ;;  %v589_v60 = vld [vmem:[%s7454_s22 + $0xac0] sm:$0xff] }
 0x10f   : > { %v6100_v63 = vpack.c.bf16 %v596_v55, %v592_v54  ;;  %v5078_v19 = vpack.c.bf16 %v593_v61, %v589_v60  ;;  %v627_v54 = vld [vmem:[%s7454_s22 + $0xbf0] sm:$0xff]  ;;  %v630_v55 = vld [vmem:[%s7454_s22 + $0xc08] sm:$0xff]  ;;  %v7879_v60 = vsub.s32 4, %v7545_v59 }
 0x110   : > { %5059 = vmatpush1.bf16.msra.mxu0 %v5058_v2  ;;  %v602_v2 = vld [vmem:[%s7454_s22 + $0xb28] sm:$0xff]  ;;  %v6118_v62 = vpack.c.bf16 %v627_v54, %v623_v52  ;;  %v668_v54 = vld [vmem:[%s7454_s22 + $0xd38] sm:$0xff] }
 0x111   : > { %6083 = vmatpush1.bf16.msra.mxu1 %v6082_v3  ;;  %5061 = vmatprep.subr.bf16.mxu0 %v5060_v4  ;;  %v600_v3 = vld [vmem:[%s7454_s22 + $0xb18] sm:$0xff]  ;;  %v5080_v6 = vpack.c.bf16 %v602_v2, %v598_v1  ;;  %v633_v1 = vld [vmem:[%s7454_s22 + $0xc20] sm:$0xff]  ;;  %v631_v2 = vld [vmem:[%s7454_s22 + $0xc10] sm:$0xff] }
 0x112   : > { %6085 = vmatprep.subr.bf16.mxu1 %v6084_v7  ;;  %v604_v4 = vld [vmem:[%s7454_s22 + $0xb38] sm:$0xff]  ;;  %v597_v7 = vld [vmem:[%s7454_s22 + $0xb00] sm:$0xff]  ;;  %v5098_v13 = vpack.c.bf16 %v633_v1, %v629_v0  ;;  %v666_v52 = vld [vmem:[%s7454_s22 + $0xd28] sm:$0xff] }
 0x113   : > { %v6104_v12 = vpack.c.bf16 %v604_v4, %v600_v3  ;;  %v5082_v18 = vpack.c.bf16 %v601_v9, %v597_v7  ;;  %v635_v4 = vld [vmem:[%s7454_s22 + $0xc30] sm:$0xff]  ;;  %v7890_v7 = vld [vmem:[#allocation2] sm:$0xff]  ;;  %v670_v1 = vld [vmem:[%s7454_s22 + $0xd48] sm:$0xff] }
 0x114   : > { %5063 = vmatpush1.bf16.msra.mxu0 %v5062_v15  ;;  %v610_v15 = vld [vmem:[%s7454_s22 + $0xb68] sm:$0xff]  ;;  %v2316_v9 = vrot.slane %v7890_v7, %v7879_v60  ;;  %v667_v0 = vld [vmem:[%s7454_s22 + $0xd30] sm:$0xff] }
 0x115   : > { %6087 = vmatpush1.bf16.msra.mxu1 %v6086_v16  ;;  %5065 = vmatprep.subr.bf16.mxu0 %v5064_v17  ;;  %v608_v16 = vld [vmem:[%s7454_s22 + $0xb58] sm:$0xff]  ;;  %v5084_v21 = vpack.c.bf16 %v610_v15, %v606_v14  ;;  %v6122_v14 = vpack.c.bf16 %v635_v4, %v631_v2  ;;  %v674_v2 = vld [vmem:[%s7454_s22 + $0xd68] sm:$0xff] }
 0x116   : > { %6089 = vmatprep.subr.bf16.mxu1 %v6088_v23  ;;  %v612_v17 = vld [vmem:[%s7454_s22 + $0xb78] sm:$0xff]  ;;  %v605_v23 = vld [vmem:[%s7454_s22 + $0xb40] sm:$0xff] }
 0x117   : > { %v6108_v26 = vpack.c.bf16 %v612_v17, %v608_v16  ;;  %v5086_v32 = vpack.c.bf16 %v609_v24, %v605_v23  ;;  %v637_v16 = vld [vmem:[%s7454_s22 + $0xc40] sm:$0xff]  ;;  %v646_v23 = vld [vmem:[%s7454_s22 + $0xc88] sm:$0xff]  ;;  %v676_v4 = vld [vmem:[%s7454_s22 + $0xd78] sm:$0xff] }
 0x118   : > { %5067 = vmatpush1.bf16.msra.mxu0 %v5066_v29  ;;  %v618_v29 = vld [vmem:[%s7454_s22 + $0xba8] sm:$0xff]  ;;  %v641_v17 = vld [vmem:[%s7454_s22 + $0xc60] sm:$0xff] }
 0x119   : > { %6091 = vmatpush1.bf16.msra.mxu1 %v6090_v30  ;;  %5069 = vmatprep.subr.bf16.mxu0 %v5068_v31  ;;  %v616_v30 = vld [vmem:[%s7454_s22 + $0xb98] sm:$0xff]  ;;  %v5088_v35 = vpack.c.bf16 %v618_v29, %v614_v28  ;;  %v650_v24 = vld [vmem:[%s7454_s22 + $0xca8] sm:$0xff]  ;;  %v5102_v28 = vpack.c.bf16 %v641_v17, %v637_v16 }
 0x11a   : > { %6093 = vmatprep.subr.bf16.mxu1 %v6092_v36  ;;  %v620_v31 = vld [vmem:[%s7454_s22 + $0xbb8] sm:$0xff]  ;;  %v613_v36 = vld [vmem:[%s7454_s22 + $0xb80] sm:$0xff]  ;;  %v678_v16 = vld [vmem:[%s7454_s22 + $0xd88] sm:$0xff] }
 0x11b   : > { %v6112_v39 = vpack.c.bf16 %v620_v31, %v616_v30  ;;  %v5090_v47 = vpack.c.bf16 %v617_v37, %v613_v36  ;;  %v5104_v30 = vpack.c.bf16 %v650_v24, %v646_v23  ;;  %v645_v31 = vld [vmem:[%s7454_s22 + $0xc80] sm:$0xff]  ;;  %v651_v36 = vld [vmem:[%s7454_s22 + $0xcb0] sm:$0xff]  ;;  %v654_v37 = vld [vmem:[%s7454_s22 + $0xcc8] sm:$0xff] }
 0x11c   : > { %5071 = vmatpush1.bf16.msra.mxu0 %v5070_v42  ;;  %v626_v42 = vld [vmem:[%s7454_s22 + $0xbe8] sm:$0xff] }
 0x11d   : > { %6095 = vmatpush1.bf16.msra.mxu1 %v6094_v43  ;;  %5073 = vmatprep.subr.bf16.mxu0 %v5072_v45  ;;  %v624_v43 = vld [vmem:[%s7454_s22 + $0xbd8] sm:$0xff]  ;;  %v5092_v49 = vpack.c.bf16 %v626_v42, %v622_v41  ;;  %v682_v17 = vld [vmem:[%s7454_s22 + $0xda8] sm:$0xff] }
 0x11e   : > { %6097 = vmatprep.subr.bf16.mxu1 %v6096_v50  ;;  %v628_v45 = vld [vmem:[%s7454_s22 + $0xbf8] sm:$0xff]  ;;  %v621_v50 = vld [vmem:[%s7454_s22 + $0xbc0] sm:$0xff]  ;;  %v5120_v24 = vpack.c.bf16 %v682_v17, %v678_v16 }
 0x11f   : > { %v6116_v53 = vpack.c.bf16 %v628_v45, %v624_v43  ;;  %v5094_v61 = vpack.c.bf16 %v625_v51, %v621_v50  ;;  %v5108_v43 = vpack.c.bf16 %v658_v38, %v654_v37  ;;  %v653_v45 = vld [vmem:[%s7454_s22 + $0xcc0] sm:$0xff]  ;;  %v659_v50 = vld [vmem:[%s7454_s22 + $0xcf0] sm:$0xff]  ;;  %v662_v51 = vld [vmem:[%s7454_s22 + $0xd08] sm:$0xff] }
 0x120   : > { %5075 = vmatpush1.bf16.msra.mxu0 %v5074_v56  ;;  %v634_v56 = vld [vmem:[%s7454_s22 + $0xc28] sm:$0xff]  ;;  %v685_v38 = vld [vmem:[%s7454_s22 + $0xdc0] sm:$0xff] }
 0x121   : > { %6099 = vmatpush1.bf16.msra.mxu1 %v6098_v57  ;;  %5077 = vmatprep.subr.bf16.mxu0 %v5076_v58  ;;  %v632_v57 = vld [vmem:[%s7454_s22 + $0xc18] sm:$0xff]  ;;  %v709_v17 = vld [vmem:[%s7454_s22 + $0xe80] sm:$0xff] }
 0x122   : > { %6101 = vmatprep.subr.bf16.mxu1 %v6100_v63  ;;  %v636_v58 = vld [vmem:[%s7454_s22 + $0xc38] sm:$0xff]  ;;  %v5096_v63 = vpack.c.bf16 %v634_v56, %v630_v55 }
 0x123   : > { %v6120_v3 = vpack.c.bf16 %v636_v58, %v632_v57  ;;  %v5112_v57 = vpack.c.bf16 %v666_v52, %v662_v51  ;;  %v661_v58 = vld [vmem:[%s7454_s22 + $0xd00] sm:$0xff] }
 0x124   : > { %5079 = vmatpush1.bf16.msra.mxu0 %v5078_v19  ;;  %v638_v19 = vld [vmem:[%s7454_s22 + $0xc48] sm:$0xff]  ;;  %v693_v52 = vld [vmem:[%s7454_s22 + $0xe00] sm:$0xff] }
 0x125   : > { %6103 = vmatpush1.bf16.msra.mxu1 %v6102_v5  ;;  %5081 = vmatprep.subr.bf16.mxu0 %v5080_v6  ;;  %v642_v5 = vld [vmem:[%s7454_s22 + $0xc68] sm:$0xff]  ;;  %v7888_v6 = vsub.s32 7, %v7545_v59 }
 0x126   : > { %6105 = vmatprep.subr.bf16.mxu1 %v6104_v12  ;;  %v644_v12 = vld [vmem:[%s7454_s22 + $0xc78] sm:$0xff]  ;;  %v5100_v15 = vpack.c.bf16 %v642_v5, %v638_v19 }
 0x127   : > { %v2328_v25 = vrot.slane %v7890_v7, %v7888_v6 }
 0x128   : > { %5083 = vmatpush1.bf16.msra.mxu0 %v5082_v18  ;;  %v639_v18 = vld [vmem:[%s7454_s22 + $0xc50] sm:$0xff] }
 0x129   : > { %6107 = vmatpush1.bf16.msra.mxu1 %v6106_v20  ;;  %5085 = vmatprep.subr.bf16.mxu0 %v5084_v21  ;;  %v6124_v20 = vpack.c.bf16 %v644_v12, %v640_v11  ;;  %v643_v21 = vld [vmem:[%s7454_s22 + $0xc70] sm:$0xff]  ;;  %v669_v11 = vld [vmem:[%s7454_s22 + $0xd40] sm:$0xff] }
 0x12a   : > { %6109 = vmatprep.subr.bf16.mxu1 %v6108_v26  ;;  %v648_v26 = vld [vmem:[%s7454_s22 + $0xc98] sm:$0xff]  ;;  %v6126_v29 = vpack.c.bf16 %v643_v21, %v639_v18  ;;  %v673_v12 = vld [vmem:[%s7454_s22 + $0xd60] sm:$0xff] }
 0x12b   : > { %v680_v18 = vld [vmem:[%s7454_s22 + $0xd98] sm:$0xff]  ;;  %v5118_v21 = vpack.c.bf16 %v673_v12, %v669_v11  ;;  %v714_v11 = vld [vmem:[%s7454_s22 + $0xea8] sm:$0xff] }
 0x12c   : > { %5087 = vmatpush1.bf16.msra.mxu0 %v5086_v32  ;;  %v649_v32 = vld [vmem:[%s7454_s22 + $0xca0] sm:$0xff]  ;;  %v712_v12 = vld [vmem:[%s7454_s22 + $0xe98] sm:$0xff] }
 0x12d   : > { %6111 = vmatpush1.bf16.msra.mxu1 %v6110_v34  ;;  %5089 = vmatprep.subr.bf16.mxu0 %v5088_v35  ;;  %v647_v34 = vld [vmem:[%s7454_s22 + $0xc90] sm:$0xff]  ;;  %v6128_v35 = vpack.c.bf16 %v652_v27, %v648_v26  ;;  %v5106_v41 = vpack.c.bf16 %v649_v32, %v645_v31  ;;  %v681_v26 = vld [vmem:[%s7454_s22 + $0xda0] sm:$0xff]  ;;  %v690_v31 = vld [vmem:[%s7454_s22 + $0xde8] sm:$0xff] }
 0x12e   : > { %6113 = vmatprep.subr.bf16.mxu1 %v6112_v39  ;;  %v656_v39 = vld [vmem:[%s7454_s22 + $0xcd8] sm:$0xff]  ;;  %v6130_v42 = vpack.c.bf16 %v651_v36, %v647_v34  ;;  %v679_v27 = vld [vmem:[%s7454_s22 + $0xd90] sm:$0xff] }
 0x12f   : > { %v688_v32 = vld [vmem:[%s7454_s22 + $0xdd8] sm:$0xff] }
 0x130   : > { %5091 = vmatpush1.bf16.msra.mxu0 %v5090_v47  ;;  %v657_v47 = vld [vmem:[%s7454_s22 + $0xce0] sm:$0xff]  ;;  %v692_v34 = vld [vmem:[%s7454_s22 + $0xdf8] sm:$0xff] }
 0x131   : > { %6115 = vmatpush1.bf16.msra.mxu1 %v6114_v48  ;;  %5093 = vmatprep.subr.bf16.mxu0 %v5092_v49  ;;  %v655_v48 = vld [vmem:[%s7454_s22 + $0xcd0] sm:$0xff]  ;;  %v6132_v49 = vpack.c.bf16 %v660_v40, %v656_v39  ;;  %v5110_v55 = vpack.c.bf16 %v657_v47, %v653_v45  ;;  %v689_v39 = vld [vmem:[%s7454_s22 + $0xde0] sm:$0xff]  ;;  %v698_v45 = vld [vmem:[%s7454_s22 + $0xe28] sm:$0xff] }
 0x132   : > { %6117 = vmatprep.subr.bf16.mxu1 %v6116_v53  ;;  %v664_v53 = vld [vmem:[%s7454_s22 + $0xd18] sm:$0xff]  ;;  %v6134_v56 = vpack.c.bf16 %v659_v50, %v655_v48  ;;  %v687_v40 = vld [vmem:[%s7454_s22 + $0xdd0] sm:$0xff] }
 0x133   : > { %v696_v47 = vld [vmem:[%s7454_s22 + $0xe18] sm:$0xff] }
 0x134   : > { %5095 = vmatpush1.bf16.msra.mxu0 %v5094_v61  ;;  %v665_v61 = vld [vmem:[%s7454_s22 + $0xd20] sm:$0xff]  ;;  %v700_v48 = vld [vmem:[%s7454_s22 + $0xe38] sm:$0xff] }
 0x135   : > { %6119 = vmatpush1.bf16.msra.mxu1 %v6118_v62  ;;  %5097 = vmatprep.subr.bf16.mxu0 %v5096_v63  ;;  %v663_v62 = vld [vmem:[%s7454_s22 + $0xd10] sm:$0xff]  ;;  %v6136_v63 = vpack.c.bf16 %v668_v54, %v664_v53  ;;  %v5114_v19 = vpack.c.bf16 %v665_v61, %v661_v58  ;;  %v697_v53 = vld [vmem:[%s7454_s22 + $0xe20] sm:$0xff]  ;;  %v706_v58 = vld [vmem:[%s7454_s22 + $0xe68] sm:$0xff] }
 0x136   : > { %6121 = vmatprep.subr.bf16.mxu1 %v6120_v3  ;;  %v672_v3 = vld [vmem:[%s7454_s22 + $0xd58] sm:$0xff]  ;;  %v6138_v5 = vpack.c.bf16 %v667_v0, %v663_v62  ;;  %v695_v54 = vld [vmem:[%s7454_s22 + $0xe10] sm:$0xff] }
 0x137   : > { %2664 = vmatmul.mubr.f32.vlgmr.msra.gmra.mrb[0].mxu0 %v2316_v9  ;;  %v704_v61 = vld [vmem:[%s7454_s22 + $0xe58] sm:$0xff] }
 0x138   : > { %5099 = vmatpush1.bf16.msra.mxu0 %v5098_v13  ;;  %3800 = vmatmul.mubr.f32.vlgmr.msra.gmra.mrb[0].mxu1 %v2316_v9  ;;  %v5116_v9 = vpack.c.bf16 %v674_v2, %v670_v1  ;;  %v671_v13 = vld [vmem:[%s7454_s22 + $0xd50] sm:$0xff]  ;;  %v708_v62 = vld [vmem:[%s7454_s22 + $0xe78] sm:$0xff]  ;;  %v701_v2 = vld [vmem:[%s7454_s22 + $0xe40] sm:$0xff] }
 0x139   : > { %6123 = vmatpush1.bf16.msra.mxu1 %v6122_v14  ;;  %5101 = vmatprep.subr.bf16.mxu0 %v5100_v15  ;;  %v6140_v14 = vpack.c.bf16 %v676_v4, %v672_v3  ;;  %v675_v15 = vld [vmem:[%s7454_s22 + $0xd70] sm:$0xff]  ;;  %v705_v3 = vld [vmem:[%s7454_s22 + $0xe60] sm:$0xff] }
 0x13a   : > { %6125 = vmatprep.subr.bf16.mxu1 %v6124_v20  ;;  %2734 = vmatprep.mubr.f32.mxu0 %v2328_v25  ;;  %v684_v20 = vld [vmem:[%s7454_s22 + $0xdb8] sm:$0xff]  ;;  %v6142_v23 = vpack.c.bf16 %v675_v15, %v671_v13  ;;  %v703_v4 = vld [vmem:[%s7454_s22 + $0xe50] sm:$0xff] }
 0x13b   : > { %3870 = vmatprep.mubr.f32.mxu1 %v2328_v25  ;;  %v677_v25 = vld [vmem:[%s7454_s22 + $0xd80] sm:$0xff]  ;;  %v716_v13 = vld [vmem:[%s7454_s22 + $0xeb8] sm:$0xff] }
 0x13c   : > { %5103 = vmatpush1.bf16.msra.mxu0 %v5102_v28  ;;  %v6144_v28 = vpack.c.bf16 %v684_v20, %v680_v18  ;;  %v713_v18 = vld [vmem:[%s7454_s22 + $0xea0] sm:$0xff]  ;;  %v711_v20 = vld [vmem:[%s7454_s22 + $0xe90] sm:$0xff] }
 0x13d   : > { %6127 = vmatpush1.bf16.msra.mxu1 %v6126_v29  ;;  %5105 = vmatprep.subr.bf16.mxu0 %v5104_v30  ;;  %v683_v29 = vld [vmem:[%s7454_s22 + $0xdb0] sm:$0xff]  ;;  %v686_v30 = vld [vmem:[%s7454_s22 + $0xdc8] sm:$0xff] }
 0x13e   : > { %6129 = vmatprep.subr.bf16.mxu1 %v6128_v35  ;;  %v5122_v35 = vpack.c.bf16 %v681_v26, %v677_v25  ;;  %v6146_v36 = vpack.c.bf16 %v683_v29, %v679_v27  ;;  %v5124_v37 = vpack.c.bf16 %v690_v31, %v686_v30  ;;  %v722_v25 = vld [vmem:[%s7454_s22 + $0xee8] sm:$0xff]  ;;  %v720_v26 = vld [vmem:[%s7454_s22 + $0xed8] sm:$0xff]  ;;  %v717_v31 = vld [vmem:[%s7454_s22 + $0xec0] sm:$0xff] }
 0x13f   : > { %v724_v27 = vld [vmem:[%s7454_s22 + $0xef8] sm:$0xff] }
 0x140   : > { %5107 = vmatpush1.bf16.msra.mxu0 %v5106_v41  ;;  %v6148_v41 = vpack.c.bf16 %v692_v34, %v688_v32  ;;  %v721_v32 = vld [vmem:[%s7454_s22 + $0xee0] sm:$0xff]  ;;  %v719_v34 = vld [vmem:[%s7454_s22 + $0xed0] sm:$0xff] }
 0x141   : > { %6131 = vmatpush1.bf16.msra.mxu1 %v6130_v42  ;;  %5109 = vmatprep.subr.bf16.mxu0 %v5108_v43  ;;  %v691_v42 = vld [vmem:[%s7454_s22 + $0xdf0] sm:$0xff]  ;;  %v694_v43 = vld [vmem:[%s7454_s22 + $0xe08] sm:$0xff] }
 0x142   : > { %6133 = vmatprep.subr.bf16.mxu1 %v6132_v49  ;;  %v5126_v49 = vpack.c.bf16 %v689_v39, %v685_v38  ;;  %v6150_v50 = vpack.c.bf16 %v691_v42, %v687_v40  ;;  %v5128_v51 = vpack.c.bf16 %v698_v45, %v694_v43  ;;  %v730_v38 = vld [vmem:[%s7454_s22 + $0xf28] sm:$0xff]  ;;  %v728_v39 = vld [vmem:[%s7454_s22 + $0xf18] sm:$0xff]  ;;  %v725_v45 = vld [vmem:[%s7454_s22 + $0xf00] sm:$0xff] }
 0x143   : > { %v732_v40 = vld [vmem:[%s7454_s22 + $0xf38] sm:$0xff] }
 0x144   : > { %5111 = vmatpush1.bf16.msra.mxu0 %v5110_v55  ;;  %v6152_v55 = vpack.c.bf16 %v700_v48, %v696_v47  ;;  %v729_v47 = vld [vmem:[%s7454_s22 + $0xf20] sm:$0xff]  ;;  %v727_v48 = vld [vmem:[%s7454_s22 + $0xf10] sm:$0xff] }
 0x145   : > { %6135 = vmatpush1.bf16.msra.mxu1 %v6134_v56  ;;  %5113 = vmatprep.subr.bf16.mxu0 %v5112_v57  ;;  %v699_v56 = vld [vmem:[%s7454_s22 + $0xe30] sm:$0xff]  ;;  %v702_v57 = vld [vmem:[%s7454_s22 + $0xe48] sm:$0xff] }
 0x146   : > { %6137 = vmatprep.subr.bf16.mxu1 %v6136_v63  ;;  %v5130_v63 = vpack.c.bf16 %v697_v53, %v693_v52  ;;  %v6154_v0 = vpack.c.bf16 %v699_v56, %v695_v54  ;;  %v5132_v1 = vpack.c.bf16 %v706_v58, %v702_v57  ;;  %v738_v52 = vld [vmem:[%s7454_s22 + $0xf68] sm:$0xff]  ;;  %v736_v53 = vld [vmem:[%s7454_s22 + $0xf58] sm:$0xff]  ;;  %v733_v58 = vld [vmem:[%s7454_s22 + $0xf40] sm:$0xff] }
 0x147   : > { %v740_v54 = vld [vmem:[%s7454_s22 + $0xf78] sm:$0xff] }
 0x148   : > { %5115 = vmatpush1.bf16.msra.mxu0 %v5114_v19  ;;  %v6156_v19 = vpack.c.bf16 %v708_v62, %v704_v61  ;;  %v737_v61 = vld [vmem:[%s7454_s22 + $0xf60] sm:$0xff]  ;;  %v735_v62 = vld [vmem:[%s7454_s22 + $0xf50] sm:$0xff] }
 0x149   : > { %6139 = vmatpush1.bf16.msra.mxu1 %v6138_v5  ;;  %5117 = vmatprep.subr.bf16.mxu0 %v5116_v9  ;;  %v707_v5 = vld [vmem:[%s7454_s22 + $0xe70] sm:$0xff]  ;;  %v710_v9 = vld [vmem:[%s7454_s22 + $0xe88] sm:$0xff] }
 0x14a   : > { %6141 = vmatprep.subr.bf16.mxu1 %v6140_v14  ;;  %v5134_v14 = vpack.c.bf16 %v705_v3, %v701_v2  ;;  %v6158_v15 = vpack.c.bf16 %v707_v5, %v703_v4  ;;  %v5136_v16 = vpack.c.bf16 %v714_v11, %v710_v9  ;;  %v746_v2 = vld [vmem:[%s7454_s22 + $0xfa8] sm:$0xff]  ;;  %v744_v3 = vld [vmem:[%s7454_s22 + $0xf98] sm:$0xff]  ;;  %v741_v11 = vld [vmem:[%s7454_s22 + $0xf80] sm:$0xff] }
 0x14b   : > { %v748_v4 = vld [vmem:[%s7454_s22 + $0xfb8] sm:$0xff] }
 0x14c   : > { %5119 = vmatpush1.bf16.msra.mxu0 %v5118_v21  ;;  %v6160_v21 = vpack.c.bf16 %v716_v13, %v712_v12  ;;  %v745_v12 = vld [vmem:[%s7454_s22 + $0xfa0] sm:$0xff]  ;;  %v743_v13 = vld [vmem:[%s7454_s22 + $0xf90] sm:$0xff] }
 0x14d   : > { %6143 = vmatpush1.bf16.msra.mxu1 %v6142_v23  ;;  %5121 = vmatprep.subr.bf16.mxu0 %v5120_v24  ;;  %v715_v23 = vld [vmem:[%s7454_s22 + $0xeb0] sm:$0xff]  ;;  %v718_v24 = vld [vmem:[%s7454_s22 + $0xec8] sm:$0xff] }
 0x14e   : > { %6145 = vmatprep.subr.bf16.mxu1 %v6144_v28  ;;  %v5138_v28 = vpack.c.bf16 %v713_v18, %v709_v17  ;;  %v6162_v29 = vpack.c.bf16 %v715_v23, %v711_v20  ;;  %v5140_v30 = vpack.c.bf16 %v722_v25, %v718_v24  ;;  %v754_v17 = vld [vmem:[%s7454_s22 + $0xfe8] sm:$0xff]  ;;  %v752_v18 = vld [vmem:[%s7454_s22 + $0xfd8] sm:$0xff]  ;;  %v749_v25 = vld [vmem:[%s7454_s22 + $0xfc0] sm:$0xff] }
 0x14f   : > { %v756_v20 = vld [vmem:[%s7454_s22 + $0xff8] sm:$0xff] }
 0x150   : > { %5123 = vmatpush1.bf16.msra.mxu0 %v5122_v35  ;;  %v6164_v35 = vpack.c.bf16 %v724_v27, %v720_v26  ;;  %v753_v26 = vld [vmem:[%s7454_s22 + $0xfe0] sm:$0xff]  ;;  %v751_v27 = vld [vmem:[%s7454_s22 + $0xfd0] sm:$0xff] }
 0x151   : > { %6147 = vmatpush1.bf16.msra.mxu1 %v6146_v36  ;;  %5125 = vmatprep.subr.bf16.mxu0 %v5124_v37  ;;  %v723_v36 = vld [vmem:[%s7454_s22 + $0xef0] sm:$0xff]  ;;  %v726_v37 = vld [vmem:[%s7454_s22 + $0xf08] sm:$0xff] }
 0x152   : > { %6149 = vmatprep.subr.bf16.mxu1 %v6148_v41  ;;  %v5142_v41 = vpack.c.bf16 %v721_v32, %v717_v31  ;;  %v6166_v42 = vpack.c.bf16 %v723_v36, %v719_v34  ;;  %v5144_v43 = vpack.c.bf16 %v730_v38, %v726_v37  ;;  %v762_v31 = vld [vmem:[%s7454_s22 + $0x1028] sm:$0xff]  ;;  %v760_v32 = vld [vmem:[%s7454_s22 + $0x1018] sm:$0xff]  ;;  %v5158_v36 = vpack.c.bf16 %v753_v26, %v749_v25  ;;  %v787_v26 = vld [vmem:[%s7454_s22 + $0x10f0] sm:$0xff] }
 0x153   : > { %v764_v34 = vld [vmem:[%s7454_s22 + $0x1038] sm:$0xff] }
 0x154   : > { %5127 = vmatpush1.bf16.msra.mxu0 %v5126_v49  ;;  %v6168_v49 = vpack.c.bf16 %v732_v40, %v728_v39  ;;  %v757_v39 = vld [vmem:[%s7454_s22 + $0x1000] sm:$0xff] }
 0x155   : > { %6151 = vmatpush1.bf16.msra.mxu1 %v6150_v50  ;;  %5129 = vmatprep.subr.bf16.mxu0 %v5128_v51  ;;  %v731_v50 = vld [vmem:[%s7454_s22 + $0xf30] sm:$0xff]  ;;  %v734_v51 = vld [vmem:[%s7454_s22 + $0xf48] sm:$0xff]  ;;  %v761_v40 = vld [vmem:[%s7454_s22 + $0x1020] sm:$0xff] }
 0x156   : > { %6153 = vmatprep.subr.bf16.mxu1 %v6152_v55  ;;  %v5146_v55 = vpack.c.bf16 %v729_v47, %v725_v45  ;;  %v6170_v56 = vpack.c.bf16 %v731_v50, %v727_v48  ;;  %v5148_v57 = vpack.c.bf16 %v738_v52, %v734_v51  ;;  %v766_v45 = vld [vmem:[%s7454_s22 + $0x1048] sm:$0xff]  ;;  %v772_v50 = vld [vmem:[%s7454_s22 + $0x1078] sm:$0xff]  ;;  %v5162_v52 = vpack.c.bf16 %v761_v40, %v757_v39  ;;  %v795_v40 = vld [vmem:[%s7454_s22 + $0x1130] sm:$0xff] }
 0x157   : > { %v770_v47 = vld [vmem:[%s7454_s22 + $0x1068] sm:$0xff] }
 0x158   : > { %5131 = vmatpush1.bf16.msra.mxu0 %v5130_v63  ;;  %v6172_v63 = vpack.c.bf16 %v740_v54, %v736_v53  ;;  %v8031_v51 = vld [vmem:[#allocation2 + $0x8] sm:$0xff]  ;;  %v5164_v54 = vpack.c.bf16 %v770_v47, %v766_v45  ;;  %v804_v45 = vld [vmem:[%s7454_s22 + $0x1178] sm:$0xff] }
 0x159   : > { %6155 = vmatpush1.bf16.msra.mxu1 %v6154_v0  ;;  %5133 = vmatprep.subr.bf16.mxu0 %v5132_v1  ;;  %v739_v0 = vld [vmem:[%s7454_s22 + $0xf70] sm:$0xff]  ;;  %v742_v1 = vld [vmem:[%s7454_s22 + $0xf88] sm:$0xff] }
 0x15a   : > { %6157 = vmatprep.subr.bf16.mxu1 %v6156_v19  ;;  %v5150_v19 = vpack.c.bf16 %v737_v61, %v733_v58  ;;  %v6174_v5 = vpack.c.bf16 %v739_v0, %v735_v62  ;;  %v5152_v9 = vpack.c.bf16 %v746_v2, %v742_v1  ;;  %v771_v58 = vld [vmem:[%s7454_s22 + $0x1070] sm:$0xff]  ;;  %v774_v61 = vld [vmem:[%s7454_s22 + $0x1088] sm:$0xff]  ;;  %v776_v0 = vld [vmem:[%s7454_s22 + $0x1098] sm:$0xff] }
 0x15b   : > { %v778_v62 = vld [vmem:[%s7454_s22 + $0x10a8] sm:$0xff]  ;;  %v780_v1 = vld [vmem:[%s7454_s22 + $0x10b8] sm:$0xff] }
 0x15c   : > { %5135 = vmatpush1.bf16.msra.mxu0 %v5134_v14  ;;  %v6176_v14 = vpack.c.bf16 %v748_v4, %v744_v3  ;;  %v5168_v4 = vpack.c.bf16 %v778_v62, %v774_v61 }
 0x15d   : > { %6159 = vmatpush1.bf16.msra.mxu1 %v6158_v15  ;;  %5137 = vmatprep.subr.bf16.mxu0 %v5136_v16  ;;  %v747_v15 = vld [vmem:[%s7454_s22 + $0xfb0] sm:$0xff]  ;;  %v750_v16 = vld [vmem:[%s7454_s22 + $0xfc8] sm:$0xff] }
 0x15e   : > { %6161 = vmatprep.subr.bf16.mxu1 %v6160_v21  ;;  %v5154_v21 = vpack.c.bf16 %v745_v12, %v741_v11  ;;  %v6178_v23 = vpack.c.bf16 %v747_v15, %v743_v13  ;;  %v5156_v24 = vpack.c.bf16 %v754_v17, %v750_v16  ;;  %v6192_v11 = vpack.c.bf16 %v780_v1, %v776_v0  ;;  %v779_v12 = vld [vmem:[%s7454_s22 + $0x10b0] sm:$0xff]  ;;  %v782_v13 = vld [vmem:[%s7454_s22 + $0x10c8] sm:$0xff]  ;;  %v784_v15 = vld [vmem:[%s7454_s22 + $0x10d8] sm:$0xff] }
 0x15f   : > { %v788_v16 = vld [vmem:[%s7454_s22 + $0x10f8] sm:$0xff]  ;;  %v805_v0 = vld [vmem:[%s7454_s22 + $0x1180] sm:$0xff] }
 0x160   : > { %5139 = vmatpush1.bf16.msra.mxu0 %v5138_v28  ;;  %v6180_v28 = vpack.c.bf16 %v756_v20, %v752_v18  ;;  %v6196_v25 = vpack.c.bf16 %v788_v16, %v784_v15  ;;  %v809_v1 = vld [vmem:[%s7454_s22 + $0x11a0] sm:$0xff] }
 0x161   : > { %6163 = vmatpush1.bf16.msra.mxu1 %v6162_v29  ;;  %5141 = vmatprep.subr.bf16.mxu0 %v5140_v30  ;;  %v755_v29 = vld [vmem:[%s7454_s22 + $0xff0] sm:$0xff]  ;;  %v758_v30 = vld [vmem:[%s7454_s22 + $0x1008] sm:$0xff]  ;;  %v813_v15 = vld [vmem:[%s7454_s22 + $0x11c0] sm:$0xff] }
 0x162   : > { %6165 = vmatprep.subr.bf16.mxu1 %v6164_v35  ;;  %v8019_v35 = vsub.s32 6, %v7545_v59  ;;  %v6182_v37 = vpack.c.bf16 %v755_v29, %v751_v27  ;;  %v5160_v38 = vpack.c.bf16 %v762_v31, %v758_v30  ;;  %v790_v27 = vld [vmem:[%s7454_s22 + $0x1108] sm:$0xff]  ;;  %v792_v29 = vld [vmem:[%s7454_s22 + $0x1118] sm:$0xff]  ;;  %v817_v16 = vld [vmem:[%s7454_s22 + $0x11e0] sm:$0xff] }
 0x163   : > { %v796_v30 = vld [vmem:[%s7454_s22 + $0x1138] sm:$0xff] }
 0x164   : > { %5143 = vmatpush1.bf16.msra.mxu0 %v5142_v41  ;;  %v759_v41 = vld [vmem:[%s7454_s22 + $0x1010] sm:$0xff]  ;;  %v2324_v48 = vrot.slane %v7890_v7, %v8019_v35  ;;  %v6200_v39 = vpack.c.bf16 %v796_v30, %v792_v29  ;;  %v821_v29 = vld [vmem:[%s7454_s22 + $0x1200] sm:$0xff] }
 0x165   : > { %6167 = vmatpush1.bf16.msra.mxu1 %v6166_v42  ;;  %5145 = vmatprep.subr.bf16.mxu0 %v5144_v43  ;;  %v6184_v42 = vpack.c.bf16 %v764_v34, %v760_v32  ;;  %v763_v43 = vld [vmem:[%s7454_s22 + $0x1030] sm:$0xff]  ;;  %v825_v30 = vld [vmem:[%s7454_s22 + $0x1220] sm:$0xff] }
 0x166   : > { %6169 = vmatprep.subr.bf16.mxu1 %v6168_v49  ;;  %v768_v49 = vld [vmem:[%s7454_s22 + $0x1058] sm:$0xff]  ;;  %v6186_v53 = vpack.c.bf16 %v763_v43, %v759_v41  ;;  %v798_v41 = vld [vmem:[%s7454_s22 + $0x1148] sm:$0xff] }
 0x167   : > { %v6188_v7 = vpack.c.bf16 %v772_v50, %v768_v49  ;;  %v800_v43 = vld [vmem:[%s7454_s22 + $0x1158] sm:$0xff]  ;;  %v797_v50 = vld [vmem:[%s7454_s22 + $0x1140] sm:$0xff] }
 0x168   : > { %5147 = vmatpush1.bf16.msra.mxu0 %v5146_v55  ;;  %v765_v55 = vld [vmem:[%s7454_s22 + $0x1040] sm:$0xff] }
 0x169   : > { %6171 = vmatpush1.bf16.msra.mxu1 %v6170_v56  ;;  %5149 = vmatprep.subr.bf16.mxu0 %v5148_v57  ;;  %v769_v56 = vld [vmem:[%s7454_s22 + $0x1060] sm:$0xff]  ;;  %v767_v57 = vld [vmem:[%s7454_s22 + $0x1050] sm:$0xff] }
 0x16a   : > { %6173 = vmatprep.subr.bf16.mxu1 %v6172_v63  ;;  %v2336_v63 = vrot.slane %v8031_v51, %v7556_v8  ;;  %v5166_v2 = vpack.c.bf16 %v769_v56, %v765_v55  ;;  %v6190_v3 = vpack.c.bf16 %v771_v58, %v767_v57  ;;  %v803_v55 = vld [vmem:[%s7454_s22 + $0x1170] sm:$0xff]  ;;  %v806_v56 = vld [vmem:[%s7454_s22 + $0x1188] sm:$0xff]  ;;  %v812_v58 = vld [vmem:[%s7454_s22 + $0x11b8] sm:$0xff] }
 0x16b   : > { %v810_v57 = vld [vmem:[%s7454_s22 + $0x11a8] sm:$0xff] }
 0x16c   : > { %5151 = vmatpush1.bf16.msra.mxu0 %v5150_v19  ;;  %v773_v19 = vld [vmem:[%s7454_s22 + $0x1080] sm:$0xff] }
 0x16d   : > { %6175 = vmatpush1.bf16.msra.mxu1 %v6174_v5  ;;  %5153 = vmatprep.subr.bf16.mxu0 %v5152_v9  ;;  %v777_v5 = vld [vmem:[%s7454_s22 + $0x10a0] sm:$0xff]  ;;  %v775_v9 = vld [vmem:[%s7454_s22 + $0x1090] sm:$0xff] }
 0x16e   : > { %6177 = vmatprep.subr.bf16.mxu1 %v6176_v14  ;;  %v786_v14 = vld [vmem:[%s7454_s22 + $0x10e8] sm:$0xff]  ;;  %v5170_v17 = vpack.c.bf16 %v777_v5, %v773_v19  ;;  %v6194_v18 = vpack.c.bf16 %v779_v12, %v775_v9  ;;  %v816_v9 = vld [vmem:[%s7454_s22 + $0x11d8] sm:$0xff]  ;;  %v5186_v12 = vpack.c.bf16 %v809_v1, %v805_v0 }
 0x16f   : > { %v5172_v20 = vpack.c.bf16 %v786_v14, %v782_v13  ;;  %v814_v19 = vld [vmem:[%s7454_s22 + $0x11c8] sm:$0xff] }
 0x170   : > { %5155 = vmatpush1.bf16.msra.mxu0 %v5154_v21  ;;  %v781_v21 = vld [vmem:[%s7454_s22 + $0x10c0] sm:$0xff]  ;;  %v818_v5 = vld [vmem:[%s7454_s22 + $0x11e8] sm:$0xff] }
 0x171   : > { %6179 = vmatpush1.bf16.msra.mxu1 %v6178_v23  ;;  %5157 = vmatprep.subr.bf16.mxu0 %v5156_v24  ;;  %v785_v23 = vld [vmem:[%s7454_s22 + $0x10e0] sm:$0xff]  ;;  %v783_v24 = vld [vmem:[%s7454_s22 + $0x10d0] sm:$0xff]  ;;  %v5188_v14 = vpack.c.bf16 %v818_v5, %v814_v19  ;;  %v846_v0 = vld [vmem:[%s7454_s22 + $0x12c8] sm:$0xff] }
 0x172   : > { %6181 = vmatprep.subr.bf16.mxu1 %v6180_v28  ;;  %v794_v28 = vld [vmem:[%s7454_s22 + $0x1128] sm:$0xff]  ;;  %v5174_v31 = vpack.c.bf16 %v785_v23, %v781_v21  ;;  %v6198_v32 = vpack.c.bf16 %v787_v26, %v783_v24  ;;  %v824_v24 = vld [vmem:[%s7454_s22 + $0x1218] sm:$0xff]  ;;  %v5190_v26 = vpack.c.bf16 %v817_v16, %v813_v15 }
 0x173   : > { %v5176_v34 = vpack.c.bf16 %v794_v28, %v790_v27  ;;  %v822_v21 = vld [vmem:[%s7454_s22 + $0x1208] sm:$0xff] }
 0x174   : > { %5159 = vmatpush1.bf16.msra.mxu0 %v5158_v36  ;;  %v789_v36 = vld [vmem:[%s7454_s22 + $0x1100] sm:$0xff]  ;;  %v826_v23 = vld [vmem:[%s7454_s22 + $0x1228] sm:$0xff] }
 0x175   : > { %6183 = vmatpush1.bf16.msra.mxu1 %v6182_v37  ;;  %5161 = vmatprep.subr.bf16.mxu0 %v5160_v38  ;;  %v793_v37 = vld [vmem:[%s7454_s22 + $0x1120] sm:$0xff]  ;;  %v791_v38 = vld [vmem:[%s7454_s22 + $0x1110] sm:$0xff]  ;;  %v5192_v28 = vpack.c.bf16 %v826_v23, %v822_v21  ;;  %v850_v1 = vld [vmem:[%s7454_s22 + $0x12e8] sm:$0xff] }
 0x176   : > { %6185 = vmatprep.subr.bf16.mxu1 %v6184_v42  ;;  %v802_v42 = vld [vmem:[%s7454_s22 + $0x1168] sm:$0xff]  ;;  %v5178_v47 = vpack.c.bf16 %v793_v37, %v789_v36  ;;  %v5204_v5 = vpack.c.bf16 %v850_v1, %v846_v0 }
 0x177   : > { %2735 = vmatmul.mubr.f32.vlgmr.msra.gmra.mrb[0].mxu0 %v2324_v48  ;;  %v5180_v49 = vpack.c.bf16 %v802_v42, %v798_v41  ;;  %v830_v36 = vld [vmem:[%s7454_s22 + $0x1248] sm:$0xff] }
 0x178   : > { %5163 = vmatpush1.bf16.msra.mxu0 %v5162_v52  ;;  %3871 = vmatmul.mubr.f32.vlgmr.msra.gmra.mrb[0].mxu1 %v2324_v48  ;;  %v6202_v48 = vpack.c.bf16 %v795_v40, %v791_v38  ;;  %v801_v52 = vld [vmem:[%s7454_s22 + $0x1160] sm:$0xff]  ;;  %v834_v37 = vld [vmem:[%s7454_s22 + $0x1268] sm:$0xff]  ;;  %v832_v38 = vld [vmem:[%s7454_s22 + $0x1258] sm:$0xff]  ;;  %v5194_v40 = vpack.c.bf16 %v825_v30, %v821_v29 }
 0x179   : > { %6187 = vmatpush1.bf16.msra.mxu1 %v6186_v53  ;;  %5165 = vmatprep.subr.bf16.mxu0 %v5164_v54  ;;  %v799_v53 = vld [vmem:[%s7454_s22 + $0x1150] sm:$0xff]  ;;  %v6204_v54 = vpack.c.bf16 %v804_v45, %v800_v43  ;;  %v5182_v61 = vpack.c.bf16 %v801_v52, %v797_v50  ;;  %v5196_v42 = vpack.c.bf16 %v834_v37, %v830_v36  ;;  %v829_v43 = vld [vmem:[%s7454_s22 + $0x1240] sm:$0xff]  ;;  %v838_v50 = vld [vmem:[%s7454_s22 + $0x1288] sm:$0xff] }
 0x17a   : > { %6189 = vmatprep.subr.bf16.mxu1 %v6188_v7  ;;  %2805 = vmatprep.mubr.f32.mxu0 %v2336_v63  ;;  %v808_v7 = vld [vmem:[%s7454_s22 + $0x1198] sm:$0xff]  ;;  %v6206_v62 = vpack.c.bf16 %v803_v55, %v799_v53  ;;  %v833_v45 = vld [vmem:[%s7454_s22 + $0x1260] sm:$0xff]  ;;  %v842_v52 = vld [vmem:[%s7454_s22 + $0x12a8] sm:$0xff] }
 0x17b   : > { %3941 = vmatprep.mubr.f32.mxu1 %v2336_v63  ;;  %v5184_v63 = vpack.c.bf16 %v810_v57, %v806_v56  ;;  %v840_v53 = vld [vmem:[%s7454_s22 + $0x1298] sm:$0xff]  ;;  %v5198_v55 = vpack.c.bf16 %v833_v45, %v829_v43  ;;  %v5200_v57 = vpack.c.bf16 %v842_v52, %v838_v50  ;;  %v854_v15 = vld [vmem:[%s7454_s22 + $0x1308] sm:$0xff] }
 0x17c   : > { %5167 = vmatpush1.bf16.msra.mxu0 %v5166_v2  ;;  %v807_v2 = vld [vmem:[%s7454_s22 + $0x1190] sm:$0xff]  ;;  %v858_v16 = vld [vmem:[%s7454_s22 + $0x1328] sm:$0xff] }
 0x17d   : > { %6191 = vmatpush1.bf16.msra.mxu1 %v6190_v3  ;;  %5169 = vmatprep.subr.bf16.mxu0 %v5168_v4  ;;  %v6208_v3 = vpack.c.bf16 %v812_v58, %v808_v7  ;;  %v811_v4 = vld [vmem:[%s7454_s22 + $0x11b0] sm:$0xff]  ;;  %v837_v7 = vld [vmem:[%s7454_s22 + $0x1280] sm:$0xff]  ;;  %v5208_v23 = vpack.c.bf16 %v858_v16, %v854_v15  ;;  %v862_v29 = vld [vmem:[%s7454_s22 + $0x1348] sm:$0xff] }
 0x17e   : > { %6193 = vmatprep.subr.bf16.mxu1 %v6192_v11  ;;  %v820_v11 = vld [vmem:[%s7454_s22 + $0x11f8] sm:$0xff]  ;;  %v6210_v13 = vpack.c.bf16 %v811_v4, %v807_v2  ;;  %v841_v58 = vld [vmem:[%s7454_s22 + $0x12a0] sm:$0xff]  ;;  %v866_v30 = vld [vmem:[%s7454_s22 + $0x1368] sm:$0xff] }
 0x17f   : > { %v848_v2 = vld [vmem:[%s7454_s22 + $0x12d8] sm:$0xff]  ;;  %v5202_v4 = vpack.c.bf16 %v841_v58, %v837_v7  ;;  %v5212_v37 = vpack.c.bf16 %v866_v30, %v862_v29  ;;  %v870_v43 = vld [vmem:[%s7454_s22 + $0x1388] sm:$0xff] }
 0x180   : > { %5171 = vmatpush1.bf16.msra.mxu0 %v5170_v17  ;;  %v815_v17 = vld [vmem:[%s7454_s22 + $0x11d0] sm:$0xff]  ;;  %v874_v45 = vld [vmem:[%s7454_s22 + $0x13a8] sm:$0xff] }
 0x181   : > { %6195 = vmatpush1.bf16.msra.mxu1 %v6194_v18  ;;  %5173 = vmatprep.subr.bf16.mxu0 %v5172_v20  ;;  %v6212_v18 = vpack.c.bf16 %v820_v11, %v816_v9  ;;  %v819_v20 = vld [vmem:[%s7454_s22 + $0x11f0] sm:$0xff]  ;;  %v845_v9 = vld [vmem:[%s7454_s22 + $0x12c0] sm:$0xff]  ;;  %v5216_v52 = vpack.c.bf16 %v874_v45, %v870_v43  ;;  %v878_v7 = vld [vmem:[%s7454_s22 + $0x13c8] sm:$0xff] }
 0x182   : > { %6197 = vmatprep.subr.bf16.mxu1 %v6196_v25  ;;  %v828_v25 = vld [vmem:[%s7454_s22 + $0x1238] sm:$0xff]  ;;  %v6214_v27 = vpack.c.bf16 %v819_v20, %v815_v17  ;;  %v849_v11 = vld [vmem:[%s7454_s22 + $0x12e0] sm:$0xff]  ;;  %v882_v58 = vld [vmem:[%s7454_s22 + $0x13e8] sm:$0xff] }
 0x183   : > { %v856_v17 = vld [vmem:[%s7454_s22 + $0x1318] sm:$0xff]  ;;  %v5206_v20 = vpack.c.bf16 %v849_v11, %v845_v9  ;;  %v5220_v1 = vpack.c.bf16 %v882_v58, %v878_v7  ;;  %v886_v9 = vld [vmem:[%s7454_s22 + $0x1408] sm:$0xff] }
 0x184   : > { %5175 = vmatpush1.bf16.msra.mxu0 %v5174_v31  ;;  %v823_v31 = vld [vmem:[%s7454_s22 + $0x1210] sm:$0xff]  ;;  %v890_v11 = vld [vmem:[%s7454_s22 + $0x1428] sm:$0xff]  ;;  %v908_v43 = vld [vmem:[%s7454_s22 + $0x14b8] sm:$0xff] }
 0x185   : > { %6199 = vmatpush1.bf16.msra.mxu1 %v6198_v32  ;;  %5177 = vmatprep.subr.bf16.mxu0 %v5176_v34  ;;  %v6216_v32 = vpack.c.bf16 %v828_v25, %v824_v24  ;;  %v827_v34 = vld [vmem:[%s7454_s22 + $0x1230] sm:$0xff]  ;;  %v853_v24 = vld [vmem:[%s7454_s22 + $0x1300] sm:$0xff]  ;;  %v5224_v16 = vpack.c.bf16 %v890_v11, %v886_v9 }
 0x186   : > { %6201 = vmatprep.subr.bf16.mxu1 %v6200_v39  ;;  %v836_v39 = vld [vmem:[%s7454_s22 + $0x1278] sm:$0xff]  ;;  %v6218_v41 = vpack.c.bf16 %v827_v34, %v823_v31  ;;  %v857_v25 = vld [vmem:[%s7454_s22 + $0x1320] sm:$0xff] }
 0x187   : > { %v864_v31 = vld [vmem:[%s7454_s22 + $0x1358] sm:$0xff]  ;;  %v5210_v34 = vpack.c.bf16 %v857_v25, %v853_v24  ;;  %v894_v24 = vld [vmem:[%s7454_s22 + $0x1448] sm:$0xff] }
 0x188   : > { %5179 = vmatpush1.bf16.msra.mxu0 %v5178_v47  ;;  %v831_v47 = vld [vmem:[%s7454_s22 + $0x1250] sm:$0xff]  ;;  %v898_v25 = vld [vmem:[%s7454_s22 + $0x1468] sm:$0xff] }
 0x189   : > { %6203 = vmatpush1.bf16.msra.mxu1 %v6202_v48  ;;  %5181 = vmatprep.subr.bf16.mxu0 %v5180_v49  ;;  %v6220_v48 = vpack.c.bf16 %v836_v39, %v832_v38  ;;  %v835_v49 = vld [vmem:[%s7454_s22 + $0x1270] sm:$0xff]  ;;  %v861_v38 = vld [vmem:[%s7454_s22 + $0x1340] sm:$0xff] }
 0x18a   : > { %6205 = vmatprep.subr.bf16.mxu1 %v6204_v54  ;;  %v844_v54 = vld [vmem:[%s7454_s22 + $0x12b8] sm:$0xff]  ;;  %v6222_v56 = vpack.c.bf16 %v835_v49, %v831_v47  ;;  %v865_v39 = vld [vmem:[%s7454_s22 + $0x1360] sm:$0xff] }
 0x18b   : > { %v872_v47 = vld [vmem:[%s7454_s22 + $0x1398] sm:$0xff]  ;;  %v5214_v49 = vpack.c.bf16 %v865_v39, %v861_v38  ;;  %v899_v38 = vld [vmem:[%s7454_s22 + $0x1470] sm:$0xff]  ;;  %v902_v39 = vld [vmem:[%s7454_s22 + $0x1488] sm:$0xff] }
 0x18c   : > { %5183 = vmatpush1.bf16.msra.mxu0 %v5182_v61  ;;  %v839_v61 = vld [vmem:[%s7454_s22 + $0x1290] sm:$0xff] }
 0x18d   : > { %6207 = vmatpush1.bf16.msra.mxu1 %v6206_v62  ;;  %5185 = vmatprep.subr.bf16.mxu0 %v5184_v63  ;;  %v6224_v62 = vpack.c.bf16 %v844_v54, %v840_v53  ;;  %v843_v63 = vld [vmem:[%s7454_s22 + $0x12b0] sm:$0xff]  ;;  %v869_v53 = vld [vmem:[%s7454_s22 + $0x1380] sm:$0xff] }
 0x18e   : > { %6209 = vmatprep.subr.bf16.mxu1 %v6208_v3  ;;  %v852_v3 = vld [vmem:[%s7454_s22 + $0x12f8] sm:$0xff]  ;;  %v6226_v19 = vpack.c.bf16 %v843_v63, %v839_v61  ;;  %v873_v54 = vld [vmem:[%s7454_s22 + $0x13a0] sm:$0xff] }
 0x18f   : > { %v880_v61 = vld [vmem:[%s7454_s22 + $0x13d8] sm:$0xff]  ;;  %v5218_v63 = vpack.c.bf16 %v873_v54, %v869_v53  ;;  %v907_v53 = vld [vmem:[%s7454_s22 + $0x14b0] sm:$0xff]  ;;  %v910_v54 = vld [vmem:[%s7454_s22 + $0x14c8] sm:$0xff] }
 0x190   : > { %5187 = vmatpush1.bf16.msra.mxu0 %v5186_v12  ;;  %v847_v12 = vld [vmem:[%s7454_s22 + $0x12d0] sm:$0xff] }
 0x191   : > { %6211 = vmatpush1.bf16.msra.mxu1 %v6210_v13  ;;  %5189 = vmatprep.subr.bf16.mxu0 %v5188_v14  ;;  %v6228_v13 = vpack.c.bf16 %v852_v3, %v848_v2  ;;  %v851_v14 = vld [vmem:[%s7454_s22 + $0x12f0] sm:$0xff]  ;;  %v877_v2 = vld [vmem:[%s7454_s22 + $0x13c0] sm:$0xff] }
 0x192   : > { %6213 = vmatprep.subr.bf16.mxu1 %v6212_v18  ;;  %v860_v18 = vld [vmem:[%s7454_s22 + $0x1338] sm:$0xff]  ;;  %v6230_v21 = vpack.c.bf16 %v851_v14, %v847_v12  ;;  %v881_v3 = vld [vmem:[%s7454_s22 + $0x13e0] sm:$0xff] }
 0x193   : > { %v888_v12 = vld [vmem:[%s7454_s22 + $0x1418] sm:$0xff]  ;;  %v5222_v14 = vpack.c.bf16 %v881_v3, %v877_v2  ;;  %v915_v2 = vld [vmem:[%s7454_s22 + $0x14f0] sm:$0xff]  ;;  %v918_v3 = vld [vmem:[%s7454_s22 + $0x1508] sm:$0xff] }
 0x194   : > { %5191 = vmatpush1.bf16.msra.mxu0 %v5190_v26  ;;  %v855_v26 = vld [vmem:[%s7454_s22 + $0x1310] sm:$0xff] }
 0x195   : > { %6215 = vmatpush1.bf16.msra.mxu1 %v6214_v27  ;;  %5193 = vmatprep.subr.bf16.mxu0 %v5192_v28  ;;  %v6232_v27 = vpack.c.bf16 %v860_v18, %v856_v17  ;;  %v859_v28 = vld [vmem:[%s7454_s22 + $0x1330] sm:$0xff]  ;;  %v885_v17 = vld [vmem:[%s7454_s22 + $0x1400] sm:$0xff] }
 0x196   : > { %6217 = vmatprep.subr.bf16.mxu1 %v6216_v32  ;;  %v868_v32 = vld [vmem:[%s7454_s22 + $0x1378] sm:$0xff]  ;;  %v6234_v36 = vpack.c.bf16 %v859_v28, %v855_v26  ;;  %v889_v18 = vld [vmem:[%s7454_s22 + $0x1420] sm:$0xff]  ;;  %v2332_v26 = vrot.slane %v8031_v51, %v7603_v10 }
 0x197   : > { %v900_v28 = vld [vmem:[%s7454_s22 + $0x1478] sm:$0xff]  ;;  %v5226_v29 = vpack.c.bf16 %v889_v18, %v885_v17  ;;  %v923_v17 = vld [vmem:[%s7454_s22 + $0x1530] sm:$0xff]  ;;  %v926_v18 = vld [vmem:[%s7454_s22 + $0x1548] sm:$0xff] }
 0x198   : > { %5195 = vmatpush1.bf16.msra.mxu0 %v5194_v40  ;;  %v863_v40 = vld [vmem:[%s7454_s22 + $0x1350] sm:$0xff] }
 0x199   : > { %6219 = vmatpush1.bf16.msra.mxu1 %v6218_v41  ;;  %5197 = vmatprep.subr.bf16.mxu0 %v5196_v42  ;;  %v6236_v41 = vpack.c.bf16 %v868_v32, %v864_v31  ;;  %v867_v42 = vld [vmem:[%s7454_s22 + $0x1370] sm:$0xff]  ;;  %v5228_v31 = vpack.c.bf16 %v898_v25, %v894_v24  ;;  %v893_v32 = vld [vmem:[%s7454_s22 + $0x1440] sm:$0xff] }
 0x19a   : > { %6221 = vmatprep.subr.bf16.mxu1 %v6220_v48  ;;  %v876_v48 = vld [vmem:[%s7454_s22 + $0x13b8] sm:$0xff]  ;;  %v6238_v50 = vpack.c.bf16 %v867_v42, %v863_v40  ;;  %v906_v40 = vld [vmem:[%s7454_s22 + $0x14a8] sm:$0xff] }
 0x19b   : > { %v904_v42 = vld [vmem:[%s7454_s22 + $0x1498] sm:$0xff] }
 0x19c   : > { %5199 = vmatpush1.bf16.msra.mxu0 %v5198_v55  ;;  %v871_v55 = vld [vmem:[%s7454_s22 + $0x1390] sm:$0xff] }
 0x19d   : > { %6223 = vmatpush1.bf16.msra.mxu1 %v6222_v56  ;;  %5201 = vmatprep.subr.bf16.mxu0 %v5200_v57  ;;  %v6240_v56 = vpack.c.bf16 %v876_v48, %v872_v47  ;;  %v875_v57 = vld [vmem:[%s7454_s22 + $0x13b0] sm:$0xff]  ;;  %v5232_v48 = vpack.c.bf16 %v906_v40, %v902_v39 }
 0x19e   : > { %6225 = vmatprep.subr.bf16.mxu1 %v6224_v62  ;;  %v884_v62 = vld [vmem:[%s7454_s22 + $0x13f8] sm:$0xff]  ;;  %v6242_v0 = vpack.c.bf16 %v875_v57, %v871_v55  ;;  %v914_v55 = vld [vmem:[%s7454_s22 + $0x14e8] sm:$0xff] }
 0x19f   : > { %v916_v57 = vld [vmem:[%s7454_s22 + $0x14f8] sm:$0xff] }
 0x1a0   : > { %5203 = vmatpush1.bf16.msra.mxu0 %v5202_v4  ;;  %v879_v4 = vld [vmem:[%s7454_s22 + $0x13d0] sm:$0xff] }
 0x1a1   : > { %6227 = vmatpush1.bf16.msra.mxu1 %v6226_v19  ;;  %5205 = vmatprep.subr.bf16.mxu0 %v5204_v5  ;;  %v6244_v19 = vpack.c.bf16 %v884_v62, %v880_v61  ;;  %v883_v5 = vld [vmem:[%s7454_s22 + $0x13f0] sm:$0xff]  ;;  %v5236_v61 = vpack.c.bf16 %v914_v55, %v910_v54  ;;  %v909_v62 = vld [vmem:[%s7454_s22 + $0x14c0] sm:$0xff] }
 0x1a2   : > { %6229 = vmatprep.subr.bf16.mxu1 %v6228_v13  ;;  %v892_v13 = vld [vmem:[%s7454_s22 + $0x1438] sm:$0xff]  ;;  %v6246_v15 = vpack.c.bf16 %v883_v5, %v879_v4  ;;  %v922_v4 = vld [vmem:[%s7454_s22 + $0x1528] sm:$0xff]  ;;  %v941_v55 = vld [vmem:[%s7454_s22 + $0x15c0] sm:$0xff] }
 0x1a3   : > { %v924_v5 = vld [vmem:[%s7454_s22 + $0x1538] sm:$0xff] }
 0x1a4   : > { %5207 = vmatpush1.bf16.msra.mxu0 %v5206_v20  ;;  %v887_v20 = vld [vmem:[%s7454_s22 + $0x1410] sm:$0xff] }
 0x1a5   : > { %6231 = vmatpush1.bf16.msra.mxu1 %v6230_v21  ;;  %5209 = vmatprep.subr.bf16.mxu0 %v5208_v23  ;;  %v6248_v21 = vpack.c.bf16 %v892_v13, %v888_v12  ;;  %v891_v23 = vld [vmem:[%s7454_s22 + $0x1430] sm:$0xff]  ;;  %v5240_v12 = vpack.c.bf16 %v922_v4, %v918_v3  ;;  %v917_v13 = vld [vmem:[%s7454_s22 + $0x1500] sm:$0xff] }
 0x1a6   : > { %6233 = vmatprep.subr.bf16.mxu1 %v6232_v27  ;;  %v896_v27 = vld [vmem:[%s7454_s22 + $0x1458] sm:$0xff]  ;;  %v6250_v30 = vpack.c.bf16 %v891_v23, %v887_v20  ;;  %v930_v20 = vld [vmem:[%s7454_s22 + $0x1568] sm:$0xff]  ;;  %v949_v4 = vld [vmem:[%s7454_s22 + $0x1600] sm:$0xff] }
 0x1a7   : > { %v932_v23 = vld [vmem:[%s7454_s22 + $0x1578] sm:$0xff] }
 0x1a8   : > { %5211 = vmatpush1.bf16.msra.mxu0 %v5210_v34  ;;  %v897_v34 = vld [vmem:[%s7454_s22 + $0x1460] sm:$0xff] }
 0x1a9   : > { %6235 = vmatpush1.bf16.msra.mxu1 %v6234_v36  ;;  %5213 = vmatprep.subr.bf16.mxu0 %v5212_v37  ;;  %v895_v36 = vld [vmem:[%s7454_s22 + $0x1450] sm:$0xff]  ;;  %v6252_v37 = vpack.c.bf16 %v900_v28, %v896_v27  ;;  %v5230_v45 = vpack.c.bf16 %v897_v34, %v893_v32  ;;  %v925_v27 = vld [vmem:[%s7454_s22 + $0x1540] sm:$0xff]  ;;  %v934_v32 = vld [vmem:[%s7454_s22 + $0x1588] sm:$0xff] }
 0x1aa   : > { %6237 = vmatprep.subr.bf16.mxu1 %v6236_v41  ;;  %v2344_v41 = vrot.slane %v8031_v51, %v7612_v22  ;;  %v6254_v47 = vpack.c.bf16 %v899_v38, %v895_v36  ;;  %v6256_v51 = vpack.c.bf16 %v908_v43, %v904_v42  ;;  %v929_v28 = vld [vmem:[%s7454_s22 + $0x1560] sm:$0xff]  ;;  %v938_v34 = vld [vmem:[%s7454_s22 + $0x15a8] sm:$0xff]  ;;  %v936_v36 = vld [vmem:[%s7454_s22 + $0x1598] sm:$0xff] }
 0x1ab   : > { %v5246_v38 = vpack.c.bf16 %v929_v28, %v925_v27  ;;  %v5248_v40 = vpack.c.bf16 %v938_v34, %v934_v32  ;;  %v937_v42 = vld [vmem:[%s7454_s22 + $0x15a0] sm:$0xff]  ;;  %v935_v43 = vld [vmem:[%s7454_s22 + $0x1590] sm:$0xff]  ;;  %v970_v27 = vld [vmem:[%s7454_s22 + $0x16a8] sm:$0xff] }
 0x1ac   : > { %5215 = vmatpush1.bf16.msra.mxu0 %v5214_v49  ;;  %v901_v49 = vld [vmem:[%s7454_s22 + $0x1480] sm:$0xff]  ;;  %v968_v28 = vld [vmem:[%s7454_s22 + $0x1698] sm:$0xff] }
 0x1ad   : > { %6239 = vmatpush1.bf16.msra.mxu1 %v6238_v50  ;;  %5217 = vmatprep.subr.bf16.mxu0 %v5216_v52  ;;  %v905_v50 = vld [vmem:[%s7454_s22 + $0x14a0] sm:$0xff]  ;;  %v903_v52 = vld [vmem:[%s7454_s22 + $0x1490] sm:$0xff] }
 0x1ae   : > { %6241 = vmatprep.subr.bf16.mxu1 %v6240_v56  ;;  %v912_v56 = vld [vmem:[%s7454_s22 + $0x14d8] sm:$0xff]  ;;  %v5234_v7 = vpack.c.bf16 %v905_v50, %v901_v49  ;;  %v6258_v58 = vpack.c.bf16 %v907_v53, %v903_v52  ;;  %v946_v49 = vld [vmem:[%s7454_s22 + $0x15e8] sm:$0xff]  ;;  %v965_v34 = vld [vmem:[%s7454_s22 + $0x1680] sm:$0xff] }
 0x1af   : > { %v944_v50 = vld [vmem:[%s7454_s22 + $0x15d8] sm:$0xff] }
 0x1b0   : > { %5219 = vmatpush1.bf16.msra.mxu0 %v5218_v63  ;;  %v913_v63 = vld [vmem:[%s7454_s22 + $0x14e0] sm:$0xff]  ;;  %v948_v52 = vld [vmem:[%s7454_s22 + $0x15f8] sm:$0xff] }
 0x1b1   : > { %6243 = vmatpush1.bf16.msra.mxu1 %v6242_v0  ;;  %5221 = vmatprep.subr.bf16.mxu0 %v5220_v1  ;;  %v911_v0 = vld [vmem:[%s7454_s22 + $0x14d0] sm:$0xff]  ;;  %v6260_v1 = vpack.c.bf16 %v916_v57, %v912_v56  ;;  %v5238_v9 = vpack.c.bf16 %v913_v63, %v909_v62  ;;  %v945_v56 = vld [vmem:[%s7454_s22 + $0x15e0] sm:$0xff]  ;;  %v954_v62 = vld [vmem:[%s7454_s22 + $0x1628] sm:$0xff] }
 0x1b2   : > { %6245 = vmatprep.subr.bf16.mxu1 %v6244_v19  ;;  %v920_v19 = vld [vmem:[%s7454_s22 + $0x1518] sm:$0xff]  ;;  %v6262_v11 = vpack.c.bf16 %v915_v2, %v911_v0  ;;  %v943_v57 = vld [vmem:[%s7454_s22 + $0x15d0] sm:$0xff] }
 0x1b3   : > { %v952_v63 = vld [vmem:[%s7454_s22 + $0x1618] sm:$0xff] }
 0x1b4   : > { %5223 = vmatpush1.bf16.msra.mxu0 %v5222_v14  ;;  %v921_v14 = vld [vmem:[%s7454_s22 + $0x1520] sm:$0xff]  ;;  %v956_v0 = vld [vmem:[%s7454_s22 + $0x1638] sm:$0xff] }
 0x1b5   : > { %6247 = vmatpush1.bf16.msra.mxu1 %v6246_v15  ;;  %5225 = vmatprep.subr.bf16.mxu0 %v5224_v16  ;;  %v919_v15 = vld [vmem:[%s7454_s22 + $0x1510] sm:$0xff]  ;;  %v6264_v16 = vpack.c.bf16 %v924_v5, %v920_v19  ;;  %v5242_v24 = vpack.c.bf16 %v921_v14, %v917_v13  ;;  %v953_v19 = vld [vmem:[%s7454_s22 + $0x1620] sm:$0xff]  ;;  %v962_v13 = vld [vmem:[%s7454_s22 + $0x1668] sm:$0xff] }
 0x1b6   : > { %6249 = vmatprep.subr.bf16.mxu1 %v6248_v21  ;;  %v928_v21 = vld [vmem:[%s7454_s22 + $0x1558] sm:$0xff]  ;;  %v6266_v25 = vpack.c.bf16 %v923_v17, %v919_v15  ;;  %v951_v5 = vld [vmem:[%s7454_s22 + $0x1610] sm:$0xff] }
 0x1b7   : > { %2806 = vmatmul.mubr.f32.vlgmr.msra.gmra.mrb[0].mxu0 %v2332_v26  ;;  %v960_v14 = vld [vmem:[%s7454_s22 + $0x1658] sm:$0xff] }
 0x1b8   : > { %5227 = vmatpush1.bf16.msra.mxu0 %v5226_v29  ;;  %3942 = vmatmul.mubr.f32.vlgmr.msra.gmra.mrb[0].mxu1 %v2332_v26  ;;  %v5244_v26 = vpack.c.bf16 %v930_v20, %v926_v18  ;;  %v927_v29 = vld [vmem:[%s7454_s22 + $0x1550] sm:$0xff]  ;;  %v964_v15 = vld [vmem:[%s7454_s22 + $0x1678] sm:$0xff]  ;;  %v957_v20 = vld [vmem:[%s7454_s22 + $0x1640] sm:$0xff] }
 0x1b9   : > { %6251 = vmatpush1.bf16.msra.mxu1 %v6250_v30  ;;  %5229 = vmatprep.subr.bf16.mxu0 %v5228_v31  ;;  %v6268_v30 = vpack.c.bf16 %v932_v23, %v928_v21  ;;  %v931_v31 = vld [vmem:[%s7454_s22 + $0x1570] sm:$0xff]  ;;  %v961_v21 = vld [vmem:[%s7454_s22 + $0x1660] sm:$0xff] }
 0x1ba   : > { %6253 = vmatprep.subr.bf16.mxu1 %v6252_v37  ;;  %2876 = vmatprep.mubr.f32.mxu0 %v2344_v41  ;;  %v940_v37 = vld [vmem:[%s7454_s22 + $0x15b8] sm:$0xff]  ;;  %v6270_v39 = vpack.c.bf16 %v931_v31, %v927_v29  ;;  %v959_v23 = vld [vmem:[%s7454_s22 + $0x1650] sm:$0xff] }
 0x1bb   : > { %4012 = vmatprep.mubr.f32.mxu1 %v2344_v41  ;;  %v933_v41 = vld [vmem:[%s7454_s22 + $0x1580] sm:$0xff]  ;;  %v972_v29 = vld [vmem:[%s7454_s22 + $0x16b8] sm:$0xff] }
 0x1bc   : > { %5231 = vmatpush1.bf16.msra.mxu0 %v5230_v45  ;;  %v6272_v45 = vpack.c.bf16 %v940_v37, %v936_v36  ;;  %v969_v36 = vld [vmem:[%s7454_s22 + $0x16a0] sm:$0xff]  ;;  %v967_v37 = vld [vmem:[%s7454_s22 + $0x1690] sm:$0xff] }
 0x1bd   : > { %6255 = vmatpush1.bf16.msra.mxu1 %v6254_v47  ;;  %5233 = vmatprep.subr.bf16.mxu0 %v5232_v48  ;;  %v939_v47 = vld [vmem:[%s7454_s22 + $0x15b0] sm:$0xff]  ;;  %v942_v48 = vld [vmem:[%s7454_s22 + $0x15c8] sm:$0xff] }
 0x1be   : > { %6257 = vmatprep.subr.bf16.mxu1 %v6256_v51  ;;  %v5250_v51 = vpack.c.bf16 %v937_v42, %v933_v41  ;;  %v6274_v53 = vpack.c.bf16 %v939_v47, %v935_v43  ;;  %v5252_v54 = vpack.c.bf16 %v946_v49, %v942_v48  ;;  %v978_v41 = vld [vmem:[%s7454_s22 + $0x16e8] sm:$0xff]  ;;  %v976_v42 = vld [vmem:[%s7454_s22 + $0x16d8] sm:$0xff]  ;;  %v973_v49 = vld [vmem:[%s7454_s22 + $0x16c0] sm:$0xff] }
 0x1bf   : > { %v980_v43 = vld [vmem:[%s7454_s22 + $0x16f8] sm:$0xff] }
 0x1c0   : > { %5235 = vmatpush1.bf16.msra.mxu0 %v5234_v7  ;;  %v6276_v7 = vpack.c.bf16 %v948_v52, %v944_v50  ;;  %v977_v50 = vld [vmem:[%s7454_s22 + $0x16e0] sm:$0xff]  ;;  %v975_v52 = vld [vmem:[%s7454_s22 + $0x16d0] sm:$0xff] }
 0x1c1   : > { %6259 = vmatpush1.bf16.msra.mxu1 %v6258_v58  ;;  %5237 = vmatprep.subr.bf16.mxu0 %v5236_v61  ;;  %v947_v58 = vld [vmem:[%s7454_s22 + $0x15f0] sm:$0xff]  ;;  %v950_v61 = vld [vmem:[%s7454_s22 + $0x1608] sm:$0xff] }
 0x1c2   : > { %6261 = vmatprep.subr.bf16.mxu1 %v6260_v1  ;;  %v5254_v1 = vpack.c.bf16 %v945_v56, %v941_v55  ;;  %v6278_v2 = vpack.c.bf16 %v947_v58, %v943_v57  ;;  %v5256_v3 = vpack.c.bf16 %v954_v62, %v950_v61  ;;  %v986_v55 = vld [vmem:[%s7454_s22 + $0x1728] sm:$0xff]  ;;  %v984_v56 = vld [vmem:[%s7454_s22 + $0x1718] sm:$0xff]  ;;  %v981_v62 = vld [vmem:[%s7454_s22 + $0x1700] sm:$0xff] }
 0x1c3   : > { %v988_v57 = vld [vmem:[%s7454_s22 + $0x1738] sm:$0xff] }
 0x1c4   : > { %5239 = vmatpush1.bf16.msra.mxu0 %v5238_v9  ;;  %v6280_v9 = vpack.c.bf16 %v956_v0, %v952_v63  ;;  %v985_v63 = vld [vmem:[%s7454_s22 + $0x1720] sm:$0xff]  ;;  %v983_v0 = vld [vmem:[%s7454_s22 + $0x1710] sm:$0xff] }
 0x1c5   : > { %6263 = vmatpush1.bf16.msra.mxu1 %v6262_v11  ;;  %5241 = vmatprep.subr.bf16.mxu0 %v5240_v12  ;;  %v955_v11 = vld [vmem:[%s7454_s22 + $0x1630] sm:$0xff]  ;;  %v958_v12 = vld [vmem:[%s7454_s22 + $0x1648] sm:$0xff] }
 0x1c6   : > { %6265 = vmatprep.subr.bf16.mxu1 %v6264_v16  ;;  %v5258_v16 = vpack.c.bf16 %v953_v19, %v949_v4  ;;  %v6282_v17 = vpack.c.bf16 %v955_v11, %v951_v5  ;;  %v5260_v18 = vpack.c.bf16 %v962_v13, %v958_v12  ;;  %v994_v4 = vld [vmem:[%s7454_s22 + $0x1768] sm:$0xff]  ;;  %v992_v19 = vld [vmem:[%s7454_s22 + $0x1758] sm:$0xff]  ;;  %v989_v13 = vld [vmem:[%s7454_s22 + $0x1740] sm:$0xff] }
 0x1c7   : > { %v996_v5 = vld [vmem:[%s7454_s22 + $0x1778] sm:$0xff] }
 0x1c8   : > { %5243 = vmatpush1.bf16.msra.mxu0 %v5242_v24  ;;  %v6284_v24 = vpack.c.bf16 %v964_v15, %v960_v14  ;;  %v993_v14 = vld [vmem:[%s7454_s22 + $0x1760] sm:$0xff]  ;;  %v991_v15 = vld [vmem:[%s7454_s22 + $0x1750] sm:$0xff] }
 0x1c9   : > { %6267 = vmatpush1.bf16.msra.mxu1 %v6266_v25  ;;  %5245 = vmatprep.subr.bf16.mxu0 %v5244_v26  ;;  %v963_v25 = vld [vmem:[%s7454_s22 + $0x1670] sm:$0xff]  ;;  %v966_v26 = vld [vmem:[%s7454_s22 + $0x1688] sm:$0xff] }
 0x1ca   : > { %6269 = vmatprep.subr.bf16.mxu1 %v6268_v30  ;;  %v5262_v30 = vpack.c.bf16 %v961_v21, %v957_v20  ;;  %v6286_v31 = vpack.c.bf16 %v963_v25, %v959_v23  ;;  %v5264_v32 = vpack.c.bf16 %v970_v27, %v966_v26  ;;  %v1002_v20 = vld [vmem:[%s7454_s22 + $0x17a8] sm:$0xff]  ;;  %v1000_v21 = vld [vmem:[%s7454_s22 + $0x1798] sm:$0xff]  ;;  %v997_v27 = vld [vmem:[%s7454_s22 + $0x1780] sm:$0xff] }
 0x1cb   : > { %v1004_v23 = vld [vmem:[%s7454_s22 + $0x17b8] sm:$0xff] }
 0x1cc   : > { %5247 = vmatpush1.bf16.msra.mxu0 %v5246_v38  ;;  %v6288_v38 = vpack.c.bf16 %v972_v29, %v968_v28  ;;  %v1001_v28 = vld [vmem:[%s7454_s22 + $0x17a0] sm:$0xff]  ;;  %v999_v29 = vld [vmem:[%s7454_s22 + $0x1790] sm:$0xff] }
 0x1cd   : > { %6271 = vmatpush1.bf16.msra.mxu1 %v6270_v39  ;;  %5249 = vmatprep.subr.bf16.mxu0 %v5248_v40  ;;  %v971_v39 = vld [vmem:[%s7454_s22 + $0x16b0] sm:$0xff]  ;;  %v974_v40 = vld [vmem:[%s7454_s22 + $0x16c8] sm:$0xff] }
 0x1ce   : > { %6273 = vmatprep.subr.bf16.mxu1 %v6272_v45  ;;  %v5266_v45 = vpack.c.bf16 %v969_v36, %v965_v34  ;;  %v6290_v47 = vpack.c.bf16 %v971_v39, %v967_v37  ;;  %v5268_v48 = vpack.c.bf16 %v978_v41, %v974_v40  ;;  %v1010_v34 = vld [vmem:[%s7454_s22 + $0x17e8] sm:$0xff]  ;;  %v1008_v36 = vld [vmem:[%s7454_s22 + $0x17d8] sm:$0xff]  ;;  %v1005_v41 = vld [vmem:[%s7454_s22 + $0x17c0] sm:$0xff] }
 0x1cf   : > { %v1012_v37 = vld [vmem:[%s7454_s22 + $0x17f8] sm:$0xff] }
 0x1d0   : > { %5251 = vmatpush1.bf16.msra.mxu0 %v5250_v51  ;;  %v6292_v51 = vpack.c.bf16 %v980_v43, %v976_v42  ;;  %v1009_v42 = vld [vmem:[%s7454_s22 + $0x17e0] sm:$0xff]  ;;  %v1007_v43 = vld [vmem:[%s7454_s22 + $0x17d0] sm:$0xff] }
 0x1d1   : > { %6275 = vmatpush1.bf16.msra.mxu1 %v6274_v53  ;;  %5253 = vmatprep.subr.bf16.mxu0 %v5252_v54  ;;  %v979_v53 = vld [vmem:[%s7454_s22 + $0x16f0] sm:$0xff]  ;;  %v982_v54 = vld [vmem:[%s7454_s22 + $0x1708] sm:$0xff] }
 0x1d2   : > { %6277 = vmatprep.subr.bf16.mxu1 %v6276_v7  ;;  %v5270_v7 = vpack.c.bf16 %v977_v50, %v973_v49  ;;  %v6294_v58 = vpack.c.bf16 %v979_v53, %v975_v52  ;;  %v5272_v61 = vpack.c.bf16 %v986_v55, %v982_v54  ;;  %v1018_v49 = vld [vmem:[%s7454_s22 + $0x1828] sm:$0xff]  ;;  %v1016_v50 = vld [vmem:[%s7454_s22 + $0x1818] sm:$0xff]  ;;  %v1013_v55 = vld [vmem:[%s7454_s22 + $0x1800] sm:$0xff] }
 0x1d3   : > { %v1020_v52 = vld [vmem:[%s7454_s22 + $0x1838] sm:$0xff] }
 0x1d4   : > { %5255 = vmatpush1.bf16.msra.mxu0 %v5254_v1  ;;  %v6296_v1 = vpack.c.bf16 %v988_v57, %v984_v56  ;;  %v1017_v56 = vld [vmem:[%s7454_s22 + $0x1820] sm:$0xff]  ;;  %v1015_v57 = vld [vmem:[%s7454_s22 + $0x1810] sm:$0xff] }
 0x1d5   : > { %6279 = vmatpush1.bf16.msra.mxu1 %v6278_v2  ;;  %5257 = vmatprep.subr.bf16.mxu0 %v5256_v3  ;;  %v987_v2 = vld [vmem:[%s7454_s22 + $0x1730] sm:$0xff]  ;;  %v990_v3 = vld [vmem:[%s7454_s22 + $0x1748] sm:$0xff] }
 0x1d6   : > { %6281 = vmatprep.subr.bf16.mxu1 %v6280_v9  ;;  %v5274_v9 = vpack.c.bf16 %v985_v63, %v981_v62  ;;  %v6298_v11 = vpack.c.bf16 %v987_v2, %v983_v0  ;;  %v5276_v12 = vpack.c.bf16 %v994_v4, %v990_v3  ;;  %v1026_v62 = vld [vmem:[%s7454_s22 + $0x1868] sm:$0xff]  ;;  %v1028_v2 = vld [vmem:[%s7454_s22 + $0x1878] sm:$0xff]  ;;  %v5290_v3 = vpack.c.bf16 %v1017_v56, %v1013_v55  ;;  %v1051_v56 = vld [vmem:[%s7454_s22 + $0x1930] sm:$0xff] }
 0x1d7   : > { %v8293_v63 = vld [vmem:[#allocation2 + $0x8] sm:$0xff] }
 0x1d8   : > { %5259 = vmatpush1.bf16.msra.mxu0 %v5258_v16  ;;  %v6300_v16 = vpack.c.bf16 %v996_v5, %v992_v19  ;;  %v2340_v0 = vrot.slane %v8293_v63, %v7741_v33  ;;  %v1021_v5 = vld [vmem:[%s7454_s22 + $0x1840] sm:$0xff] }
 0x1d9   : > { %6283 = vmatpush1.bf16.msra.mxu1 %v6282_v17  ;;  %5261 = vmatprep.subr.bf16.mxu0 %v5260_v18  ;;  %v995_v17 = vld [vmem:[%s7454_s22 + $0x1770] sm:$0xff]  ;;  %v998_v18 = vld [vmem:[%s7454_s22 + $0x1788] sm:$0xff] }
 0x1da   : > { %6285 = vmatprep.subr.bf16.mxu1 %v6284_v24  ;;  %v5278_v24 = vpack.c.bf16 %v993_v14, %v989_v13  ;;  %v6302_v25 = vpack.c.bf16 %v995_v17, %v991_v15  ;;  %v5280_v26 = vpack.c.bf16 %v1002_v20, %v998_v18  ;;  %v1027_v13 = vld [vmem:[%s7454_s22 + $0x1870] sm:$0xff]  ;;  %v1030_v14 = vld [vmem:[%s7454_s22 + $0x1888] sm:$0xff]  ;;  %v1032_v17 = vld [vmem:[%s7454_s22 + $0x1898] sm:$0xff] }
 0x1db   : > { %v1034_v15 = vld [vmem:[%s7454_s22 + $0x18a8] sm:$0xff]  ;;  %v1036_v18 = vld [vmem:[%s7454_s22 + $0x18b8] sm:$0xff] }
 0x1dc   : > { %5263 = vmatpush1.bf16.msra.mxu0 %v5262_v30  ;;  %v6304_v30 = vpack.c.bf16 %v1004_v23, %v1000_v21  ;;  %v5296_v23 = vpack.c.bf16 %v1034_v15, %v1030_v14 }
 0x1dd   : > { %6287 = vmatpush1.bf16.msra.mxu1 %v6286_v31  ;;  %5265 = vmatprep.subr.bf16.mxu0 %v5264_v32  ;;  %v1003_v31 = vld [vmem:[%s7454_s22 + $0x17b0] sm:$0xff]  ;;  %v1006_v32 = vld [vmem:[%s7454_s22 + $0x17c8] sm:$0xff] }
 0x1de   : > { %6289 = vmatprep.subr.bf16.mxu1 %v6288_v38  ;;  %v5282_v38 = vpack.c.bf16 %v1001_v28, %v997_v27  ;;  %v6306_v39 = vpack.c.bf16 %v1003_v31, %v999_v29  ;;  %v5284_v40 = vpack.c.bf16 %v1010_v34, %v1006_v32  ;;  %v6320_v27 = vpack.c.bf16 %v1036_v18, %v1032_v17  ;;  %v1035_v28 = vld [vmem:[%s7454_s22 + $0x18b0] sm:$0xff]  ;;  %v1038_v29 = vld [vmem:[%s7454_s22 + $0x18c8] sm:$0xff]  ;;  %v1040_v31 = vld [vmem:[%s7454_s22 + $0x18d8] sm:$0xff] }
 0x1df   : > { %v1044_v32 = vld [vmem:[%s7454_s22 + $0x18f8] sm:$0xff]  ;;  %v1061_v17 = vld [vmem:[%s7454_s22 + $0x1980] sm:$0xff] }
 0x1e0   : > { %5267 = vmatpush1.bf16.msra.mxu0 %v5266_v45  ;;  %v6308_v45 = vpack.c.bf16 %v1012_v37, %v1008_v36  ;;  %v1065_v18 = vld [vmem:[%s7454_s22 + $0x19a0] sm:$0xff] }
 0x1e1   : > { %6291 = vmatpush1.bf16.msra.mxu1 %v6290_v47  ;;  %5269 = vmatprep.subr.bf16.mxu0 %v5268_v48  ;;  %v1011_v47 = vld [vmem:[%s7454_s22 + $0x17f0] sm:$0xff]  ;;  %v1014_v48 = vld [vmem:[%s7454_s22 + $0x1808] sm:$0xff] }
 0x1e2   : > { %6293 = vmatprep.subr.bf16.mxu1 %v6292_v51  ;;  %v5286_v51 = vpack.c.bf16 %v1009_v42, %v1005_v41  ;;  %v6310_v53 = vpack.c.bf16 %v1011_v47, %v1007_v43  ;;  %v5288_v54 = vpack.c.bf16 %v1018_v49, %v1014_v48  ;;  %v6324_v41 = vpack.c.bf16 %v1044_v32, %v1040_v31  ;;  %v1043_v42 = vld [vmem:[%s7454_s22 + $0x18f0] sm:$0xff]  ;;  %v1046_v43 = vld [vmem:[%s7454_s22 + $0x1908] sm:$0xff]  ;;  %v1048_v47 = vld [vmem:[%s7454_s22 + $0x1918] sm:$0xff] }
 0x1e3   : > { %v1052_v48 = vld [vmem:[%s7454_s22 + $0x1938] sm:$0xff]  ;;  %v1069_v31 = vld [vmem:[%s7454_s22 + $0x19c0] sm:$0xff] }
 0x1e4   : > { %5271 = vmatpush1.bf16.msra.mxu0 %v5270_v7  ;;  %v6312_v7 = vpack.c.bf16 %v1020_v52, %v1016_v50  ;;  %v6328_v55 = vpack.c.bf16 %v1052_v48, %v1048_v47  ;;  %v1073_v32 = vld [vmem:[%s7454_s22 + $0x19e0] sm:$0xff] }
 0x1e5   : > { %6295 = vmatpush1.bf16.msra.mxu1 %v6294_v58  ;;  %5273 = vmatprep.subr.bf16.mxu0 %v5272_v61  ;;  %v1019_v58 = vld [vmem:[%s7454_s22 + $0x1830] sm:$0xff]  ;;  %v1022_v61 = vld [vmem:[%s7454_s22 + $0x1848] sm:$0xff]  ;;  %v1077_v47 = vld [vmem:[%s7454_s22 + $0x1a00] sm:$0xff] }
 0x1e6   : > { %6297 = vmatprep.subr.bf16.mxu1 %v6296_v1  ;;  %v1024_v1 = vld [vmem:[%s7454_s22 + $0x1858] sm:$0xff]  ;;  %v6314_v4 = vpack.c.bf16 %v1019_v58, %v1015_v57  ;;  %v5292_v19 = vpack.c.bf16 %v1026_v62, %v1022_v61  ;;  %v1054_v57 = vld [vmem:[%s7454_s22 + $0x1948] sm:$0xff]  ;;  %v1081_v48 = vld [vmem:[%s7454_s22 + $0x1a20] sm:$0xff] }
 0x1e7   : > { %v1056_v58 = vld [vmem:[%s7454_s22 + $0x1958] sm:$0xff] }
 0x1e8   : > { %5275 = vmatpush1.bf16.msra.mxu0 %v5274_v9  ;;  %v1025_v9 = vld [vmem:[%s7454_s22 + $0x1860] sm:$0xff]  ;;  %v1060_v61 = vld [vmem:[%s7454_s22 + $0x1978] sm:$0xff] }
 0x1e9   : > { %6299 = vmatpush1.bf16.msra.mxu1 %v6298_v11  ;;  %5277 = vmatprep.subr.bf16.mxu0 %v5276_v12  ;;  %v1023_v11 = vld [vmem:[%s7454_s22 + $0x1850] sm:$0xff]  ;;  %v6316_v12 = vpack.c.bf16 %v1028_v2, %v1024_v1  ;;  %v5294_v20 = vpack.c.bf16 %v1025_v9, %v1021_v5  ;;  %v1053_v2 = vld [vmem:[%s7454_s22 + $0x1940] sm:$0xff]  ;;  %v1062_v9 = vld [vmem:[%s7454_s22 + $0x1988] sm:$0xff] }
 0x1ea   : > { %6301 = vmatprep.subr.bf16.mxu1 %v6300_v16  ;;  %v2352_v16 = vrot.slane %v8293_v63, %v7750_v44  ;;  %v6318_v21 = vpack.c.bf16 %v1027_v13, %v1023_v11  ;;  %v1059_v5 = vld [vmem:[%s7454_s22 + $0x1970] sm:$0xff]  ;;  %v1066_v11 = vld [vmem:[%s7454_s22 + $0x19a8] sm:$0xff]  ;;  %v1068_v13 = vld [vmem:[%s7454_s22 + $0x19b8] sm:$0xff] }
 0x1ec   : > { %5279 = vmatpush1.bf16.msra.mxu0 %v5278_v24  ;;  %v1029_v24 = vld [vmem:[%s7454_s22 + $0x1880] sm:$0xff] }
 0x1ed   : > { %6303 = vmatpush1.bf16.msra.mxu1 %v6302_v25  ;;  %5281 = vmatprep.subr.bf16.mxu0 %v5280_v26  ;;  %v1033_v25 = vld [vmem:[%s7454_s22 + $0x18a0] sm:$0xff]  ;;  %v1031_v26 = vld [vmem:[%s7454_s22 + $0x1890] sm:$0xff] }
 0x1ee   : > { %6305 = vmatprep.subr.bf16.mxu1 %v6304_v30  ;;  %v1042_v30 = vld [vmem:[%s7454_s22 + $0x18e8] sm:$0xff]  ;;  %v5298_v34 = vpack.c.bf16 %v1033_v25, %v1029_v24  ;;  %v6322_v36 = vpack.c.bf16 %v1035_v28, %v1031_v26  ;;  %v1072_v26 = vld [vmem:[%s7454_s22 + $0x19d8] sm:$0xff]  ;;  %v5314_v28 = vpack.c.bf16 %v1065_v18, %v1061_v17 }
 0x1ef   : > { %v5300_v37 = vpack.c.bf16 %v1042_v30, %v1038_v29  ;;  %v1070_v24 = vld [vmem:[%s7454_s22 + $0x19c8] sm:$0xff] }
 0x1f0   : > { %5283 = vmatpush1.bf16.msra.mxu0 %v5282_v38  ;;  %v1037_v38 = vld [vmem:[%s7454_s22 + $0x18c0] sm:$0xff]  ;;  %v1074_v25 = vld [vmem:[%s7454_s22 + $0x19e8] sm:$0xff] }
 0x1f1   : > { %6307 = vmatpush1.bf16.msra.mxu1 %v6306_v39  ;;  %5285 = vmatprep.subr.bf16.mxu0 %v5284_v40  ;;  %v1041_v39 = vld [vmem:[%s7454_s22 + $0x18e0] sm:$0xff]  ;;  %v1039_v40 = vld [vmem:[%s7454_s22 + $0x18d0] sm:$0xff]  ;;  %v5316_v30 = vpack.c.bf16 %v1074_v25, %v1070_v24  ;;  %v1102_v17 = vld [vmem:[%s7454_s22 + $0x1ac8] sm:$0xff] }
 0x1f2   : > { %6309 = vmatprep.subr.bf16.mxu1 %v6308_v45  ;;  %v1050_v45 = vld [vmem:[%s7454_s22 + $0x1928] sm:$0xff]  ;;  %v5302_v49 = vpack.c.bf16 %v1041_v39, %v1037_v38  ;;  %v6326_v50 = vpack.c.bf16 %v1043_v42, %v1039_v40  ;;  %v1080_v40 = vld [vmem:[%s7454_s22 + $0x1a18] sm:$0xff]  ;;  %v5318_v42 = vpack.c.bf16 %v1073_v32, %v1069_v31 }
 0x1f3   : > { %v5304_v52 = vpack.c.bf16 %v1050_v45, %v1046_v43  ;;  %v1078_v38 = vld [vmem:[%s7454_s22 + $0x1a08] sm:$0xff] }
 0x1f4   : > { %5287 = vmatpush1.bf16.msra.mxu0 %v5286_v51  ;;  %v1045_v51 = vld [vmem:[%s7454_s22 + $0x1900] sm:$0xff]  ;;  %v1082_v39 = vld [vmem:[%s7454_s22 + $0x1a28] sm:$0xff] }
 0x1f5   : > { %6311 = vmatpush1.bf16.msra.mxu1 %v6310_v53  ;;  %5289 = vmatprep.subr.bf16.mxu0 %v5288_v54  ;;  %v1049_v53 = vld [vmem:[%s7454_s22 + $0x1920] sm:$0xff]  ;;  %v1047_v54 = vld [vmem:[%s7454_s22 + $0x1910] sm:$0xff]  ;;  %v5320_v45 = vpack.c.bf16 %v1082_v39, %v1078_v38  ;;  %v1106_v18 = vld [vmem:[%s7454_s22 + $0x1ae8] sm:$0xff] }
 0x1f6   : > { %6313 = vmatprep.subr.bf16.mxu1 %v6312_v7  ;;  %v1058_v7 = vld [vmem:[%s7454_s22 + $0x1968] sm:$0xff]  ;;  %v5306_v62 = vpack.c.bf16 %v1049_v53, %v1045_v51  ;;  %v5332_v25 = vpack.c.bf16 %v1106_v18, %v1102_v17 }
 0x1f7   : > { %2877 = vmatmul.mubr.f32.vlgmr.msra.gmra.mrb[0].mxu0 %v2340_v0  ;;  %v5308_v1 = vpack.c.bf16 %v1058_v7, %v1054_v57  ;;  %v1086_v51 = vld [vmem:[%s7454_s22 + $0x1a48] sm:$0xff] }
 0x1f8   : > { %5291 = vmatpush1.bf16.msra.mxu0 %v5290_v3  ;;  %4013 = vmatmul.mubr.f32.vlgmr.msra.gmra.mrb[0].mxu1 %v2340_v0  ;;  %v6330_v0 = vpack.c.bf16 %v1051_v56, %v1047_v54  ;;  %v1057_v3 = vld [vmem:[%s7454_s22 + $0x1960] sm:$0xff]  ;;  %v1090_v53 = vld [vmem:[%s7454_s22 + $0x1a68] sm:$0xff]  ;;  %v1088_v54 = vld [vmem:[%s7454_s22 + $0x1a58] sm:$0xff]  ;;  %v5322_v56 = vpack.c.bf16 %v1081_v48, %v1077_v47 }
 0x1f9   : > { %6315 = vmatpush1.bf16.msra.mxu1 %v6314_v4  ;;  %5293 = vmatprep.subr.bf16.mxu0 %v5292_v19  ;;  %v1055_v4 = vld [vmem:[%s7454_s22 + $0x1950] sm:$0xff]  ;;  %v6332_v19 = vpack.c.bf16 %v1060_v61, %v1056_v58  ;;  %v5310_v14 = vpack.c.bf16 %v1057_v3, %v1053_v2  ;;  %v5324_v7 = vpack.c.bf16 %v1090_v53, %v1086_v51  ;;  %v1085_v58 = vld [vmem:[%s7454_s22 + $0x1a40] sm:$0xff]  ;;  %v1094_v2 = vld [vmem:[%s7454_s22 + $0x1a88] sm:$0xff] }
 0x1fa   : > { %6317 = vmatprep.subr.bf16.mxu1 %v6316_v12  ;;  %2947 = vmatprep.mubr.f32.mxu0 %v2352_v16  ;;  %v1064_v12 = vld [vmem:[%s7454_s22 + $0x1998] sm:$0xff]  ;;  %v6334_v15 = vpack.c.bf16 %v1059_v5, %v1055_v4  ;;  %v1089_v61 = vld [vmem:[%s7454_s22 + $0x1a60] sm:$0xff]  ;;  %v1098_v3 = vld [vmem:[%s7454_s22 + $0x1aa8] sm:$0xff] }
 0x1fb   : > { %4083 = vmatprep.mubr.f32.mxu1 %v2352_v16  ;;  %v5312_v16 = vpack.c.bf16 %v1066_v11, %v1062_v9  ;;  %v1096_v4 = vld [vmem:[%s7454_s22 + $0x1a98] sm:$0xff]  ;;  %v5326_v5 = vpack.c.bf16 %v1089_v61, %v1085_v58  ;;  %v5328_v11 = vpack.c.bf16 %v1098_v3, %v1094_v2  ;;  %v1110_v31 = vld [vmem:[%s7454_s22 + $0x1b08] sm:$0xff] }
 0x1fc   : > { %5295 = vmatpush1.bf16.msra.mxu0 %v5294_v20  ;;  %v1063_v20 = vld [vmem:[%s7454_s22 + $0x1990] sm:$0xff]  ;;  %v1114_v32 = vld [vmem:[%s7454_s22 + $0x1b28] sm:$0xff] }
 0x1fd   : > { %6319 = vmatpush1.bf16.msra.mxu1 %v6318_v21  ;;  %5297 = vmatprep.subr.bf16.mxu0 %v5296_v23  ;;  %v6336_v21 = vpack.c.bf16 %v1068_v13, %v1064_v12  ;;  %v1067_v23 = vld [vmem:[%s7454_s22 + $0x19b0] sm:$0xff]  ;;  %v1093_v12 = vld [vmem:[%s7454_s22 + $0x1a80] sm:$0xff]  ;;  %v5336_v39 = vpack.c.bf16 %v1114_v32, %v1110_v31  ;;  %v1118_v47 = vld [vmem:[%s7454_s22 + $0x1b48] sm:$0xff] }
 0x1fe   : > { %6321 = vmatprep.subr.bf16.mxu1 %v6320_v27  ;;  %v1076_v27 = vld [vmem:[%s7454_s22 + $0x19f8] sm:$0xff]  ;;  %v6338_v29 = vpack.c.bf16 %v1067_v23, %v1063_v20  ;;  %v1097_v13 = vld [vmem:[%s7454_s22 + $0x1aa0] sm:$0xff]  ;;  %v1122_v48 = vld [vmem:[%s7454_s22 + $0x1b68] sm:$0xff] }
 0x1ff   : > { %v1104_v20 = vld [vmem:[%s7454_s22 + $0x1ad8] sm:$0xff]  ;;  %v5330_v23 = vpack.c.bf16 %v1097_v13, %v1093_v12  ;;  %v5340_v53 = vpack.c.bf16 %v1122_v48, %v1118_v47  ;;  %v1126_v58 = vld [vmem:[%s7454_s22 + $0x1b88] sm:$0xff] }
 0x200   : > { %5299 = vmatpush1.bf16.msra.mxu0 %v5298_v34  ;;  %v1071_v34 = vld [vmem:[%s7454_s22 + $0x19d0] sm:$0xff]  ;;  %v1130_v61 = vld [vmem:[%s7454_s22 + $0x1ba8] sm:$0xff] }
 0x201   : > { %6323 = vmatpush1.bf16.msra.mxu1 %v6322_v36  ;;  %5301 = vmatprep.subr.bf16.mxu0 %v5300_v37  ;;  %v6340_v36 = vpack.c.bf16 %v1076_v27, %v1072_v26  ;;  %v1075_v37 = vld [vmem:[%s7454_s22 + $0x19f0] sm:$0xff]  ;;  %v1101_v26 = vld [vmem:[%s7454_s22 + $0x1ac0] sm:$0xff]  ;;  %v5344_v3 = vpack.c.bf16 %v1130_v61, %v1126_v58  ;;  %v1134_v12 = vld [vmem:[%s7454_s22 + $0x1bc8] sm:$0xff] }
 0x202   : > { %6325 = vmatprep.subr.bf16.mxu1 %v6324_v41  ;;  %v1084_v41 = vld [vmem:[%s7454_s22 + $0x1a38] sm:$0xff]  ;;  %v6342_v43 = vpack.c.bf16 %v1075_v37, %v1071_v34  ;;  %v1105_v27 = vld [vmem:[%s7454_s22 + $0x1ae0] sm:$0xff]  ;;  %v1138_v13 = vld [vmem:[%s7454_s22 + $0x1be8] sm:$0xff] }
 0x203   : > { %v1112_v34 = vld [vmem:[%s7454_s22 + $0x1b18] sm:$0xff]  ;;  %v5334_v37 = vpack.c.bf16 %v1105_v27, %v1101_v26  ;;  %v5348_v18 = vpack.c.bf16 %v1138_v13, %v1134_v12  ;;  %v1142_v26 = vld [vmem:[%s7454_s22 + $0x1c08] sm:$0xff] }
 0x204   : > { %5303 = vmatpush1.bf16.msra.mxu0 %v5302_v49  ;;  %v1079_v49 = vld [vmem:[%s7454_s22 + $0x1a10] sm:$0xff]  ;;  %v1146_v27 = vld [vmem:[%s7454_s22 + $0x1c28] sm:$0xff]  ;;  %v1164_v58 = vld [vmem:[%s7454_s22 + $0x1cb8] sm:$0xff] }
 0x205   : > { %6327 = vmatpush1.bf16.msra.mxu1 %v6326_v50  ;;  %5305 = vmatprep.subr.bf16.mxu0 %v5304_v52  ;;  %v6344_v50 = vpack.c.bf16 %v1084_v41, %v1080_v40  ;;  %v1083_v52 = vld [vmem:[%s7454_s22 + $0x1a30] sm:$0xff]  ;;  %v1109_v40 = vld [vmem:[%s7454_s22 + $0x1b00] sm:$0xff]  ;;  %v5352_v32 = vpack.c.bf16 %v1146_v27, %v1142_v26 }
 0x206   : > { %6329 = vmatprep.subr.bf16.mxu1 %v6328_v55  ;;  %v1092_v55 = vld [vmem:[%s7454_s22 + $0x1a78] sm:$0xff]  ;;  %v6346_v57 = vpack.c.bf16 %v1083_v52, %v1079_v49  ;;  %v1113_v41 = vld [vmem:[%s7454_s22 + $0x1b20] sm:$0xff] }
 0x207   : > { %v1120_v49 = vld [vmem:[%s7454_s22 + $0x1b58] sm:$0xff]  ;;  %v5338_v52 = vpack.c.bf16 %v1113_v41, %v1109_v40  ;;  %v1150_v40 = vld [vmem:[%s7454_s22 + $0x1c48] sm:$0xff] }
 0x208   : > { %5307 = vmatpush1.bf16.msra.mxu0 %v5306_v62  ;;  %v1087_v62 = vld [vmem:[%s7454_s22 + $0x1a50] sm:$0xff]  ;;  %v1154_v41 = vld [vmem:[%s7454_s22 + $0x1c68] sm:$0xff] }
 0x209   : > { %6331 = vmatpush1.bf16.msra.mxu1 %v6330_v0  ;;  %5309 = vmatprep.subr.bf16.mxu0 %v5308_v1  ;;  %v6348_v0 = vpack.c.bf16 %v1092_v55, %v1088_v54  ;;  %v1091_v1 = vld [vmem:[%s7454_s22 + $0x1a70] sm:$0xff]  ;;  %v1117_v54 = vld [vmem:[%s7454_s22 + $0x1b40] sm:$0xff] }
 0x20a   : > { %6333 = vmatprep.subr.bf16.mxu1 %v6332_v19  ;;  %v1100_v19 = vld [vmem:[%s7454_s22 + $0x1ab8] sm:$0xff]  ;;  %v6350_v9 = vpack.c.bf16 %v1091_v1, %v1087_v62  ;;  %v1121_v55 = vld [vmem:[%s7454_s22 + $0x1b60] sm:$0xff] }
 0x20b   : > { %v1128_v62 = vld [vmem:[%s7454_s22 + $0x1b98] sm:$0xff]  ;;  %v5342_v1 = vpack.c.bf16 %v1121_v55, %v1117_v54  ;;  %v1155_v54 = vld [vmem:[%s7454_s22 + $0x1c70] sm:$0xff]  ;;  %v1158_v55 = vld [vmem:[%s7454_s22 + $0x1c88] sm:$0xff] }
 0x20c   : > { %5311 = vmatpush1.bf16.msra.mxu0 %v5310_v14  ;;  %v1095_v14 = vld [vmem:[%s7454_s22 + $0x1a90] sm:$0xff] }
 0x20d   : > { %6335 = vmatpush1.bf16.msra.mxu1 %v6334_v15  ;;  %5313 = vmatprep.subr.bf16.mxu0 %v5312_v16  ;;  %v6352_v15 = vpack.c.bf16 %v1100_v19, %v1096_v4  ;;  %v1099_v16 = vld [vmem:[%s7454_s22 + $0x1ab0] sm:$0xff]  ;;  %v1125_v4 = vld [vmem:[%s7454_s22 + $0x1b80] sm:$0xff] }
 0x20e   : > { %6337 = vmatprep.subr.bf16.mxu1 %v6336_v21  ;;  %v1108_v21 = vld [vmem:[%s7454_s22 + $0x1af8] sm:$0xff]  ;;  %v6354_v24 = vpack.c.bf16 %v1099_v16, %v1095_v14  ;;  %v1129_v19 = vld [vmem:[%s7454_s22 + $0x1ba0] sm:$0xff] }
 0x20f   : > { %v1136_v14 = vld [vmem:[%s7454_s22 + $0x1bd8] sm:$0xff]  ;;  %v5346_v16 = vpack.c.bf16 %v1129_v19, %v1125_v4  ;;  %v1163_v4 = vld [vmem:[%s7454_s22 + $0x1cb0] sm:$0xff]  ;;  %v1166_v19 = vld [vmem:[%s7454_s22 + $0x1cc8] sm:$0xff] }
 0x210   : > { %5315 = vmatpush1.bf16.msra.mxu0 %v5314_v28  ;;  %v1103_v28 = vld [vmem:[%s7454_s22 + $0x1ad0] sm:$0xff] }
 0x211   : > { %6339 = vmatpush1.bf16.msra.mxu1 %v6338_v29  ;;  %5317 = vmatprep.subr.bf16.mxu0 %v5316_v30  ;;  %v6356_v29 = vpack.c.bf16 %v1108_v21, %v1104_v20  ;;  %v1107_v30 = vld [vmem:[%s7454_s22 + $0x1af0] sm:$0xff]  ;;  %v1133_v20 = vld [vmem:[%s7454_s22 + $0x1bc0] sm:$0xff] }
 0x212   : > { %6341 = vmatprep.subr.bf16.mxu1 %v6340_v36  ;;  %v1116_v36 = vld [vmem:[%s7454_s22 + $0x1b38] sm:$0xff]  ;;  %v6358_v38 = vpack.c.bf16 %v1107_v30, %v1103_v28  ;;  %v1137_v21 = vld [vmem:[%s7454_s22 + $0x1be0] sm:$0xff] }
 0x213   : > { %v1144_v28 = vld [vmem:[%s7454_s22 + $0x1c18] sm:$0xff]  ;;  %v5350_v30 = vpack.c.bf16 %v1137_v21, %v1133_v20  ;;  %v1171_v20 = vld [vmem:[%s7454_s22 + $0x1cf0] sm:$0xff]  ;;  %v1174_v21 = vld [vmem:[%s7454_s22 + $0x1d08] sm:$0xff] }
 0x214   : > { %5319 = vmatpush1.bf16.msra.mxu0 %v5318_v42  ;;  %v1111_v42 = vld [vmem:[%s7454_s22 + $0x1b10] sm:$0xff] }
 0x215   : > { %6343 = vmatpush1.bf16.msra.mxu1 %v6342_v43  ;;  %5321 = vmatprep.subr.bf16.mxu0 %v5320_v45  ;;  %v6360_v43 = vpack.c.bf16 %v1116_v36, %v1112_v34  ;;  %v1115_v45 = vld [vmem:[%s7454_s22 + $0x1b30] sm:$0xff]  ;;  %v1141_v34 = vld [vmem:[%s7454_s22 + $0x1c00] sm:$0xff] }
 0x216   : > { %6345 = vmatprep.subr.bf16.mxu1 %v6344_v50  ;;  %v1124_v50 = vld [vmem:[%s7454_s22 + $0x1b78] sm:$0xff]  ;;  %v6362_v51 = vpack.c.bf16 %v1115_v45, %v1111_v42  ;;  %v1145_v36 = vld [vmem:[%s7454_s22 + $0x1c20] sm:$0xff]  ;;  %v2348_v42 = vrot.slane %v8293_v63, %v7879_v60 }
 0x217   : > { %v1156_v45 = vld [vmem:[%s7454_s22 + $0x1c78] sm:$0xff]  ;;  %v5354_v47 = vpack.c.bf16 %v1145_v36, %v1141_v34  ;;  %v1179_v34 = vld [vmem:[%s7454_s22 + $0x1d30] sm:$0xff]  ;;  %v1182_v36 = vld [vmem:[%s7454_s22 + $0x1d48] sm:$0xff] }
 0x218   : > { %5323 = vmatpush1.bf16.msra.mxu0 %v5322_v56  ;;  %v1119_v56 = vld [vmem:[%s7454_s22 + $0x1b50] sm:$0xff] }
 0x219   : > { %6347 = vmatpush1.bf16.msra.mxu1 %v6346_v57  ;;  %5325 = vmatprep.subr.bf16.mxu0 %v5324_v7  ;;  %v6364_v57 = vpack.c.bf16 %v1124_v50, %v1120_v49  ;;  %v1123_v7 = vld [vmem:[%s7454_s22 + $0x1b70] sm:$0xff]  ;;  %v5356_v49 = vpack.c.bf16 %v1154_v41, %v1150_v40  ;;  %v1149_v50 = vld [vmem:[%s7454_s22 + $0x1c40] sm:$0xff] }
 0x21a   : > { %6349 = vmatprep.subr.bf16.mxu1 %v6348_v0  ;;  %v1132_v0 = vld [vmem:[%s7454_s22 + $0x1bb8] sm:$0xff]  ;;  %v6366_v2 = vpack.c.bf16 %v1123_v7, %v1119_v56  ;;  %v1162_v56 = vld [vmem:[%s7454_s22 + $0x1ca8] sm:$0xff] }
 0x21b   : > { %v1160_v7 = vld [vmem:[%s7454_s22 + $0x1c98] sm:$0xff] }
 0x21c   : > { %5327 = vmatpush1.bf16.msra.mxu0 %v5326_v5  ;;  %v1127_v5 = vld [vmem:[%s7454_s22 + $0x1b90] sm:$0xff] }
 0x21d   : > { %6351 = vmatpush1.bf16.msra.mxu1 %v6350_v9  ;;  %5329 = vmatprep.subr.bf16.mxu0 %v5328_v11  ;;  %v6368_v9 = vpack.c.bf16 %v1132_v0, %v1128_v62  ;;  %v1131_v11 = vld [vmem:[%s7454_s22 + $0x1bb0] sm:$0xff]  ;;  %v5360_v0 = vpack.c.bf16 %v1162_v56, %v1158_v55 }
 0x21e   : > { %6353 = vmatprep.subr.bf16.mxu1 %v6352_v15  ;;  %v1140_v15 = vld [vmem:[%s7454_s22 + $0x1bf8] sm:$0xff]  ;;  %v6370_v17 = vpack.c.bf16 %v1131_v11, %v1127_v5  ;;  %v1170_v5 = vld [vmem:[%s7454_s22 + $0x1ce8] sm:$0xff] }
 0x21f   : > { %v1172_v11 = vld [vmem:[%s7454_s22 + $0x1cf8] sm:$0xff] }
 0x220   : > { %5331 = vmatpush1.bf16.msra.mxu0 %v5330_v23  ;;  %v1135_v23 = vld [vmem:[%s7454_s22 + $0x1bd0] sm:$0xff] }
 0x221   : > { %6355 = vmatpush1.bf16.msra.mxu1 %v6354_v24  ;;  %5333 = vmatprep.subr.bf16.mxu0 %v5332_v25  ;;  %v6372_v24 = vpack.c.bf16 %v1140_v15, %v1136_v14  ;;  %v1139_v25 = vld [vmem:[%s7454_s22 + $0x1bf0] sm:$0xff]  ;;  %v5364_v14 = vpack.c.bf16 %v1170_v5, %v1166_v19  ;;  %v1165_v15 = vld [vmem:[%s7454_s22 + $0x1cc0] sm:$0xff] }
 0x222   : > { %6357 = vmatprep.subr.bf16.mxu1 %v6356_v29  ;;  %v1148_v29 = vld [vmem:[%s7454_s22 + $0x1c38] sm:$0xff]  ;;  %v6374_v31 = vpack.c.bf16 %v1139_v25, %v1135_v23  ;;  %v1178_v23 = vld [vmem:[%s7454_s22 + $0x1d28] sm:$0xff]  ;;  %v1197_v5 = vld [vmem:[%s7454_s22 + $0x1dc0] sm:$0xff] }
 0x223   : > { %v1180_v25 = vld [vmem:[%s7454_s22 + $0x1d38] sm:$0xff] }
 0x224   : > { %5335 = vmatpush1.bf16.msra.mxu0 %v5334_v37  ;;  %v1143_v37 = vld [vmem:[%s7454_s22 + $0x1c10] sm:$0xff] }
 0x225   : > { %6359 = vmatpush1.bf16.msra.mxu1 %v6358_v38  ;;  %5337 = vmatprep.subr.bf16.mxu0 %v5336_v39  ;;  %v6376_v38 = vpack.c.bf16 %v1148_v29, %v1144_v28  ;;  %v1147_v39 = vld [vmem:[%s7454_s22 + $0x1c30] sm:$0xff]  ;;  %v5368_v28 = vpack.c.bf16 %v1178_v23, %v1174_v21  ;;  %v1173_v29 = vld [vmem:[%s7454_s22 + $0x1d00] sm:$0xff] }
 0x226   : > { %6361 = vmatprep.subr.bf16.mxu1 %v6360_v43  ;;  %v1152_v43 = vld [vmem:[%s7454_s22 + $0x1c58] sm:$0xff]  ;;  %v6378_v48 = vpack.c.bf16 %v1147_v39, %v1143_v37  ;;  %v1186_v37 = vld [vmem:[%s7454_s22 + $0x1d68] sm:$0xff]  ;;  %v1205_v23 = vld [vmem:[%s7454_s22 + $0x1e00] sm:$0xff] }
 0x227   : > { %v1188_v39 = vld [vmem:[%s7454_s22 + $0x1d78] sm:$0xff] }
 0x228   : > { %5339 = vmatpush1.bf16.msra.mxu0 %v5338_v52  ;;  %v1153_v52 = vld [vmem:[%s7454_s22 + $0x1c60] sm:$0xff] }
 0x229   : > { %6363 = vmatpush1.bf16.msra.mxu1 %v6362_v51  ;;  %5341 = vmatprep.subr.bf16.mxu0 %v5340_v53  ;;  %v1151_v51 = vld [vmem:[%s7454_s22 + $0x1c50] sm:$0xff]  ;;  %v6380_v53 = vpack.c.bf16 %v1156_v45, %v1152_v43  ;;  %v5358_v61 = vpack.c.bf16 %v1153_v52, %v1149_v50  ;;  %v1181_v43 = vld [vmem:[%s7454_s22 + $0x1d40] sm:$0xff]  ;;  %v1190_v50 = vld [vmem:[%s7454_s22 + $0x1d88] sm:$0xff] }
 0x22a   : > { %6365 = vmatprep.subr.bf16.mxu1 %v6364_v57  ;;  %v2360_v57 = vrot.slane %v8293_v63, %v7888_v6  ;;  %v6382_v62 = vpack.c.bf16 %v1155_v54, %v1151_v51  ;;  %v6384_v63 = vpack.c.bf16 %v1164_v58, %v1160_v7  ;;  %v1185_v45 = vld [vmem:[%s7454_s22 + $0x1d60] sm:$0xff]  ;;  %v1194_v52 = vld [vmem:[%s7454_s22 + $0x1da8] sm:$0xff]  ;;  %v1192_v51 = vld [vmem:[%s7454_s22 + $0x1d98] sm:$0xff] }
 0x22b   : > { %v5374_v54 = vpack.c.bf16 %v1185_v45, %v1181_v43  ;;  %v5376_v56 = vpack.c.bf16 %v1194_v52, %v1190_v50  ;;  %v1193_v7 = vld [vmem:[%s7454_s22 + $0x1da0] sm:$0xff]  ;;  %v1191_v58 = vld [vmem:[%s7454_s22 + $0x1d90] sm:$0xff]  ;;  %v1226_v43 = vld [vmem:[%s7454_s22 + $0x1ea8] sm:$0xff] }
 0x22c   : > { %5343 = vmatpush1.bf16.msra.mxu0 %v5342_v1  ;;  %v1157_v1 = vld [vmem:[%s7454_s22 + $0x1c80] sm:$0xff]  ;;  %v1224_v45 = vld [vmem:[%s7454_s22 + $0x1e98] sm:$0xff] }
 0x22d   : > { %6367 = vmatpush1.bf16.msra.mxu1 %v6366_v2  ;;  %5345 = vmatprep.subr.bf16.mxu0 %v5344_v3  ;;  %v1161_v2 = vld [vmem:[%s7454_s22 + $0x1ca0] sm:$0xff]  ;;  %v1159_v3 = vld [vmem:[%s7454_s22 + $0x1c90] sm:$0xff] }
 0x22e   : > { %6369 = vmatprep.subr.bf16.mxu1 %v6368_v9  ;;  %v1168_v9 = vld [vmem:[%s7454_s22 + $0x1cd8] sm:$0xff]  ;;  %v5362_v12 = vpack.c.bf16 %v1161_v2, %v1157_v1  ;;  %v6386_v13 = vpack.c.bf16 %v1163_v4, %v1159_v3  ;;  %v1202_v1 = vld [vmem:[%s7454_s22 + $0x1de8] sm:$0xff]  ;;  %v1221_v52 = vld [vmem:[%s7454_s22 + $0x1e80] sm:$0xff] }
 0x22f   : > { %v1200_v2 = vld [vmem:[%s7454_s22 + $0x1dd8] sm:$0xff] }
 0x230   : > { %5347 = vmatpush1.bf16.msra.mxu0 %v5346_v16  ;;  %v1169_v16 = vld [vmem:[%s7454_s22 + $0x1ce0] sm:$0xff]  ;;  %v1204_v3 = vld [vmem:[%s7454_s22 + $0x1df8] sm:$0xff] }
 0x231   : > { %6371 = vmatpush1.bf16.msra.mxu1 %v6370_v17  ;;  %5349 = vmatprep.subr.bf16.mxu0 %v5348_v18  ;;  %v1167_v17 = vld [vmem:[%s7454_s22 + $0x1cd0] sm:$0xff]  ;;  %v6388_v18 = vpack.c.bf16 %v1172_v11, %v1168_v9  ;;  %v5366_v26 = vpack.c.bf16 %v1169_v16, %v1165_v15  ;;  %v1201_v9 = vld [vmem:[%s7454_s22 + $0x1de0] sm:$0xff]  ;;  %v1210_v15 = vld [vmem:[%s7454_s22 + $0x1e28] sm:$0xff] }
 0x232   : > { %6373 = vmatprep.subr.bf16.mxu1 %v6372_v24  ;;  %v1176_v24 = vld [vmem:[%s7454_s22 + $0x1d18] sm:$0xff]  ;;  %v6390_v27 = vpack.c.bf16 %v1171_v20, %v1167_v17  ;;  %v1199_v11 = vld [vmem:[%s7454_s22 + $0x1dd0] sm:$0xff] }
 0x233   : > { %v1208_v16 = vld [vmem:[%s7454_s22 + $0x1e18] sm:$0xff] }
 0x234   : > { %5351 = vmatpush1.bf16.msra.mxu0 %v5350_v30  ;;  %v1177_v30 = vld [vmem:[%s7454_s22 + $0x1d20] sm:$0xff]  ;;  %v1212_v17 = vld [vmem:[%s7454_s22 + $0x1e38] sm:$0xff] }
 0x235   : > { %6375 = vmatpush1.bf16.msra.mxu1 %v6374_v31  ;;  %5353 = vmatprep.subr.bf16.mxu0 %v5352_v32  ;;  %v1175_v31 = vld [vmem:[%s7454_s22 + $0x1d10] sm:$0xff]  ;;  %v6392_v32 = vpack.c.bf16 %v1180_v25, %v1176_v24  ;;  %v5370_v40 = vpack.c.bf16 %v1177_v30, %v1173_v29  ;;  %v1209_v24 = vld [vmem:[%s7454_s22 + $0x1e20] sm:$0xff]  ;;  %v1218_v29 = vld [vmem:[%s7454_s22 + $0x1e68] sm:$0xff] }
 0x236   : > { %6377 = vmatprep.subr.bf16.mxu1 %v6376_v38  ;;  %v1184_v38 = vld [vmem:[%s7454_s22 + $0x1d58] sm:$0xff]  ;;  %v6394_v41 = vpack.c.bf16 %v1179_v34, %v1175_v31  ;;  %v1207_v25 = vld [vmem:[%s7454_s22 + $0x1e10] sm:$0xff] }
 0x237   : > { %2948 = vmatmul.mubr.f32.vlgmr.msra.gmra.mrb[0].mxu0 %v2348_v42  ;;  %v1216_v30 = vld [vmem:[%s7454_s22 + $0x1e58] sm:$0xff] }
 0x238   : > { %5355 = vmatpush1.bf16.msra.mxu0 %v5354_v47  ;;  %4084 = vmatmul.mubr.f32.vlgmr.msra.gmra.mrb[0].mxu1 %v2348_v42  ;;  %v5372_v42 = vpack.c.bf16 %v1186_v37, %v1182_v36  ;;  %v1183_v47 = vld [vmem:[%s7454_s22 + $0x1d50] sm:$0xff]  ;;  %v1220_v31 = vld [vmem:[%s7454_s22 + $0x1e78] sm:$0xff]  ;;  %v1213_v37 = vld [vmem:[%s7454_s22 + $0x1e40] sm:$0xff] }
 0x239   : > { %6379 = vmatpush1.bf16.msra.mxu1 %v6378_v48  ;;  %5357 = vmatprep.subr.bf16.mxu0 %v5356_v49  ;;  %v6396_v48 = vpack.c.bf16 %v1188_v39, %v1184_v38  ;;  %v1187_v49 = vld [vmem:[%s7454_s22 + $0x1d70] sm:$0xff]  ;;  %v1217_v38 = vld [vmem:[%s7454_s22 + $0x1e60] sm:$0xff] }
 0x23a   : > { %6381 = vmatprep.subr.bf16.mxu1 %v6380_v53  ;;  %3018 = vmatprep.mubr.f32.mxu0 %v2360_v57  ;;  %v1196_v53 = vld [vmem:[%s7454_s22 + $0x1db8] sm:$0xff]  ;;  %v6398_v55 = vpack.c.bf16 %v1187_v49, %v1183_v47  ;;  %v1215_v39 = vld [vmem:[%s7454_s22 + $0x1e50] sm:$0xff] }
 0x23b   : > { %4154 = vmatprep.mubr.f32.mxu1 %v2360_v57  ;;  %v1189_v57 = vld [vmem:[%s7454_s22 + $0x1d80] sm:$0xff]  ;;  %v1228_v47 = vld [vmem:[%s7454_s22 + $0x1eb8] sm:$0xff] }
 0x23c   : > { %5359 = vmatpush1.bf16.msra.mxu0 %v5358_v61  ;;  %v6400_v61 = vpack.c.bf16 %v1196_v53, %v1192_v51  ;;  %v1225_v51 = vld [vmem:[%s7454_s22 + $0x1ea0] sm:$0xff]  ;;  %v1223_v53 = vld [vmem:[%s7454_s22 + $0x1e90] sm:$0xff] }
 0x23d   : > { %6383 = vmatpush1.bf16.msra.mxu1 %v6382_v62  ;;  %5361 = vmatprep.subr.bf16.mxu0 %v5360_v0  ;;  %v1195_v62 = vld [vmem:[%s7454_s22 + $0x1db0] sm:$0xff]  ;;  %v1198_v0 = vld [vmem:[%s7454_s22 + $0x1dc8] sm:$0xff] }
 0x23e   : > { %6385 = vmatprep.subr.bf16.mxu1 %v6384_v63  ;;  %v5378_v63 = vpack.c.bf16 %v1193_v7, %v1189_v57  ;;  %v6402_v4 = vpack.c.bf16 %v1195_v62, %v1191_v58  ;;  %v5380_v19 = vpack.c.bf16 %v1202_v1, %v1198_v0  ;;  %v1234_v57 = vld [vmem:[%s7454_s22 + $0x1ee8] sm:$0xff]  ;;  %v1232_v7 = vld [vmem:[%s7454_s22 + $0x1ed8] sm:$0xff]  ;;  %v1229_v1 = vld [vmem:[%s7454_s22 + $0x1ec0] sm:$0xff] }
 0x23f   : > { %v1236_v58 = vld [vmem:[%s7454_s22 + $0x1ef8] sm:$0xff] }
 0x240   : > { %5363 = vmatpush1.bf16.msra.mxu0 %v5362_v12  ;;  %v6404_v12 = vpack.c.bf16 %v1204_v3, %v1200_v2  ;;  %v1233_v2 = vld [vmem:[%s7454_s22 + $0x1ee0] sm:$0xff]  ;;  %v1231_v3 = vld [vmem:[%s7454_s22 + $0x1ed0] sm:$0xff] }
 0x241   : > { %6387 = vmatpush1.bf16.msra.mxu1 %v6386_v13  ;;  %5365 = vmatprep.subr.bf16.mxu0 %v5364_v14  ;;  %v1203_v13 = vld [vmem:[%s7454_s22 + $0x1df0] sm:$0xff]  ;;  %v1206_v14 = vld [vmem:[%s7454_s22 + $0x1e08] sm:$0xff] }
 0x242   : > { %6389 = vmatprep.subr.bf16.mxu1 %v6388_v18  ;;  %v5382_v18 = vpack.c.bf16 %v1201_v9, %v1197_v5  ;;  %v6406_v20 = vpack.c.bf16 %v1203_v13, %v1199_v11  ;;  %v5384_v21 = vpack.c.bf16 %v1210_v15, %v1206_v14  ;;  %v1242_v5 = vld [vmem:[%s7454_s22 + $0x1f28] sm:$0xff]  ;;  %v1240_v9 = vld [vmem:[%s7454_s22 + $0x1f18] sm:$0xff]  ;;  %v1237_v15 = vld [vmem:[%s7454_s22 + $0x1f00] sm:$0xff] }
 0x243   : > { %v1244_v11 = vld [vmem:[%s7454_s22 + $0x1f38] sm:$0xff] }
 0x244   : > { %5367 = vmatpush1.bf16.msra.mxu0 %v5366_v26  ;;  %v6408_v26 = vpack.c.bf16 %v1212_v17, %v1208_v16  ;;  %v1241_v16 = vld [vmem:[%s7454_s22 + $0x1f20] sm:$0xff]  ;;  %v1239_v17 = vld [vmem:[%s7454_s22 + $0x1f10] sm:$0xff] }
 0x245   : > { %6391 = vmatpush1.bf16.msra.mxu1 %v6390_v27  ;;  %5369 = vmatprep.subr.bf16.mxu0 %v5368_v28  ;;  %v1211_v27 = vld [vmem:[%s7454_s22 + $0x1e30] sm:$0xff]  ;;  %v1214_v28 = vld [vmem:[%s7454_s22 + $0x1e48] sm:$0xff] }
 0x246   : > { %6393 = vmatprep.subr.bf16.mxu1 %v6392_v32  ;;  %v5386_v32 = vpack.c.bf16 %v1209_v24, %v1205_v23  ;;  %v6410_v34 = vpack.c.bf16 %v1211_v27, %v1207_v25  ;;  %v5388_v36 = vpack.c.bf16 %v1218_v29, %v1214_v28  ;;  %v1250_v23 = vld [vmem:[%s7454_s22 + $0x1f68] sm:$0xff]  ;;  %v1248_v24 = vld [vmem:[%s7454_s22 + $0x1f58] sm:$0xff]  ;;  %v1245_v29 = vld [vmem:[%s7454_s22 + $0x1f40] sm:$0xff] }
 0x247   : > { %v1252_v25 = vld [vmem:[%s7454_s22 + $0x1f78] sm:$0xff] }
 0x248   : > { %5371 = vmatpush1.bf16.msra.mxu0 %v5370_v40  ;;  %v6412_v40 = vpack.c.bf16 %v1220_v31, %v1216_v30  ;;  %v1249_v30 = vld [vmem:[%s7454_s22 + $0x1f60] sm:$0xff]  ;;  %v1247_v31 = vld [vmem:[%s7454_s22 + $0x1f50] sm:$0xff] }
 0x249   : > { %6395 = vmatpush1.bf16.msra.mxu1 %v6394_v41  ;;  %5373 = vmatprep.subr.bf16.mxu0 %v5372_v42  ;;  %v1219_v41 = vld [vmem:[%s7454_s22 + $0x1e70] sm:$0xff]  ;;  %v1222_v42 = vld [vmem:[%s7454_s22 + $0x1e88] sm:$0xff] }
 0x24a   : > { %6397 = vmatprep.subr.bf16.mxu1 %v6396_v48  ;;  %v5390_v48 = vpack.c.bf16 %v1217_v38, %v1213_v37  ;;  %v6414_v49 = vpack.c.bf16 %v1219_v41, %v1215_v39  ;;  %v5392_v50 = vpack.c.bf16 %v1226_v43, %v1222_v42  ;;  %v1258_v37 = vld [vmem:[%s7454_s22 + $0x1fa8] sm:$0xff]  ;;  %v1256_v38 = vld [vmem:[%s7454_s22 + $0x1f98] sm:$0xff]  ;;  %v1253_v43 = vld [vmem:[%s7454_s22 + $0x1f80] sm:$0xff] }
 0x24b   : > { %v1260_v39 = vld [vmem:[%s7454_s22 + $0x1fb8] sm:$0xff] }
 0x24c   : > { %5375 = vmatpush1.bf16.msra.mxu0 %v5374_v54  ;;  %v6416_v54 = vpack.c.bf16 %v1228_v47, %v1224_v45  ;;  %v1257_v45 = vld [vmem:[%s7454_s22 + $0x1fa0] sm:$0xff]  ;;  %v1255_v47 = vld [vmem:[%s7454_s22 + $0x1f90] sm:$0xff] }
 0x24d   : > { %6399 = vmatpush1.bf16.msra.mxu1 %v6398_v55  ;;  %5377 = vmatprep.subr.bf16.mxu0 %v5376_v56  ;;  %v1227_v55 = vld [vmem:[%s7454_s22 + $0x1eb0] sm:$0xff]  ;;  %v1230_v56 = vld [vmem:[%s7454_s22 + $0x1ec8] sm:$0xff] }
 0x24e   : > { %6401 = vmatprep.subr.bf16.mxu1 %v6400_v61  ;;  %v5394_v61 = vpack.c.bf16 %v1225_v51, %v1221_v52  ;;  %v6418_v62 = vpack.c.bf16 %v1227_v55, %v1223_v53  ;;  %v5396_v0 = vpack.c.bf16 %v1234_v57, %v1230_v56  ;;  %v1266_v52 = vld [vmem:[%s7454_s22 + $0x1fe8] sm:$0xff]  ;;  %v1264_v51 = vld [vmem:[%s7454_s22 + $0x1fd8] sm:$0xff]  ;;  %v1261_v57 = vld [vmem:[%s7454_s22 + $0x1fc0] sm:$0xff] }
 0x24f   : > { %v1268_v53 = vld [vmem:[%s7454_s22 + $0x1ff8] sm:$0xff] }
 0x250   : > { %5379 = vmatpush1.bf16.msra.mxu0 %v5378_v63  ;;  %v6420_v63 = vpack.c.bf16 %v1236_v58, %v1232_v7  ;;  %v1265_v7 = vld [vmem:[%s7454_s22 + $0x1fe0] sm:$0xff]  ;;  %v1263_v58 = vld [vmem:[%s7454_s22 + $0x1fd0] sm:$0xff] }
 0x251   : > { %6403 = vmatpush1.bf16.msra.mxu1 %v6402_v4  ;;  %5381 = vmatprep.subr.bf16.mxu0 %v5380_v19  ;;  %v1235_v4 = vld [vmem:[%s7454_s22 + $0x1ef0] sm:$0xff]  ;;  %v1238_v19 = vld [vmem:[%s7454_s22 + $0x1f08] sm:$0xff] }
 0x252   : > { %6405 = vmatprep.subr.bf16.mxu1 %v6404_v12  ;;  %v5398_v12 = vpack.c.bf16 %v1233_v2, %v1229_v1  ;;  %v6422_v13 = vpack.c.bf16 %v1235_v4, %v1231_v3  ;;  %v5400_v14 = vpack.c.bf16 %v1242_v5, %v1238_v19  ;;  %v1274_v1 = vld [vmem:[%s7454_s22 + $0x2028] sm:$0xff]  ;;  %v1272_v2 = vld [vmem:[%s7454_s22 + $0x2018] sm:$0xff]  ;;  %v1269_v5 = vld [vmem:[%s7454_s22 + $0x2000] sm:$0xff] }
 0x253   : > { %v1276_v3 = vld [vmem:[%s7454_s22 + $0x2038] sm:$0xff] }
 0x254   : > { %5383 = vmatpush1.bf16.msra.mxu0 %v5382_v18  ;;  %v6424_v18 = vpack.c.bf16 %v1244_v11, %v1240_v9  ;;  %v1273_v9 = vld [vmem:[%s7454_s22 + $0x2020] sm:$0xff]  ;;  %v1271_v11 = vld [vmem:[%s7454_s22 + $0x2010] sm:$0xff] }
 0x255   : > { %6407 = vmatpush1.bf16.msra.mxu1 %v6406_v20  ;;  %5385 = vmatprep.subr.bf16.mxu0 %v5384_v21  ;;  %v1243_v20 = vld [vmem:[%s7454_s22 + $0x1f30] sm:$0xff]  ;;  %v1246_v21 = vld [vmem:[%s7454_s22 + $0x1f48] sm:$0xff] }
 0x256   : > { %6409 = vmatprep.subr.bf16.mxu1 %v6408_v26  ;;  %v5402_v26 = vpack.c.bf16 %v1241_v16, %v1237_v15  ;;  %v6426_v27 = vpack.c.bf16 %v1243_v20, %v1239_v17  ;;  %v5404_v28 = vpack.c.bf16 %v1250_v23, %v1246_v21  ;;  %v1282_v15 = vld [vmem:[%s7454_s22 + $0x2068] sm:$0xff]  ;;  %v1284_v20 = vld [vmem:[%s7454_s22 + $0x2078] sm:$0xff]  ;;  %v8562_v21 = vld [vmem:[#allocation2 + $0x10] sm:$0xff]  ;;  %v5418_v23 = vpack.c.bf16 %v1273_v9, %v1269_v5 }
 0x257   : > { %v7080_v16 = vld [vmem:[#allocation2 + $0x8] sm:$0xff]  ;;  %v1303_v5 = vld [vmem:[%s7454_s22 + $0x2110] sm:$0xff] }
 0x258   : > { %5387 = vmatpush1.bf16.msra.mxu0 %v5386_v32  ;;  %v6428_v32 = vpack.c.bf16 %v1252_v25, %v1248_v24  ;;  %v2356_v17 = vrot.slane %v7080_v16, %v8019_v35 }
 0x259   : > { %6411 = vmatpush1.bf16.msra.mxu1 %v6410_v34  ;;  %5389 = vmatprep.subr.bf16.mxu0 %v5388_v36  ;;  %v1251_v34 = vld [vmem:[%s7454_s22 + $0x1f70] sm:$0xff]  ;;  %v1254_v36 = vld [vmem:[%s7454_s22 + $0x1f88] sm:$0xff] }
 0x25a   : > { %6413 = vmatprep.subr.bf16.mxu1 %v6412_v40  ;;  %v5406_v40 = vpack.c.bf16 %v1249_v30, %v1245_v29  ;;  %v6430_v41 = vpack.c.bf16 %v1251_v34, %v1247_v31  ;;  %v5408_v42 = vpack.c.bf16 %v1258_v37, %v1254_v36  ;;  %v1283_v30 = vld [vmem:[%s7454_s22 + $0x2070] sm:$0xff]  ;;  %v1286_v31 = vld [vmem:[%s7454_s22 + $0x2088] sm:$0xff]  ;;  %v2368_v34 = vrot.slane %v8562_v21, %v7556_v8  ;;  %v1288_v36 = vld [vmem:[%s7454_s22 + $0x2098] sm:$0xff] }
 0x25b   : > { %v1292_v37 = vld [vmem:[%s7454_s22 + $0x20b8] sm:$0xff] }
 0x25c   : > { %5391 = vmatpush1.bf16.msra.mxu0 %v5390_v48  ;;  %v6432_v48 = vpack.c.bf16 %v1260_v39, %v1256_v38 }
 0x25d   : > { %6415 = vmatpush1.bf16.msra.mxu1 %v6414_v49  ;;  %5393 = vmatprep.subr.bf16.mxu0 %v5392_v50  ;;  %v1259_v49 = vld [vmem:[%s7454_s22 + $0x1fb0] sm:$0xff]  ;;  %v1262_v50 = vld [vmem:[%s7454_s22 + $0x1fc8] sm:$0xff] }
 0x25e   : > { %6417 = vmatprep.subr.bf16.mxu1 %v6416_v54  ;;  %v5410_v54 = vpack.c.bf16 %v1257_v45, %v1253_v43  ;;  %v6434_v55 = vpack.c.bf16 %v1259_v49, %v1255_v47  ;;  %v5412_v56 = vpack.c.bf16 %v1266_v52, %v1262_v50  ;;  %v1287_v43 = vld [vmem:[%s7454_s22 + $0x2090] sm:$0xff]  ;;  %v6448_v45 = vpack.c.bf16 %v1292_v37, %v1288_v36  ;;  %v1298_v49 = vld [vmem:[%s7454_s22 + $0x20e8] sm:$0xff]  ;;  %v1296_v50 = vld [vmem:[%s7454_s22 + $0x20d8] sm:$0xff] }
 0x25f   : > { %v1291_v47 = vld [vmem:[%s7454_s22 + $0x20b0] sm:$0xff]  ;;  %v1300_v52 = vld [vmem:[%s7454_s22 + $0x20f8] sm:$0xff]  ;;  %v1317_v36 = vld [vmem:[%s7454_s22 + $0x2180] sm:$0xff] }
 0x260   : > { %5395 = vmatpush1.bf16.msra.mxu0 %v5394_v61  ;;  %v6436_v61 = vpack.c.bf16 %v1268_v53, %v1264_v51  ;;  %v6450_v53 = vpack.c.bf16 %v1291_v47, %v1287_v43  ;;  %v1321_v37 = vld [vmem:[%s7454_s22 + $0x21a0] sm:$0xff]  ;;  %v1328_v43 = vld [vmem:[%s7454_s22 + $0x21d8] sm:$0xff] }
 0x261   : > { %6419 = vmatpush1.bf16.msra.mxu1 %v6418_v62  ;;  %5397 = vmatprep.subr.bf16.mxu0 %v5396_v0  ;;  %v1267_v62 = vld [vmem:[%s7454_s22 + $0x1ff0] sm:$0xff]  ;;  %v1270_v0 = vld [vmem:[%s7454_s22 + $0x2008] sm:$0xff]  ;;  %v5442_v47 = vpack.c.bf16 %v1321_v37, %v1317_v36 }
 0x262   : > { %6421 = vmatprep.subr.bf16.mxu1 %v6420_v63  ;;  %v5414_v63 = vpack.c.bf16 %v1265_v7, %v1261_v57  ;;  %v6438_v4 = vpack.c.bf16 %v1267_v62, %v1263_v58  ;;  %v5416_v19 = vpack.c.bf16 %v1274_v1, %v1270_v0  ;;  %v1295_v57 = vld [vmem:[%s7454_s22 + $0x20d0] sm:$0xff]  ;;  %v6452_v7 = vpack.c.bf16 %v1300_v52, %v1296_v50  ;;  %v1306_v62 = vld [vmem:[%s7454_s22 + $0x2128] sm:$0xff]  ;;  %v1304_v0 = vld [vmem:[%s7454_s22 + $0x2118] sm:$0xff] }
 0x263   : > { %v1299_v58 = vld [vmem:[%s7454_s22 + $0x20f0] sm:$0xff]  ;;  %v1308_v1 = vld [vmem:[%s7454_s22 + $0x2138] sm:$0xff]  ;;  %v1325_v50 = vld [vmem:[%s7454_s22 + $0x21c0] sm:$0xff] }
 0x264   : > { %5399 = vmatpush1.bf16.msra.mxu0 %v5398_v12  ;;  %v6440_v12 = vpack.c.bf16 %v1276_v3, %v1272_v2  ;;  %v6454_v3 = vpack.c.bf16 %v1299_v58, %v1295_v57  ;;  %v6456_v9 = vpack.c.bf16 %v1308_v1, %v1304_v0  ;;  %v1329_v52 = vld [vmem:[%s7454_s22 + $0x21e0] sm:$0xff]  ;;  %v1336_v57 = vld [vmem:[%s7454_s22 + $0x2218] sm:$0xff]  ;;  %v1358_v36 = vld [vmem:[%s7454_s22 + $0x22c8] sm:$0xff] }
 0x265   : > { %6423 = vmatpush1.bf16.msra.mxu1 %v6422_v13  ;;  %5401 = vmatprep.subr.bf16.mxu0 %v5400_v14  ;;  %v1275_v13 = vld [vmem:[%s7454_s22 + $0x2030] sm:$0xff]  ;;  %v1278_v14 = vld [vmem:[%s7454_s22 + $0x2048] sm:$0xff]  ;;  %v5446_v58 = vpack.c.bf16 %v1329_v52, %v1325_v50  ;;  %v1333_v0 = vld [vmem:[%s7454_s22 + $0x2200] sm:$0xff] }
 0x266   : > { %6425 = vmatprep.subr.bf16.mxu1 %v6424_v18  ;;  %v1280_v18 = vld [vmem:[%s7454_s22 + $0x2058] sm:$0xff]  ;;  %v6442_v24 = vpack.c.bf16 %v1275_v13, %v1271_v11  ;;  %v5420_v25 = vpack.c.bf16 %v1282_v15, %v1278_v14  ;;  %v1307_v11 = vld [vmem:[%s7454_s22 + $0x2130] sm:$0xff]  ;;  %v1314_v13 = vld [vmem:[%s7454_s22 + $0x2168] sm:$0xff] }
 0x267   : > { %v6444_v29 = vpack.c.bf16 %v1284_v20, %v1280_v18  ;;  %v1312_v14 = vld [vmem:[%s7454_s22 + $0x2158] sm:$0xff]  ;;  %v1309_v20 = vld [vmem:[%s7454_s22 + $0x2140] sm:$0xff]  ;;  %v1362_v37 = vld [vmem:[%s7454_s22 + $0x22e8] sm:$0xff] }
 0x268   : > { %5403 = vmatpush1.bf16.msra.mxu0 %v5402_v26  ;;  %v1277_v26 = vld [vmem:[%s7454_s22 + $0x2040] sm:$0xff]  ;;  %v1316_v15 = vld [vmem:[%s7454_s22 + $0x2178] sm:$0xff]  ;;  %v1366_v50 = vld [vmem:[%s7454_s22 + $0x2308] sm:$0xff] }
 0x269   : > { %6427 = vmatpush1.bf16.msra.mxu1 %v6426_v27  ;;  %5405 = vmatprep.subr.bf16.mxu0 %v5404_v28  ;;  %v1281_v27 = vld [vmem:[%s7454_s22 + $0x2060] sm:$0xff]  ;;  %v1279_v28 = vld [vmem:[%s7454_s22 + $0x2050] sm:$0xff]  ;;  %v1370_v52 = vld [vmem:[%s7454_s22 + $0x2328] sm:$0xff] }
 0x26a   : > { %6429 = vmatprep.subr.bf16.mxu1 %v6428_v32  ;;  %v1290_v32 = vld [vmem:[%s7454_s22 + $0x20a8] sm:$0xff]  ;;  %v5422_v38 = vpack.c.bf16 %v1281_v27, %v1277_v26  ;;  %v6446_v39 = vpack.c.bf16 %v1283_v30, %v1279_v28  ;;  %v1315_v26 = vld [vmem:[%s7454_s22 + $0x2170] sm:$0xff]  ;;  %v1324_v30 = vld [vmem:[%s7454_s22 + $0x21b8] sm:$0xff] }
 0x26b   : > { %v1318_v27 = vld [vmem:[%s7454_s22 + $0x2188] sm:$0xff]  ;;  %v1337_v1 = vld [vmem:[%s7454_s22 + $0x2220] sm:$0xff] }
 0x26c   : > { %5407 = vmatpush1.bf16.msra.mxu0 %v5406_v40  ;;  %v5424_v40 = vpack.c.bf16 %v1290_v32, %v1286_v31  ;;  %v1322_v28 = vld [vmem:[%s7454_s22 + $0x21a8] sm:$0xff] }
 0x26d   : > { %6431 = vmatpush1.bf16.msra.mxu1 %v6430_v41  ;;  %5409 = vmatprep.subr.bf16.mxu0 %v5408_v42  ;;  %v1285_v41 = vld [vmem:[%s7454_s22 + $0x2080] sm:$0xff] }
 0x26e   : > { %6433 = vmatprep.subr.bf16.mxu1 %v6432_v48  ;;  %v1289_v42 = vld [vmem:[%s7454_s22 + $0x20a0] sm:$0xff]  ;;  %v1294_v48 = vld [vmem:[%s7454_s22 + $0x20c8] sm:$0xff] }
 0x26f   : > { %v5426_v51 = vpack.c.bf16 %v1289_v42, %v1285_v41  ;;  %v1326_v41 = vld [vmem:[%s7454_s22 + $0x21c8] sm:$0xff] }
 0x270   : > { %5411 = vmatpush1.bf16.msra.mxu0 %v5410_v54  ;;  %v5428_v54 = vpack.c.bf16 %v1298_v49, %v1294_v48  ;;  %v1330_v42 = vld [vmem:[%s7454_s22 + $0x21e8] sm:$0xff] }
 0x271   : > { %6435 = vmatpush1.bf16.msra.mxu1 %v6434_v55  ;;  %5413 = vmatprep.subr.bf16.mxu0 %v5412_v56  ;;  %v1293_v55 = vld [vmem:[%s7454_s22 + $0x20c0] sm:$0xff]  ;;  %v5444_v49 = vpack.c.bf16 %v1330_v42, %v1326_v41  ;;  %v5460_v42 = vpack.c.bf16 %v1362_v37, %v1358_v36 }
 0x272   : > { %6437 = vmatprep.subr.bf16.mxu1 %v6436_v61  ;;  %v1297_v56 = vld [vmem:[%s7454_s22 + $0x20e0] sm:$0xff]  ;;  %v1302_v61 = vld [vmem:[%s7454_s22 + $0x2108] sm:$0xff] }
 0x273   : > { %v5430_v2 = vpack.c.bf16 %v1297_v56, %v1293_v55  ;;  %v1334_v55 = vld [vmem:[%s7454_s22 + $0x2208] sm:$0xff] }
 0x274   : > { %5415 = vmatpush1.bf16.msra.mxu0 %v5414_v63  ;;  %v5432_v63 = vpack.c.bf16 %v1306_v62, %v1302_v61  ;;  %v1338_v56 = vld [vmem:[%s7454_s22 + $0x2228] sm:$0xff] }
 0x275   : > { %6439 = vmatpush1.bf16.msra.mxu1 %v6438_v4  ;;  %5417 = vmatprep.subr.bf16.mxu0 %v5416_v19  ;;  %v1301_v4 = vld [vmem:[%s7454_s22 + $0x2100] sm:$0xff]  ;;  %v5448_v62 = vpack.c.bf16 %v1338_v56, %v1334_v55  ;;  %v5464_v56 = vpack.c.bf16 %v1370_v52, %v1366_v50 }
 0x276   : > { %6441 = vmatprep.subr.bf16.mxu1 %v6440_v12  ;;  %v1305_v19 = vld [vmem:[%s7454_s22 + $0x2120] sm:$0xff]  ;;  %v1310_v12 = vld [vmem:[%s7454_s22 + $0x2148] sm:$0xff] }
 0x277   : > { %3019 = vmatmul.mubr.f32.vlgmr.msra.gmra.mrb[0].mxu0 %v2356_v17  ;;  %v5434_v16 = vpack.c.bf16 %v1305_v19, %v1301_v4  ;;  %v5436_v18 = vpack.c.bf16 %v1314_v13, %v1310_v12  ;;  %v1342_v4 = vld [vmem:[%s7454_s22 + $0x2248] sm:$0xff] }
 0x278   : > { %5419 = vmatpush1.bf16.msra.mxu0 %v5418_v23  ;;  %4155 = vmatmul.mubr.f32.vlgmr.msra.gmra.mrb[0].mxu1 %v2356_v17  ;;  %v6458_v17 = vpack.c.bf16 %v1307_v11, %v1303_v5  ;;  %v1313_v23 = vld [vmem:[%s7454_s22 + $0x2160] sm:$0xff]  ;;  %v1346_v19 = vld [vmem:[%s7454_s22 + $0x2268] sm:$0xff]  ;;  %v1344_v5 = vld [vmem:[%s7454_s22 + $0x2258] sm:$0xff]  ;;  %v5450_v11 = vpack.c.bf16 %v1337_v1, %v1333_v0 }
 0x279   : > { %6443 = vmatpush1.bf16.msra.mxu1 %v6442_v24  ;;  %5421 = vmatprep.subr.bf16.mxu0 %v5420_v25  ;;  %v1311_v24 = vld [vmem:[%s7454_s22 + $0x2150] sm:$0xff]  ;;  %v6460_v25 = vpack.c.bf16 %v1316_v15, %v1312_v14  ;;  %v5438_v31 = vpack.c.bf16 %v1313_v23, %v1309_v20  ;;  %v5452_v13 = vpack.c.bf16 %v1346_v19, %v1342_v4  ;;  %v1341_v14 = vld [vmem:[%s7454_s22 + $0x2240] sm:$0xff]  ;;  %v1350_v20 = vld [vmem:[%s7454_s22 + $0x2288] sm:$0xff] }
 0x27a   : > { %6445 = vmatprep.subr.bf16.mxu1 %v6444_v29  ;;  %3089 = vmatprep.mubr.f32.mxu0 %v2368_v34  ;;  %v1320_v29 = vld [vmem:[%s7454_s22 + $0x2198] sm:$0xff]  ;;  %v6462_v32 = vpack.c.bf16 %v1315_v26, %v1311_v24  ;;  %v1345_v15 = vld [vmem:[%s7454_s22 + $0x2260] sm:$0xff]  ;;  %v1354_v23 = vld [vmem:[%s7454_s22 + $0x22a8] sm:$0xff] }
 0x27b   : > { %4225 = vmatprep.mubr.f32.mxu1 %v2368_v34  ;;  %v5440_v34 = vpack.c.bf16 %v1322_v28, %v1318_v27  ;;  %v1352_v24 = vld [vmem:[%s7454_s22 + $0x2298] sm:$0xff]  ;;  %v5454_v26 = vpack.c.bf16 %v1345_v15, %v1341_v14  ;;  %v5456_v28 = vpack.c.bf16 %v1354_v23, %v1350_v20  ;;  %v1374_v0 = vld [vmem:[%s7454_s22 + $0x2348] sm:$0xff] }
 0x27c   : > { %5423 = vmatpush1.bf16.msra.mxu0 %v5422_v38  ;;  %v1319_v38 = vld [vmem:[%s7454_s22 + $0x2190] sm:$0xff]  ;;  %v1378_v1 = vld [vmem:[%s7454_s22 + $0x2368] sm:$0xff] }
 0x27d   : > { %6447 = vmatpush1.bf16.msra.mxu1 %v6446_v39  ;;  %5425 = vmatprep.subr.bf16.mxu0 %v5424_v40  ;;  %v6464_v39 = vpack.c.bf16 %v1324_v30, %v1320_v29  ;;  %v1323_v40 = vld [vmem:[%s7454_s22 + $0x21b0] sm:$0xff]  ;;  %v1349_v29 = vld [vmem:[%s7454_s22 + $0x2280] sm:$0xff]  ;;  %v5468_v19 = vpack.c.bf16 %v1378_v1, %v1374_v0  ;;  %v1382_v14 = vld [vmem:[%s7454_s22 + $0x2388] sm:$0xff] }
 0x27e   : > { %6449 = vmatprep.subr.bf16.mxu1 %v6448_v45  ;;  %v1332_v45 = vld [vmem:[%s7454_s22 + $0x21f8] sm:$0xff]  ;;  %v6466_v48 = vpack.c.bf16 %v1323_v40, %v1319_v38  ;;  %v1353_v30 = vld [vmem:[%s7454_s22 + $0x22a0] sm:$0xff]  ;;  %v1386_v15 = vld [vmem:[%s7454_s22 + $0x23a8] sm:$0xff] }
 0x27f   : > { %v1360_v38 = vld [vmem:[%s7454_s22 + $0x22d8] sm:$0xff]  ;;  %v5458_v40 = vpack.c.bf16 %v1353_v30, %v1349_v29  ;;  %v5472_v23 = vpack.c.bf16 %v1386_v15, %v1382_v14  ;;  %v1390_v29 = vld [vmem:[%s7454_s22 + $0x23c8] sm:$0xff] }
 0x280   : > { %5427 = vmatpush1.bf16.msra.mxu0 %v5426_v51  ;;  %v1327_v51 = vld [vmem:[%s7454_s22 + $0x21d0] sm:$0xff]  ;;  %v1394_v30 = vld [vmem:[%s7454_s22 + $0x23e8] sm:$0xff]  ;;  %v1420_v14 = vld [vmem:[%s7454_s22 + $0x24b8] sm:$0xff] }
 0x281   : > { %6451 = vmatpush1.bf16.msra.mxu1 %v6450_v53  ;;  %5429 = vmatprep.subr.bf16.mxu0 %v5428_v54  ;;  %v6468_v53 = vpack.c.bf16 %v1332_v45, %v1328_v43  ;;  %v1331_v54 = vld [vmem:[%s7454_s22 + $0x21f0] sm:$0xff]  ;;  %v1357_v43 = vld [vmem:[%s7454_s22 + $0x22c0] sm:$0xff]  ;;  %v5476_v37 = vpack.c.bf16 %v1394_v30, %v1390_v29 }
 0x282   : > { %6453 = vmatprep.subr.bf16.mxu1 %v6452_v7  ;;  %v1340_v7 = vld [vmem:[%s7454_s22 + $0x2238] sm:$0xff]  ;;  %v6470_v61 = vpack.c.bf16 %v1331_v54, %v1327_v51  ;;  %v1361_v45 = vld [vmem:[%s7454_s22 + $0x22e0] sm:$0xff] }
 0x283   : > { %v1368_v51 = vld [vmem:[%s7454_s22 + $0x2318] sm:$0xff]  ;;  %v5462_v54 = vpack.c.bf16 %v1361_v45, %v1357_v43  ;;  %v1398_v43 = vld [vmem:[%s7454_s22 + $0x2408] sm:$0xff] }
 0x284   : > { %5431 = vmatpush1.bf16.msra.mxu0 %v5430_v2  ;;  %v1335_v2 = vld [vmem:[%s7454_s22 + $0x2210] sm:$0xff]  ;;  %v1402_v45 = vld [vmem:[%s7454_s22 + $0x2428] sm:$0xff] }
 0x285   : > { %6455 = vmatpush1.bf16.msra.mxu1 %v6454_v3  ;;  %5433 = vmatprep.subr.bf16.mxu0 %v5432_v63  ;;  %v6472_v3 = vpack.c.bf16 %v1340_v7, %v1336_v57  ;;  %v1339_v63 = vld [vmem:[%s7454_s22 + $0x2230] sm:$0xff]  ;;  %v1365_v57 = vld [vmem:[%s7454_s22 + $0x2300] sm:$0xff]  ;;  %v5480_v52 = vpack.c.bf16 %v1402_v45, %v1398_v43 }
 0x286   : > { %6457 = vmatprep.subr.bf16.mxu1 %v6456_v9  ;;  %v1348_v9 = vld [vmem:[%s7454_s22 + $0x2278] sm:$0xff]  ;;  %v6474_v12 = vpack.c.bf16 %v1339_v63, %v1335_v2  ;;  %v1369_v7 = vld [vmem:[%s7454_s22 + $0x2320] sm:$0xff] }
 0x287   : > { %v1376_v2 = vld [vmem:[%s7454_s22 + $0x2358] sm:$0xff]  ;;  %v5466_v63 = vpack.c.bf16 %v1369_v7, %v1365_v57  ;;  %v1406_v57 = vld [vmem:[%s7454_s22 + $0x2448] sm:$0xff] }
 0x288   : > { %5435 = vmatpush1.bf16.msra.mxu0 %v5434_v16  ;;  %v1343_v16 = vld [vmem:[%s7454_s22 + $0x2250] sm:$0xff]  ;;  %v1410_v7 = vld [vmem:[%s7454_s22 + $0x2468] sm:$0xff] }
 0x289   : > { %6459 = vmatpush1.bf16.msra.mxu1 %v6458_v17  ;;  %5437 = vmatprep.subr.bf16.mxu0 %v5436_v18  ;;  %v6476_v17 = vpack.c.bf16 %v1348_v9, %v1344_v5  ;;  %v1347_v18 = vld [vmem:[%s7454_s22 + $0x2270] sm:$0xff]  ;;  %v1373_v5 = vld [vmem:[%s7454_s22 + $0x2340] sm:$0xff] }
 0x28a   : > { %6461 = vmatprep.subr.bf16.mxu1 %v6460_v25  ;;  %v1356_v25 = vld [vmem:[%s7454_s22 + $0x22b8] sm:$0xff]  ;;  %v6478_v27 = vpack.c.bf16 %v1347_v18, %v1343_v16  ;;  %v1377_v9 = vld [vmem:[%s7454_s22 + $0x2360] sm:$0xff] }
 0x28b   : > { %v1384_v16 = vld [vmem:[%s7454_s22 + $0x2398] sm:$0xff]  ;;  %v5470_v18 = vpack.c.bf16 %v1377_v9, %v1373_v5  ;;  %v1411_v5 = vld [vmem:[%s7454_s22 + $0x2470] sm:$0xff]  ;;  %v1414_v9 = vld [vmem:[%s7454_s22 + $0x2488] sm:$0xff] }
 0x28c   : > { %5439 = vmatpush1.bf16.msra.mxu0 %v5438_v31  ;;  %v1351_v31 = vld [vmem:[%s7454_s22 + $0x2290] sm:$0xff] }
 0x28d   : > { %6463 = vmatpush1.bf16.msra.mxu1 %v6462_v32  ;;  %5441 = vmatprep.subr.bf16.mxu0 %v5440_v34  ;;  %v6480_v32 = vpack.c.bf16 %v1356_v25, %v1352_v24  ;;  %v1355_v34 = vld [vmem:[%s7454_s22 + $0x22b0] sm:$0xff]  ;;  %v1381_v24 = vld [vmem:[%s7454_s22 + $0x2380] sm:$0xff] }
 0x28e   : > { %6465 = vmatprep.subr.bf16.mxu1 %v6464_v39  ;;  %v1364_v39 = vld [vmem:[%s7454_s22 + $0x22f8] sm:$0xff]  ;;  %v6482_v41 = vpack.c.bf16 %v1355_v34, %v1351_v31  ;;  %v1385_v25 = vld [vmem:[%s7454_s22 + $0x23a0] sm:$0xff] }
 0x28f   : > { %v1392_v31 = vld [vmem:[%s7454_s22 + $0x23d8] sm:$0xff]  ;;  %v5474_v34 = vpack.c.bf16 %v1385_v25, %v1381_v24  ;;  %v1419_v24 = vld [vmem:[%s7454_s22 + $0x24b0] sm:$0xff]  ;;  %v1422_v25 = vld [vmem:[%s7454_s22 + $0x24c8] sm:$0xff] }
 0x290   : > { %5443 = vmatpush1.bf16.msra.mxu0 %v5442_v47  ;;  %v1359_v47 = vld [vmem:[%s7454_s22 + $0x22d0] sm:$0xff] }
 0x291   : > { %6467 = vmatpush1.bf16.msra.mxu1 %v6466_v48  ;;  %5445 = vmatprep.subr.bf16.mxu0 %v5444_v49  ;;  %v6484_v48 = vpack.c.bf16 %v1364_v39, %v1360_v38  ;;  %v1363_v49 = vld [vmem:[%s7454_s22 + $0x22f0] sm:$0xff]  ;;  %v1389_v38 = vld [vmem:[%s7454_s22 + $0x23c0] sm:$0xff] }
 0x292   : > { %6469 = vmatprep.subr.bf16.mxu1 %v6468_v53  ;;  %v1372_v53 = vld [vmem:[%s7454_s22 + $0x2338] sm:$0xff]  ;;  %v6486_v55 = vpack.c.bf16 %v1363_v49, %v1359_v47  ;;  %v1393_v39 = vld [vmem:[%s7454_s22 + $0x23e0] sm:$0xff] }
 0x293   : > { %v1400_v47 = vld [vmem:[%s7454_s22 + $0x2418] sm:$0xff]  ;;  %v5478_v49 = vpack.c.bf16 %v1393_v39, %v1389_v38  ;;  %v1427_v38 = vld [vmem:[%s7454_s22 + $0x24f0] sm:$0xff]  ;;  %v1430_v39 = vld [vmem:[%s7454_s22 + $0x2508] sm:$0xff] }
 0x294   : > { %5447 = vmatpush1.bf16.msra.mxu0 %v5446_v58  ;;  %v1367_v58 = vld [vmem:[%s7454_s22 + $0x2310] sm:$0xff] }
 0x295   : > { %6471 = vmatpush1.bf16.msra.mxu1 %v6470_v61  ;;  %5449 = vmatprep.subr.bf16.mxu0 %v5448_v62  ;;  %v6488_v61 = vpack.c.bf16 %v1372_v53, %v1368_v51  ;;  %v1371_v62 = vld [vmem:[%s7454_s22 + $0x2330] sm:$0xff]  ;;  %v1397_v51 = vld [vmem:[%s7454_s22 + $0x2400] sm:$0xff] }
 0x296   : > { %6473 = vmatprep.subr.bf16.mxu1 %v6472_v3  ;;  %v1380_v3 = vld [vmem:[%s7454_s22 + $0x2378] sm:$0xff]  ;;  %v6490_v4 = vpack.c.bf16 %v1371_v62, %v1367_v58  ;;  %v1401_v53 = vld [vmem:[%s7454_s22 + $0x2420] sm:$0xff]  ;;  %v2364_v58 = vrot.slane %v8562_v21, %v7603_v10 }
 0x297   : > { %v1412_v62 = vld [vmem:[%s7454_s22 + $0x2478] sm:$0xff]  ;;  %v5482_v0 = vpack.c.bf16 %v1401_v53, %v1397_v51  ;;  %v1435_v51 = vld [vmem:[%s7454_s22 + $0x2530] sm:$0xff]  ;;  %v1438_v53 = vld [vmem:[%s7454_s22 + $0x2548] sm:$0xff] }
 0x298   : > { %5451 = vmatpush1.bf16.msra.mxu0 %v5450_v11  ;;  %v1375_v11 = vld [vmem:[%s7454_s22 + $0x2350] sm:$0xff] }
 0x299   : > { %6475 = vmatpush1.bf16.msra.mxu1 %v6474_v12  ;;  %5453 = vmatprep.subr.bf16.mxu0 %v5452_v13  ;;  %v6492_v12 = vpack.c.bf16 %v1380_v3, %v1376_v2  ;;  %v1379_v13 = vld [vmem:[%s7454_s22 + $0x2370] sm:$0xff]  ;;  %v5484_v2 = vpack.c.bf16 %v1410_v7, %v1406_v57  ;;  %v1405_v3 = vld [vmem:[%s7454_s22 + $0x2440] sm:$0xff] }
 0x29a   : > { %6477 = vmatprep.subr.bf16.mxu1 %v6476_v17  ;;  %v1388_v17 = vld [vmem:[%s7454_s22 + $0x23b8] sm:$0xff]  ;;  %v6494_v20 = vpack.c.bf16 %v1379_v13, %v1375_v11  ;;  %v1418_v11 = vld [vmem:[%s7454_s22 + $0x24a8] sm:$0xff] }
 0x29b   : > { %v1416_v13 = vld [vmem:[%s7454_s22 + $0x2498] sm:$0xff] }
 0x29c   : > { %5455 = vmatpush1.bf16.msra.mxu0 %v5454_v26  ;;  %v1383_v26 = vld [vmem:[%s7454_s22 + $0x2390] sm:$0xff] }
 0x29d   : > { %6479 = vmatpush1.bf16.msra.mxu1 %v6478_v27  ;;  %5457 = vmatprep.subr.bf16.mxu0 %v5456_v28  ;;  %v6496_v27 = vpack.c.bf16 %v1388_v17, %v1384_v16  ;;  %v1387_v28 = vld [vmem:[%s7454_s22 + $0x23b0] sm:$0xff]  ;;  %v5488_v17 = vpack.c.bf16 %v1418_v11, %v1414_v9 }
 0x29e   : > { %6481 = vmatprep.subr.bf16.mxu1 %v6480_v32  ;;  %v1396_v32 = vld [vmem:[%s7454_s22 + $0x23f8] sm:$0xff]  ;;  %v6498_v36 = vpack.c.bf16 %v1387_v28, %v1383_v26  ;;  %v1426_v26 = vld [vmem:[%s7454_s22 + $0x24e8] sm:$0xff] }
 0x29f   : > { %v1428_v28 = vld [vmem:[%s7454_s22 + $0x24f8] sm:$0xff] }
 0x2a0   : > { %5459 = vmatpush1.bf16.msra.mxu0 %v5458_v40  ;;  %v1391_v40 = vld [vmem:[%s7454_s22 + $0x23d0] sm:$0xff] }
 0x2a1   : > { %6483 = vmatpush1.bf16.msra.mxu1 %v6482_v41  ;;  %5461 = vmatprep.subr.bf16.mxu0 %v5460_v42  ;;  %v6500_v41 = vpack.c.bf16 %v1396_v32, %v1392_v31  ;;  %v1395_v42 = vld [vmem:[%s7454_s22 + $0x23f0] sm:$0xff]  ;;  %v5492_v31 = vpack.c.bf16 %v1426_v26, %v1422_v25  ;;  %v1421_v32 = vld [vmem:[%s7454_s22 + $0x24c0] sm:$0xff] }
 0x2a2   : > { %6485 = vmatprep.subr.bf16.mxu1 %v6484_v48  ;;  %v1404_v48 = vld [vmem:[%s7454_s22 + $0x2438] sm:$0xff]  ;;  %v6502_v50 = vpack.c.bf16 %v1395_v42, %v1391_v40  ;;  %v1434_v40 = vld [vmem:[%s7454_s22 + $0x2528] sm:$0xff]  ;;  %v1453_v26 = vld [vmem:[%s7454_s22 + $0x25c0] sm:$0xff] }
 0x2a3   : > { %v1436_v42 = vld [vmem:[%s7454_s22 + $0x2538] sm:$0xff] }
 0x2a4   : > { %5463 = vmatpush1.bf16.msra.mxu0 %v5462_v54  ;;  %v1399_v54 = vld [vmem:[%s7454_s22 + $0x2410] sm:$0xff] }
 0x2a5   : > { %6487 = vmatpush1.bf16.msra.mxu1 %v6486_v55  ;;  %5465 = vmatprep.subr.bf16.mxu0 %v5464_v56  ;;  %v6504_v55 = vpack.c.bf16 %v1404_v48, %v1400_v47  ;;  %v1403_v56 = vld [vmem:[%s7454_s22 + $0x2430] sm:$0xff]  ;;  %v5496_v47 = vpack.c.bf16 %v1434_v40, %v1430_v39  ;;  %v1429_v48 = vld [vmem:[%s7454_s22 + $0x2500] sm:$0xff] }
 0x2a6   : > { %6489 = vmatprep.subr.bf16.mxu1 %v6488_v61  ;;  %v1408_v61 = vld [vmem:[%s7454_s22 + $0x2458] sm:$0xff]  ;;  %v6506_v1 = vpack.c.bf16 %v1403_v56, %v1399_v54  ;;  %v1442_v54 = vld [vmem:[%s7454_s22 + $0x2568] sm:$0xff]  ;;  %v1461_v40 = vld [vmem:[%s7454_s22 + $0x2600] sm:$0xff] }
 0x2a7   : > { %v1444_v56 = vld [vmem:[%s7454_s22 + $0x2578] sm:$0xff] }
 0x2a8   : > { %5467 = vmatpush1.bf16.msra.mxu0 %v5466_v63  ;;  %v1409_v63 = vld [vmem:[%s7454_s22 + $0x2460] sm:$0xff] }
 0x2a9   : > { %6491 = vmatpush1.bf16.msra.mxu1 %v6490_v4  ;;  %5469 = vmatprep.subr.bf16.mxu0 %v5468_v19  ;;  %v1407_v4 = vld [vmem:[%s7454_s22 + $0x2450] sm:$0xff]  ;;  %v6508_v19 = vpack.c.bf16 %v1412_v62, %v1408_v61  ;;  %v5486_v15 = vpack.c.bf16 %v1409_v63, %v1405_v3  ;;  %v1437_v61 = vld [vmem:[%s7454_s22 + $0x2540] sm:$0xff]  ;;  %v1446_v3 = vld [vmem:[%s7454_s22 + $0x2588] sm:$0xff] }
 0x2aa   : > { %6493 = vmatprep.subr.bf16.mxu1 %v6492_v12  ;;  %v2376_v12 = vrot.slane %v8562_v21, %v7612_v22  ;;  %v6510_v16 = vpack.c.bf16 %v1411_v5, %v1407_v4  ;;  %v6512_v21 = vpack.c.bf16 %v1420_v14, %v1416_v13  ;;  %v1441_v62 = vld [vmem:[%s7454_s22 + $0x2560] sm:$0xff]  ;;  %v1450_v63 = vld [vmem:[%s7454_s22 + $0x25a8] sm:$0xff]  ;;  %v1448_v4 = vld [vmem:[%s7454_s22 + $0x2598] sm:$0xff] }
 0x2ab   : > { %v5502_v5 = vpack.c.bf16 %v1441_v62, %v1437_v61  ;;  %v5504_v11 = vpack.c.bf16 %v1450_v63, %v1446_v3  ;;  %v1449_v13 = vld [vmem:[%s7454_s22 + $0x25a0] sm:$0xff]  ;;  %v1447_v14 = vld [vmem:[%s7454_s22 + $0x2590] sm:$0xff]  ;;  %v1482_v61 = vld [vmem:[%s7454_s22 + $0x26a8] sm:$0xff] }
 0x2ac   : > { %5471 = vmatpush1.bf16.msra.mxu0 %v5470_v18  ;;  %v1413_v18 = vld [vmem:[%s7454_s22 + $0x2480] sm:$0xff]  ;;  %v1480_v62 = vld [vmem:[%s7454_s22 + $0x2698] sm:$0xff] }
 0x2ad   : > { %6495 = vmatpush1.bf16.msra.mxu1 %v6494_v20  ;;  %5473 = vmatprep.subr.bf16.mxu0 %v5472_v23  ;;  %v1417_v20 = vld [vmem:[%s7454_s22 + $0x24a0] sm:$0xff]  ;;  %v1415_v23 = vld [vmem:[%s7454_s22 + $0x2490] sm:$0xff] }
 0x2ae   : > { %6497 = vmatprep.subr.bf16.mxu1 %v6496_v27  ;;  %v1424_v27 = vld [vmem:[%s7454_s22 + $0x24d8] sm:$0xff]  ;;  %v5490_v29 = vpack.c.bf16 %v1417_v20, %v1413_v18  ;;  %v6514_v30 = vpack.c.bf16 %v1419_v24, %v1415_v23  ;;  %v1458_v18 = vld [vmem:[%s7454_s22 + $0x25e8] sm:$0xff]  ;;  %v1477_v63 = vld [vmem:[%s7454_s22 + $0x2680] sm:$0xff] }
 0x2af   : > { %v1456_v20 = vld [vmem:[%s7454_s22 + $0x25d8] sm:$0xff] }
 0x2b0   : > { %5475 = vmatpush1.bf16.msra.mxu0 %v5474_v34  ;;  %v1425_v34 = vld [vmem:[%s7454_s22 + $0x24e0] sm:$0xff]  ;;  %v1460_v23 = vld [vmem:[%s7454_s22 + $0x25f8] sm:$0xff] }
 0x2b1   : > { %6499 = vmatpush1.bf16.msra.mxu1 %v6498_v36  ;;  %5477 = vmatprep.subr.bf16.mxu0 %v5476_v37  ;;  %v1423_v36 = vld [vmem:[%s7454_s22 + $0x24d0] sm:$0xff]  ;;  %v6516_v37 = vpack.c.bf16 %v1428_v28, %v1424_v27  ;;  %v5494_v43 = vpack.c.bf16 %v1425_v34, %v1421_v32  ;;  %v1457_v27 = vld [vmem:[%s7454_s22 + $0x25e0] sm:$0xff]  ;;  %v1466_v32 = vld [vmem:[%s7454_s22 + $0x2628] sm:$0xff] }
 0x2b2   : > { %6501 = vmatprep.subr.bf16.mxu1 %v6500_v41  ;;  %v1432_v41 = vld [vmem:[%s7454_s22 + $0x2518] sm:$0xff]  ;;  %v6518_v45 = vpack.c.bf16 %v1427_v38, %v1423_v36  ;;  %v1455_v28 = vld [vmem:[%s7454_s22 + $0x25d0] sm:$0xff] }
 0x2b3   : > { %v1464_v34 = vld [vmem:[%s7454_s22 + $0x2618] sm:$0xff] }
 0x2b4   : > { %5479 = vmatpush1.bf16.msra.mxu0 %v5478_v49  ;;  %v1433_v49 = vld [vmem:[%s7454_s22 + $0x2520] sm:$0xff]  ;;  %v1468_v36 = vld [vmem:[%s7454_s22 + $0x2638] sm:$0xff] }
 0x2b5   : > { %6503 = vmatpush1.bf16.msra.mxu1 %v6502_v50  ;;  %5481 = vmatprep.subr.bf16.mxu0 %v5480_v52  ;;  %v1431_v50 = vld [vmem:[%s7454_s22 + $0x2510] sm:$0xff]  ;;  %v6520_v52 = vpack.c.bf16 %v1436_v42, %v1432_v41  ;;  %v5498_v57 = vpack.c.bf16 %v1433_v49, %v1429_v48  ;;  %v1465_v41 = vld [vmem:[%s7454_s22 + $0x2620] sm:$0xff]  ;;  %v1474_v48 = vld [vmem:[%s7454_s22 + $0x2668] sm:$0xff] }
 0x2b6   : > { %6505 = vmatprep.subr.bf16.mxu1 %v6504_v55  ;;  %v1440_v55 = vld [vmem:[%s7454_s22 + $0x2558] sm:$0xff]  ;;  %v6522_v7 = vpack.c.bf16 %v1435_v51, %v1431_v50  ;;  %v1463_v42 = vld [vmem:[%s7454_s22 + $0x2610] sm:$0xff] }
 0x2b7   : > { %3090 = vmatmul.mubr.f32.vlgmr.msra.gmra.mrb[0].mxu0 %v2364_v58  ;;  %v1472_v49 = vld [vmem:[%s7454_s22 + $0x2658] sm:$0xff] }
 0x2b8   : > { %5483 = vmatpush1.bf16.msra.mxu0 %v5482_v0  ;;  %4226 = vmatmul.mubr.f32.vlgmr.msra.gmra.mrb[0].mxu1 %v2364_v58  ;;  %v5500_v58 = vpack.c.bf16 %v1442_v54, %v1438_v53  ;;  %v1439_v0 = vld [vmem:[%s7454_s22 + $0x2550] sm:$0xff]  ;;  %v1476_v50 = vld [vmem:[%s7454_s22 + $0x2678] sm:$0xff]  ;;  %v1469_v54 = vld [vmem:[%s7454_s22 + $0x2640] sm:$0xff] }
 0x2b9   : > { %6507 = vmatpush1.bf16.msra.mxu1 %v6506_v1  ;;  %5485 = vmatprep.subr.bf16.mxu0 %v5484_v2  ;;  %v6524_v1 = vpack.c.bf16 %v1444_v56, %v1440_v55  ;;  %v1443_v2 = vld [vmem:[%s7454_s22 + $0x2570] sm:$0xff]  ;;  %v1473_v55 = vld [vmem:[%s7454_s22 + $0x2660] sm:$0xff] }
 0x2ba   : > { %6509 = vmatprep.subr.bf16.mxu1 %v6508_v19  ;;  %3160 = vmatprep.mubr.f32.mxu0 %v2376_v12  ;;  %v1452_v19 = vld [vmem:[%s7454_s22 + $0x25b8] sm:$0xff]  ;;  %v6526_v9 = vpack.c.bf16 %v1443_v2, %v1439_v0  ;;  %v1471_v56 = vld [vmem:[%s7454_s22 + $0x2650] sm:$0xff] }
 0x2bb   : > { %4296 = vmatprep.mubr.f32.mxu1 %v2376_v12  ;;  %v1445_v12 = vld [vmem:[%s7454_s22 + $0x2580] sm:$0xff]  ;;  %v1484_v0 = vld [vmem:[%s7454_s22 + $0x26b8] sm:$0xff] }
 0x2bc   : > { %5487 = vmatpush1.bf16.msra.mxu0 %v5486_v15  ;;  %v6528_v15 = vpack.c.bf16 %v1452_v19, %v1448_v4  ;;  %v1481_v4 = vld [vmem:[%s7454_s22 + $0x26a0] sm:$0xff]  ;;  %v1479_v19 = vld [vmem:[%s7454_s22 + $0x2690] sm:$0xff] }
 0x2bd   : > { %6511 = vmatpush1.bf16.msra.mxu1 %v6510_v16  ;;  %5489 = vmatprep.subr.bf16.mxu0 %v5488_v17  ;;  %v1451_v16 = vld [vmem:[%s7454_s22 + $0x25b0] sm:$0xff]  ;;  %v1454_v17 = vld [vmem:[%s7454_s22 + $0x25c8] sm:$0xff] }
 0x2be   : > { %6513 = vmatprep.subr.bf16.mxu1 %v6512_v21  ;;  %v5506_v21 = vpack.c.bf16 %v1449_v13, %v1445_v12  ;;  %v6530_v24 = vpack.c.bf16 %v1451_v16, %v1447_v14  ;;  %v5508_v25 = vpack.c.bf16 %v1458_v18, %v1454_v17  ;;  %v1490_v12 = vld [vmem:[%s7454_s22 + $0x26e8] sm:$0xff]  ;;  %v1488_v13 = vld [vmem:[%s7454_s22 + $0x26d8] sm:$0xff]  ;;  %v1485_v18 = vld [vmem:[%s7454_s22 + $0x26c0] sm:$0xff] }
 0x2bf   : > { %v1492_v14 = vld [vmem:[%s7454_s22 + $0x26f8] sm:$0xff] }
 0x2c0   : > { %5491 = vmatpush1.bf16.msra.mxu0 %v5490_v29  ;;  %v6532_v29 = vpack.c.bf16 %v1460_v23, %v1456_v20  ;;  %v1489_v20 = vld [vmem:[%s7454_s22 + $0x26e0] sm:$0xff]  ;;  %v1487_v23 = vld [vmem:[%s7454_s22 + $0x26d0] sm:$0xff] }
 0x2c1   : > { %6515 = vmatpush1.bf16.msra.mxu1 %v6514_v30  ;;  %5493 = vmatprep.subr.bf16.mxu0 %v5492_v31  ;;  %v1459_v30 = vld [vmem:[%s7454_s22 + $0x25f0] sm:$0xff]  ;;  %v1462_v31 = vld [vmem:[%s7454_s22 + $0x2608] sm:$0xff] }
 0x2c2   : > { %6517 = vmatprep.subr.bf16.mxu1 %v6516_v37  ;;  %v5510_v37 = vpack.c.bf16 %v1457_v27, %v1453_v26  ;;  %v6534_v38 = vpack.c.bf16 %v1459_v30, %v1455_v28  ;;  %v5512_v39 = vpack.c.bf16 %v1466_v32, %v1462_v31  ;;  %v1498_v26 = vld [vmem:[%s7454_s22 + $0x2728] sm:$0xff]  ;;  %v1496_v27 = vld [vmem:[%s7454_s22 + $0x2718] sm:$0xff]  ;;  %v1493_v32 = vld [vmem:[%s7454_s22 + $0x2700] sm:$0xff] }
 0x2c3   : > { %v1500_v28 = vld [vmem:[%s7454_s22 + $0x2738] sm:$0xff] }
 0x2c4   : > { %5495 = vmatpush1.bf16.msra.mxu0 %v5494_v43  ;;  %v6536_v43 = vpack.c.bf16 %v1468_v36, %v1464_v34  ;;  %v1497_v34 = vld [vmem:[%s7454_s22 + $0x2720] sm:$0xff]  ;;  %v1495_v36 = vld [vmem:[%s7454_s22 + $0x2710] sm:$0xff] }
 0x2c5   : > { %6519 = vmatpush1.bf16.msra.mxu1 %v6518_v45  ;;  %5497 = vmatprep.subr.bf16.mxu0 %v5496_v47  ;;  %v1467_v45 = vld [vmem:[%s7454_s22 + $0x2630] sm:$0xff]  ;;  %v1470_v47 = vld [vmem:[%s7454_s22 + $0x2648] sm:$0xff] }
 0x2c6   : > { %6521 = vmatprep.subr.bf16.mxu1 %v6520_v52  ;;  %v5514_v52 = vpack.c.bf16 %v1465_v41, %v1461_v40  ;;  %v6538_v51 = vpack.c.bf16 %v1467_v45, %v1463_v42  ;;  %v5516_v53 = vpack.c.bf16 %v1474_v48, %v1470_v47  ;;  %v1506_v40 = vld [vmem:[%s7454_s22 + $0x2768] sm:$0xff]  ;;  %v1504_v41 = vld [vmem:[%s7454_s22 + $0x2758] sm:$0xff]  ;;  %v1501_v48 = vld [vmem:[%s7454_s22 + $0x2740] sm:$0xff] }
 0x2c7   : > { %v1508_v42 = vld [vmem:[%s7454_s22 + $0x2778] sm:$0xff] }
 0x2c8   : > { %5499 = vmatpush1.bf16.msra.mxu0 %v5498_v57  ;;  %v6540_v57 = vpack.c.bf16 %v1476_v50, %v1472_v49  ;;  %v1505_v49 = vld [vmem:[%s7454_s22 + $0x2760] sm:$0xff]  ;;  %v1503_v50 = vld [vmem:[%s7454_s22 + $0x2750] sm:$0xff] }
 0x2c9   : > { %6523 = vmatpush1.bf16.msra.mxu1 %v6522_v7  ;;  %5501 = vmatprep.subr.bf16.mxu0 %v5500_v58  ;;  %v1475_v7 = vld [vmem:[%s7454_s22 + $0x2670] sm:$0xff]  ;;  %v1478_v58 = vld [vmem:[%s7454_s22 + $0x2688] sm:$0xff] }
 0x2ca   : > { %6525 = vmatprep.subr.bf16.mxu1 %v6524_v1  ;;  %v5518_v1 = vpack.c.bf16 %v1473_v55, %v1469_v54  ;;  %v6542_v2 = vpack.c.bf16 %v1475_v7, %v1471_v56  ;;  %v5520_v3 = vpack.c.bf16 %v1482_v61, %v1478_v58  ;;  %v1514_v54 = vld [vmem:[%s7454_s22 + $0x27a8] sm:$0xff]  ;;  %v1512_v55 = vld [vmem:[%s7454_s22 + $0x2798] sm:$0xff]  ;;  %v1509_v61 = vld [vmem:[%s7454_s22 + $0x2780] sm:$0xff] }
 0x2cb   : > { %v1516_v56 = vld [vmem:[%s7454_s22 + $0x27b8] sm:$0xff] }
 0x2cc   : > { %5503 = vmatpush1.bf16.msra.mxu0 %v5502_v5  ;;  %v6544_v5 = vpack.c.bf16 %v1484_v0, %v1480_v62  ;;  %v1513_v62 = vld [vmem:[%s7454_s22 + $0x27a0] sm:$0xff]  ;;  %v1511_v0 = vld [vmem:[%s7454_s22 + $0x2790] sm:$0xff] }
 0x2cd   : > { %6527 = vmatpush1.bf16.msra.mxu1 %v6526_v9  ;;  %5505 = vmatprep.subr.bf16.mxu0 %v5504_v11  ;;  %v1483_v9 = vld [vmem:[%s7454_s22 + $0x26b0] sm:$0xff]  ;;  %v1486_v11 = vld [vmem:[%s7454_s22 + $0x26c8] sm:$0xff] }
 0x2ce   : > { %6529 = vmatprep.subr.bf16.mxu1 %v6528_v15  ;;  %v5522_v15 = vpack.c.bf16 %v1481_v4, %v1477_v63  ;;  %v6546_v16 = vpack.c.bf16 %v1483_v9, %v1479_v19  ;;  %v5524_v17 = vpack.c.bf16 %v1490_v12, %v1486_v11  ;;  %v1522_v63 = vld [vmem:[%s7454_s22 + $0x27e8] sm:$0xff]  ;;  %v1520_v4 = vld [vmem:[%s7454_s22 + $0x27d8] sm:$0xff]  ;;  %v1517_v12 = vld [vmem:[%s7454_s22 + $0x27c0] sm:$0xff] }
 0x2cf   : > { %v1524_v19 = vld [vmem:[%s7454_s22 + $0x27f8] sm:$0xff] }
 0x2d0   : > { %5507 = vmatpush1.bf16.msra.mxu0 %v5506_v21  ;;  %v6548_v21 = vpack.c.bf16 %v1492_v14, %v1488_v13  ;;  %v1521_v13 = vld [vmem:[%s7454_s22 + $0x27e0] sm:$0xff]  ;;  %v1519_v14 = vld [vmem:[%s7454_s22 + $0x27d0] sm:$0xff] }
 0x2d1   : > { %6531 = vmatpush1.bf16.msra.mxu1 %v6530_v24  ;;  %5509 = vmatprep.subr.bf16.mxu0 %v5508_v25  ;;  %v1491_v24 = vld [vmem:[%s7454_s22 + $0x26f0] sm:$0xff]  ;;  %v1494_v25 = vld [vmem:[%s7454_s22 + $0x2708] sm:$0xff] }
 0x2d2   : > { %6533 = vmatprep.subr.bf16.mxu1 %v6532_v29  ;;  %v5526_v29 = vpack.c.bf16 %v1489_v20, %v1485_v18  ;;  %v6550_v30 = vpack.c.bf16 %v1491_v24, %v1487_v23  ;;  %v5528_v31 = vpack.c.bf16 %v1498_v26, %v1494_v25  ;;  %v1530_v18 = vld [vmem:[%s7454_s22 + $0x2828] sm:$0xff]  ;;  %v1528_v20 = vld [vmem:[%s7454_s22 + $0x2818] sm:$0xff]  ;;  %v1525_v26 = vld [vmem:[%s7454_s22 + $0x2800] sm:$0xff] }
 0x2d3   : > { %v1532_v23 = vld [vmem:[%s7454_s22 + $0x2838] sm:$0xff] }
 0x2d4   : > { %5511 = vmatpush1.bf16.msra.mxu0 %v5510_v37  ;;  %v6552_v37 = vpack.c.bf16 %v1500_v28, %v1496_v27  ;;  %v1529_v27 = vld [vmem:[%s7454_s22 + $0x2820] sm:$0xff]  ;;  %v1527_v28 = vld [vmem:[%s7454_s22 + $0x2810] sm:$0xff] }
 0x2d5   : > { %6535 = vmatpush1.bf16.msra.mxu1 %v6534_v38  ;;  %5513 = vmatprep.subr.bf16.mxu0 %v5512_v39  ;;  %v1499_v38 = vld [vmem:[%s7454_s22 + $0x2730] sm:$0xff]  ;;  %v1502_v39 = vld [vmem:[%s7454_s22 + $0x2748] sm:$0xff] }
 0x2d6   : > { %6537 = vmatprep.subr.bf16.mxu1 %v6536_v43  ;;  %v5530_v43 = vpack.c.bf16 %v1497_v34, %v1493_v32  ;;  %v6554_v45 = vpack.c.bf16 %v1499_v38, %v1495_v36  ;;  %v5532_v47 = vpack.c.bf16 %v1506_v40, %v1502_v39  ;;  %v1538_v32 = vld [vmem:[%s7454_s22 + $0x2868] sm:$0xff]  ;;  %v8824_v34 = vld [vmem:[#allocation2 + $0x10] sm:$0xff]  ;;  %v1540_v38 = vld [vmem:[%s7454_s22 + $0x2878] sm:$0xff]  ;;  %v5546_v39 = vpack.c.bf16 %v1529_v27, %v1525_v26 }
 0x2d7   : > { %v2372_v36 = vrot.slane %v8824_v34, %v7741_v33  ;;  %v1563_v27 = vld [vmem:[%s7454_s22 + $0x2930] sm:$0xff] }
 0x2d8   : > { %5515 = vmatpush1.bf16.msra.mxu0 %v5514_v52  ;;  %v6556_v52 = vpack.c.bf16 %v1508_v42, %v1504_v41  ;;  %v1533_v42 = vld [vmem:[%s7454_s22 + $0x2840] sm:$0xff] }
 0x2d9   : > { %6539 = vmatpush1.bf16.msra.mxu1 %v6538_v51  ;;  %5517 = vmatprep.subr.bf16.mxu0 %v5516_v53  ;;  %v1507_v51 = vld [vmem:[%s7454_s22 + $0x2770] sm:$0xff]  ;;  %v1510_v53 = vld [vmem:[%s7454_s22 + $0x2788] sm:$0xff] }
 0x2da   : > { %6541 = vmatprep.subr.bf16.mxu1 %v6540_v57  ;;  %v5534_v57 = vpack.c.bf16 %v1505_v49, %v1501_v48  ;;  %v6558_v7 = vpack.c.bf16 %v1507_v51, %v1503_v50  ;;  %v5536_v58 = vpack.c.bf16 %v1514_v54, %v1510_v53  ;;  %v1539_v48 = vld [vmem:[%s7454_s22 + $0x2870] sm:$0xff]  ;;  %v1542_v49 = vld [vmem:[%s7454_s22 + $0x2888] sm:$0xff]  ;;  %v1544_v51 = vld [vmem:[%s7454_s22 + $0x2898] sm:$0xff] }
 0x2db   : > { %v1546_v50 = vld [vmem:[%s7454_s22 + $0x28a8] sm:$0xff]  ;;  %v1548_v53 = vld [vmem:[%s7454_s22 + $0x28b8] sm:$0xff] }
 0x2dc   : > { %5519 = vmatpush1.bf16.msra.mxu0 %v5518_v1  ;;  %v6560_v1 = vpack.c.bf16 %v1516_v56, %v1512_v55  ;;  %v5552_v56 = vpack.c.bf16 %v1546_v50, %v1542_v49 }
 0x2dd   : > { %6543 = vmatpush1.bf16.msra.mxu1 %v6542_v2  ;;  %5521 = vmatprep.subr.bf16.mxu0 %v5520_v3  ;;  %v1515_v2 = vld [vmem:[%s7454_s22 + $0x27b0] sm:$0xff]  ;;  %v1518_v3 = vld [vmem:[%s7454_s22 + $0x27c8] sm:$0xff] }
 0x2de   : > { %6545 = vmatprep.subr.bf16.mxu1 %v6544_v5  ;;  %v5538_v5 = vpack.c.bf16 %v1513_v62, %v1509_v61  ;;  %v6562_v9 = vpack.c.bf16 %v1515_v2, %v1511_v0  ;;  %v5540_v11 = vpack.c.bf16 %v1522_v63, %v1518_v3  ;;  %v6576_v61 = vpack.c.bf16 %v1548_v53, %v1544_v51  ;;  %v1547_v62 = vld [vmem:[%s7454_s22 + $0x28b0] sm:$0xff]  ;;  %v1550_v0 = vld [vmem:[%s7454_s22 + $0x28c8] sm:$0xff]  ;;  %v1552_v2 = vld [vmem:[%s7454_s22 + $0x28d8] sm:$0xff] }
 0x2df   : > { %v1556_v3 = vld [vmem:[%s7454_s22 + $0x28f8] sm:$0xff]  ;;  %v1573_v51 = vld [vmem:[%s7454_s22 + $0x2980] sm:$0xff] }
 0x2e0   : > { %5523 = vmatpush1.bf16.msra.mxu0 %v5522_v15  ;;  %v6564_v15 = vpack.c.bf16 %v1524_v19, %v1520_v4  ;;  %v1577_v53 = vld [vmem:[%s7454_s22 + $0x29a0] sm:$0xff] }
 0x2e1   : > { %6547 = vmatpush1.bf16.msra.mxu1 %v6546_v16  ;;  %5525 = vmatprep.subr.bf16.mxu0 %v5524_v17  ;;  %v1523_v16 = vld [vmem:[%s7454_s22 + $0x27f0] sm:$0xff]  ;;  %v1526_v17 = vld [vmem:[%s7454_s22 + $0x2808] sm:$0xff] }
 0x2e2   : > { %6549 = vmatprep.subr.bf16.mxu1 %v6548_v21  ;;  %v5542_v21 = vpack.c.bf16 %v1521_v13, %v1517_v12  ;;  %v6566_v24 = vpack.c.bf16 %v1523_v16, %v1519_v14  ;;  %v5544_v25 = vpack.c.bf16 %v1530_v18, %v1526_v17  ;;  %v6580_v12 = vpack.c.bf16 %v1556_v3, %v1552_v2  ;;  %v1555_v13 = vld [vmem:[%s7454_s22 + $0x28f0] sm:$0xff]  ;;  %v1558_v14 = vld [vmem:[%s7454_s22 + $0x2908] sm:$0xff]  ;;  %v1560_v16 = vld [vmem:[%s7454_s22 + $0x2918] sm:$0xff] }
 0x2e3   : > { %v1564_v17 = vld [vmem:[%s7454_s22 + $0x2938] sm:$0xff]  ;;  %v1581_v2 = vld [vmem:[%s7454_s22 + $0x29c0] sm:$0xff] }
 0x2e4   : > { %5527 = vmatpush1.bf16.msra.mxu0 %v5526_v29  ;;  %v6568_v29 = vpack.c.bf16 %v1532_v23, %v1528_v20  ;;  %v6584_v26 = vpack.c.bf16 %v1564_v17, %v1560_v16  ;;  %v1585_v3 = vld [vmem:[%s7454_s22 + $0x29e0] sm:$0xff] }
 0x2e5   : > { %6551 = vmatpush1.bf16.msra.mxu1 %v6550_v30  ;;  %5529 = vmatprep.subr.bf16.mxu0 %v5528_v31  ;;  %v1531_v30 = vld [vmem:[%s7454_s22 + $0x2830] sm:$0xff]  ;;  %v1534_v31 = vld [vmem:[%s7454_s22 + $0x2848] sm:$0xff]  ;;  %v1589_v16 = vld [vmem:[%s7454_s22 + $0x2a00] sm:$0xff] }
 0x2e6   : > { %6553 = vmatprep.subr.bf16.mxu1 %v6552_v37  ;;  %v1536_v37 = vld [vmem:[%s7454_s22 + $0x2858] sm:$0xff]  ;;  %v6570_v40 = vpack.c.bf16 %v1531_v30, %v1527_v28  ;;  %v5548_v41 = vpack.c.bf16 %v1538_v32, %v1534_v31  ;;  %v1566_v28 = vld [vmem:[%s7454_s22 + $0x2948] sm:$0xff]  ;;  %v1593_v17 = vld [vmem:[%s7454_s22 + $0x2a20] sm:$0xff] }
 0x2e7   : > { %v1568_v30 = vld [vmem:[%s7454_s22 + $0x2958] sm:$0xff] }
 0x2e8   : > { %5531 = vmatpush1.bf16.msra.mxu0 %v5530_v43  ;;  %v1537_v43 = vld [vmem:[%s7454_s22 + $0x2860] sm:$0xff]  ;;  %v1572_v31 = vld [vmem:[%s7454_s22 + $0x2978] sm:$0xff] }
 0x2e9   : > { %6555 = vmatpush1.bf16.msra.mxu1 %v6554_v45  ;;  %5533 = vmatprep.subr.bf16.mxu0 %v5532_v47  ;;  %v1535_v45 = vld [vmem:[%s7454_s22 + $0x2850] sm:$0xff]  ;;  %v6572_v47 = vpack.c.bf16 %v1540_v38, %v1536_v37  ;;  %v5550_v54 = vpack.c.bf16 %v1537_v43, %v1533_v42  ;;  %v1565_v38 = vld [vmem:[%s7454_s22 + $0x2940] sm:$0xff]  ;;  %v1574_v43 = vld [vmem:[%s7454_s22 + $0x2988] sm:$0xff] }
 0x2ea   : > { %6557 = vmatprep.subr.bf16.mxu1 %v6556_v52  ;;  %v2384_v52 = vrot.slane %v8824_v34, %v7750_v44  ;;  %v6574_v55 = vpack.c.bf16 %v1539_v48, %v1535_v45  ;;  %v1571_v42 = vld [vmem:[%s7454_s22 + $0x2970] sm:$0xff]  ;;  %v1578_v45 = vld [vmem:[%s7454_s22 + $0x29a8] sm:$0xff]  ;;  %v1580_v48 = vld [vmem:[%s7454_s22 + $0x29b8] sm:$0xff] }
 0x2ec   : > { %5535 = vmatpush1.bf16.msra.mxu0 %v5534_v57  ;;  %v1541_v57 = vld [vmem:[%s7454_s22 + $0x2880] sm:$0xff] }
 0x2ed   : > { %6559 = vmatpush1.bf16.msra.mxu1 %v6558_v7  ;;  %5537 = vmatprep.subr.bf16.mxu0 %v5536_v58  ;;  %v1545_v7 = vld [vmem:[%s7454_s22 + $0x28a0] sm:$0xff]  ;;  %v1543_v58 = vld [vmem:[%s7454_s22 + $0x2890] sm:$0xff] }
 0x2ee   : > { %6561 = vmatprep.subr.bf16.mxu1 %v6560_v1  ;;  %v1554_v1 = vld [vmem:[%s7454_s22 + $0x28e8] sm:$0xff]  ;;  %v5554_v63 = vpack.c.bf16 %v1545_v7, %v1541_v57  ;;  %v6578_v4 = vpack.c.bf16 %v1547_v62, %v1543_v58  ;;  %v1584_v58 = vld [vmem:[%s7454_s22 + $0x29d8] sm:$0xff]  ;;  %v5570_v62 = vpack.c.bf16 %v1577_v53, %v1573_v51 }
 0x2ef   : > { %v5556_v19 = vpack.c.bf16 %v1554_v1, %v1550_v0  ;;  %v1582_v57 = vld [vmem:[%s7454_s22 + $0x29c8] sm:$0xff] }
 0x2f0   : > { %5539 = vmatpush1.bf16.msra.mxu0 %v5538_v5  ;;  %v1549_v5 = vld [vmem:[%s7454_s22 + $0x28c0] sm:$0xff]  ;;  %v1586_v7 = vld [vmem:[%s7454_s22 + $0x29e8] sm:$0xff] }
 0x2f1   : > { %6563 = vmatpush1.bf16.msra.mxu1 %v6562_v9  ;;  %5541 = vmatprep.subr.bf16.mxu0 %v5540_v11  ;;  %v1553_v9 = vld [vmem:[%s7454_s22 + $0x28e0] sm:$0xff]  ;;  %v1551_v11 = vld [vmem:[%s7454_s22 + $0x28d0] sm:$0xff]  ;;  %v5572_v1 = vpack.c.bf16 %v1586_v7, %v1582_v57  ;;  %v1614_v51 = vld [vmem:[%s7454_s22 + $0x2ac8] sm:$0xff] }
 0x2f2   : > { %6565 = vmatprep.subr.bf16.mxu1 %v6564_v15  ;;  %v1562_v15 = vld [vmem:[%s7454_s22 + $0x2928] sm:$0xff]  ;;  %v5558_v18 = vpack.c.bf16 %v1553_v9, %v1549_v5  ;;  %v6582_v20 = vpack.c.bf16 %v1555_v13, %v1551_v11  ;;  %v1592_v11 = vld [vmem:[%s7454_s22 + $0x2a18] sm:$0xff]  ;;  %v5574_v13 = vpack.c.bf16 %v1585_v3, %v1581_v2 }
 0x2f3   : > { %v5560_v23 = vpack.c.bf16 %v1562_v15, %v1558_v14  ;;  %v1590_v5 = vld [vmem:[%s7454_s22 + $0x2a08] sm:$0xff] }
 0x2f4   : > { %5543 = vmatpush1.bf16.msra.mxu0 %v5542_v21  ;;  %v1557_v21 = vld [vmem:[%s7454_s22 + $0x2900] sm:$0xff]  ;;  %v1594_v9 = vld [vmem:[%s7454_s22 + $0x2a28] sm:$0xff] }
 0x2f5   : > { %6567 = vmatpush1.bf16.msra.mxu1 %v6566_v24  ;;  %5545 = vmatprep.subr.bf16.mxu0 %v5544_v25  ;;  %v1561_v24 = vld [vmem:[%s7454_s22 + $0x2920] sm:$0xff]  ;;  %v1559_v25 = vld [vmem:[%s7454_s22 + $0x2910] sm:$0xff]  ;;  %v5576_v15 = vpack.c.bf16 %v1594_v9, %v1590_v5  ;;  %v1618_v53 = vld [vmem:[%s7454_s22 + $0x2ae8] sm:$0xff] }
 0x2f6   : > { %6569 = vmatprep.subr.bf16.mxu1 %v6568_v29  ;;  %v1570_v29 = vld [vmem:[%s7454_s22 + $0x2968] sm:$0xff]  ;;  %v5562_v32 = vpack.c.bf16 %v1561_v24, %v1557_v21  ;;  %v5588_v7 = vpack.c.bf16 %v1618_v53, %v1614_v51 }
 0x2f7   : > { %3161 = vmatmul.mubr.f32.vlgmr.msra.gmra.mrb[0].mxu0 %v2372_v36  ;;  %v5564_v37 = vpack.c.bf16 %v1570_v29, %v1566_v28  ;;  %v1598_v21 = vld [vmem:[%s7454_s22 + $0x2a48] sm:$0xff] }
 0x2f8   : > { %5547 = vmatpush1.bf16.msra.mxu0 %v5546_v39  ;;  %4297 = vmatmul.mubr.f32.vlgmr.msra.gmra.mrb[0].mxu1 %v2372_v36  ;;  %v6586_v36 = vpack.c.bf16 %v1563_v27, %v1559_v25  ;;  %v1569_v39 = vld [vmem:[%s7454_s22 + $0x2960] sm:$0xff]  ;;  %v1602_v24 = vld [vmem:[%s7454_s22 + $0x2a68] sm:$0xff]  ;;  %v1600_v25 = vld [vmem:[%s7454_s22 + $0x2a58] sm:$0xff]  ;;  %v5578_v27 = vpack.c.bf16 %v1593_v17, %v1589_v16 }
 0x2f9   : > { %6571 = vmatpush1.bf16.msra.mxu1 %v6570_v40  ;;  %5549 = vmatprep.subr.bf16.mxu0 %v5548_v41  ;;  %v1567_v40 = vld [vmem:[%s7454_s22 + $0x2950] sm:$0xff]  ;;  %v6588_v41 = vpack.c.bf16 %v1572_v31, %v1568_v30  ;;  %v5566_v49 = vpack.c.bf16 %v1569_v39, %v1565_v38  ;;  %v5580_v29 = vpack.c.bf16 %v1602_v24, %v1598_v21  ;;  %v1597_v30 = vld [vmem:[%s7454_s22 + $0x2a40] sm:$0xff]  ;;  %v1606_v38 = vld [vmem:[%s7454_s22 + $0x2a88] sm:$0xff] }
 0x2fa   : > { %6573 = vmatprep.subr.bf16.mxu1 %v6572_v47  ;;  %3231 = vmatprep.mubr.f32.mxu0 %v2384_v52  ;;  %v1576_v47 = vld [vmem:[%s7454_s22 + $0x2998] sm:$0xff]  ;;  %v6590_v50 = vpack.c.bf16 %v1571_v42, %v1567_v40  ;;  %v1601_v31 = vld [vmem:[%s7454_s22 + $0x2a60] sm:$0xff]  ;;  %v1610_v39 = vld [vmem:[%s7454_s22 + $0x2aa8] sm:$0xff] }
 0x2fb   : > { %4367 = vmatprep.mubr.f32.mxu1 %v2384_v52  ;;  %v5568_v52 = vpack.c.bf16 %v1578_v45, %v1574_v43  ;;  %v1608_v40 = vld [vmem:[%s7454_s22 + $0x2a98] sm:$0xff]  ;;  %v5582_v42 = vpack.c.bf16 %v1601_v31, %v1597_v30  ;;  %v5584_v45 = vpack.c.bf16 %v1610_v39, %v1606_v38  ;;  %v1622_v2 = vld [vmem:[%s7454_s22 + $0x2b08] sm:$0xff] }
 0x2fc   : > { %5551 = vmatpush1.bf16.msra.mxu0 %v5550_v54  ;;  %v1575_v54 = vld [vmem:[%s7454_s22 + $0x2990] sm:$0xff]  ;;  %v1626_v3 = vld [vmem:[%s7454_s22 + $0x2b28] sm:$0xff] }
 0x2fd   : > { %6575 = vmatpush1.bf16.msra.mxu1 %v6574_v55  ;;  %5553 = vmatprep.subr.bf16.mxu0 %v5552_v56  ;;  %v6592_v55 = vpack.c.bf16 %v1580_v48, %v1576_v47  ;;  %v1579_v56 = vld [vmem:[%s7454_s22 + $0x29b0] sm:$0xff]  ;;  %v1605_v47 = vld [vmem:[%s7454_s22 + $0x2a80] sm:$0xff]  ;;  %v5592_v9 = vpack.c.bf16 %v1626_v3, %v1622_v2  ;;  %v1630_v16 = vld [vmem:[%s7454_s22 + $0x2b48] sm:$0xff] }
 0x2fe   : > { %6577 = vmatprep.subr.bf16.mxu1 %v6576_v61  ;;  %v1588_v61 = vld [vmem:[%s7454_s22 + $0x29f8] sm:$0xff]  ;;  %v6594_v0 = vpack.c.bf16 %v1579_v56, %v1575_v54  ;;  %v1609_v48 = vld [vmem:[%s7454_s22 + $0x2aa0] sm:$0xff]  ;;  %v1634_v17 = vld [vmem:[%s7454_s22 + $0x2b68] sm:$0xff] }
 0x2ff   : > { %v1616_v54 = vld [vmem:[%s7454_s22 + $0x2ad8] sm:$0xff]  ;;  %v5586_v56 = vpack.c.bf16 %v1609_v48, %v1605_v47  ;;  %v5596_v24 = vpack.c.bf16 %v1634_v17, %v1630_v16  ;;  %v1638_v30 = vld [vmem:[%s7454_s22 + $0x2b88] sm:$0xff] }
 0x300   : > { %5555 = vmatpush1.bf16.msra.mxu0 %v5554_v63  ;;  %v1583_v63 = vld [vmem:[%s7454_s22 + $0x29d0] sm:$0xff]  ;;  %v1642_v31 = vld [vmem:[%s7454_s22 + $0x2ba8] sm:$0xff] }
 0x301   : > { %6579 = vmatpush1.bf16.msra.mxu1 %v6578_v4  ;;  %5557 = vmatprep.subr.bf16.mxu0 %v5556_v19  ;;  %v6596_v4 = vpack.c.bf16 %v1588_v61, %v1584_v58  ;;  %v1587_v19 = vld [vmem:[%s7454_s22 + $0x29f0] sm:$0xff]  ;;  %v1613_v58 = vld [vmem:[%s7454_s22 + $0x2ac0] sm:$0xff]  ;;  %v5600_v39 = vpack.c.bf16 %v1642_v31, %v1638_v30  ;;  %v1646_v47 = vld [vmem:[%s7454_s22 + $0x2bc8] sm:$0xff] }
 0x302   : > { %6581 = vmatprep.subr.bf16.mxu1 %v6580_v12  ;;  %v1596_v12 = vld [vmem:[%s7454_s22 + $0x2a38] sm:$0xff]  ;;  %v6598_v14 = vpack.c.bf16 %v1587_v19, %v1583_v63  ;;  %v1617_v61 = vld [vmem:[%s7454_s22 + $0x2ae0] sm:$0xff]  ;;  %v1650_v48 = vld [vmem:[%s7454_s22 + $0x2be8] sm:$0xff] }
 0x303   : > { %v1624_v63 = vld [vmem:[%s7454_s22 + $0x2b18] sm:$0xff]  ;;  %v5590_v19 = vpack.c.bf16 %v1617_v61, %v1613_v58  ;;  %v5604_v53 = vpack.c.bf16 %v1650_v48, %v1646_v47  ;;  %v1654_v58 = vld [vmem:[%s7454_s22 + $0x2c08] sm:$0xff] }
 0x304   : > { %5559 = vmatpush1.bf16.msra.mxu0 %v5558_v18  ;;  %v1591_v18 = vld [vmem:[%s7454_s22 + $0x2a10] sm:$0xff]  ;;  %v1658_v61 = vld [vmem:[%s7454_s22 + $0x2c28] sm:$0xff]  ;;  %v1676_v30 = vld [vmem:[%s7454_s22 + $0x2cb8] sm:$0xff] }
 0x305   : > { %6583 = vmatpush1.bf16.msra.mxu1 %v6582_v20  ;;  %5561 = vmatprep.subr.bf16.mxu0 %v5560_v23  ;;  %v6600_v20 = vpack.c.bf16 %v1596_v12, %v1592_v11  ;;  %v1595_v23 = vld [vmem:[%s7454_s22 + $0x2a30] sm:$0xff]  ;;  %v1621_v11 = vld [vmem:[%s7454_s22 + $0x2b00] sm:$0xff]  ;;  %v5608_v3 = vpack.c.bf16 %v1658_v61, %v1654_v58 }
 0x306   : > { %6585 = vmatprep.subr.bf16.mxu1 %v6584_v26  ;;  %v1604_v26 = vld [vmem:[%s7454_s22 + $0x2a78] sm:$0xff]  ;;  %v6602_v28 = vpack.c.bf16 %v1595_v23, %v1591_v18  ;;  %v1625_v12 = vld [vmem:[%s7454_s22 + $0x2b20] sm:$0xff] }
 0x307   : > { %v1632_v18 = vld [vmem:[%s7454_s22 + $0x2b58] sm:$0xff]  ;;  %v5594_v23 = vpack.c.bf16 %v1625_v12, %v1621_v11  ;;  %v1662_v11 = vld [vmem:[%s7454_s22 + $0x2c48] sm:$0xff] }
 0x308   : > { %5563 = vmatpush1.bf16.msra.mxu0 %v5562_v32  ;;  %v1599_v32 = vld [vmem:[%s7454_s22 + $0x2a50] sm:$0xff]  ;;  %v1666_v12 = vld [vmem:[%s7454_s22 + $0x2c68] sm:$0xff] }
 0x309   : > { %6587 = vmatpush1.bf16.msra.mxu1 %v6586_v36  ;;  %5565 = vmatprep.subr.bf16.mxu0 %v5564_v37  ;;  %v6604_v36 = vpack.c.bf16 %v1604_v26, %v1600_v25  ;;  %v1603_v37 = vld [vmem:[%s7454_s22 + $0x2a70] sm:$0xff]  ;;  %v1629_v25 = vld [vmem:[%s7454_s22 + $0x2b40] sm:$0xff] }
 0x30a   : > { %6589 = vmatprep.subr.bf16.mxu1 %v6588_v41  ;;  %v1612_v41 = vld [vmem:[%s7454_s22 + $0x2ab8] sm:$0xff]  ;;  %v6606_v43 = vpack.c.bf16 %v1603_v37, %v1599_v32  ;;  %v1633_v26 = vld [vmem:[%s7454_s22 + $0x2b60] sm:$0xff] }
 0x30b   : > { %v1640_v32 = vld [vmem:[%s7454_s22 + $0x2b98] sm:$0xff]  ;;  %v5598_v37 = vpack.c.bf16 %v1633_v26, %v1629_v25  ;;  %v1667_v25 = vld [vmem:[%s7454_s22 + $0x2c70] sm:$0xff]  ;;  %v1670_v26 = vld [vmem:[%s7454_s22 + $0x2c88] sm:$0xff] }
 0x30c   : > { %5567 = vmatpush1.bf16.msra.mxu0 %v5566_v49  ;;  %v1607_v49 = vld [vmem:[%s7454_s22 + $0x2a90] sm:$0xff] }
 0x30d   : > { %6591 = vmatpush1.bf16.msra.mxu1 %v6590_v50  ;;  %5569 = vmatprep.subr.bf16.mxu0 %v5568_v52  ;;  %v6608_v50 = vpack.c.bf16 %v1612_v41, %v1608_v40  ;;  %v1611_v52 = vld [vmem:[%s7454_s22 + $0x2ab0] sm:$0xff]  ;;  %v1637_v40 = vld [vmem:[%s7454_s22 + $0x2b80] sm:$0xff] }
 0x30e   : > { %6593 = vmatprep.subr.bf16.mxu1 %v6592_v55  ;;  %v1620_v55 = vld [vmem:[%s7454_s22 + $0x2af8] sm:$0xff]  ;;  %v6610_v57 = vpack.c.bf16 %v1611_v52, %v1607_v49  ;;  %v1641_v41 = vld [vmem:[%s7454_s22 + $0x2ba0] sm:$0xff] }
 0x30f   : > { %v1648_v49 = vld [vmem:[%s7454_s22 + $0x2bd8] sm:$0xff]  ;;  %v5602_v52 = vpack.c.bf16 %v1641_v41, %v1637_v40  ;;  %v1675_v40 = vld [vmem:[%s7454_s22 + $0x2cb0] sm:$0xff]  ;;  %v1678_v41 = vld [vmem:[%s7454_s22 + $0x2cc8] sm:$0xff] }
 0x310   : > { %5571 = vmatpush1.bf16.msra.mxu0 %v5570_v62  ;;  %v1615_v62 = vld [vmem:[%s7454_s22 + $0x2ad0] sm:$0xff] }
 0x311   : > { %6595 = vmatpush1.bf16.msra.mxu1 %v6594_v0  ;;  %5573 = vmatprep.subr.bf16.mxu0 %v5572_v1  ;;  %v6612_v0 = vpack.c.bf16 %v1620_v55, %v1616_v54  ;;  %v1619_v1 = vld [vmem:[%s7454_s22 + $0x2af0] sm:$0xff]  ;;  %v1645_v54 = vld [vmem:[%s7454_s22 + $0x2bc0] sm:$0xff] }
 0x312   : > { %6597 = vmatprep.subr.bf16.mxu1 %v6596_v4  ;;  %v1628_v4 = vld [vmem:[%s7454_s22 + $0x2b38] sm:$0xff]  ;;  %v6614_v5 = vpack.c.bf16 %v1619_v1, %v1615_v62  ;;  %v1649_v55 = vld [vmem:[%s7454_s22 + $0x2be0] sm:$0xff] }
 0x313   : > { %v1656_v62 = vld [vmem:[%s7454_s22 + $0x2c18] sm:$0xff]  ;;  %v5606_v1 = vpack.c.bf16 %v1649_v55, %v1645_v54  ;;  %v1683_v54 = vld [vmem:[%s7454_s22 + $0x2cf0] sm:$0xff]  ;;  %v1686_v55 = vld [vmem:[%s7454_s22 + $0x2d08] sm:$0xff] }
 0x314   : > { %5575 = vmatpush1.bf16.msra.mxu0 %v5574_v13  ;;  %v1623_v13 = vld [vmem:[%s7454_s22 + $0x2b10] sm:$0xff] }
 0x315   : > { %6599 = vmatpush1.bf16.msra.mxu1 %v6598_v14  ;;  %5577 = vmatprep.subr.bf16.mxu0 %v5576_v15  ;;  %v6616_v14 = vpack.c.bf16 %v1628_v4, %v1624_v63  ;;  %v1627_v15 = vld [vmem:[%s7454_s22 + $0x2b30] sm:$0xff]  ;;  %v1653_v63 = vld [vmem:[%s7454_s22 + $0x2c00] sm:$0xff] }
 0x316   : > { %6601 = vmatprep.subr.bf16.mxu1 %v6600_v20  ;;  %v1636_v20 = vld [vmem:[%s7454_s22 + $0x2b78] sm:$0xff]  ;;  %v6618_v21 = vpack.c.bf16 %v1627_v15, %v1623_v13  ;;  %v1657_v4 = vld [vmem:[%s7454_s22 + $0x2c20] sm:$0xff]  ;;  %v2380_v13 = vrot.slane %v8824_v34, %v7879_v60 }
 0x317   : > { %v1668_v15 = vld [vmem:[%s7454_s22 + $0x2c78] sm:$0xff]  ;;  %v5610_v16 = vpack.c.bf16 %v1657_v4, %v1653_v63  ;;  %v1691_v63 = vld [vmem:[%s7454_s22 + $0x2d30] sm:$0xff]  ;;  %v1694_v4 = vld [vmem:[%s7454_s22 + $0x2d48] sm:$0xff] }
 0x318   : > { %5579 = vmatpush1.bf16.msra.mxu0 %v5578_v27  ;;  %v1631_v27 = vld [vmem:[%s7454_s22 + $0x2b50] sm:$0xff] }
 0x319   : > { %6603 = vmatpush1.bf16.msra.mxu1 %v6602_v28  ;;  %5581 = vmatprep.subr.bf16.mxu0 %v5580_v29  ;;  %v6620_v28 = vpack.c.bf16 %v1636_v20, %v1632_v18  ;;  %v1635_v29 = vld [vmem:[%s7454_s22 + $0x2b70] sm:$0xff]  ;;  %v5612_v18 = vpack.c.bf16 %v1666_v12, %v1662_v11  ;;  %v1661_v20 = vld [vmem:[%s7454_s22 + $0x2c40] sm:$0xff] }
 0x31a   : > { %6605 = vmatprep.subr.bf16.mxu1 %v6604_v36  ;;  %v1644_v36 = vld [vmem:[%s7454_s22 + $0x2bb8] sm:$0xff]  ;;  %v6622_v38 = vpack.c.bf16 %v1635_v29, %v1631_v27  ;;  %v1674_v27 = vld [vmem:[%s7454_s22 + $0x2ca8] sm:$0xff] }
 0x31b   : > { %v1672_v29 = vld [vmem:[%s7454_s22 + $0x2c98] sm:$0xff] }
 0x31c   : > { %5583 = vmatpush1.bf16.msra.mxu0 %v5582_v42  ;;  %v1639_v42 = vld [vmem:[%s7454_s22 + $0x2b90] sm:$0xff] }
 0x31d   : > { %6607 = vmatpush1.bf16.msra.mxu1 %v6606_v43  ;;  %5585 = vmatprep.subr.bf16.mxu0 %v5584_v45  ;;  %v6624_v43 = vpack.c.bf16 %v1644_v36, %v1640_v32  ;;  %v1643_v45 = vld [vmem:[%s7454_s22 + $0x2bb0] sm:$0xff]  ;;  %v5616_v36 = vpack.c.bf16 %v1674_v27, %v1670_v26 }
 0x31e   : > { %6609 = vmatprep.subr.bf16.mxu1 %v6608_v50  ;;  %v1652_v50 = vld [vmem:[%s7454_s22 + $0x2bf8] sm:$0xff]  ;;  %v6626_v51 = vpack.c.bf16 %v1643_v45, %v1639_v42  ;;  %v1682_v42 = vld [vmem:[%s7454_s22 + $0x2ce8] sm:$0xff] }
 0x31f   : > { %v1684_v45 = vld [vmem:[%s7454_s22 + $0x2cf8] sm:$0xff] }
 0x320   : > { %5587 = vmatpush1.bf16.msra.mxu0 %v5586_v56  ;;  %v1647_v56 = vld [vmem:[%s7454_s22 + $0x2bd0] sm:$0xff] }
 0x321   : > { %6611 = vmatpush1.bf16.msra.mxu1 %v6610_v57  ;;  %5589 = vmatprep.subr.bf16.mxu0 %v5588_v7  ;;  %v6628_v57 = vpack.c.bf16 %v1652_v50, %v1648_v49  ;;  %v1651_v7 = vld [vmem:[%s7454_s22 + $0x2bf0] sm:$0xff]  ;;  %v5620_v49 = vpack.c.bf16 %v1682_v42, %v1678_v41  ;;  %v1677_v50 = vld [vmem:[%s7454_s22 + $0x2cc0] sm:$0xff] }
 0x322   : > { %6613 = vmatprep.subr.bf16.mxu1 %v6612_v0  ;;  %v1660_v0 = vld [vmem:[%s7454_s22 + $0x2c38] sm:$0xff]  ;;  %v6630_v2 = vpack.c.bf16 %v1651_v7, %v1647_v56  ;;  %v1690_v56 = vld [vmem:[%s7454_s22 + $0x2d28] sm:$0xff]  ;;  %v1709_v42 = vld [vmem:[%s7454_s22 + $0x2dc0] sm:$0xff] }
 0x323   : > { %v1692_v7 = vld [vmem:[%s7454_s22 + $0x2d38] sm:$0xff] }
 0x324   : > { %5591 = vmatpush1.bf16.msra.mxu0 %v5590_v19  ;;  %v1655_v19 = vld [vmem:[%s7454_s22 + $0x2c10] sm:$0xff] }
 0x325   : > { %6615 = vmatpush1.bf16.msra.mxu1 %v6614_v5  ;;  %5593 = vmatprep.subr.bf16.mxu0 %v5592_v9  ;;  %v6632_v5 = vpack.c.bf16 %v1660_v0, %v1656_v62  ;;  %v1659_v9 = vld [vmem:[%s7454_s22 + $0x2c30] sm:$0xff]  ;;  %v5624_v62 = vpack.c.bf16 %v1690_v56, %v1686_v55  ;;  %v1685_v0 = vld [vmem:[%s7454_s22 + $0x2d00] sm:$0xff] }
 0x326   : > { %6617 = vmatprep.subr.bf16.mxu1 %v6616_v14  ;;  %v1664_v14 = vld [vmem:[%s7454_s22 + $0x2c58] sm:$0xff]  ;;  %v6634_v17 = vpack.c.bf16 %v1659_v9, %v1655_v19  ;;  %v1698_v19 = vld [vmem:[%s7454_s22 + $0x2d68] sm:$0xff]  ;;  %v1717_v56 = vld [vmem:[%s7454_s22 + $0x2e00] sm:$0xff] }
 0x327   : > { %v1700_v9 = vld [vmem:[%s7454_s22 + $0x2d78] sm:$0xff] }
 0x328   : > { %5595 = vmatpush1.bf16.msra.mxu0 %v5594_v23  ;;  %v1665_v23 = vld [vmem:[%s7454_s22 + $0x2c60] sm:$0xff] }
 0x329   : > { %6619 = vmatpush1.bf16.msra.mxu1 %v6618_v21  ;;  %5597 = vmatprep.subr.bf16.mxu0 %v5596_v24  ;;  %v1663_v21 = vld [vmem:[%s7454_s22 + $0x2c50] sm:$0xff]  ;;  %v6636_v24 = vpack.c.bf16 %v1668_v15, %v1664_v14  ;;  %v5614_v31 = vpack.c.bf16 %v1665_v23, %v1661_v20  ;;  %v1693_v14 = vld [vmem:[%s7454_s22 + $0x2d40] sm:$0xff]  ;;  %v1702_v20 = vld [vmem:[%s7454_s22 + $0x2d88] sm:$0xff] }
 0x32a   : > { %6621 = vmatprep.subr.bf16.mxu1 %v6620_v28  ;;  %v2392_v28 = vrot.slane %v8824_v34, %v7888_v6  ;;  %v6638_v32 = vpack.c.bf16 %v1667_v25, %v1663_v21  ;;  %v6640_v34 = vpack.c.bf16 %v1676_v30, %v1672_v29  ;;  %v1697_v15 = vld [vmem:[%s7454_s22 + $0x2d60] sm:$0xff]  ;;  %v1706_v23 = vld [vmem:[%s7454_s22 + $0x2da8] sm:$0xff]  ;;  %v1704_v21 = vld [vmem:[%s7454_s22 + $0x2d98] sm:$0xff] }
 0x32b   : > { %v5630_v25 = vpack.c.bf16 %v1697_v15, %v1693_v14  ;;  %v5632_v27 = vpack.c.bf16 %v1706_v23, %v1702_v20  ;;  %v1705_v29 = vld [vmem:[%s7454_s22 + $0x2da0] sm:$0xff]  ;;  %v1703_v30 = vld [vmem:[%s7454_s22 + $0x2d90] sm:$0xff]  ;;  %v1738_v14 = vld [vmem:[%s7454_s22 + $0x2ea8] sm:$0xff] }
 0x32c   : > { %5599 = vmatpush1.bf16.msra.mxu0 %v5598_v37  ;;  %v1669_v37 = vld [vmem:[%s7454_s22 + $0x2c80] sm:$0xff]  ;;  %v1736_v15 = vld [vmem:[%s7454_s22 + $0x2e98] sm:$0xff] }
 0x32d   : > { %6623 = vmatpush1.bf16.msra.mxu1 %v6622_v38  ;;  %5601 = vmatprep.subr.bf16.mxu0 %v5600_v39  ;;  %v1673_v38 = vld [vmem:[%s7454_s22 + $0x2ca0] sm:$0xff]  ;;  %v1671_v39 = vld [vmem:[%s7454_s22 + $0x2c90] sm:$0xff] }
 0x32e   : > { %6625 = vmatprep.subr.bf16.mxu1 %v6624_v43  ;;  %v1680_v43 = vld [vmem:[%s7454_s22 + $0x2cd8] sm:$0xff]  ;;  %v5618_v47 = vpack.c.bf16 %v1673_v38, %v1669_v37  ;;  %v6642_v48 = vpack.c.bf16 %v1675_v40, %v1671_v39  ;;  %v1714_v37 = vld [vmem:[%s7454_s22 + $0x2de8] sm:$0xff]  ;;  %v1733_v23 = vld [vmem:[%s7454_s22 + $0x2e80] sm:$0xff] }
 0x32f   : > { %v1712_v38 = vld [vmem:[%s7454_s22 + $0x2dd8] sm:$0xff] }
 0x330   : > { %5603 = vmatpush1.bf16.msra.mxu0 %v5602_v52  ;;  %v1681_v52 = vld [vmem:[%s7454_s22 + $0x2ce0] sm:$0xff]  ;;  %v1716_v39 = vld [vmem:[%s7454_s22 + $0x2df8] sm:$0xff] }
 0x331   : > { %6627 = vmatpush1.bf16.msra.mxu1 %v6626_v51  ;;  %5605 = vmatprep.subr.bf16.mxu0 %v5604_v53  ;;  %v1679_v51 = vld [vmem:[%s7454_s22 + $0x2cd0] sm:$0xff]  ;;  %v6644_v53 = vpack.c.bf16 %v1684_v45, %v1680_v43  ;;  %v5622_v58 = vpack.c.bf16 %v1681_v52, %v1677_v50  ;;  %v1713_v43 = vld [vmem:[%s7454_s22 + $0x2de0] sm:$0xff]  ;;  %v1722_v50 = vld [vmem:[%s7454_s22 + $0x2e28] sm:$0xff] }
 0x332   : > { %6629 = vmatprep.subr.bf16.mxu1 %v6628_v57  ;;  %v1688_v57 = vld [vmem:[%s7454_s22 + $0x2d18] sm:$0xff]  ;;  %v6646_v61 = vpack.c.bf16 %v1683_v54, %v1679_v51  ;;  %v1711_v45 = vld [vmem:[%s7454_s22 + $0x2dd0] sm:$0xff] }
 0x333   : > { %v1720_v52 = vld [vmem:[%s7454_s22 + $0x2e18] sm:$0xff] }
 0x334   : > { %5607 = vmatpush1.bf16.msra.mxu0 %v5606_v1  ;;  %v1689_v1 = vld [vmem:[%s7454_s22 + $0x2d20] sm:$0xff]  ;;  %v1724_v51 = vld [vmem:[%s7454_s22 + $0x2e38] sm:$0xff] }
 0x335   : > { %6631 = vmatpush1.bf16.msra.mxu1 %v6630_v2  ;;  %5609 = vmatprep.subr.bf16.mxu0 %v5608_v3  ;;  %v1687_v2 = vld [vmem:[%s7454_s22 + $0x2d10] sm:$0xff]  ;;  %v6648_v3 = vpack.c.bf16 %v1692_v7, %v1688_v57  ;;  %v5626_v11 = vpack.c.bf16 %v1689_v1, %v1685_v0  ;;  %v1721_v57 = vld [vmem:[%s7454_s22 + $0x2e20] sm:$0xff]  ;;  %v1730_v0 = vld [vmem:[%s7454_s22 + $0x2e68] sm:$0xff] }
 0x336   : > { %6633 = vmatprep.subr.bf16.mxu1 %v6632_v5  ;;  %v1696_v5 = vld [vmem:[%s7454_s22 + $0x2d58] sm:$0xff]  ;;  %v6650_v12 = vpack.c.bf16 %v1691_v63, %v1687_v2  ;;  %v1719_v7 = vld [vmem:[%s7454_s22 + $0x2e10] sm:$0xff] }
 0x337   : > { %3232 = vmatmul.mubr.f32.vlgmr.msra.gmra.mrb[0].mxu0 %v2380_v13  ;;  %v1728_v1 = vld [vmem:[%s7454_s22 + $0x2e58] sm:$0xff] }
 0x338   : > { %5611 = vmatpush1.bf16.msra.mxu0 %v5610_v16  ;;  %4368 = vmatmul.mubr.f32.vlgmr.msra.gmra.mrb[0].mxu1 %v2380_v13  ;;  %v5628_v13 = vpack.c.bf16 %v1698_v19, %v1694_v4  ;;  %v1695_v16 = vld [vmem:[%s7454_s22 + $0x2d50] sm:$0xff]  ;;  %v1732_v2 = vld [vmem:[%s7454_s22 + $0x2e78] sm:$0xff]  ;;  %v1725_v19 = vld [vmem:[%s7454_s22 + $0x2e40] sm:$0xff] }
 0x339   : > { %6635 = vmatpush1.bf16.msra.mxu1 %v6634_v17  ;;  %5613 = vmatprep.subr.bf16.mxu0 %v5612_v18  ;;  %v6652_v17 = vpack.c.bf16 %v1700_v9, %v1696_v5  ;;  %v1699_v18 = vld [vmem:[%s7454_s22 + $0x2d70] sm:$0xff]  ;;  %v1729_v5 = vld [vmem:[%s7454_s22 + $0x2e60] sm:$0xff] }
 0x33a   : > { %6637 = vmatprep.subr.bf16.mxu1 %v6636_v24  ;;  %3302 = vmatprep.mubr.f32.mxu0 %v2392_v28  ;;  %v1708_v24 = vld [vmem:[%s7454_s22 + $0x2db8] sm:$0xff]  ;;  %v6654_v26 = vpack.c.bf16 %v1699_v18, %v1695_v16  ;;  %v1727_v9 = vld [vmem:[%s7454_s22 + $0x2e50] sm:$0xff] }
 0x33b   : > { %4438 = vmatprep.mubr.f32.mxu1 %v2392_v28  ;;  %v1701_v28 = vld [vmem:[%s7454_s22 + $0x2d80] sm:$0xff]  ;;  %v1740_v16 = vld [vmem:[%s7454_s22 + $0x2eb8] sm:$0xff] }
 0x33c   : > { %5615 = vmatpush1.bf16.msra.mxu0 %v5614_v31  ;;  %v6656_v31 = vpack.c.bf16 %v1708_v24, %v1704_v21  ;;  %v1737_v21 = vld [vmem:[%s7454_s22 + $0x2ea0] sm:$0xff]  ;;  %v1735_v24 = vld [vmem:[%s7454_s22 + $0x2e90] sm:$0xff] }
 0x33d   : > { %6639 = vmatpush1.bf16.msra.mxu1 %v6638_v32  ;;  %5617 = vmatprep.subr.bf16.mxu0 %v5616_v36  ;;  %v1707_v32 = vld [vmem:[%s7454_s22 + $0x2db0] sm:$0xff]  ;;  %v1710_v36 = vld [vmem:[%s7454_s22 + $0x2dc8] sm:$0xff] }
 0x33e   : > { %6641 = vmatprep.subr.bf16.mxu1 %v6640_v34  ;;  %v5634_v34 = vpack.c.bf16 %v1705_v29, %v1701_v28  ;;  %v6658_v40 = vpack.c.bf16 %v1707_v32, %v1703_v30  ;;  %v5636_v41 = vpack.c.bf16 %v1714_v37, %v1710_v36  ;;  %v1746_v28 = vld [vmem:[%s7454_s22 + $0x2ee8] sm:$0xff]  ;;  %v1744_v29 = vld [vmem:[%s7454_s22 + $0x2ed8] sm:$0xff]  ;;  %v1741_v37 = vld [vmem:[%s7454_s22 + $0x2ec0] sm:$0xff] }
 0x33f   : > { %v1748_v30 = vld [vmem:[%s7454_s22 + $0x2ef8] sm:$0xff] }
 0x340   : > { %5619 = vmatpush1.bf16.msra.mxu0 %v5618_v47  ;;  %v6660_v47 = vpack.c.bf16 %v1716_v39, %v1712_v38  ;;  %v1745_v38 = vld [vmem:[%s7454_s22 + $0x2ee0] sm:$0xff]  ;;  %v1743_v39 = vld [vmem:[%s7454_s22 + $0x2ed0] sm:$0xff] }
 0x341   : > { %6643 = vmatpush1.bf16.msra.mxu1 %v6642_v48  ;;  %5621 = vmatprep.subr.bf16.mxu0 %v5620_v49  ;;  %v1715_v48 = vld [vmem:[%s7454_s22 + $0x2df0] sm:$0xff]  ;;  %v1718_v49 = vld [vmem:[%s7454_s22 + $0x2e08] sm:$0xff] }
 0x342   : > { %6645 = vmatprep.subr.bf16.mxu1 %v6644_v53  ;;  %v5638_v53 = vpack.c.bf16 %v1713_v43, %v1709_v42  ;;  %v6662_v54 = vpack.c.bf16 %v1715_v48, %v1711_v45  ;;  %v5640_v55 = vpack.c.bf16 %v1722_v50, %v1718_v49  ;;  %v1754_v42 = vld [vmem:[%s7454_s22 + $0x2f28] sm:$0xff]  ;;  %v1752_v43 = vld [vmem:[%s7454_s22 + $0x2f18] sm:$0xff]  ;;  %v1749_v50 = vld [vmem:[%s7454_s22 + $0x2f00] sm:$0xff] }
 0x343   : > { %v1756_v45 = vld [vmem:[%s7454_s22 + $0x2f38] sm:$0xff] }
 0x344   : > { %5623 = vmatpush1.bf16.msra.mxu0 %v5622_v58  ;;  %v6664_v58 = vpack.c.bf16 %v1724_v51, %v1720_v52  ;;  %v1753_v52 = vld [vmem:[%s7454_s22 + $0x2f20] sm:$0xff]  ;;  %v1751_v51 = vld [vmem:[%s7454_s22 + $0x2f10] sm:$0xff] }
 0x345   : > { %6647 = vmatpush1.bf16.msra.mxu1 %v6646_v61  ;;  %5625 = vmatprep.subr.bf16.mxu0 %v5624_v62  ;;  %v1723_v61 = vld [vmem:[%s7454_s22 + $0x2e30] sm:$0xff]  ;;  %v1726_v62 = vld [vmem:[%s7454_s22 + $0x2e48] sm:$0xff] }
 0x346   : > { %6649 = vmatprep.subr.bf16.mxu1 %v6648_v3  ;;  %v5642_v3 = vpack.c.bf16 %v1721_v57, %v1717_v56  ;;  %v6666_v63 = vpack.c.bf16 %v1723_v61, %v1719_v7  ;;  %v5644_v4 = vpack.c.bf16 %v1730_v0, %v1726_v62  ;;  %v1762_v56 = vld [vmem:[%s7454_s22 + $0x2f68] sm:$0xff]  ;;  %v1760_v57 = vld [vmem:[%s7454_s22 + $0x2f58] sm:$0xff]  ;;  %v1757_v0 = vld [vmem:[%s7454_s22 + $0x2f40] sm:$0xff] }
 0x347   : > { %v1764_v7 = vld [vmem:[%s7454_s22 + $0x2f78] sm:$0xff] }
 0x348   : > { %5627 = vmatpush1.bf16.msra.mxu0 %v5626_v11  ;;  %v6668_v11 = vpack.c.bf16 %v1732_v2, %v1728_v1  ;;  %v1761_v1 = vld [vmem:[%s7454_s22 + $0x2f60] sm:$0xff]  ;;  %v1759_v2 = vld [vmem:[%s7454_s22 + $0x2f50] sm:$0xff] }
 0x349   : > { %6651 = vmatpush1.bf16.msra.mxu1 %v6650_v12  ;;  %5629 = vmatprep.subr.bf16.mxu0 %v5628_v13  ;;  %v1731_v12 = vld [vmem:[%s7454_s22 + $0x2e70] sm:$0xff]  ;;  %v1734_v13 = vld [vmem:[%s7454_s22 + $0x2e88] sm:$0xff] }
 0x34a   : > { %6653 = vmatprep.subr.bf16.mxu1 %v6652_v17  ;;  %v5646_v17 = vpack.c.bf16 %v1729_v5, %v1725_v19  ;;  %v6670_v18 = vpack.c.bf16 %v1731_v12, %v1727_v9  ;;  %v5648_v20 = vpack.c.bf16 %v1738_v14, %v1734_v13  ;;  %v1770_v19 = vld [vmem:[%s7454_s22 + $0x2fa8] sm:$0xff]  ;;  %v1768_v5 = vld [vmem:[%s7454_s22 + $0x2f98] sm:$0xff]  ;;  %v1765_v14 = vld [vmem:[%s7454_s22 + $0x2f80] sm:$0xff] }
 0x34b   : > { %v1772_v9 = vld [vmem:[%s7454_s22 + $0x2fb8] sm:$0xff] }
 0x34c   : > { %5631 = vmatpush1.bf16.msra.mxu0 %v5630_v25  ;;  %v6672_v25 = vpack.c.bf16 %v1740_v16, %v1736_v15  ;;  %v1769_v15 = vld [vmem:[%s7454_s22 + $0x2fa0] sm:$0xff]  ;;  %v1767_v16 = vld [vmem:[%s7454_s22 + $0x2f90] sm:$0xff] }
 0x34d   : > { %6655 = vmatpush1.bf16.msra.mxu1 %v6654_v26  ;;  %5633 = vmatprep.subr.bf16.mxu0 %v5632_v27  ;;  %v1739_v26 = vld [vmem:[%s7454_s22 + $0x2eb0] sm:$0xff]  ;;  %v1742_v27 = vld [vmem:[%s7454_s22 + $0x2ec8] sm:$0xff] }
 0x34e   : > { %6657 = vmatprep.subr.bf16.mxu1 %v6656_v31  ;;  %v5650_v31 = vpack.c.bf16 %v1737_v21, %v1733_v23  ;;  %v6674_v32 = vpack.c.bf16 %v1739_v26, %v1735_v24  ;;  %v5652_v36 = vpack.c.bf16 %v1746_v28, %v1742_v27  ;;  %v1778_v23 = vld [vmem:[%s7454_s22 + $0x2fe8] sm:$0xff]  ;;  %v1776_v21 = vld [vmem:[%s7454_s22 + $0x2fd8] sm:$0xff]  ;;  %v1773_v28 = vld [vmem:[%s7454_s22 + $0x2fc0] sm:$0xff] }
 0x34f   : > { %v1780_v24 = vld [vmem:[%s7454_s22 + $0x2ff8] sm:$0xff] }
 0x350   : > { %5635 = vmatpush1.bf16.msra.mxu0 %v5634_v34  ;;  %v6676_v34 = vpack.c.bf16 %v1748_v30, %v1744_v29  ;;  %v1777_v29 = vld [vmem:[%s7454_s22 + $0x2fe0] sm:$0xff]  ;;  %v1775_v30 = vld [vmem:[%s7454_s22 + $0x2fd0] sm:$0xff] }
 0x351   : > { %6659 = vmatpush1.bf16.msra.mxu1 %v6658_v40  ;;  %5637 = vmatprep.subr.bf16.mxu0 %v5636_v41  ;;  %v1747_v40 = vld [vmem:[%s7454_s22 + $0x2ef0] sm:$0xff]  ;;  %v1750_v41 = vld [vmem:[%s7454_s22 + $0x2f08] sm:$0xff] }
 0x352   : > { %6661 = vmatprep.subr.bf16.mxu1 %v6660_v47  ;;  %v5654_v47 = vpack.c.bf16 %v1745_v38, %v1741_v37  ;;  %v6678_v48 = vpack.c.bf16 %v1747_v40, %v1743_v39  ;;  %v5656_v49 = vpack.c.bf16 %v1754_v42, %v1750_v41  ;;  %v1786_v37 = vld [vmem:[%s7454_s22 + $0x3028] sm:$0xff]  ;;  %v1784_v38 = vld [vmem:[%s7454_s22 + $0x3018] sm:$0xff]  ;;  %v1781_v42 = vld [vmem:[%s7454_s22 + $0x3000] sm:$0xff] }
 0x353   : > { %v1788_v39 = vld [vmem:[%s7454_s22 + $0x3038] sm:$0xff] }
 0x354   : > { %5639 = vmatpush1.bf16.msra.mxu0 %v5638_v53  ;;  %v6680_v53 = vpack.c.bf16 %v1756_v45, %v1752_v43  ;;  %v1785_v43 = vld [vmem:[%s7454_s22 + $0x3020] sm:$0xff]  ;;  %v1783_v45 = vld [vmem:[%s7454_s22 + $0x3010] sm:$0xff] }
 0x355   : > { %6663 = vmatpush1.bf16.msra.mxu1 %v6662_v54  ;;  %5641 = vmatprep.subr.bf16.mxu0 %v5640_v55  ;;  %v1755_v54 = vld [vmem:[%s7454_s22 + $0x2f30] sm:$0xff]  ;;  %v1758_v55 = vld [vmem:[%s7454_s22 + $0x2f48] sm:$0xff] }
 0x356   : > { %6665 = vmatprep.subr.bf16.mxu1 %v6664_v58  ;;  %v5658_v58 = vpack.c.bf16 %v1753_v52, %v1749_v50  ;;  %v6682_v61 = vpack.c.bf16 %v1755_v54, %v1751_v51  ;;  %v5660_v62 = vpack.c.bf16 %v1762_v56, %v1758_v55  ;;  %v1794_v50 = vld [vmem:[%s7454_s22 + $0x3068] sm:$0xff]  ;;  %v7082_v52 = vld [vmem:[#allocation2 + $0x10] sm:$0xff]  ;;  %v1796_v54 = vld [vmem:[%s7454_s22 + $0x3078] sm:$0xff]  ;;  %v5674_v56 = vpack.c.bf16 %v1785_v43, %v1781_v42 }
 0x357   : > { %v2388_v51 = vrot.slane %v7082_v52, %v8019_v35  ;;  %v9093_v55 = vld [vmem:[#allocation2 + $0x18] sm:$0xff]  ;;  %v1819_v43 = vld [vmem:[%s7454_s22 + $0x3130] sm:$0xff] }
 0x358   : > { %5643 = vmatpush1.bf16.msra.mxu0 %v5642_v3  ;;  %v6684_v3 = vpack.c.bf16 %v1764_v7, %v1760_v57 }
 0x359   : > { %6667 = vmatpush1.bf16.msra.mxu1 %v6666_v63  ;;  %5645 = vmatprep.subr.bf16.mxu0 %v5644_v4  ;;  %v1763_v63 = vld [vmem:[%s7454_s22 + $0x2f70] sm:$0xff]  ;;  %v1766_v4 = vld [vmem:[%s7454_s22 + $0x2f88] sm:$0xff] }
 0x35a   : > { %6669 = vmatprep.subr.bf16.mxu1 %v6668_v11  ;;  %v5662_v11 = vpack.c.bf16 %v1761_v1, %v1757_v0  ;;  %v6686_v12 = vpack.c.bf16 %v1763_v63, %v1759_v2  ;;  %v5664_v13 = vpack.c.bf16 %v1770_v19, %v1766_v4  ;;  %v1795_v1 = vld [vmem:[%s7454_s22 + $0x3070] sm:$0xff]  ;;  %v1798_v2 = vld [vmem:[%s7454_s22 + $0x3088] sm:$0xff]  ;;  %v2400_v63 = vrot.slane %v9093_v55, %v7556_v8  ;;  %v1800_v4 = vld [vmem:[%s7454_s22 + $0x3098] sm:$0xff] }
 0x35b   : > { %v1804_v19 = vld [vmem:[%s7454_s22 + $0x30b8] sm:$0xff] }
 0x35c   : > { %5647 = vmatpush1.bf16.msra.mxu0 %v5646_v17  ;;  %v6688_v17 = vpack.c.bf16 %v1772_v9, %v1768_v5  ;;  %v6704_v8 = vpack.c.bf16 %v1804_v19, %v1800_v4  ;;  %v1833_v4 = vld [vmem:[%s7454_s22 + $0x31a0] sm:$0xff]  ;;  %v1831_v19 = vld [vmem:[%s7454_s22 + $0x3190] sm:$0xff] }
 0x35d   : > { %6671 = vmatpush1.bf16.msra.mxu1 %v6670_v18  ;;  %5649 = vmatprep.subr.bf16.mxu0 %v5648_v20  ;;  %v1771_v18 = vld [vmem:[%s7454_s22 + $0x2fb0] sm:$0xff]  ;;  %v1774_v20 = vld [vmem:[%s7454_s22 + $0x2fc8] sm:$0xff] }
 0x35e   : > { %6673 = vmatprep.subr.bf16.mxu1 %v6672_v25  ;;  %v5666_v25 = vpack.c.bf16 %v1769_v15, %v1765_v14  ;;  %v6690_v26 = vpack.c.bf16 %v1771_v18, %v1767_v16  ;;  %v5668_v27 = vpack.c.bf16 %v1778_v23, %v1774_v20  ;;  %v1799_v14 = vld [vmem:[%s7454_s22 + $0x3090] sm:$0xff]  ;;  %v1806_v16 = vld [vmem:[%s7454_s22 + $0x30c8] sm:$0xff]  ;;  %v1808_v18 = vld [vmem:[%s7454_s22 + $0x30d8] sm:$0xff] }
 0x35f   : > { %v1803_v15 = vld [vmem:[%s7454_s22 + $0x30b0] sm:$0xff]  ;;  %v1812_v20 = vld [vmem:[%s7454_s22 + $0x30f8] sm:$0xff] }
 0x360   : > { %5651 = vmatpush1.bf16.msra.mxu0 %v5650_v31  ;;  %v6692_v31 = vpack.c.bf16 %v1780_v24, %v1776_v21  ;;  %v6706_v21 = vpack.c.bf16 %v1803_v15, %v1799_v14  ;;  %v1844_v14 = vld [vmem:[%s7454_s22 + $0x31f8] sm:$0xff] }
 0x361   : > { %6675 = vmatpush1.bf16.msra.mxu1 %v6674_v32  ;;  %5653 = vmatprep.subr.bf16.mxu0 %v5652_v36  ;;  %v1779_v32 = vld [vmem:[%s7454_s22 + $0x2ff0] sm:$0xff]  ;;  %v1782_v36 = vld [vmem:[%s7454_s22 + $0x3008] sm:$0xff] }
 0x362   : > { %6677 = vmatprep.subr.bf16.mxu1 %v6676_v34  ;;  %v5670_v34 = vpack.c.bf16 %v1777_v29, %v1773_v28  ;;  %v6694_v40 = vpack.c.bf16 %v1779_v32, %v1775_v30  ;;  %v5672_v41 = vpack.c.bf16 %v1786_v37, %v1782_v36  ;;  %v6708_v28 = vpack.c.bf16 %v1812_v20, %v1808_v18  ;;  %v1811_v29 = vld [vmem:[%s7454_s22 + $0x30f0] sm:$0xff]  ;;  %v1814_v30 = vld [vmem:[%s7454_s22 + $0x3108] sm:$0xff]  ;;  %v1816_v32 = vld [vmem:[%s7454_s22 + $0x3118] sm:$0xff] }
 0x363   : > { %v1820_v36 = vld [vmem:[%s7454_s22 + $0x3138] sm:$0xff]  ;;  %v1841_v18 = vld [vmem:[%s7454_s22 + $0x31e0] sm:$0xff]  ;;  %v1839_v20 = vld [vmem:[%s7454_s22 + $0x31d0] sm:$0xff] }
 0x364   : > { %5655 = vmatpush1.bf16.msra.mxu0 %v5654_v47  ;;  %v6696_v47 = vpack.c.bf16 %v1788_v39, %v1784_v38  ;;  %v6712_v42 = vpack.c.bf16 %v1820_v36, %v1816_v32  ;;  %v1849_v32 = vld [vmem:[%s7454_s22 + $0x3220] sm:$0xff]  ;;  %v1847_v36 = vld [vmem:[%s7454_s22 + $0x3210] sm:$0xff] }
 0x365   : > { %6679 = vmatpush1.bf16.msra.mxu1 %v6678_v48  ;;  %5657 = vmatprep.subr.bf16.mxu0 %v5656_v49  ;;  %v1787_v48 = vld [vmem:[%s7454_s22 + $0x3030] sm:$0xff]  ;;  %v1790_v49 = vld [vmem:[%s7454_s22 + $0x3048] sm:$0xff] }
 0x366   : > { %6681 = vmatprep.subr.bf16.mxu1 %v6680_v53  ;;  %v1792_v53 = vld [vmem:[%s7454_s22 + $0x3058] sm:$0xff]  ;;  %v6698_v57 = vpack.c.bf16 %v1787_v48, %v1783_v45  ;;  %v5676_v7 = vpack.c.bf16 %v1794_v50, %v1790_v49  ;;  %v1822_v45 = vld [vmem:[%s7454_s22 + $0x3148] sm:$0xff] }
 0x367   : > { %v6700_v0 = vpack.c.bf16 %v1796_v54, %v1792_v53  ;;  %v1824_v48 = vld [vmem:[%s7454_s22 + $0x3158] sm:$0xff]  ;;  %v1821_v53 = vld [vmem:[%s7454_s22 + $0x3140] sm:$0xff] }
 0x368   : > { %5659 = vmatpush1.bf16.msra.mxu0 %v5658_v58  ;;  %v1789_v58 = vld [vmem:[%s7454_s22 + $0x3040] sm:$0xff]  ;;  %v1828_v49 = vld [vmem:[%s7454_s22 + $0x3178] sm:$0xff] }
 0x369   : > { %6683 = vmatpush1.bf16.msra.mxu1 %v6682_v61  ;;  %5661 = vmatprep.subr.bf16.mxu0 %v5660_v62  ;;  %v1793_v61 = vld [vmem:[%s7454_s22 + $0x3060] sm:$0xff]  ;;  %v1791_v62 = vld [vmem:[%s7454_s22 + $0x3050] sm:$0xff] }
 0x36a   : > { %6685 = vmatprep.subr.bf16.mxu1 %v6684_v3  ;;  %v1802_v3 = vld [vmem:[%s7454_s22 + $0x30a8] sm:$0xff]  ;;  %v5678_v5 = vpack.c.bf16 %v1793_v61, %v1789_v58  ;;  %v6702_v9 = vpack.c.bf16 %v1795_v1, %v1791_v62  ;;  %v1825_v54 = vld [vmem:[%s7454_s22 + $0x3160] sm:$0xff]  ;;  %v1832_v62 = vld [vmem:[%s7454_s22 + $0x3198] sm:$0xff] }
 0x36b   : > { %v1830_v58 = vld [vmem:[%s7454_s22 + $0x3188] sm:$0xff]  ;;  %v5694_v1 = vpack.c.bf16 %v1825_v54, %v1821_v53  ;;  %v1864_v54 = vld [vmem:[%s7454_s22 + $0x3298] sm:$0xff] }
 0x36c   : > { %5663 = vmatpush1.bf16.msra.mxu0 %v5662_v11  ;;  %v5680_v11 = vpack.c.bf16 %v1802_v3, %v1798_v2  ;;  %v1834_v61 = vld [vmem:[%s7454_s22 + $0x31a8] sm:$0xff] }
 0x36d   : > { %6687 = vmatpush1.bf16.msra.mxu1 %v6686_v12  ;;  %5665 = vmatprep.subr.bf16.mxu0 %v5664_v13  ;;  %v1797_v12 = vld [vmem:[%s7454_s22 + $0x3080] sm:$0xff]  ;;  %v5696_v3 = vpack.c.bf16 %v1834_v61, %v1830_v58  ;;  %v1866_v53 = vld [vmem:[%s7454_s22 + $0x32a8] sm:$0xff] }
 0x36e   : > { %6689 = vmatprep.subr.bf16.mxu1 %v6688_v17  ;;  %v1801_v13 = vld [vmem:[%s7454_s22 + $0x30a0] sm:$0xff]  ;;  %v1810_v17 = vld [vmem:[%s7454_s22 + $0x30e8] sm:$0xff] }
 0x36f   : > { %v5682_v23 = vpack.c.bf16 %v1801_v13, %v1797_v12  ;;  %v5684_v24 = vpack.c.bf16 %v1810_v17, %v1806_v16  ;;  %v1842_v12 = vld [vmem:[%s7454_s22 + $0x31e8] sm:$0xff]  ;;  %v1840_v13 = vld [vmem:[%s7454_s22 + $0x31d8] sm:$0xff]  ;;  %v1837_v17 = vld [vmem:[%s7454_s22 + $0x31c0] sm:$0xff] }
 0x370   : > { %5667 = vmatpush1.bf16.msra.mxu0 %v5666_v25  ;;  %v1805_v25 = vld [vmem:[%s7454_s22 + $0x30c0] sm:$0xff] }
 0x371   : > { %6691 = vmatpush1.bf16.msra.mxu1 %v6690_v26  ;;  %5669 = vmatprep.subr.bf16.mxu0 %v5668_v27  ;;  %v1809_v26 = vld [vmem:[%s7454_s22 + $0x30e0] sm:$0xff]  ;;  %v1807_v27 = vld [vmem:[%s7454_s22 + $0x30d0] sm:$0xff] }
 0x372   : > { %6693 = vmatprep.subr.bf16.mxu1 %v6692_v31  ;;  %v1818_v31 = vld [vmem:[%s7454_s22 + $0x3128] sm:$0xff]  ;;  %v5686_v37 = vpack.c.bf16 %v1809_v26, %v1805_v25  ;;  %v6710_v38 = vpack.c.bf16 %v1811_v29, %v1807_v27  ;;  %v1848_v26 = vld [vmem:[%s7454_s22 + $0x3218] sm:$0xff]  ;;  %v1861_v61 = vld [vmem:[%s7454_s22 + $0x3280] sm:$0xff] }
 0x373   : > { %v5688_v39 = vpack.c.bf16 %v1818_v31, %v1814_v30  ;;  %v1850_v25 = vld [vmem:[%s7454_s22 + $0x3228] sm:$0xff]  ;;  %v1852_v27 = vld [vmem:[%s7454_s22 + $0x3238] sm:$0xff]  ;;  %v1845_v31 = vld [vmem:[%s7454_s22 + $0x3200] sm:$0xff] }
 0x374   : > { %5671 = vmatpush1.bf16.msra.mxu0 %v5670_v34  ;;  %v1813_v34 = vld [vmem:[%s7454_s22 + $0x3100] sm:$0xff] }
 0x375   : > { %6695 = vmatpush1.bf16.msra.mxu1 %v6694_v40  ;;  %5673 = vmatprep.subr.bf16.mxu0 %v5672_v41  ;;  %v1817_v40 = vld [vmem:[%s7454_s22 + $0x3120] sm:$0xff]  ;;  %v1815_v41 = vld [vmem:[%s7454_s22 + $0x3110] sm:$0xff] }
 0x376   : > { %6697 = vmatprep.subr.bf16.mxu1 %v6696_v47  ;;  %v1826_v47 = vld [vmem:[%s7454_s22 + $0x3168] sm:$0xff]  ;;  %v5690_v50 = vpack.c.bf16 %v1817_v40, %v1813_v34  ;;  %v6714_v52 = vpack.c.bf16 %v1819_v43, %v1815_v41  ;;  %v1856_v40 = vld [vmem:[%s7454_s22 + $0x3258] sm:$0xff] }
 0x377   : > { %3303 = vmatmul.mubr.f32.vlgmr.msra.gmra.mrb[0].mxu0 %v2388_v51  ;;  %v1858_v34 = vld [vmem:[%s7454_s22 + $0x3268] sm:$0xff]  ;;  %v1860_v41 = vld [vmem:[%s7454_s22 + $0x3278] sm:$0xff] }
 0x378   : > { %5675 = vmatpush1.bf16.msra.mxu0 %v5674_v56  ;;  %4439 = vmatmul.mubr.f32.vlgmr.msra.gmra.mrb[0].mxu1 %v2388_v51  ;;  %v5692_v51 = vpack.c.bf16 %v1826_v47, %v1822_v45  ;;  %v1823_v56 = vld [vmem:[%s7454_s22 + $0x3150] sm:$0xff]  ;;  %v1853_v47 = vld [vmem:[%s7454_s22 + $0x3240] sm:$0xff] }
 0x379   : > { %6699 = vmatpush1.bf16.msra.mxu1 %v6698_v57  ;;  %5677 = vmatprep.subr.bf16.mxu0 %v5676_v7  ;;  %v6716_v57 = vpack.c.bf16 %v1828_v49, %v1824_v48  ;;  %v1827_v7 = vld [vmem:[%s7454_s22 + $0x3170] sm:$0xff]  ;;  %v1857_v48 = vld [vmem:[%s7454_s22 + $0x3260] sm:$0xff] }
 0x37a   : > { %6701 = vmatprep.subr.bf16.mxu1 %v6700_v0  ;;  %3373 = vmatprep.mubr.f32.mxu0 %v2400_v63  ;;  %v1836_v0 = vld [vmem:[%s7454_s22 + $0x31b8] sm:$0xff]  ;;  %v6718_v2 = vpack.c.bf16 %v1827_v7, %v1823_v56  ;;  %v1855_v49 = vld [vmem:[%s7454_s22 + $0x3250] sm:$0xff] }
 0x37b   : > { %4509 = vmatprep.mubr.f32.mxu1 %v2400_v63  ;;  %v1829_v63 = vld [vmem:[%s7454_s22 + $0x3180] sm:$0xff]  ;;  %v1868_v56 = vld [vmem:[%s7454_s22 + $0x32b8] sm:$0xff] }
 0x37c   : > { %5679 = vmatpush1.bf16.msra.mxu0 %v5678_v5  ;;  %v6720_v5 = vpack.c.bf16 %v1836_v0, %v1832_v62  ;;  %v1865_v62 = vld [vmem:[%s7454_s22 + $0x32a0] sm:$0xff]  ;;  %v1863_v0 = vld [vmem:[%s7454_s22 + $0x3290] sm:$0xff] }
 0x37d   : > { %6703 = vmatpush1.bf16.msra.mxu1 %v6702_v9  ;;  %5681 = vmatprep.subr.bf16.mxu0 %v5680_v11  ;;  %v1835_v9 = vld [vmem:[%s7454_s22 + $0x31b0] sm:$0xff]  ;;  %v1838_v11 = vld [vmem:[%s7454_s22 + $0x31c8] sm:$0xff] }
 0x37e   : > { %6705 = vmatprep.subr.bf16.mxu1 %v6704_v8  ;;  %v5698_v8 = vpack.c.bf16 %v1833_v4, %v1829_v63  ;;  %v6722_v15 = vpack.c.bf16 %v1835_v9, %v1831_v19  ;;  %v5700_v16 = vpack.c.bf16 %v1842_v12, %v1838_v11  ;;  %v1874_v63 = vld [vmem:[%s7454_s22 + $0x32e8] sm:$0xff]  ;;  %v1872_v4 = vld [vmem:[%s7454_s22 + $0x32d8] sm:$0xff]  ;;  %v1869_v12 = vld [vmem:[%s7454_s22 + $0x32c0] sm:$0xff] }
 0x37f   : > { %v1876_v19 = vld [vmem:[%s7454_s22 + $0x32f8] sm:$0xff] }
 0x380   : > { %5683 = vmatpush1.bf16.msra.mxu0 %v5682_v23  ;;  %v6724_v23 = vpack.c.bf16 %v1844_v14, %v1840_v13  ;;  %v1873_v13 = vld [vmem:[%s7454_s22 + $0x32e0] sm:$0xff]  ;;  %v1871_v14 = vld [vmem:[%s7454_s22 + $0x32d0] sm:$0xff] }
 0x381   : > { %6707 = vmatpush1.bf16.msra.mxu1 %v6706_v21  ;;  %5685 = vmatprep.subr.bf16.mxu0 %v5684_v24  ;;  %v1843_v21 = vld [vmem:[%s7454_s22 + $0x31f0] sm:$0xff]  ;;  %v1846_v24 = vld [vmem:[%s7454_s22 + $0x3208] sm:$0xff] }
 0x382   : > { %6709 = vmatprep.subr.bf16.mxu1 %v6708_v28  ;;  %v5702_v28 = vpack.c.bf16 %v1841_v18, %v1837_v17  ;;  %v6726_v29 = vpack.c.bf16 %v1843_v21, %v1839_v20  ;;  %v5704_v30 = vpack.c.bf16 %v1850_v25, %v1846_v24  ;;  %v1882_v17 = vld [vmem:[%s7454_s22 + $0x3328] sm:$0xff]  ;;  %v1880_v18 = vld [vmem:[%s7454_s22 + $0x3318] sm:$0xff]  ;;  %v1877_v25 = vld [vmem:[%s7454_s22 + $0x3300] sm:$0xff] }
 0x383   : > { %v1884_v20 = vld [vmem:[%s7454_s22 + $0x3338] sm:$0xff] }
 0x384   : > { %5687 = vmatpush1.bf16.msra.mxu0 %v5686_v37  ;;  %v6728_v37 = vpack.c.bf16 %v1852_v27, %v1848_v26  ;;  %v1881_v26 = vld [vmem:[%s7454_s22 + $0x3320] sm:$0xff]  ;;  %v1879_v27 = vld [vmem:[%s7454_s22 + $0x3310] sm:$0xff] }
 0x385   : > { %6711 = vmatpush1.bf16.msra.mxu1 %v6710_v38  ;;  %5689 = vmatprep.subr.bf16.mxu0 %v5688_v39  ;;  %v1851_v38 = vld [vmem:[%s7454_s22 + $0x3230] sm:$0xff]  ;;  %v1854_v39 = vld [vmem:[%s7454_s22 + $0x3248] sm:$0xff] }
 0x386   : > { %6713 = vmatprep.subr.bf16.mxu1 %v6712_v42  ;;  %v5706_v42 = vpack.c.bf16 %v1849_v32, %v1845_v31  ;;  %v6730_v43 = vpack.c.bf16 %v1851_v38, %v1847_v36  ;;  %v5708_v45 = vpack.c.bf16 %v1858_v34, %v1854_v39  ;;  %v1890_v31 = vld [vmem:[%s7454_s22 + $0x3368] sm:$0xff]  ;;  %v1888_v32 = vld [vmem:[%s7454_s22 + $0x3358] sm:$0xff]  ;;  %v1885_v34 = vld [vmem:[%s7454_s22 + $0x3340] sm:$0xff] }
 0x387   : > { %v1892_v36 = vld [vmem:[%s7454_s22 + $0x3378] sm:$0xff] }
 0x388   : > { %5691 = vmatpush1.bf16.msra.mxu0 %v5690_v50  ;;  %v6732_v50 = vpack.c.bf16 %v1860_v41, %v1856_v40  ;;  %v1889_v40 = vld [vmem:[%s7454_s22 + $0x3360] sm:$0xff]  ;;  %v1887_v41 = vld [vmem:[%s7454_s22 + $0x3350] sm:$0xff] }
 0x389   : > { %6715 = vmatpush1.bf16.msra.mxu1 %v6714_v52  ;;  %5693 = vmatprep.subr.bf16.mxu0 %v5692_v51  ;;  %v1859_v52 = vld [vmem:[%s7454_s22 + $0x3270] sm:$0xff]  ;;  %v1862_v51 = vld [vmem:[%s7454_s22 + $0x3288] sm:$0xff] }
 0x38a   : > { %6717 = vmatprep.subr.bf16.mxu1 %v6716_v57  ;;  %v5710_v57 = vpack.c.bf16 %v1857_v48, %v1853_v47  ;;  %v6734_v7 = vpack.c.bf16 %v1859_v52, %v1855_v49  ;;  %v5712_v58 = vpack.c.bf16 %v1866_v53, %v1862_v51  ;;  %v1898_v47 = vld [vmem:[%s7454_s22 + $0x33a8] sm:$0xff]  ;;  %v1896_v48 = vld [vmem:[%s7454_s22 + $0x3398] sm:$0xff]  ;;  %v1893_v53 = vld [vmem:[%s7454_s22 + $0x3380] sm:$0xff] }
 0x38b   : > { %v1900_v49 = vld [vmem:[%s7454_s22 + $0x33b8] sm:$0xff] }
 0x38c   : > { %5695 = vmatpush1.bf16.msra.mxu0 %v5694_v1  ;;  %v6736_v1 = vpack.c.bf16 %v1868_v56, %v1864_v54  ;;  %v1897_v54 = vld [vmem:[%s7454_s22 + $0x33a0] sm:$0xff]  ;;  %v1895_v56 = vld [vmem:[%s7454_s22 + $0x3390] sm:$0xff] }
 0x38d   : > { %6719 = vmatpush1.bf16.msra.mxu1 %v6718_v2  ;;  %5697 = vmatprep.subr.bf16.mxu0 %v5696_v3  ;;  %v1867_v2 = vld [vmem:[%s7454_s22 + $0x32b0] sm:$0xff]  ;;  %v1870_v3 = vld [vmem:[%s7454_s22 + $0x32c8] sm:$0xff] }
 0x38e   : > { %6721 = vmatprep.subr.bf16.mxu1 %v6720_v5  ;;  %v5714_v5 = vpack.c.bf16 %v1865_v62, %v1861_v61  ;;  %v6738_v9 = vpack.c.bf16 %v1867_v2, %v1863_v0  ;;  %v5716_v11 = vpack.c.bf16 %v1874_v63, %v1870_v3  ;;  %v1906_v61 = vld [vmem:[%s7454_s22 + $0x33e8] sm:$0xff]  ;;  %v1904_v62 = vld [vmem:[%s7454_s22 + $0x33d8] sm:$0xff]  ;;  %v1901_v63 = vld [vmem:[%s7454_s22 + $0x33c0] sm:$0xff] }
 0x38f   : > { %v1908_v0 = vld [vmem:[%s7454_s22 + $0x33f8] sm:$0xff] }
 0x390   : > { %5699 = vmatpush1.bf16.msra.mxu0 %v5698_v8  ;;  %v6740_v8 = vpack.c.bf16 %v1876_v19, %v1872_v4  ;;  %v1905_v4 = vld [vmem:[%s7454_s22 + $0x33e0] sm:$0xff]  ;;  %v1903_v19 = vld [vmem:[%s7454_s22 + $0x33d0] sm:$0xff] }
 0x391   : > { %6723 = vmatpush1.bf16.msra.mxu1 %v6722_v15  ;;  %5701 = vmatprep.subr.bf16.mxu0 %v5700_v16  ;;  %v1875_v15 = vld [vmem:[%s7454_s22 + $0x32f0] sm:$0xff]  ;;  %v1878_v16 = vld [vmem:[%s7454_s22 + $0x3308] sm:$0xff] }
 0x392   : > { %6725 = vmatprep.subr.bf16.mxu1 %v6724_v23  ;;  %v5718_v23 = vpack.c.bf16 %v1873_v13, %v1869_v12  ;;  %v6742_v21 = vpack.c.bf16 %v1875_v15, %v1871_v14  ;;  %v5720_v24 = vpack.c.bf16 %v1882_v17, %v1878_v16  ;;  %v1914_v12 = vld [vmem:[%s7454_s22 + $0x3428] sm:$0xff]  ;;  %v1912_v13 = vld [vmem:[%s7454_s22 + $0x3418] sm:$0xff]  ;;  %v1909_v17 = vld [vmem:[%s7454_s22 + $0x3400] sm:$0xff] }
 0x393   : > { %v1916_v14 = vld [vmem:[%s7454_s22 + $0x3438] sm:$0xff] }
 0x394   : > { %5703 = vmatpush1.bf16.msra.mxu0 %v5702_v28  ;;  %v6744_v28 = vpack.c.bf16 %v1884_v20, %v1880_v18  ;;  %v1913_v18 = vld [vmem:[%s7454_s22 + $0x3420] sm:$0xff]  ;;  %v1911_v20 = vld [vmem:[%s7454_s22 + $0x3410] sm:$0xff] }
 0x395   : > { %6727 = vmatpush1.bf16.msra.mxu1 %v6726_v29  ;;  %5705 = vmatprep.subr.bf16.mxu0 %v5704_v30  ;;  %v1883_v29 = vld [vmem:[%s7454_s22 + $0x3330] sm:$0xff]  ;;  %v1886_v30 = vld [vmem:[%s7454_s22 + $0x3348] sm:$0xff] }
 0x396   : > { %6729 = vmatprep.subr.bf16.mxu1 %v6728_v37  ;;  %v5722_v37 = vpack.c.bf16 %v1881_v26, %v1877_v25  ;;  %v6746_v38 = vpack.c.bf16 %v1883_v29, %v1879_v27  ;;  %v5724_v39 = vpack.c.bf16 %v1890_v31, %v1886_v30  ;;  %v1922_v25 = vld [vmem:[%s7454_s22 + $0x3468] sm:$0xff]  ;;  %v2396_v26 = vrot.slane %v9093_v55, %v7603_v10  ;;  %v1920_v27 = vld [vmem:[%s7454_s22 + $0x3458] sm:$0xff] }
 0x397   : > { %v5738_v29 = vpack.c.bf16 %v1913_v18, %v1909_v17  ;;  %v1926_v10 = vld [vmem:[%s7454_s22 + $0x3488] sm:$0xff]  ;;  %v1952_v17 = vld [vmem:[%s7454_s22 + $0x3558] sm:$0xff] }
 0x398   : > { %5707 = vmatpush1.bf16.msra.mxu0 %v5706_v42  ;;  %v6748_v42 = vpack.c.bf16 %v1892_v36, %v1888_v32  ;;  %v1917_v32 = vld [vmem:[%s7454_s22 + $0x3440] sm:$0xff]  ;;  %v1956_v18 = vld [vmem:[%s7454_s22 + $0x3578] sm:$0xff] }
 0x399   : > { %6731 = vmatpush1.bf16.msra.mxu1 %v6730_v43  ;;  %5709 = vmatprep.subr.bf16.mxu0 %v5708_v45  ;;  %v1891_v43 = vld [vmem:[%s7454_s22 + $0x3370] sm:$0xff]  ;;  %v1894_v45 = vld [vmem:[%s7454_s22 + $0x3388] sm:$0xff]  ;;  %v1921_v36 = vld [vmem:[%s7454_s22 + $0x3460] sm:$0xff] }
 0x39a   : > { %6733 = vmatprep.subr.bf16.mxu1 %v6732_v50  ;;  %v5726_v50 = vpack.c.bf16 %v1889_v40, %v1885_v34  ;;  %v6750_v52 = vpack.c.bf16 %v1891_v43, %v1887_v41  ;;  %v5728_v51 = vpack.c.bf16 %v1898_v47, %v1894_v45  ;;  %v1930_v34 = vld [vmem:[%s7454_s22 + $0x34a8] sm:$0xff]  ;;  %v2408_v40 = vrot.slane %v9093_v55, %v7612_v22  ;;  %v1928_v41 = vld [vmem:[%s7454_s22 + $0x3498] sm:$0xff]  ;;  %v1931_v55 = vld [vmem:[%s7454_s22 + $0x34b0] sm:$0xff] }
 0x39b   : > { %v5742_v43 = vpack.c.bf16 %v1921_v36, %v1917_v32  ;;  %v5744_v47 = vpack.c.bf16 %v1930_v34, %v1926_v10  ;;  %v1964_v32 = vld [vmem:[%s7454_s22 + $0x35b8] sm:$0xff]  ;;  %v1961_v10 = vld [vmem:[%s7454_s22 + $0x35a0] sm:$0xff]  ;;  %v1959_v34 = vld [vmem:[%s7454_s22 + $0x3590] sm:$0xff] }
 0x39c   : > { %5711 = vmatpush1.bf16.msra.mxu0 %v5710_v57  ;;  %v6752_v57 = vpack.c.bf16 %v1900_v49, %v1896_v48  ;;  %v1925_v48 = vld [vmem:[%s7454_s22 + $0x3480] sm:$0xff] }
 0x39d   : > { %6735 = vmatpush1.bf16.msra.mxu1 %v6734_v7  ;;  %5713 = vmatprep.subr.bf16.mxu0 %v5712_v58  ;;  %v1899_v7 = vld [vmem:[%s7454_s22 + $0x33b0] sm:$0xff]  ;;  %v1902_v58 = vld [vmem:[%s7454_s22 + $0x33c8] sm:$0xff]  ;;  %v1929_v49 = vld [vmem:[%s7454_s22 + $0x34a0] sm:$0xff] }
 0x39e   : > { %6737 = vmatprep.subr.bf16.mxu1 %v6736_v1  ;;  %v5730_v1 = vpack.c.bf16 %v1897_v54, %v1893_v53  ;;  %v6754_v2 = vpack.c.bf16 %v1899_v7, %v1895_v56  ;;  %v5732_v3 = vpack.c.bf16 %v1906_v61, %v1902_v58  ;;  %v1936_v53 = vld [vmem:[%s7454_s22 + $0x34d8] sm:$0xff]  ;;  %v5746_v56 = vpack.c.bf16 %v1929_v49, %v1925_v48  ;;  %v1933_v58 = vld [vmem:[%s7454_s22 + $0x34c0] sm:$0xff] }
 0x39f   : > { %v1940_v54 = vld [vmem:[%s7454_s22 + $0x34f8] sm:$0xff]  ;;  %v1937_v61 = vld [vmem:[%s7454_s22 + $0x34e0] sm:$0xff] }
 0x3a0   : > { %5715 = vmatpush1.bf16.msra.mxu0 %v5714_v5  ;;  %v6756_v5 = vpack.c.bf16 %v1908_v0, %v1904_v62  ;;  %v1935_v62 = vld [vmem:[%s7454_s22 + $0x34d0] sm:$0xff]  ;;  %v6772_v0 = vpack.c.bf16 %v1940_v54, %v1936_v53  ;;  %v1974_v54 = vld [vmem:[%s7454_s22 + $0x3608] sm:$0xff] }
 0x3a1   : > { %6739 = vmatpush1.bf16.msra.mxu1 %v6738_v9  ;;  %5717 = vmatprep.subr.bf16.mxu0 %v5716_v11  ;;  %v1907_v9 = vld [vmem:[%s7454_s22 + $0x33f0] sm:$0xff]  ;;  %v1910_v11 = vld [vmem:[%s7454_s22 + $0x3408] sm:$0xff] }
 0x3a2   : > { %6741 = vmatprep.subr.bf16.mxu1 %v6740_v8  ;;  %v5734_v8 = vpack.c.bf16 %v1905_v4, %v1901_v63  ;;  %v6758_v15 = vpack.c.bf16 %v1907_v9, %v1903_v19  ;;  %v5736_v16 = vpack.c.bf16 %v1914_v12, %v1910_v11  ;;  %v1944_v63 = vld [vmem:[%s7454_s22 + $0x3518] sm:$0xff]  ;;  %v5750_v19 = vpack.c.bf16 %v1937_v61, %v1933_v58  ;;  %v1941_v11 = vld [vmem:[%s7454_s22 + $0x3500] sm:$0xff]  ;;  %v1971_v53 = vld [vmem:[%s7454_s22 + $0x35f0] sm:$0xff] }
 0x3a3   : > { %v1948_v4 = vld [vmem:[%s7454_s22 + $0x3538] sm:$0xff]  ;;  %v1945_v12 = vld [vmem:[%s7454_s22 + $0x3520] sm:$0xff] }
 0x3a4   : > { %5719 = vmatpush1.bf16.msra.mxu0 %v5718_v23  ;;  %v6760_v23 = vpack.c.bf16 %v1916_v14, %v1912_v13  ;;  %v1943_v13 = vld [vmem:[%s7454_s22 + $0x3510] sm:$0xff]  ;;  %v6776_v14 = vpack.c.bf16 %v1948_v4, %v1944_v63  ;;  %v1982_v4 = vld [vmem:[%s7454_s22 + $0x3648] sm:$0xff] }
 0x3a5   : > { %6743 = vmatpush1.bf16.msra.mxu1 %v6742_v21  ;;  %5721 = vmatprep.subr.bf16.mxu0 %v5720_v24  ;;  %v1915_v21 = vld [vmem:[%s7454_s22 + $0x3430] sm:$0xff]  ;;  %v1918_v24 = vld [vmem:[%s7454_s22 + $0x3448] sm:$0xff] }
 0x3a6   : > { %6745 = vmatprep.subr.bf16.mxu1 %v6744_v28  ;;  %v1924_v28 = vld [vmem:[%s7454_s22 + $0x3478] sm:$0xff]  ;;  %v6762_v30 = vpack.c.bf16 %v1915_v21, %v1911_v20  ;;  %v5740_v31 = vpack.c.bf16 %v1922_v25, %v1918_v24  ;;  %v5754_v20 = vpack.c.bf16 %v1945_v12, %v1941_v11  ;;  %v1949_v24 = vld [vmem:[%s7454_s22 + $0x3540] sm:$0xff]  ;;  %v1979_v63 = vld [vmem:[%s7454_s22 + $0x3630] sm:$0xff] }
 0x3a7   : > { %v1953_v25 = vld [vmem:[%s7454_s22 + $0x3560] sm:$0xff] }
 0x3a8   : > { %5723 = vmatpush1.bf16.msra.mxu0 %v5722_v37  ;;  %v1919_v37 = vld [vmem:[%s7454_s22 + $0x3450] sm:$0xff]  ;;  %v5758_v36 = vpack.c.bf16 %v1953_v25, %v1949_v24 }
 0x3a9   : > { %6747 = vmatpush1.bf16.msra.mxu1 %v6746_v38  ;;  %5725 = vmatprep.subr.bf16.mxu0 %v5724_v39  ;;  %v6764_v38 = vpack.c.bf16 %v1924_v28, %v1920_v27  ;;  %v1923_v39 = vld [vmem:[%s7454_s22 + $0x3470] sm:$0xff]  ;;  %v6780_v27 = vpack.c.bf16 %v1956_v18, %v1952_v17  ;;  %v1990_v18 = vld [vmem:[%s7454_s22 + $0x3688] sm:$0xff] }
 0x3aa   : > { %6749 = vmatprep.subr.bf16.mxu1 %v6748_v42  ;;  %v1932_v42 = vld [vmem:[%s7454_s22 + $0x34b8] sm:$0xff]  ;;  %v6766_v45 = vpack.c.bf16 %v1923_v39, %v1919_v37  ;;  %v1955_v28 = vld [vmem:[%s7454_s22 + $0x3570] sm:$0xff]  ;;  %v1957_v39 = vld [vmem:[%s7454_s22 + $0x3580] sm:$0xff] }
 0x3ab   : > { %v6768_v22 = vpack.c.bf16 %v1932_v42, %v1928_v41  ;;  %v1963_v41 = vld [vmem:[%s7454_s22 + $0x35b0] sm:$0xff]  ;;  %v1966_v42 = vld [vmem:[%s7454_s22 + $0x35c8] sm:$0xff]  ;;  %v5762_v48 = vpack.c.bf16 %v1961_v10, %v1957_v39 }
 0x3ac   : > { %5727 = vmatpush1.bf16.msra.mxu0 %v5726_v50  ;;  %v1927_v50 = vld [vmem:[%s7454_s22 + $0x3490] sm:$0xff]  ;;  %v6786_v49 = vpack.c.bf16 %v1963_v41, %v1959_v34  ;;  %v2001_v41 = vld [vmem:[%s7454_s22 + $0x36e0] sm:$0xff] }
 0x3ad   : > { %6751 = vmatpush1.bf16.msra.mxu1 %v6750_v52  ;;  %5729 = vmatprep.subr.bf16.mxu0 %v5728_v51  ;;  %v1934_v52 = vld [vmem:[%s7454_s22 + $0x34c8] sm:$0xff]  ;;  %v1987_v17 = vld [vmem:[%s7454_s22 + $0x3670] sm:$0xff] }
 0x3ae   : > { %6753 = vmatprep.subr.bf16.mxu1 %v6752_v57  ;;  %v1938_v51 = vld [vmem:[%s7454_s22 + $0x34e8] sm:$0xff]  ;;  %v6770_v57 = vpack.c.bf16 %v1931_v55, %v1927_v50  ;;  %v1969_v55 = vld [vmem:[%s7454_s22 + $0x35e0] sm:$0xff] }
 0x3af   : > { %v5748_v7 = vpack.c.bf16 %v1938_v51, %v1934_v52  ;;  %v1967_v52 = vld [vmem:[%s7454_s22 + $0x35d0] sm:$0xff] }
 0x3b0   : > { %5731 = vmatpush1.bf16.msra.mxu0 %v5730_v1  ;;  %v1939_v1 = vld [vmem:[%s7454_s22 + $0x34f0] sm:$0xff]  ;;  %v6790_v61 = vpack.c.bf16 %v1971_v53, %v1967_v52  ;;  %v2009_v53 = vld [vmem:[%s7454_s22 + $0x3720] sm:$0xff] }
 0x3b1   : > { %6755 = vmatpush1.bf16.msra.mxu1 %v6754_v2  ;;  %5733 = vmatprep.subr.bf16.mxu0 %v5732_v3  ;;  %v1942_v2 = vld [vmem:[%s7454_s22 + $0x3508] sm:$0xff] }
 0x3b2   : > { %6757 = vmatprep.subr.bf16.mxu1 %v6756_v5  ;;  %v1946_v3 = vld [vmem:[%s7454_s22 + $0x3528] sm:$0xff]  ;;  %v6774_v5 = vpack.c.bf16 %v1939_v1, %v1935_v62  ;;  %v1977_v1 = vld [vmem:[%s7454_s22 + $0x3620] sm:$0xff] }
 0x3b3   : > { %v5752_v9 = vpack.c.bf16 %v1946_v3, %v1942_v2  ;;  %v1975_v2 = vld [vmem:[%s7454_s22 + $0x3610] sm:$0xff] }
 0x3b4   : > { %5735 = vmatpush1.bf16.msra.mxu0 %v5734_v8  ;;  %v1947_v8 = vld [vmem:[%s7454_s22 + $0x3530] sm:$0xff]  ;;  %v6794_v12 = vpack.c.bf16 %v1979_v63, %v1975_v2  ;;  %v2017_v63 = vld [vmem:[%s7454_s22 + $0x3760] sm:$0xff] }
 0x3b5   : > { %6759 = vmatpush1.bf16.msra.mxu1 %v6758_v15  ;;  %5737 = vmatprep.subr.bf16.mxu0 %v5736_v16  ;;  %v1950_v15 = vld [vmem:[%s7454_s22 + $0x3548] sm:$0xff] }
 0x3b6   : > { %6761 = vmatprep.subr.bf16.mxu1 %v6760_v23  ;;  %v1954_v16 = vld [vmem:[%s7454_s22 + $0x3568] sm:$0xff]  ;;  %v6778_v23 = vpack.c.bf16 %v1947_v8, %v1943_v13  ;;  %v1985_v8 = vld [vmem:[%s7454_s22 + $0x3660] sm:$0xff] }
 0x3b7   : > { %3374 = vmatmul.mubr.f32.vlgmr.msra.gmra.mrb[0].mxu0 %v2396_v26  ;;  %v5756_v21 = vpack.c.bf16 %v1954_v16, %v1950_v15  ;;  %v1983_v15 = vld [vmem:[%s7454_s22 + $0x3650] sm:$0xff] }
 0x3b8   : > { %5739 = vmatpush1.bf16.msra.mxu0 %v5738_v29  ;;  %4510 = vmatmul.mubr.f32.vlgmr.msra.gmra.mrb[0].mxu1 %v2396_v26  ;;  %v1951_v26 = vld [vmem:[%s7454_s22 + $0x3550] sm:$0xff]  ;;  %v1958_v29 = vld [vmem:[%s7454_s22 + $0x3588] sm:$0xff]  ;;  %v6798_v25 = vpack.c.bf16 %v1987_v17, %v1983_v15  ;;  %v2025_v17 = vld [vmem:[%s7454_s22 + $0x37a0] sm:$0xff] }
 0x3b9   : > { %6763 = vmatpush1.bf16.msra.mxu1 %v6762_v30  ;;  %5741 = vmatprep.subr.bf16.mxu0 %v5740_v31  ;;  %v1962_v30 = vld [vmem:[%s7454_s22 + $0x35a8] sm:$0xff]  ;;  %v1960_v31 = vld [vmem:[%s7454_s22 + $0x3598] sm:$0xff]  ;;  %v6782_v37 = vpack.c.bf16 %v1955_v28, %v1951_v26  ;;  %v1993_v28 = vld [vmem:[%s7454_s22 + $0x36a0] sm:$0xff] }
 0x3ba   : > { %6765 = vmatprep.subr.bf16.mxu1 %v6764_v38  ;;  %3444 = vmatprep.mubr.f32.mxu0 %v2408_v40  ;;  %v5760_v38 = vpack.c.bf16 %v1962_v30, %v1958_v29  ;;  %v1991_v29 = vld [vmem:[%s7454_s22 + $0x3690] sm:$0xff] }
 0x3bb   : > { %4580 = vmatprep.mubr.f32.mxu1 %v2408_v40  ;;  %v6784_v40 = vpack.c.bf16 %v1964_v32, %v1960_v31  ;;  %v1995_v31 = vld [vmem:[%s7454_s22 + $0x36b0] sm:$0xff]  ;;  %v1998_v32 = vld [vmem:[%s7454_s22 + $0x36c8] sm:$0xff] }
 0x3bc   : > { %5743 = vmatpush1.bf16.msra.mxu0 %v5742_v43  ;;  %v1970_v43 = vld [vmem:[%s7454_s22 + $0x35e8] sm:$0xff]  ;;  %v6802_v10 = vpack.c.bf16 %v1995_v31, %v1991_v29  ;;  %v2033_v31 = vld [vmem:[%s7454_s22 + $0x37e0] sm:$0xff] }
 0x3bd   : > { %6767 = vmatpush1.bf16.msra.mxu1 %v6766_v45  ;;  %5745 = vmatprep.subr.bf16.mxu0 %v5744_v47  ;;  %v1968_v45 = vld [vmem:[%s7454_s22 + $0x35d8] sm:$0xff]  ;;  %v5764_v50 = vpack.c.bf16 %v1970_v43, %v1966_v42  ;;  %v1999_v42 = vld [vmem:[%s7454_s22 + $0x36d0] sm:$0xff] }
 0x3be   : > { %6769 = vmatprep.subr.bf16.mxu1 %v6768_v22  ;;  %v1972_v47 = vld [vmem:[%s7454_s22 + $0x35f8] sm:$0xff]  ;;  %v1965_v22 = vld [vmem:[%s7454_s22 + $0x35c0] sm:$0xff] }
 0x3bf   : > { %v6788_v51 = vpack.c.bf16 %v1972_v47, %v1968_v45  ;;  %v5766_v58 = vpack.c.bf16 %v1969_v55, %v1965_v22  ;;  %v2003_v45 = vld [vmem:[%s7454_s22 + $0x36f0] sm:$0xff]  ;;  %v2006_v47 = vld [vmem:[%s7454_s22 + $0x3708] sm:$0xff] }
 0x3c0   : > { %5747 = vmatpush1.bf16.msra.mxu0 %v5746_v56  ;;  %v1978_v56 = vld [vmem:[%s7454_s22 + $0x3628] sm:$0xff]  ;;  %v6806_v55 = vpack.c.bf16 %v2003_v45, %v1999_v42  ;;  %v2041_v45 = vld [vmem:[%s7454_s22 + $0x3820] sm:$0xff] }
 0x3c1   : > { %6771 = vmatpush1.bf16.msra.mxu1 %v6770_v57  ;;  %5749 = vmatprep.subr.bf16.mxu0 %v5748_v7  ;;  %v1976_v57 = vld [vmem:[%s7454_s22 + $0x3618] sm:$0xff]  ;;  %v5768_v62 = vpack.c.bf16 %v1978_v56, %v1974_v54  ;;  %v2007_v54 = vld [vmem:[%s7454_s22 + $0x3710] sm:$0xff] }
 0x3c2   : > { %6773 = vmatprep.subr.bf16.mxu1 %v6772_v0  ;;  %v1980_v7 = vld [vmem:[%s7454_s22 + $0x3638] sm:$0xff]  ;;  %v1973_v0 = vld [vmem:[%s7454_s22 + $0x3600] sm:$0xff] }
 0x3c3   : > { %v6792_v3 = vpack.c.bf16 %v1980_v7, %v1976_v57  ;;  %v5770_v11 = vpack.c.bf16 %v1977_v1, %v1973_v0  ;;  %v2011_v57 = vld [vmem:[%s7454_s22 + $0x3730] sm:$0xff]  ;;  %v2014_v7 = vld [vmem:[%s7454_s22 + $0x3748] sm:$0xff] }
 0x3c4   : > { %5751 = vmatpush1.bf16.msra.mxu0 %v5750_v19  ;;  %v1986_v19 = vld [vmem:[%s7454_s22 + $0x3668] sm:$0xff]  ;;  %v6810_v1 = vpack.c.bf16 %v2011_v57, %v2007_v54 }
 0x3c5   : > { %6775 = vmatpush1.bf16.msra.mxu1 %v6774_v5  ;;  %5753 = vmatprep.subr.bf16.mxu0 %v5752_v9  ;;  %v1984_v5 = vld [vmem:[%s7454_s22 + $0x3658] sm:$0xff]  ;;  %v5772_v13 = vpack.c.bf16 %v1986_v19, %v1982_v4  ;;  %v2015_v4 = vld [vmem:[%s7454_s22 + $0x3750] sm:$0xff] }
 0x3c6   : > { %6777 = vmatprep.subr.bf16.mxu1 %v6776_v14  ;;  %v1988_v9 = vld [vmem:[%s7454_s22 + $0x3678] sm:$0xff]  ;;  %v1981_v14 = vld [vmem:[%s7454_s22 + $0x3640] sm:$0xff] }
 0x3c7   : > { %v6796_v16 = vpack.c.bf16 %v1988_v9, %v1984_v5  ;;  %v5774_v24 = vpack.c.bf16 %v1985_v8, %v1981_v14  ;;  %v2019_v5 = vld [vmem:[%s7454_s22 + $0x3770] sm:$0xff]  ;;  %v2022_v9 = vld [vmem:[%s7454_s22 + $0x3788] sm:$0xff] }
 0x3c8   : > { %5755 = vmatpush1.bf16.msra.mxu0 %v5754_v20  ;;  %v1994_v20 = vld [vmem:[%s7454_s22 + $0x36a8] sm:$0xff]  ;;  %v6814_v8 = vpack.c.bf16 %v2019_v5, %v2015_v4 }
 0x3c9   : > { %6779 = vmatpush1.bf16.msra.mxu1 %v6778_v23  ;;  %5757 = vmatprep.subr.bf16.mxu0 %v5756_v21  ;;  %v1992_v23 = vld [vmem:[%s7454_s22 + $0x3698] sm:$0xff]  ;;  %v5776_v26 = vpack.c.bf16 %v1994_v20, %v1990_v18  ;;  %v2023_v18 = vld [vmem:[%s7454_s22 + $0x3790] sm:$0xff] }
 0x3ca   : > { %6781 = vmatprep.subr.bf16.mxu1 %v6780_v27  ;;  %v1996_v21 = vld [vmem:[%s7454_s22 + $0x36b8] sm:$0xff]  ;;  %v1989_v27 = vld [vmem:[%s7454_s22 + $0x3680] sm:$0xff] }
 0x3cb   : > { %v6800_v30 = vpack.c.bf16 %v1996_v21, %v1992_v23  ;;  %v5778_v39 = vpack.c.bf16 %v1993_v28, %v1989_v27  ;;  %v2027_v23 = vld [vmem:[%s7454_s22 + $0x37b0] sm:$0xff]  ;;  %v2030_v21 = vld [vmem:[%s7454_s22 + $0x37c8] sm:$0xff] }
 0x3cc   : > { %5759 = vmatpush1.bf16.msra.mxu0 %v5758_v36  ;;  %v2002_v36 = vld [vmem:[%s7454_s22 + $0x36e8] sm:$0xff]  ;;  %v6818_v28 = vpack.c.bf16 %v2027_v23, %v2023_v18  ;;  %v2061_v23 = vld [vmem:[%s7454_s22 + $0x38c0] sm:$0xff] }
 0x3cd   : > { %6783 = vmatpush1.bf16.msra.mxu1 %v6782_v37  ;;  %5761 = vmatprep.subr.bf16.mxu0 %v5760_v38  ;;  %v2000_v37 = vld [vmem:[%s7454_s22 + $0x36d8] sm:$0xff]  ;;  %v5780_v34 = vpack.c.bf16 %v2002_v36, %v1998_v32  ;;  %v2031_v32 = vld [vmem:[%s7454_s22 + $0x37d0] sm:$0xff] }
 0x3ce   : > { %6785 = vmatprep.subr.bf16.mxu1 %v6784_v40  ;;  %v2004_v38 = vld [vmem:[%s7454_s22 + $0x36f8] sm:$0xff]  ;;  %v1997_v40 = vld [vmem:[%s7454_s22 + $0x36c0] sm:$0xff] }
 0x3cf   : > { %v6804_v43 = vpack.c.bf16 %v2004_v38, %v2000_v37  ;;  %v5782_v22 = vpack.c.bf16 %v2001_v41, %v1997_v40  ;;  %v2035_v37 = vld [vmem:[%s7454_s22 + $0x37f0] sm:$0xff]  ;;  %v2038_v38 = vld [vmem:[%s7454_s22 + $0x3808] sm:$0xff] }
 0x3d0   : > { %5763 = vmatpush1.bf16.msra.mxu0 %v5762_v48  ;;  %v2010_v48 = vld [vmem:[%s7454_s22 + $0x3728] sm:$0xff]  ;;  %v6822_v41 = vpack.c.bf16 %v2035_v37, %v2031_v32  ;;  %v2069_v37 = vld [vmem:[%s7454_s22 + $0x3900] sm:$0xff] }
 0x3d1   : > { %6787 = vmatpush1.bf16.msra.mxu1 %v6786_v49  ;;  %5765 = vmatprep.subr.bf16.mxu0 %v5764_v50  ;;  %v2008_v49 = vld [vmem:[%s7454_s22 + $0x3718] sm:$0xff]  ;;  %v5784_v52 = vpack.c.bf16 %v2010_v48, %v2006_v47  ;;  %v2039_v47 = vld [vmem:[%s7454_s22 + $0x3810] sm:$0xff] }
 0x3d2   : > { %6789 = vmatprep.subr.bf16.mxu1 %v6788_v51  ;;  %v2012_v50 = vld [vmem:[%s7454_s22 + $0x3738] sm:$0xff]  ;;  %v2005_v51 = vld [vmem:[%s7454_s22 + $0x3700] sm:$0xff] }
 0x3d3   : > { %v6808_v56 = vpack.c.bf16 %v2012_v50, %v2008_v49  ;;  %v5786_v0 = vpack.c.bf16 %v2009_v53, %v2005_v51  ;;  %v2043_v49 = vld [vmem:[%s7454_s22 + $0x3830] sm:$0xff]  ;;  %v2046_v50 = vld [vmem:[%s7454_s22 + $0x3848] sm:$0xff]  ;;  %v2048_v51 = vld [vmem:[%s7454_s22 + $0x3858] sm:$0xff] }
 0x3d4   : > { %5767 = vmatpush1.bf16.msra.mxu0 %v5766_v58  ;;  %v2018_v58 = vld [vmem:[%s7454_s22 + $0x3768] sm:$0xff]  ;;  %v2052_v53 = vld [vmem:[%s7454_s22 + $0x3878] sm:$0xff] }
 0x3d5   : > { %6791 = vmatpush1.bf16.msra.mxu1 %v6790_v61  ;;  %5769 = vmatprep.subr.bf16.mxu0 %v5768_v62  ;;  %v2016_v61 = vld [vmem:[%s7454_s22 + $0x3758] sm:$0xff]  ;;  %v5788_v2 = vpack.c.bf16 %v2018_v58, %v2014_v7  ;;  %v2045_v7 = vld [vmem:[%s7454_s22 + $0x3840] sm:$0xff] }
 0x3d6   : > { %6793 = vmatprep.subr.bf16.mxu1 %v6792_v3  ;;  %v2020_v62 = vld [vmem:[%s7454_s22 + $0x3778] sm:$0xff]  ;;  %v2013_v3 = vld [vmem:[%s7454_s22 + $0x3740] sm:$0xff] }
 0x3d7   : > { %v6812_v19 = vpack.c.bf16 %v2020_v62, %v2016_v61  ;;  %v5790_v14 = vpack.c.bf16 %v2017_v63, %v2013_v3  ;;  %v2049_v58 = vld [vmem:[%s7454_s22 + $0x3860] sm:$0xff]  ;;  %v2047_v61 = vld [vmem:[%s7454_s22 + $0x3850] sm:$0xff]  ;;  %v6828_v62 = vpack.c.bf16 %v2052_v53, %v2048_v51  ;;  %v2056_v3 = vld [vmem:[%s7454_s22 + $0x3898] sm:$0xff] }
 0x3d8   : > { %5771 = vmatpush1.bf16.msra.mxu0 %v5770_v11  ;;  %v2026_v11 = vld [vmem:[%s7454_s22 + $0x37a8] sm:$0xff]  ;;  %v2060_v63 = vld [vmem:[%s7454_s22 + $0x38b8] sm:$0xff]  ;;  %v5806_v4 = vpack.c.bf16 %v2049_v58, %v2045_v7  ;;  %v2083_v51 = vld [vmem:[%s7454_s22 + $0x3970] sm:$0xff] }
 0x3d9   : > { %6795 = vmatpush1.bf16.msra.mxu1 %v6794_v12  ;;  %5773 = vmatprep.subr.bf16.mxu0 %v5772_v13  ;;  %v2024_v12 = vld [vmem:[%s7454_s22 + $0x3798] sm:$0xff]  ;;  %v5792_v15 = vpack.c.bf16 %v2026_v11, %v2022_v9  ;;  %v2053_v9 = vld [vmem:[%s7454_s22 + $0x3880] sm:$0xff]  ;;  %v2086_v53 = vld [vmem:[%s7454_s22 + $0x3988] sm:$0xff] }
 0x3da   : > { %6797 = vmatprep.subr.bf16.mxu1 %v6796_v16  ;;  %v2028_v13 = vld [vmem:[%s7454_s22 + $0x37b8] sm:$0xff]  ;;  %v2021_v16 = vld [vmem:[%s7454_s22 + $0x3780] sm:$0xff] }
 0x3db   : > { %v6816_v20 = vpack.c.bf16 %v2028_v13, %v2024_v12  ;;  %v5794_v27 = vpack.c.bf16 %v2025_v17, %v2021_v16  ;;  %v2057_v11 = vld [vmem:[%s7454_s22 + $0x38a0] sm:$0xff]  ;;  %v2055_v12 = vld [vmem:[%s7454_s22 + $0x3890] sm:$0xff]  ;;  %v2068_v16 = vld [vmem:[%s7454_s22 + $0x38f8] sm:$0xff] }
 0x3dc   : > { %5775 = vmatpush1.bf16.msra.mxu0 %v5774_v24  ;;  %v2034_v24 = vld [vmem:[%s7454_s22 + $0x37e8] sm:$0xff]  ;;  %v2059_v13 = vld [vmem:[%s7454_s22 + $0x38b0] sm:$0xff]  ;;  %v5810_v17 = vpack.c.bf16 %v2057_v11, %v2053_v9 }
 0x3dd   : > { %6799 = vmatpush1.bf16.msra.mxu1 %v6798_v25  ;;  %5777 = vmatprep.subr.bf16.mxu0 %v5776_v26  ;;  %v2032_v25 = vld [vmem:[%s7454_s22 + $0x37d8] sm:$0xff]  ;;  %v5796_v29 = vpack.c.bf16 %v2034_v24, %v2030_v21  ;;  %v6834_v18 = vpack.c.bf16 %v2059_v13, %v2055_v12  ;;  %v2065_v21 = vld [vmem:[%s7454_s22 + $0x38e0] sm:$0xff]  ;;  %v2063_v24 = vld [vmem:[%s7454_s22 + $0x38d0] sm:$0xff] }
 0x3de   : > { %6801 = vmatprep.subr.bf16.mxu1 %v6800_v30  ;;  %v2036_v26 = vld [vmem:[%s7454_s22 + $0x37f8] sm:$0xff]  ;;  %v2029_v30 = vld [vmem:[%s7454_s22 + $0x37c0] sm:$0xff]  ;;  %v2095_v13 = vld [vmem:[%s7454_s22 + $0x39d0] sm:$0xff] }
 0x3df   : > { %v6820_v36 = vpack.c.bf16 %v2036_v26, %v2032_v25  ;;  %v5798_v40 = vpack.c.bf16 %v2033_v31, %v2029_v30  ;;  %v2067_v26 = vld [vmem:[%s7454_s22 + $0x38f0] sm:$0xff]  ;;  %v2076_v30 = vld [vmem:[%s7454_s22 + $0x3938] sm:$0xff]  ;;  %v5814_v31 = vpack.c.bf16 %v2065_v21, %v2061_v23  ;;  %v2093_v12 = vld [vmem:[%s7454_s22 + $0x39c0] sm:$0xff] }
 0x3e0   : > { %5779 = vmatpush1.bf16.msra.mxu0 %v5778_v39  ;;  %v2042_v39 = vld [vmem:[%s7454_s22 + $0x3828] sm:$0xff]  ;;  %v6838_v32 = vpack.c.bf16 %v2067_v26, %v2063_v24  ;;  %v2101_v24 = vld [vmem:[%s7454_s22 + $0x3a00] sm:$0xff]  ;;  %v2103_v26 = vld [vmem:[%s7454_s22 + $0x3a10] sm:$0xff] }
 0x3e1   : > { %6803 = vmatpush1.bf16.msra.mxu1 %v6802_v10  ;;  %5781 = vmatprep.subr.bf16.mxu0 %v5780_v34  ;;  %v2040_v10 = vld [vmem:[%s7454_s22 + $0x3818] sm:$0xff]  ;;  %v5800_v42 = vpack.c.bf16 %v2042_v39, %v2038_v38  ;;  %v2073_v38 = vld [vmem:[%s7454_s22 + $0x3920] sm:$0xff]  ;;  %v2071_v39 = vld [vmem:[%s7454_s22 + $0x3910] sm:$0xff] }
 0x3e2   : > { %6805 = vmatprep.subr.bf16.mxu1 %v6804_v43  ;;  %v2044_v34 = vld [vmem:[%s7454_s22 + $0x3838] sm:$0xff]  ;;  %v2037_v43 = vld [vmem:[%s7454_s22 + $0x3800] sm:$0xff] }
 0x3e3   : > { %v6824_v48 = vpack.c.bf16 %v2044_v34, %v2040_v10  ;;  %v5802_v54 = vpack.c.bf16 %v2041_v45, %v2037_v43  ;;  %v2075_v34 = vld [vmem:[%s7454_s22 + $0x3930] sm:$0xff]  ;;  %v2084_v43 = vld [vmem:[%s7454_s22 + $0x3978] sm:$0xff]  ;;  %v5818_v45 = vpack.c.bf16 %v2073_v38, %v2069_v37 }
 0x3e4   : > { %5783 = vmatpush1.bf16.msra.mxu0 %v5782_v22  ;;  %v2050_v22 = vld [vmem:[%s7454_s22 + $0x3868] sm:$0xff] }
 0x3e5   : > { %6807 = vmatpush1.bf16.msra.mxu1 %v6806_v55  ;;  %5785 = vmatprep.subr.bf16.mxu0 %v5784_v52  ;;  %v9355_v55 = vld [vmem:[#allocation2 + $0x18] sm:$0xff]  ;;  %v5804_v57 = vpack.c.bf16 %v2050_v22, %v2046_v50  ;;  %v2081_v50 = vld [vmem:[%s7454_s22 + $0x3960] sm:$0xff]  ;;  %v2079_v22 = vld [vmem:[%s7454_s22 + $0x3950] sm:$0xff] }
 0x3e6   : > { %6809 = vmatprep.subr.bf16.mxu1 %v6808_v56  ;;  %v2404_v52 = vrot.slane %v9355_v55, %v7741_v33  ;;  %v6826_v56 = vpack.c.bf16 %v2043_v49, %v2039_v47  ;;  %v2054_v33 = vld [vmem:[%s7454_s22 + $0x3888] sm:$0xff]  ;;  %v6842_v47 = vpack.c.bf16 %v2075_v34, %v2071_v39  ;;  %v2077_v49 = vld [vmem:[%s7454_s22 + $0x3940] sm:$0xff]  ;;  %v6846_v58 = vpack.c.bf16 %v2083_v51, %v2079_v22  ;;  %v2111_v34 = vld [vmem:[%s7454_s22 + $0x3a50] sm:$0xff] }
 0x3e7   : > { %v5822_v7 = vpack.c.bf16 %v2081_v50, %v2077_v49  ;;  %v2109_v39 = vld [vmem:[%s7454_s22 + $0x3a40] sm:$0xff]  ;;  %v2119_v51 = vld [vmem:[%s7454_s22 + $0x3a90] sm:$0xff] }
 0x3e8   : > { %5787 = vmatpush1.bf16.msra.mxu0 %v5786_v0  ;;  %v2051_v0 = vld [vmem:[%s7454_s22 + $0x3870] sm:$0xff]  ;;  %v2117_v22 = vld [vmem:[%s7454_s22 + $0x3a80] sm:$0xff] }
 0x3e9   : > { %6811 = vmatpush1.bf16.msra.mxu1 %v6810_v1  ;;  %5789 = vmatprep.subr.bf16.mxu0 %v5788_v2  ;;  %v2058_v1 = vld [vmem:[%s7454_s22 + $0x38a8] sm:$0xff]  ;;  %v2416_v2 = vrot.slane %v9355_v55, %v7750_v44  ;;  %v6832_v44 = vpack.c.bf16 %v2060_v63, %v2056_v3 }
 0x3ea   : > { %6813 = vmatprep.subr.bf16.mxu1 %v6812_v19  ;;  %v6830_v19 = vpack.c.bf16 %v2051_v0, %v2047_v61  ;;  %v5808_v5 = vpack.c.bf16 %v2058_v1, %v2054_v33  ;;  %v2089_v0 = vld [vmem:[%s7454_s22 + $0x39a0] sm:$0xff]  ;;  %v2087_v33 = vld [vmem:[%s7454_s22 + $0x3990] sm:$0xff]  ;;  %v2094_v3 = vld [vmem:[%s7454_s22 + $0x39c8] sm:$0xff] }
 0x3eb   : > { %v2098_v63 = vld [vmem:[%s7454_s22 + $0x39e8] sm:$0xff] }
 0x3ec   : > { %5791 = vmatpush1.bf16.msra.mxu0 %v5790_v14  ;;  %v2062_v14 = vld [vmem:[%s7454_s22 + $0x38c8] sm:$0xff]  ;;  %v5828_v11 = vpack.c.bf16 %v2098_v63, %v2094_v3  ;;  %v2131_v63 = vld [vmem:[%s7454_s22 + $0x3af0] sm:$0xff] }
 0x3ed   : > { %6815 = vmatpush1.bf16.msra.mxu1 %v6814_v8  ;;  %5793 = vmatprep.subr.bf16.mxu0 %v5792_v15  ;;  %v2066_v8 = vld [vmem:[%s7454_s22 + $0x38e8] sm:$0xff]  ;;  %v2064_v15 = vld [vmem:[%s7454_s22 + $0x38d8] sm:$0xff] }
 0x3ee   : > { %6817 = vmatprep.subr.bf16.mxu1 %v6816_v20  ;;  %v5812_v20 = vpack.c.bf16 %v2066_v8, %v2062_v14  ;;  %v6836_v25 = vpack.c.bf16 %v2068_v16, %v2064_v15  ;;  %v2099_v8 = vld [vmem:[%s7454_s22 + $0x39f0] sm:$0xff]  ;;  %v2102_v15 = vld [vmem:[%s7454_s22 + $0x3a08] sm:$0xff] }
 0x3ef   : > { %v2106_v16 = vld [vmem:[%s7454_s22 + $0x3a28] sm:$0xff]  ;;  %v6854_v23 = vpack.c.bf16 %v2099_v8, %v2095_v13  ;;  %v2133_v13 = vld [vmem:[%s7454_s22 + $0x3b00] sm:$0xff]  ;;  %v2135_v8 = vld [vmem:[%s7454_s22 + $0x3b10] sm:$0xff] }
 0x3f0   : > { %5795 = vmatpush1.bf16.msra.mxu0 %v5794_v27  ;;  %v2070_v27 = vld [vmem:[%s7454_s22 + $0x3908] sm:$0xff]  ;;  %v5832_v21 = vpack.c.bf16 %v2106_v16, %v2102_v15  ;;  %v2139_v16 = vld [vmem:[%s7454_s22 + $0x3b30] sm:$0xff] }
 0x3f1   : > { %6819 = vmatpush1.bf16.msra.mxu1 %v6818_v28  ;;  %5797 = vmatprep.subr.bf16.mxu0 %v5796_v29  ;;  %v2074_v28 = vld [vmem:[%s7454_s22 + $0x3928] sm:$0xff]  ;;  %v2072_v29 = vld [vmem:[%s7454_s22 + $0x3918] sm:$0xff] }
 0x3f2   : > { %6821 = vmatprep.subr.bf16.mxu1 %v6820_v36  ;;  %v5816_v36 = vpack.c.bf16 %v2074_v28, %v2070_v27  ;;  %v6840_v10 = vpack.c.bf16 %v2076_v30, %v2072_v29  ;;  %v2107_v28 = vld [vmem:[%s7454_s22 + $0x3a30] sm:$0xff]  ;;  %v2110_v29 = vld [vmem:[%s7454_s22 + $0x3a48] sm:$0xff] }
 0x3f3   : > { %v2114_v30 = vld [vmem:[%s7454_s22 + $0x3a68] sm:$0xff]  ;;  %v6858_v37 = vpack.c.bf16 %v2107_v28, %v2103_v26  ;;  %v2141_v26 = vld [vmem:[%s7454_s22 + $0x3b40] sm:$0xff]  ;;  %v2143_v28 = vld [vmem:[%s7454_s22 + $0x3b50] sm:$0xff] }
 0x3f4   : > { %5799 = vmatpush1.bf16.msra.mxu0 %v5798_v40  ;;  %v2078_v40 = vld [vmem:[%s7454_s22 + $0x3948] sm:$0xff]  ;;  %v5836_v38 = vpack.c.bf16 %v2114_v30, %v2110_v29  ;;  %v2147_v30 = vld [vmem:[%s7454_s22 + $0x3b70] sm:$0xff] }
 0x3f5   : > { %6823 = vmatpush1.bf16.msra.mxu1 %v6822_v41  ;;  %5801 = vmatprep.subr.bf16.mxu0 %v5800_v42  ;;  %v2082_v41 = vld [vmem:[%s7454_s22 + $0x3968] sm:$0xff]  ;;  %v2080_v42 = vld [vmem:[%s7454_s22 + $0x3958] sm:$0xff] }
 0x3f6   : > { %6825 = vmatprep.subr.bf16.mxu1 %v6824_v48  ;;  %v5820_v48 = vpack.c.bf16 %v2082_v41, %v2078_v40  ;;  %v2115_v41 = vld [vmem:[%s7454_s22 + $0x3a70] sm:$0xff] }
 0x3f7   : > { %3445 = vmatmul.mubr.f32.vlgmr.msra.gmra.mrb[0].mxu0 %v2404_v52  ;;  %v6862_v49 = vpack.c.bf16 %v2115_v41, %v2111_v34  ;;  %v2149_v34 = vld [vmem:[%s7454_s22 + $0x3b80] sm:$0xff]  ;;  %v2151_v41 = vld [vmem:[%s7454_s22 + $0x3b90] sm:$0xff] }
 0x3f8   : > { %5803 = vmatpush1.bf16.msra.mxu0 %v5802_v54  ;;  %4581 = vmatmul.mubr.f32.vlgmr.msra.gmra.mrb[0].mxu1 %v2404_v52  ;;  %v6844_v52 = vpack.c.bf16 %v2084_v43, %v2080_v42  ;;  %v2090_v54 = vld [vmem:[%s7454_s22 + $0x39a8] sm:$0xff] }
 0x3f9   : > { %6827 = vmatpush1.bf16.msra.mxu1 %v6826_v56  ;;  %5805 = vmatprep.subr.bf16.mxu0 %v5804_v57  ;;  %v2088_v56 = vld [vmem:[%s7454_s22 + $0x3998] sm:$0xff]  ;;  %v5824_v61 = vpack.c.bf16 %v2090_v54, %v2086_v53  ;;  %v2118_v42 = vld [vmem:[%s7454_s22 + $0x3a88] sm:$0xff]  ;;  %v2123_v54 = vld [vmem:[%s7454_s22 + $0x3ab0] sm:$0xff] }
 0x3fa   : > { %6829 = vmatprep.subr.bf16.mxu1 %v6828_v62  ;;  %3515 = vmatprep.mubr.f32.mxu0 %v2416_v2  ;;  %v2092_v57 = vld [vmem:[%s7454_s22 + $0x39b8] sm:$0xff]  ;;  %v2085_v62 = vld [vmem:[%s7454_s22 + $0x3980] sm:$0xff]  ;;  %v2122_v43 = vld [vmem:[%s7454_s22 + $0x3aa8] sm:$0xff] }
 0x3fb   : > { %4651 = vmatprep.mubr.f32.mxu1 %v2416_v2  ;;  %v6848_v1 = vpack.c.bf16 %v2092_v57, %v2088_v56  ;;  %v2091_v2 = vld [vmem:[%s7454_s22 + $0x39b0] sm:$0xff]  ;;  %v5840_v50 = vpack.c.bf16 %v2122_v43, %v2118_v42  ;;  %v2126_v56 = vld [vmem:[%s7454_s22 + $0x3ac8] sm:$0xff] }
 0x3fc   : > { %5807 = vmatpush1.bf16.msra.mxu0 %v5806_v4  ;;  %v2096_v4 = vld [vmem:[%s7454_s22 + $0x39d8] sm:$0xff]  ;;  %v6850_v9 = vpack.c.bf16 %v2091_v2, %v2087_v33  ;;  %v2130_v57 = vld [vmem:[%s7454_s22 + $0x3ae8] sm:$0xff]  ;;  %v2125_v33 = vld [vmem:[%s7454_s22 + $0x3ac0] sm:$0xff] }
 0x3fd   : > { %6831 = vmatpush1.bf16.msra.mxu1 %v6830_v19  ;;  %5809 = vmatprep.subr.bf16.mxu0 %v5808_v5  ;;  %v2100_v19 = vld [vmem:[%s7454_s22 + $0x39f8] sm:$0xff]  ;;  %v5826_v5 = vpack.c.bf16 %v2089_v0, %v2085_v62  ;;  %v6866_v62 = vpack.c.bf16 %v2123_v54, %v2119_v51  ;;  %v5844_v0 = vpack.c.bf16 %v2130_v57, %v2126_v56  ;;  %v2127_v2 = vld [vmem:[%s7454_s22 + $0x3ad0] sm:$0xff]  ;;  %v2157_v51 = vld [vmem:[%s7454_s22 + $0x3bc0] sm:$0xff] }
 0x3fe   : > { %6833 = vmatprep.subr.bf16.mxu1 %v6832_v44  ;;  %v2097_v44 = vld [vmem:[%s7454_s22 + $0x39e0] sm:$0xff]  ;;  %v6852_v14 = vpack.c.bf16 %v2100_v19, %v2096_v4  ;;  %v2134_v4 = vld [vmem:[%s7454_s22 + $0x3b08] sm:$0xff]  ;;  %v2155_v43 = vld [vmem:[%s7454_s22 + $0x3bb0] sm:$0xff] }
 0x3ff   : > { %v2138_v19 = vld [vmem:[%s7454_s22 + $0x3b28] sm:$0xff]  ;;  %v2159_v54 = vld [vmem:[%s7454_s22 + $0x3bd0] sm:$0xff] }
 0x400   : > { %5811 = vmatpush1.bf16.msra.mxu0 %v5810_v17  ;;  %v2104_v17 = vld [vmem:[%s7454_s22 + $0x3a18] sm:$0xff]  ;;  %v2163_v57 = vld [vmem:[%s7454_s22 + $0x3bf0] sm:$0xff] }
 0x401   : > { %6835 = vmatpush1.bf16.msra.mxu1 %v6834_v18  ;;  %5813 = vmatprep.subr.bf16.mxu0 %v5812_v20  ;;  %v2108_v18 = vld [vmem:[%s7454_s22 + $0x3a38] sm:$0xff]  ;;  %v5830_v20 = vpack.c.bf16 %v2097_v44, %v2093_v12  ;;  %v6870_v12 = vpack.c.bf16 %v2131_v63, %v2127_v2  ;;  %v5848_v44 = vpack.c.bf16 %v2138_v19, %v2134_v4  ;;  %v2165_v2 = vld [vmem:[%s7454_s22 + $0x3c00] sm:$0xff]  ;;  %v2167_v63 = vld [vmem:[%s7454_s22 + $0x3c10] sm:$0xff] }
 0x402   : > { %6837 = vmatprep.subr.bf16.mxu1 %v6836_v25  ;;  %v2105_v25 = vld [vmem:[%s7454_s22 + $0x3a20] sm:$0xff]  ;;  %v6856_v27 = vpack.c.bf16 %v2108_v18, %v2104_v17  ;;  %v2142_v17 = vld [vmem:[%s7454_s22 + $0x3b48] sm:$0xff]  ;;  %v2171_v19 = vld [vmem:[%s7454_s22 + $0x3c30] sm:$0xff] }
 0x403   : > { %v2146_v18 = vld [vmem:[%s7454_s22 + $0x3b68] sm:$0xff] }
 0x404   : > { %5815 = vmatpush1.bf16.msra.mxu0 %v5814_v31  ;;  %v2112_v31 = vld [vmem:[%s7454_s22 + $0x3a58] sm:$0xff] }
 0x405   : > { %6839 = vmatpush1.bf16.msra.mxu1 %v6838_v32  ;;  %5817 = vmatprep.subr.bf16.mxu0 %v5816_v36  ;;  %v2116_v32 = vld [vmem:[%s7454_s22 + $0x3a78] sm:$0xff]  ;;  %v5834_v36 = vpack.c.bf16 %v2105_v25, %v2101_v24  ;;  %v6874_v24 = vpack.c.bf16 %v2139_v16, %v2135_v8  ;;  %v5852_v25 = vpack.c.bf16 %v2146_v18, %v2142_v17  ;;  %v2177_v16 = vld [vmem:[%s7454_s22 + $0x3c60] sm:$0xff]  ;;  %v2175_v17 = vld [vmem:[%s7454_s22 + $0x3c50] sm:$0xff] }
 0x406   : > { %6841 = vmatprep.subr.bf16.mxu1 %v6840_v10  ;;  %v2113_v10 = vld [vmem:[%s7454_s22 + $0x3a60] sm:$0xff]  ;;  %v6860_v40 = vpack.c.bf16 %v2116_v32, %v2112_v31  ;;  %v2150_v31 = vld [vmem:[%s7454_s22 + $0x3b88] sm:$0xff] }
 0x407   : > { %v2154_v32 = vld [vmem:[%s7454_s22 + $0x3ba8] sm:$0xff] }
 0x408   : > { %5819 = vmatpush1.bf16.msra.mxu0 %v5818_v45  ;;  %v2120_v45 = vld [vmem:[%s7454_s22 + $0x3a98] sm:$0xff] }
 0x409   : > { %6843 = vmatpush1.bf16.msra.mxu1 %v6842_v47  ;;  %5821 = vmatprep.subr.bf16.mxu0 %v5820_v48  ;;  %v2124_v47 = vld [vmem:[%s7454_s22 + $0x3ab8] sm:$0xff]  ;;  %v5838_v48 = vpack.c.bf16 %v2113_v10, %v2109_v39  ;;  %v6878_v39 = vpack.c.bf16 %v2147_v30, %v2143_v28  ;;  %v5856_v10 = vpack.c.bf16 %v2154_v32, %v2150_v31  ;;  %v2185_v30 = vld [vmem:[%s7454_s22 + $0x3ca0] sm:$0xff]  ;;  %v2183_v31 = vld [vmem:[%s7454_s22 + $0x3c90] sm:$0xff] }
 0x40a   : > { %6845 = vmatprep.subr.bf16.mxu1 %v6844_v52  ;;  %v2121_v52 = vld [vmem:[%s7454_s22 + $0x3aa0] sm:$0xff]  ;;  %v6864_v53 = vpack.c.bf16 %v2124_v47, %v2120_v45  ;;  %v2158_v45 = vld [vmem:[%s7454_s22 + $0x3bc8] sm:$0xff] }
 0x40b   : > { %v2162_v47 = vld [vmem:[%s7454_s22 + $0x3be8] sm:$0xff] }
 0x40c   : > { %5823 = vmatpush1.bf16.msra.mxu0 %v5822_v7  ;;  %v2128_v7 = vld [vmem:[%s7454_s22 + $0x3ad8] sm:$0xff]  ;;  %v2190_v32 = vld [vmem:[%s7454_s22 + $0x3cc8] sm:$0xff] }
 0x40d   : > { %6847 = vmatpush1.bf16.msra.mxu1 %v6846_v58  ;;  %5825 = vmatprep.subr.bf16.mxu0 %v5824_v61  ;;  %v2132_v58 = vld [vmem:[%s7454_s22 + $0x3af8] sm:$0xff]  ;;  %v5842_v61 = vpack.c.bf16 %v2121_v52, %v2117_v22  ;;  %v6882_v22 = vpack.c.bf16 %v2155_v43, %v2151_v41  ;;  %v5860_v52 = vpack.c.bf16 %v2162_v47, %v2158_v45  ;;  %v2193_v41 = vld [vmem:[%s7454_s22 + $0x3ce0] sm:$0xff]  ;;  %v2195_v45 = vld [vmem:[%s7454_s22 + $0x3cf0] sm:$0xff] }
 0x40e   : > { %6849 = vmatprep.subr.bf16.mxu1 %v6848_v1  ;;  %v2129_v1 = vld [vmem:[%s7454_s22 + $0x3ae0] sm:$0xff]  ;;  %v6868_v3 = vpack.c.bf16 %v2132_v58, %v2128_v7  ;;  %v2166_v7 = vld [vmem:[%s7454_s22 + $0x3c08] sm:$0xff] }
 0x40f   : > { %v2170_v58 = vld [vmem:[%s7454_s22 + $0x3c28] sm:$0xff] }
 0x410   : > { %5827 = vmatpush1.bf16.msra.mxu0 %v5826_v5  ;;  %v2136_v5 = vld [vmem:[%s7454_s22 + $0x3b18] sm:$0xff]  ;;  %v2198_v47 = vld [vmem:[%s7454_s22 + $0x3d08] sm:$0xff] }
 0x411   : > { %6851 = vmatpush1.bf16.msra.mxu1 %v6850_v9  ;;  %5829 = vmatprep.subr.bf16.mxu0 %v5828_v11  ;;  %v2140_v9 = vld [vmem:[%s7454_s22 + $0x3b38] sm:$0xff]  ;;  %v5846_v11 = vpack.c.bf16 %v2129_v1, %v2125_v33  ;;  %v6886_v33 = vpack.c.bf16 %v2163_v57, %v2159_v54  ;;  %v5864_v1 = vpack.c.bf16 %v2170_v58, %v2166_v7  ;;  %v2201_v54 = vld [vmem:[%s7454_s22 + $0x3d20] sm:$0xff]  ;;  %v2203_v7 = vld [vmem:[%s7454_s22 + $0x3d30] sm:$0xff] }
 0x412   : > { %6853 = vmatprep.subr.bf16.mxu1 %v6852_v14  ;;  %v2137_v14 = vld [vmem:[%s7454_s22 + $0x3b20] sm:$0xff]  ;;  %v6872_v15 = vpack.c.bf16 %v2140_v9, %v2136_v5  ;;  %v2174_v5 = vld [vmem:[%s7454_s22 + $0x3c48] sm:$0xff] }
 0x413   : > { %v2178_v9 = vld [vmem:[%s7454_s22 + $0x3c68] sm:$0xff] }
 0x414   : > { %5831 = vmatpush1.bf16.msra.mxu0 %v5830_v20  ;;  %v2144_v20 = vld [vmem:[%s7454_s22 + $0x3b58] sm:$0xff]  ;;  %v5868_v8 = vpack.c.bf16 %v2178_v9, %v2174_v5  ;;  %v2206_v58 = vld [vmem:[%s7454_s22 + $0x3d48] sm:$0xff]  ;;  %v2211_v5 = vld [vmem:[%s7454_s22 + $0x3d70] sm:$0xff] }
 0x415   : > { %6855 = vmatpush1.bf16.msra.mxu1 %v6854_v23  ;;  %5833 = vmatprep.subr.bf16.mxu0 %v5832_v21  ;;  %v2148_v23 = vld [vmem:[%s7454_s22 + $0x3b78] sm:$0xff]  ;;  %v5850_v21 = vpack.c.bf16 %v2137_v14, %v2133_v13  ;;  %v6890_v14 = vpack.c.bf16 %v2171_v19, %v2167_v63  ;;  %v2209_v63 = vld [vmem:[%s7454_s22 + $0x3d60] sm:$0xff]  ;;  %v2214_v9 = vld [vmem:[%s7454_s22 + $0x3d88] sm:$0xff] }
 0x416   : > { %6857 = vmatprep.subr.bf16.mxu1 %v6856_v27  ;;  %v2145_v27 = vld [vmem:[%s7454_s22 + $0x3b60] sm:$0xff]  ;;  %v6876_v29 = vpack.c.bf16 %v2148_v23, %v2144_v20  ;;  %v2179_v20 = vld [vmem:[%s7454_s22 + $0x3c70] sm:$0xff]  ;;  %v2186_v23 = vld [vmem:[%s7454_s22 + $0x3ca8] sm:$0xff] }
 0x418   : > { %5835 = vmatpush1.bf16.msra.mxu0 %v5834_v36  ;;  %v2152_v36 = vld [vmem:[%s7454_s22 + $0x3b98] sm:$0xff] }
 0x419   : > { %6859 = vmatpush1.bf16.msra.mxu1 %v6858_v37  ;;  %5837 = vmatprep.subr.bf16.mxu0 %v5836_v38  ;;  %v2156_v37 = vld [vmem:[%s7454_s22 + $0x3bb8] sm:$0xff]  ;;  %v5854_v38 = vpack.c.bf16 %v2145_v27, %v2141_v26  ;;  %v6894_v27 = vpack.c.bf16 %v2179_v20, %v2175_v17  ;;  %v2215_v17 = vld [vmem:[%s7454_s22 + $0x3d90] sm:$0xff] }
 0x41a   : > { %6861 = vmatprep.subr.bf16.mxu1 %v6860_v40  ;;  %v2153_v40 = vld [vmem:[%s7454_s22 + $0x3ba0] sm:$0xff]  ;;  %v6880_v42 = vpack.c.bf16 %v2156_v37, %v2152_v36  ;;  %v2194_v36 = vld [vmem:[%s7454_s22 + $0x3ce8] sm:$0xff]  ;;  %v2192_v37 = vld [vmem:[%s7454_s22 + $0x3cd8] sm:$0xff] }
 0x41b   : > { %v2219_v20 = vld [vmem:[%s7454_s22 + $0x3db0] sm:$0xff] }
 0x41c   : > { %5839 = vmatpush1.bf16.msra.mxu0 %v5838_v48  ;;  %v2160_v48 = vld [vmem:[%s7454_s22 + $0x3bd8] sm:$0xff] }
 0x41d   : > { %6863 = vmatpush1.bf16.msra.mxu1 %v6862_v49  ;;  %5841 = vmatprep.subr.bf16.mxu0 %v5840_v50  ;;  %v2164_v49 = vld [vmem:[%s7454_s22 + $0x3bf8] sm:$0xff]  ;;  %v5858_v50 = vpack.c.bf16 %v2153_v40, %v2149_v34  ;;  %v5876_v34 = vpack.c.bf16 %v2194_v36, %v2190_v32  ;;  %v2189_v40 = vld [vmem:[%s7454_s22 + $0x3cc0] sm:$0xff]  ;;  %v2234_v32 = vld [vmem:[%s7454_s22 + $0x3e28] sm:$0xff] }
 0x41e   : > { %6865 = vmatprep.subr.bf16.mxu1 %v6864_v53  ;;  %v2161_v53 = vld [vmem:[%s7454_s22 + $0x3be0] sm:$0xff]  ;;  %v6884_v56 = vpack.c.bf16 %v2164_v49, %v2160_v48  ;;  %v2202_v48 = vld [vmem:[%s7454_s22 + $0x3d28] sm:$0xff]  ;;  %v2200_v49 = vld [vmem:[%s7454_s22 + $0x3d18] sm:$0xff] }
 0x41f   : > { %v2232_v36 = vld [vmem:[%s7454_s22 + $0x3e18] sm:$0xff] }
 0x420   : > { %5843 = vmatpush1.bf16.msra.mxu0 %v5842_v61  ;;  %v2168_v61 = vld [vmem:[%s7454_s22 + $0x3c18] sm:$0xff] }
 0x421   : > { %6867 = vmatpush1.bf16.msra.mxu1 %v6866_v62  ;;  %5845 = vmatprep.subr.bf16.mxu0 %v5844_v0  ;;  %v2172_v62 = vld [vmem:[%s7454_s22 + $0x3c38] sm:$0xff]  ;;  %v5862_v0 = vpack.c.bf16 %v2161_v53, %v2157_v51  ;;  %v5880_v51 = vpack.c.bf16 %v2202_v48, %v2198_v47  ;;  %v2197_v53 = vld [vmem:[%s7454_s22 + $0x3d00] sm:$0xff]  ;;  %v2242_v47 = vld [vmem:[%s7454_s22 + $0x3e68] sm:$0xff] }
 0x422   : > { %6869 = vmatprep.subr.bf16.mxu1 %v6868_v3  ;;  %v2169_v3 = vld [vmem:[%s7454_s22 + $0x3c20] sm:$0xff]  ;;  %v6888_v4 = vpack.c.bf16 %v2172_v62, %v2168_v61  ;;  %v2210_v61 = vld [vmem:[%s7454_s22 + $0x3d68] sm:$0xff]  ;;  %v2208_v62 = vld [vmem:[%s7454_s22 + $0x3d58] sm:$0xff] }
 0x423   : > { %v5866_v13 = vpack.c.bf16 %v2169_v3, %v2165_v2  ;;  %v5884_v2 = vpack.c.bf16 %v2210_v61, %v2206_v58  ;;  %v2205_v3 = vld [vmem:[%s7454_s22 + $0x3d40] sm:$0xff]  ;;  %v2240_v48 = vld [vmem:[%s7454_s22 + $0x3e58] sm:$0xff]  ;;  %v2250_v58 = vld [vmem:[%s7454_s22 + $0x3ea8] sm:$0xff] }
 0x424   : > { %5847 = vmatpush1.bf16.msra.mxu0 %v5846_v11  ;;  %v2412_v11 = vrot.slane %v9355_v55, %v7879_v60  ;;  %v2182_v60 = vld [vmem:[%s7454_s22 + $0x3c88] sm:$0xff]  ;;  %v2248_v61 = vld [vmem:[%s7454_s22 + $0x3e98] sm:$0xff] }
 0x425   : > { %6871 = vmatpush1.bf16.msra.mxu1 %v6870_v12  ;;  %5849 = vmatprep.subr.bf16.mxu0 %v5848_v44  ;;  %v2176_v12 = vld [vmem:[%s7454_s22 + $0x3c58] sm:$0xff]  ;;  %v5872_v28 = vpack.c.bf16 %v2186_v23, %v2182_v60  ;;  %v2222_v60 = vld [vmem:[%s7454_s22 + $0x3dc8] sm:$0xff] }
 0x426   : > { %6873 = vmatprep.subr.bf16.mxu1 %v6872_v15  ;;  %v2180_v44 = vld [vmem:[%s7454_s22 + $0x3c78] sm:$0xff]  ;;  %v2173_v15 = vld [vmem:[%s7454_s22 + $0x3c40] sm:$0xff]  ;;  %v2226_v23 = vld [vmem:[%s7454_s22 + $0x3de8] sm:$0xff] }
 0x427   : > { %v6892_v18 = vpack.c.bf16 %v2180_v44, %v2176_v12  ;;  %v5870_v26 = vpack.c.bf16 %v2177_v16, %v2173_v15  ;;  %v2216_v12 = vld [vmem:[%s7454_s22 + $0x3d98] sm:$0xff]  ;;  %v2213_v15 = vld [vmem:[%s7454_s22 + $0x3d80] sm:$0xff] }
 0x428   : > { %5851 = vmatpush1.bf16.msra.mxu0 %v5850_v21  ;;  %v2424_v21 = vrot.slane %v9355_v55, %v7888_v6  ;;  %v2187_v55 = vld [vmem:[%s7454_s22 + $0x3cb0] sm:$0xff]  ;;  %v2220_v44 = vld [vmem:[%s7454_s22 + $0x3db8] sm:$0xff]  ;;  %v2217_v16 = vld [vmem:[%s7454_s22 + $0x3da0] sm:$0xff] }
 0x429   : > { %6875 = vmatpush1.bf16.msra.mxu1 %v6874_v24  ;;  %5853 = vmatprep.subr.bf16.mxu0 %v5852_v25  ;;  %v2184_v24 = vld [vmem:[%s7454_s22 + $0x3c98] sm:$0xff] }
 0x42a   : > { %6877 = vmatprep.subr.bf16.mxu1 %v6876_v29  ;;  %v2188_v25 = vld [vmem:[%s7454_s22 + $0x3cb8] sm:$0xff]  ;;  %v2181_v29 = vld [vmem:[%s7454_s22 + $0x3c80] sm:$0xff] }
 0x42b   : > { %v6896_v6 = vpack.c.bf16 %v2188_v25, %v2184_v24  ;;  %v2228_v24 = vld [vmem:[%s7454_s22 + $0x3df8] sm:$0xff]  ;;  %v5890_v25 = vpack.c.bf16 %v2217_v16, %v2213_v15  ;;  %v2257_v15 = vld [vmem:[%s7454_s22 + $0x3ee0] sm:$0xff]  ;;  %v2255_v16 = vld [vmem:[%s7454_s22 + $0x3ed0] sm:$0xff] }
 0x42c   : > { %5855 = vmatpush1.bf16.msra.mxu0 %v5854_v38  ;;  %v2196_v38 = vld [vmem:[%s7454_s22 + $0x3cf8] sm:$0xff] }
 0x42d   : > { %6879 = vmatpush1.bf16.msra.mxu1 %v6878_v39  ;;  %5857 = vmatprep.subr.bf16.mxu0 %v5856_v10  ;;  %v5874_v39 = vpack.c.bf16 %v2185_v30, %v2181_v29  ;;  %v6898_v10 = vpack.c.bf16 %v2187_v55, %v2183_v31  ;;  %v6900_v43 = vpack.c.bf16 %v2196_v38, %v2192_v37  ;;  %v2225_v29 = vld [vmem:[%s7454_s22 + $0x3de0] sm:$0xff]  ;;  %v2223_v30 = vld [vmem:[%s7454_s22 + $0x3dd0] sm:$0xff]  ;;  %v2230_v55 = vld [vmem:[%s7454_s22 + $0x3e08] sm:$0xff] }
 0x42e   : > { %6881 = vmatprep.subr.bf16.mxu1 %v6880_v42  ;;  %v2191_v42 = vld [vmem:[%s7454_s22 + $0x3cd0] sm:$0xff]  ;;  %v2236_v37 = vld [vmem:[%s7454_s22 + $0x3e38] sm:$0xff] }
 0x430   : > { %5859 = vmatpush1.bf16.msra.mxu0 %v5858_v50  ;;  %v2204_v50 = vld [vmem:[%s7454_s22 + $0x3d38] sm:$0xff] }
 0x431   : > { %6883 = vmatpush1.bf16.msra.mxu1 %v6882_v22  ;;  %5861 = vmatprep.subr.bf16.mxu0 %v5860_v52  ;;  %v5878_v22 = vpack.c.bf16 %v2193_v41, %v2189_v40  ;;  %v6902_v52 = vpack.c.bf16 %v2195_v45, %v2191_v42  ;;  %v6904_v57 = vpack.c.bf16 %v2204_v50, %v2200_v49  ;;  %v2233_v40 = vld [vmem:[%s7454_s22 + $0x3e20] sm:$0xff]  ;;  %v2231_v41 = vld [vmem:[%s7454_s22 + $0x3e10] sm:$0xff]  ;;  %v2238_v45 = vld [vmem:[%s7454_s22 + $0x3e48] sm:$0xff] }
 0x432   : > { %6885 = vmatprep.subr.bf16.mxu1 %v6884_v56  ;;  %v2199_v56 = vld [vmem:[%s7454_s22 + $0x3d10] sm:$0xff]  ;;  %v6920_v42 = vpack.c.bf16 %v2236_v37, %v2232_v36  ;;  %v2244_v49 = vld [vmem:[%s7454_s22 + $0x3e78] sm:$0xff] }
 0x433   : > { %v2276_v36 = vld [vmem:[%s7454_s22 + $0x3f78] sm:$0xff] }
 0x434   : > { %5863 = vmatpush1.bf16.msra.mxu0 %v5862_v0  ;;  %v2212_v0 = vld [vmem:[%s7454_s22 + $0x3d78] sm:$0xff] }
 0x435   : > { %6887 = vmatpush1.bf16.msra.mxu1 %v6886_v33  ;;  %5865 = vmatprep.subr.bf16.mxu0 %v5864_v1  ;;  %v5882_v33 = vpack.c.bf16 %v2201_v54, %v2197_v53  ;;  %v6906_v1 = vpack.c.bf16 %v2203_v7, %v2199_v56  ;;  %v6908_v19 = vpack.c.bf16 %v2212_v0, %v2208_v62  ;;  %v2241_v53 = vld [vmem:[%s7454_s22 + $0x3e60] sm:$0xff]  ;;  %v2239_v54 = vld [vmem:[%s7454_s22 + $0x3e50] sm:$0xff]  ;;  %v2246_v7 = vld [vmem:[%s7454_s22 + $0x3e88] sm:$0xff] }
 0x436   : > { %6889 = vmatprep.subr.bf16.mxu1 %v6888_v4  ;;  %v2207_v4 = vld [vmem:[%s7454_s22 + $0x3d50] sm:$0xff]  ;;  %v6924_v56 = vpack.c.bf16 %v2244_v49, %v2240_v48  ;;  %v2252_v62 = vld [vmem:[%s7454_s22 + $0x3eb8] sm:$0xff] }
 0x437   : > { %3516 = vmatmul.mubr.f32.vlgmr.msra.gmra.mrb[0].mxu0 %v2412_v11  ;;  %v2284_v48 = vld [vmem:[%s7454_s22 + $0x3fb8] sm:$0xff] }
 0x438   : > { %5867 = vmatpush1.bf16.msra.mxu0 %v5866_v13  ;;  %4652 = vmatmul.mubr.f32.vlgmr.msra.gmra.mrb[0].mxu1 %v2412_v11  ;;  %v2218_v11 = vld [vmem:[%s7454_s22 + $0x3da8] sm:$0xff]  ;;  %v5886_v13 = vpack.c.bf16 %v2209_v63, %v2205_v3  ;;  %v2249_v3 = vld [vmem:[%s7454_s22 + $0x3ea0] sm:$0xff]  ;;  %v2247_v63 = vld [vmem:[%s7454_s22 + $0x3e90] sm:$0xff] }
 0x439   : > { %6891 = vmatpush1.bf16.msra.mxu1 %v6890_v14  ;;  %5869 = vmatprep.subr.bf16.mxu0 %v5868_v8  ;;  %v6910_v14 = vpack.c.bf16 %v2211_v5, %v2207_v4  ;;  %v5888_v8 = vpack.c.bf16 %v2218_v11, %v2214_v9  ;;  %v6928_v4 = vpack.c.bf16 %v2252_v62, %v2248_v61  ;;  %v2254_v5 = vld [vmem:[%s7454_s22 + $0x3ec8] sm:$0xff]  ;;  %v2256_v11 = vld [vmem:[%s7454_s22 + $0x3ed8] sm:$0xff] }
 0x43a   : > { %6893 = vmatprep.subr.bf16.mxu1 %v6892_v18  ;;  %3586 = vmatprep.mubr.f32.mxu0 %v2424_v21  ;;  %v6912_v18 = vpack.c.bf16 %v2220_v44, %v2216_v12  ;;  %v2258_v9 = vld [vmem:[%s7454_s22 + $0x3ee8] sm:$0xff]  ;;  %v2260_v12 = vld [vmem:[%s7454_s22 + $0x3ef8] sm:$0xff] }
 0x43b   : > { %4722 = vmatprep.mubr.f32.mxu1 %v2424_v21  ;;  %v2224_v21 = vld [vmem:[%s7454_s22 + $0x3dd8] sm:$0xff] }
 0x43c   : > { %5871 = vmatpush1.bf16.msra.mxu0 %v5870_v26  ;;  %v6914_v26 = vpack.c.bf16 %v2219_v20, %v2215_v17  ;;  %v6916_v31 = vpack.c.bf16 %v2228_v24, %v2224_v21  ;;  %v6932_v17 = vpack.c.bf16 %v2260_v12, %v2256_v11  ;;  %v2262_v20 = vld [vmem:[%s7454_s22 + $0x3f08] sm:$0xff]  ;;  %v2268_v21 = vld [vmem:[%s7454_s22 + $0x3f38] sm:$0xff]  ;;  %v7251_v12 = vmov 1966171168  }
 0x43d   : > { %6895 = vmatpush1.bf16.msra.mxu1 %v6894_v27  ;;  %5873 = vmatprep.subr.bf16.mxu0 %v5872_v28  ;;  %v5892_v27 = vpack.c.bf16 %v2226_v23, %v2222_v60  ;;  %v2221_v28 = vld [vmem:[%s7454_s22 + $0x3dc0] sm:$0xff]  ;;  %v2266_v60 = vld [vmem:[%s7454_s22 + $0x3f28] sm:$0xff]  ;;  %v2264_v23 = vld [vmem:[%s7454_s22 + $0x3f18] sm:$0xff] }
 0x43e   : > { %6897 = vmatprep.subr.bf16.mxu1 %v6896_v6  ;;  %v2227_v6 = vld [vmem:[%s7454_s22 + $0x3df0] sm:$0xff]  ;;  %v5894_v38 = vpack.c.bf16 %v2225_v29, %v2221_v28  ;;  %v2265_v28 = vld [vmem:[%s7454_s22 + $0x3f20] sm:$0xff]  ;;  %v2292_v61 = vld [vmem:[%s7454_s22 + $0x3ff8] sm:$0xff] }
 0x43f   : > { %v2263_v29 = vld [vmem:[%s7454_s22 + $0x3f10] sm:$0xff] }
 0x440   : > { %5875 = vmatpush1.bf16.msra.mxu0 %v5874_v39  ;;  %v6918_v39 = vpack.c.bf16 %v2227_v6, %v2223_v30  ;;  %v6936_v30 = vpack.c.bf16 %v2268_v21, %v2264_v23  ;;  %v2270_v6 = vld [vmem:[%s7454_s22 + $0x3f48] sm:$0xff]  ;;  %v240_v21 = vld [vmem:[%s209_s27] sm:$0xf] }
 0x441   : > { %6899 = vmatpush1.bf16.msra.mxu1 %v6898_v10  ;;  %5877 = vmatprep.subr.bf16.mxu0 %v5876_v34  ;;  %v5896_v10 = vpack.c.bf16 %v2234_v32, %v2230_v55  ;;  %v2229_v34 = vld [vmem:[%s7454_s22 + $0x3e00] sm:$0xff]  ;;  %v2274_v55 = vld [vmem:[%s7454_s22 + $0x3f68] sm:$0xff]  ;;  %v2272_v32 = vld [vmem:[%s7454_s22 + $0x3f58] sm:$0xff] }
 0x442   : > { %6901 = vmatprep.subr.bf16.mxu1 %v6900_v43  ;;  %v2235_v43 = vld [vmem:[%s7454_s22 + $0x3e30] sm:$0xff]  ;;  %v5898_v50 = vpack.c.bf16 %v2233_v40, %v2229_v34  ;;  %v2273_v34 = vld [vmem:[%s7454_s22 + $0x3f60] sm:$0xff] }
 0x443   : > { %v2271_v40 = vld [vmem:[%s7454_s22 + $0x3f50] sm:$0xff] }
 0x444   : > { %5879 = vmatpush1.bf16.msra.mxu0 %v5878_v22  ;;  %v6922_v22 = vpack.c.bf16 %v2235_v43, %v2231_v41  ;;  %v6940_v41 = vpack.c.bf16 %v2276_v36, %v2272_v32  ;;  %v2278_v43 = vld [vmem:[%s7454_s22 + $0x3f88] sm:$0xff] }
 0x445   : > { %6903 = vmatpush1.bf16.msra.mxu1 %v6902_v52  ;;  %5881 = vmatprep.subr.bf16.mxu0 %v5880_v51  ;;  %v5900_v52 = vpack.c.bf16 %v2242_v47, %v2238_v45  ;;  %v2237_v51 = vld [vmem:[%s7454_s22 + $0x3e40] sm:$0xff]  ;;  %v2282_v45 = vld [vmem:[%s7454_s22 + $0x3fa8] sm:$0xff]  ;;  %v2280_v47 = vld [vmem:[%s7454_s22 + $0x3f98] sm:$0xff] }
 0x446   : > { %6905 = vmatprep.subr.bf16.mxu1 %v6904_v57  ;;  %v2243_v57 = vld [vmem:[%s7454_s22 + $0x3e70] sm:$0xff]  ;;  %v5902_v0 = vpack.c.bf16 %v2241_v53, %v2237_v51  ;;  %v2281_v51 = vld [vmem:[%s7454_s22 + $0x3fa0] sm:$0xff] }
 0x447   : > { %v2279_v53 = vld [vmem:[%s7454_s22 + $0x3f90] sm:$0xff] }
 0x448   : > { %5883 = vmatpush1.bf16.msra.mxu0 %v5882_v33  ;;  %v6926_v33 = vpack.c.bf16 %v2243_v57, %v2239_v54  ;;  %v6944_v54 = vpack.c.bf16 %v2284_v48, %v2280_v47  ;;  %v2286_v57 = vld [vmem:[%s7454_s22 + $0x3fc8] sm:$0xff] }
 0x449   : > { %6907 = vmatpush1.bf16.msra.mxu1 %v6906_v1  ;;  %5885 = vmatprep.subr.bf16.mxu0 %v5884_v2  ;;  %v5904_v1 = vpack.c.bf16 %v2250_v58, %v2246_v7  ;;  %v2245_v2 = vld [vmem:[%s7454_s22 + $0x3e80] sm:$0xff]  ;;  %v2290_v7 = vld [vmem:[%s7454_s22 + $0x3fe8] sm:$0xff]  ;;  %v2288_v58 = vld [vmem:[%s7454_s22 + $0x3fd8] sm:$0xff] }
 0x44a   : > { %6909 = vmatprep.subr.bf16.mxu1 %v6908_v19  ;;  %v2251_v19 = vld [vmem:[%s7454_s22 + $0x3eb0] sm:$0xff]  ;;  %v5906_v44 = vpack.c.bf16 %v2249_v3, %v2245_v2  ;;  %v2289_v2 = vld [vmem:[%s7454_s22 + $0x3fe0] sm:$0xff]  ;;  %v6948_v3 = vpack.c.bf16 %v2292_v61, %v2288_v58 }
 0x44c   : > { %5887 = vmatpush1.bf16.msra.mxu0 %v5886_v13  ;;  %v6930_v13 = vpack.c.bf16 %v2251_v19, %v2247_v63  ;;  %v2287_v63 = vld [vmem:[%s7454_s22 + $0x3fd0] sm:$0xff] }
 0x44d   : > { %6911 = vmatpush1.bf16.msra.mxu1 %v6910_v14  ;;  %5889 = vmatprep.subr.bf16.mxu0 %v5888_v8  ;;  %v5908_v14 = vpack.c.bf16 %v2258_v9, %v2254_v5  ;;  %v2253_v8 = vld [vmem:[%s7454_s22 + $0x3ec0] sm:$0xff]  ;;  %v7084_v9 = vld [vmem:[#allocation2 + $0x18] sm:$0xff] }
 0x44e   : > { %6913 = vmatprep.subr.bf16.mxu1 %v6912_v18  ;;  %v2259_v18 = vld [vmem:[%s7454_s22 + $0x3ef0] sm:$0xff]  ;;  %v5910_v24 = vpack.c.bf16 %v2257_v15, %v2253_v8  ;;  %v2420_v11 = vrot.slane %v7084_v9, %v8019_v35 }
 0x450   : > { %5891 = vmatpush1.bf16.msra.mxu0 %v5890_v25  ;;  %v6934_v25 = vpack.c.bf16 %v2259_v18, %v2255_v16 }
 0x451   : > { %6915 = vmatpush1.bf16.msra.mxu1 %v6914_v26  ;;  %5893 = vmatprep.subr.bf16.mxu0 %v5892_v27  ;;  %v5912_v26 = vpack.c.bf16 %v2266_v60, %v2262_v20  ;;  %v2261_v27 = vld [vmem:[%s7454_s22 + $0x3f00] sm:$0xff] }
 0x452   : > { %6917 = vmatprep.subr.bf16.mxu1 %v6916_v31  ;;  %v2267_v31 = vld [vmem:[%s7454_s22 + $0x3f30] sm:$0xff]  ;;  %v5914_v37 = vpack.c.bf16 %v2265_v28, %v2261_v27 }
 0x454   : > { %5895 = vmatpush1.bf16.msra.mxu0 %v5894_v38  ;;  %v6938_v38 = vpack.c.bf16 %v2267_v31, %v2263_v29 }
 0x455   : > { %6919 = vmatpush1.bf16.msra.mxu1 %v6918_v39  ;;  %5897 = vmatprep.subr.bf16.mxu0 %v5896_v10  ;;  %v5916_v39 = vpack.c.bf16 %v2274_v55, %v2270_v6  ;;  %v2269_v10 = vld [vmem:[%s7454_s22 + $0x3f40] sm:$0xff] }
 0x456   : > { %6921 = vmatprep.subr.bf16.mxu1 %v6920_v42  ;;  %v2275_v42 = vld [vmem:[%s7454_s22 + $0x3f70] sm:$0xff]  ;;  %v5918_v49 = vpack.c.bf16 %v2273_v34, %v2269_v10 }
 0x458   : > { %5899 = vmatpush1.bf16.msra.mxu0 %v5898_v50  ;;  %v6942_v50 = vpack.c.bf16 %v2275_v42, %v2271_v40 }
 0x459   : > { %6923 = vmatpush1.bf16.msra.mxu1 %v6922_v22  ;;  %5901 = vmatprep.subr.bf16.mxu0 %v5900_v52  ;;  %v5920_v22 = vpack.c.bf16 %v2282_v45, %v2278_v43  ;;  %v2277_v52 = vld [vmem:[%s7454_s22 + $0x3f80] sm:$0xff] }
 0x45a   : > { %6925 = vmatprep.subr.bf16.mxu1 %v6924_v56  ;;  %v2283_v56 = vld [vmem:[%s7454_s22 + $0x3fb0] sm:$0xff]  ;;  %v5922_v62 = vpack.c.bf16 %v2281_v51, %v2277_v52 }
 0x45c   : > { %5903 = vmatpush1.bf16.msra.mxu0 %v5902_v0  ;;  %v6946_v0 = vpack.c.bf16 %v2283_v56, %v2279_v53 }
 0x45d   : > { %6927 = vmatpush1.bf16.msra.mxu1 %v6926_v33  ;;  %5905 = vmatprep.subr.bf16.mxu0 %v5904_v1  ;;  %v5924_v33 = vpack.c.bf16 %v2290_v7, %v2286_v57  ;;  %v2285_v1 = vld [vmem:[%s7454_s22 + $0x3fc0] sm:$0xff] }
 0x45e   : > { %6929 = vmatprep.subr.bf16.mxu1 %v6928_v4  ;;  %v2291_v4 = vld [vmem:[%s7454_s22 + $0x3ff0] sm:$0xff]  ;;  %v5926_v19 = vpack.c.bf16 %v2289_v2, %v2285_v1 }
 0x45f   : > { %v6950_v5 = vpack.c.bf16 %v2291_v4, %v2287_v63 }
 0x460   : > { %5907 = vmatpush1.bf16.msra.mxu0 %v5906_v44  ;;  %v4736_v44 = vunpack.c.l.s4 %v7251_v12 }
 0x461   : > { %6931 = vmatpush1.bf16.msra.mxu1 %v6930_v13  ;;  %5909 = vmatprep.subr.bf16.mxu0 %v5908_v14 }
 0x462   : > { %6933 = vmatprep.subr.bf16.mxu1 %v6932_v17  ;;  %v4737_v13 = vunpack.c.0.s8 %v4736_v44 }
 0x464   : > { %5911 = vmatpush1.bf16.msra.mxu0 %v5910_v24  ;;  %v4740_v8 = vsub.s32 %v4737_v13, %v7545_v59 }
 0x465   : > { %6935 = vmatpush1.bf16.msra.mxu1 %v6934_v25  ;;  %5913 = vmatprep.subr.bf16.mxu0 %v5912_v26 }
 0x466   : > { %6937 = vmatprep.subr.bf16.mxu1 %v6936_v30 }
 0x468   : > { %5915 = vmatpush1.bf16.msra.mxu0 %v5914_v37 }
 0x469   : > { %6939 = vmatpush1.bf16.msra.mxu1 %v6938_v38  ;;  %5917 = vmatprep.subr.bf16.mxu0 %v5916_v39 }
 0x46a   : > { %6941 = vmatprep.subr.bf16.mxu1 %v6940_v41 }
 0x46c   : > { %5919 = vmatpush1.bf16.msra.mxu0 %v5918_v49 }
 0x46d   : > { %6943 = vmatpush1.bf16.msra.mxu1 %v6942_v50  ;;  %5921 = vmatprep.subr.bf16.mxu0 %v5920_v22 }
 0x46e   : > { %6945 = vmatprep.subr.bf16.mxu1 %v6944_v54 }
 0x470   : > { %5923 = vmatpush1.bf16.msra.mxu0 %v5922_v62 }
 0x471   : > { %6947 = vmatpush1.bf16.msra.mxu1 %v6946_v0  ;;  %5925 = vmatprep.subr.bf16.mxu0 %v5924_v33 }
 0x472   : > { %6949 = vmatprep.subr.bf16.mxu1 %v6948_v3 }
 0x474   : > { %5927 = vmatpush1.bf16.msra.mxu0 %v5926_v19 }
 0x475   : > { %6951 = vmatpush1.bf16.msra.mxu1 %v6950_v5 }
 0x477   : > { %3587 = vmatmul.mubr.f32.vlgmr.msra.gmra.mrb[0].mxu0 %v2420_v11 }
 0x478   : > { %4723 = vmatmul.mubr.f32.vlgmr.msra.gmra.mrb[0].mxu1 %v2420_v11 }
 0x54a   : > { %v3588_v14 = vpop.f32.mrb[0].mxu0 }
 0x54b   : > { %v4724_v15 = vpop.f32.mrb[0].mxu1  ;;  %v3590_v16 = vpop.f32.mrb[1].mxu0 }
 0x54c   : > { %v4733_v17 = vcombine.low %v3588_v14, %v3590_v16  ;;  %v4726_v18 = vpop.f32.mrb[1].mxu1 }
 0x54d   : > { %v4734_v20 = vcombine.low %v4724_v15, %v4726_v18 }
 0x54e   : > { %v4741_v60 = vrot.slane %v4733_v17, %v4740_v8 }
 0x54f   : > { %v4748_v35 = vrot.slane %v4734_v20, %v4740_v8 }
 0x551   : > { %v4749_v23 = vcombine.low %v4741_v60, %v4748_v35 }
 0x553   : > { %v4756_v24 = vrot.slane %v4749_v23, %v4740_v8 }
 0x555   : > { %v4758_v59 = vadd.f32 %v4756_v24, %v240_v21 }
 0x557   : > { %4763 = vst.msk [vmem:[%s236_s10] sm:$0xf] %vm4761_vm0, %v4758_v59 }
 0x558   : > { %7186 = shalt.err (!%p7183_p1)
}
 0x559   : > { %s7187_s8 = scalar_lea.hbm %s9619_s11, 64  ;;  %s7191_s29 = scalar_lea.hbm %s9666_s3, 128 }
 0x55a   : > { %p7188_p6 = scmp.ne.s32.totalorder %s9619_s11, %s7187_s8  ;;  %p7192_p7 = scmp.lt.u32.totalorder %s9619_s11, %s9666_s3 }
 0x55b   : > { %p7193_p9 = scmp.lt.u32.totalorder %s7191_s29, %s7187_s8  ;;  %p7195_p12 = scmp.lt.u32.totalorder %s7187_s8, %s9619_s11 }
 0x55c   : > { %p7189_p5 = pnand %p7188_p6, %p9687_p4 }
 0x55d   : > { %p7194_p10 = por %p7193_p9, %p7192_p7 }
 0x55e   : > { %p7190_p2 = pneg %p7189_p5 }
 0x55f   : > { %p7196_p0 = por %p7195_p12, %p7194_p10 }
 0x561   : > { %p7197_p11 = pnand %p7196_p0, %p7190_p2 }
 0x563   : > { %7200 = shalt.err (!%p7197_p11)
}
 0x564   : > { %7020 = dma.vmem_to_hbm [thread:$0]  (%p9687_p4), %s9621_s20, 64, %s9619_s11, %s4765_s5  }
 0x565 PF: > { %s4791_s30 = sand.u32 1, %s7231_s12   ;;  %p9688_p13 = scmp.ne.s32.totalorder %s9677_s28, 0 }
 0x566   : > { %p9689_p3 = scmp.ge.s32.totalorder %s7243_s15, 2  ;;  %s4792_s27 = scalar_lea.sflag [#allocation4], %s4791_s30 }
 0x568   : > { %p7034_p8 = pnand %p9689_p3, %p9688_p13 }
 0x56a   : > { %7226 = dma.done.wait (!%p7034_p8), %s4792_s27, 64  }
 0x56b   : > { %7228 = vsyncadd (!%p7034_p8), %s4792_s27, 4294967232  ;;  %p17_p1 = scmp.ge.s32.totalorder %s7294_s16, 4   ;;  %s9690_s12 = smov %s7235_s13 }
 0x56c   : > { %s9691_s13 = smov %s7239_s14  ;;  %s9692_s14 = smov %s7305_s19 }
 0x56d   : > { %s9693_s15 = smov %s7294_s16  ;;  %19 = sbr.rel (!%p17_p1) target bundleno = 6 (0x6), region = 93 }
 0x574   :  { %4797 = vsyncpa [#allocation3], 1 }
 0x575   :  { %4799 = vsyncpa [#allocation3 + $0x1], 1 }
 0x576   :  { %4800 = vsyncpa [#allocation6], 1 }
 0x577   :  { %4802 = vsyncpa [#allocation6 + $0x1], 1 }
 0x578   :  { %4803 = vsyncpa [#allocation4], 1 }
 0x579   :  { %4805 = vsyncpa [#allocation4 + $0x1], 1 }

</bundles_post_ra>
